<compile_context>
chip_gen: v7x
topology: tpu7x:2x2x1
jax: 0.10.0
libtpu: 0.0.40
codegen_flags: <defaults>
</compile_context>

<pallas_src>
import math
import functools

import numpy as np
import jax
import jax.numpy as jnp
from jax.experimental import pallas as pl
from jax.experimental.pallas import tpu as pltpu

_BN_EPS = 1e-5
_GELU_C = math.sqrt(2.0 / math.pi)


# --------------------------- model hyper-params -----------------------------

class Params:
    channels = (4, 8, 16, 8, 16, 8, 4)
    kernel_size = (3, 4, 3, 3, 4, 3)
    stride = (1, 2, 1, 1, 2, 1)
    latent_dim = 16
    hidden_dim = 128                        # == channels[3] * 4 * 4


# --------------------------- in-kernel helpers -------------------------------

def _gelu(x):
    # TODO(synk): the reference module's custom GELU() class is not provided;
    # the standard tanh-approximation GELU is used.
    return 0.5 * x * (1.0 + jnp.tanh(_GELU_C * (x + 0.044715 * x * x * x)))


def _sigmoid(x):
    return 0.5 * (jnp.tanh(0.5 * x) + 1.0)


def _conv_block(x, sel_ref, wst_ref, kk, coutn):
    """One Conv2d / ConvTranspose2d, weight-first ordering.

    x:       (Cin*nb, Pin)        f32 activation (flattened pixels on lanes).
    wst_ref: (kk*Cout*nb, Cin*nb) f32 per-tap batch-block-diagonal weights.
    sel_ref: (kk, Pin, Pout)      bf16 0/1 patch matrices (encode stride,
                                  transposed-conv zero insertion, padding).
    Returns  (Cout*nb, Pout) f32.
    """
    f32 = jnp.float32
    # One big-M weight matmul (M = kk*Cout*nb) instead of kk tiny ones.
    tmp = jnp.dot(wst_ref[...], x, preferred_element_type=f32)
    y = None
    for t in range(kk):
        part = tmp[t * coutn:(t + 1) * coutn, :].astype(jnp.bfloat16)
        d = jnp.dot(part, sel_ref[t], preferred_element_type=f32)
        y = d if y is None else y + d
    return y


def _bn_gelu(y, pm_ref, g_ref, b_ref):
    """Training-mode BatchNorm2d (biased batch stats over batch x pixels) + GELU.

    pm_ref: (rows, rows) same-channel selector pre-scaled by 1/(nb*Pout).
    """
    f32 = jnp.float32
    s1 = jnp.sum(y, axis=1, keepdims=True)            # lane reduce (XLU)
    s2 = jnp.sum(y * y, axis=1, keepdims=True)
    mean = jnp.dot(pm_ref[...], s1, preferred_element_type=f32)
    msq = jnp.dot(pm_ref[...], s2, preferred_element_type=f32)
    var = msq - mean * mean
    yn = (y - mean) * jax.lax.rsqrt(var + _BN_EPS)
    return _gelu(yn * g_ref[...] + b_ref[...])


# ------------------------------ the fused kernel -----------------------------

def _vae_kernel(
        x_ref, eps_ref,
        sel0_ref, wst0_ref, pm0_ref, g0_ref, be0_ref,
        sel1_ref, wst1_ref, pm1_ref, g1_ref, be1_ref,
        sel2_ref, wst2_ref, pm2_ref, g2_ref, be2_ref,
        fcw_ref, fcmask_ref, esum_ref, gmu_ref, glv_ref, bmu_ref, blv_ref,
        wdecT_ref, eb_ref, dmask_ref, dgsum_ref, dfcb_ref,
        sel3_ref, wst3_ref, pm3_ref, g3_ref, be3_ref,
        sel4_ref, wst4_ref, pm4_ref, g4_ref, be4_ref,
        sel5_ref, wst5_ref, b5_ref,
        out_ref, stats_ref,
        *, kks, coutns):
    f32 = jnp.float32

    # ---------------- inference network (encoder) ----------------
    x = x_ref[...]
    x = _bn_gelu(_conv_block(x, sel0_ref, wst0_ref, kks[0], coutns[0]),
                 pm0_ref, g0_ref, be0_ref)
    x = _bn_gelu(_conv_block(x, sel1_ref, wst1_ref, kks[1], coutns[1]),
                 pm1_ref, g1_ref, be1_ref)
    x = _bn_gelu(_conv_block(x, sel2_ref, wst2_ref, kks[2], coutns[2]),
                 pm2_ref, g2_ref, be2_ref)
    # x: (nb*c3, p3) with row = n*c3 + c (PyTorch Flatten order).

    # ---- Flatten + fc_mu | fc_logvar (GELU applied, as in the reference) ----
    U = jnp.dot(x, fcw_ref[...], preferred_element_type=f32)        # (cn, c3*2L)
    t_rows = jnp.dot(esum_ref[...], U * fcmask_ref[...],
                     preferred_element_type=f32)                    # (nb, c3*2L)
    mu = _gelu(jnp.dot(t_rows, gmu_ref[...], preferred_element_type=f32)
               + bmu_ref[...])
    lv = _gelu(jnp.dot(t_rows, glv_ref[...], preferred_element_type=f32)
               + blv_ref[...])

    # ---------------- reparameterization (fused) ----------------
    z = mu + eps_ref[...] * jnp.exp(0.5 * lv)
    stats_ref[0] = mu
    stats_ref[1] = lv
    stats_ref[2] = z

    # ---------------- generative network (decoder) ---------------
    # Linear(latent -> hidden) + GELU + UnFlatten, written directly in the
    # (nb*c3, p3) activation layout via host-built mask / group-sum matrices.
    h = jnp.dot(z, wdecT_ref[...], preferred_element_type=f32)      # (nb, hidden)
    V = jnp.dot(eb_ref[...], h, preferred_element_type=f32)         # (cn, hidden)
    xd = jnp.dot(V * dmask_ref[...], dgsum_ref[...],
                 preferred_element_type=f32) + dfcb_ref[...]        # (cn, p3)
    xd = _gelu(xd)

    xd = _bn_gelu(_conv_block(xd, sel3_ref, wst3_ref, kks[3], coutns[3]),
                  pm3_ref, g3_ref, be3_ref)
    xd = _bn_gelu(_conv_block(xd, sel4_ref, wst4_ref, kks[4], coutns[4]),
                  pm4_ref, g4_ref, be4_ref)
    y = _conv_block(xd, sel5_ref, wst5_ref, kks[5], coutns[5]) + b5_ref[...]
    out_ref[...] = _sigmoid(y)


# ------------------- host-side one-time constant precompute ------------------

def conv_selection(H, W, k, s):
    """0/1 tensor (k*k, H*W, Ho*Wo) selecting input pixels of a stride-s conv."""
    Ho = (H - k) // s + 1
    Wo = (W - k) // s + 1
    P = np.zeros((k * k, H * W, Ho * Wo), np.float32)
    ho = np.arange(Ho)
    wo = np.arange(Wo)
    m = (ho[:, None] * Wo + wo[None, :]).reshape(-1)
    for i in range(k):
        for j in range(k):
            t = i * k + j
            p_in = ((ho[:, None] * s + i) * W + (wo[None, :] * s + j)).reshape(-1)
            P[t, p_in, m] = 1.0
    return P, Ho, Wo


def convT_selection(H, W, k, s):
    """0/1 tensor (k*k, H*W, Ho*Wo) for a stride-s ConvTranspose (no padding)."""
    Ho = (H - 1) * s + k
    Wo = (W - 1) * s + k
    P = np.zeros((k * k, H * W, Ho * Wo), np.float32)
    ho = np.arange(Ho)
    wo = np.arange(Wo)
    for a in range(k):
        for b in range(k):
            t = a * k + b
            hok = ho[((ho - a) % s == 0) & ((ho - a) // s >= 0) & ((ho - a) // s < H)]
            wok = wo[((wo - b) % s == 0) & ((wo - b) // s >= 0) & ((wo - b) // s < W)]
            if hok.size == 0 or wok.size == 0:
                continue
            hi = (hok - a) // s
            wi = (wok - b) // s
            m = (hok[:, None] * Wo + wok[None, :]).reshape(-1)
            p_in = (hi[:, None] * W + wi[None, :]).reshape(-1)
            P[t, p_in, m] = 1.0
    return P, Ho, Wo


# TODO(synk): kron(eye(nb), W) is O(nb^2) in weight bytes; fine at nb=2 but a
# batch-on-lanes layout (or a batch grid axis) would be needed for large nb.
def conv_weight_stack(w, nb):
    # torch Conv2d weight (Cout, Cin, kh, kw) -> (kh*kw*Cout*nb, Cin*nb)
    w = np.asarray(w, np.float32)
    _, _, kh, kw = w.shape
    eye = np.eye(nb, dtype=np.float32)
    return np.concatenate(
        [np.kron(eye, w[:, :, i, j]) for i in range(kh) for j in range(kw)], axis=0)


def convT_weight_stack(w, nb):
    # torch ConvTranspose2d weight (Cin, Cout, kh, kw) -> (kh*kw*Cout*nb, Cin*nb)
    w = np.asarray(w, np.float32)
    _, _, kh, kw = w.shape
    eye = np.eye(nb, dtype=np.float32)
    return np.concatenate(
        [np.kron(eye, w[:, :, a, b].T) for a in range(kh) for b in range(kw)], axis=0)


def init_params(key, p):
    keys = iter(jax.random.split(key, 24))

    def rnd(shape, scale=0.05):
        return (scale * jax.random.normal(next(keys), shape)).astype(jnp.float32)

    params = {}
    for i in range(3):
        cin, cout, k = p.channels[i], p.channels[i + 1], p.kernel_size[i]
        params[f"enc_conv{i}_w"] = rnd((cout, cin, k, k))
        params[f"enc_conv{i}_b"] = rnd((cout,))     # cancelled by train-mode BN
        params[f"enc_bn{i}_g"] = jnp.ones((cout,), jnp.float32)
        params[f"enc_bn{i}_b"] = jnp.zeros((cout,), jnp.float32)
    params["fc_mu_w"] = rnd((p.latent_dim, p.hidden_dim))
    params["fc_mu_b"] = rnd((p.latent_dim,))
    params["fc_lv_w"] = rnd((p.latent_dim, p.hidden_dim))
    params["fc_lv_b"] = rnd((p.latent_dim,))
    params["dec_fc_w"] = rnd((p.hidden_dim, p.latent_dim))
    params["dec_fc_b"] = rnd((p.hidden_dim,))
    for i in range(3):
        cin, cout, k = p.channels[3 + i], p.channels[4 + i], p.kernel_size[3 + i]
        params[f"dec_ct{i}_w"] = rnd((cin, cout, k, k))
        params[f"dec_ct{i}_b"] = rnd((cout,))
        if i < 2:
            params[f"dec_bn{i}_g"] = jnp.ones((cout,), jnp.float32)
            params[f"dec_bn{i}_b"] = jnp.zeros((cout,), jnp.float32)
    return params


def prepare_constants(params, p, nb, in_hw=(16, 16), dec_hw=(4, 4)):
    """One-time host precompute of every kernel constant (nothing rebuilt per step)."""
    latent = p.latent_dim
    c3 = p.channels[3]
    p3 = dec_hw[0] * dec_hw[1]
    hidden = p.hidden_dim
    cn3 = nb * c3
    assert hidden == c3 * p3
    consts = []

    def f32(a):
        consts.append(jnp.asarray(np.asarray(a, np.float32), jnp.float32))

    def bf16(a):
        consts.append(jnp.asarray(np.asarray(a, np.float32), jnp.bfloat16))

    def pm_const(C, pout):
        r = np.arange(C * nb)
        return (r[:, None] % C == r[None, :] % C).astype(np.float32) / float(nb * pout)

    # encoder Conv2d + BN layers
    H, W = in_hw
    for i in range(3):
        cout = p.channels[i + 1]
        k, s = p.kernel_size[i], p.stride[i]
        sel, Ho, Wo = conv_selection(H, W, k, s)
        bf16(sel)
        f32(conv_weight_stack(params[f"enc_conv{i}_w"], nb))
        f32(pm_const(cout, Ho * Wo))
        f32(np.tile(np.asarray(params[f"enc_bn{i}_g"], np.float32), nb).reshape(-1, 1))
        f32(np.tile(np.asarray(params[f"enc_bn{i}_b"], np.float32), nb).reshape(-1, 1))
        H, W = Ho, Wo
    assert (H, W) == dec_hw and H * W == p3

    # fc_mu | fc_logvar (merged), block-laid-out for the (nb*c3, p3) activations
    L2 = 2 * latent
    wcat = np.concatenate([np.asarray(params["fc_mu_w"], np.float32),
                           np.asarray(params["fc_lv_w"], np.float32)], axis=0)
    fcw_big = np.zeros((p3, c3 * L2), np.float32)
    for c in range(c3):
        fcw_big[:, c * L2:(c + 1) * L2] = wcat[:, c * p3:(c + 1) * p3].T
    f32(fcw_big)

    r = np.arange(cn3)
    col_c = np.arange(c3 * L2) // L2
    f32((r[:, None] % c3 == col_c[None, :]).astype(np.float32))         # fcmask
    f32((r[None, :] // c3 == np.arange(nb)[:, None]).astype(np.float32))  # esum
    ll = np.arange(c3 * L2) % L2
    f32((ll[:, None] == np.arange(latent)[None, :]).astype(np.float32))           # gmu
    f32((ll[:, None] == (np.arange(latent)[None, :] + latent)).astype(np.float32))  # glv
    f32(np.asarray(params["fc_mu_b"], np.float32).reshape(1, -1))
    f32(np.asarray(params["fc_lv_b"], np.float32).reshape(1, -1))

    # decoder Linear (+ UnFlatten layout)
    f32(np.asarray(params["dec_fc_w"], np.float32).T)                    # (L, hidden)
    f32((r[:, None] // c3 == np.arange(nb)[None, :]).astype(np.float32))  # eb
    kcol = np.arange(hidden)
    f32((r[:, None] % c3 == (kcol[None, :] // p3)).astype(np.float32))    # dmask
    f32(((kcol[:, None] % p3) == np.arange(p3)[None, :]).astype(np.float32))  # dgsum
    f32(np.tile(np.asarray(params["dec_fc_b"], np.float32).reshape(c3, p3), (nb, 1)))

    # decoder ConvTranspose2d layers
    H, W = dec_hw
    for i in range(3):
        cout = p.channels[4 + i]
        k, s = p.kernel_size[3 + i], p.stride[3 + i]
        sel, Ho, Wo = convT_selection(H, W, k, s)
        bf16(sel)
        f32(convT_weight_stack(params[f"dec_ct{i}_w"], nb))
        if i < 2:
            f32(pm_const(cout, Ho * Wo))
            f32(np.tile(np.asarray(params[f"dec_bn{i}_g"], np.float32), nb).reshape(-1, 1))
            f32(np.tile(np.asarray(params[f"dec_bn{i}_b"], np.float32), nb).reshape(-1, 1))
        else:
            f32(np.tile(np.asarray(params[f"dec_ct{i}_b"], np.float32), nb).reshape(-1, 1))
        H, W = Ho, Wo
    assert (H, W) == in_hw

    return tuple(consts)


# ------------------------------ forward wrapper -------------------------------

def _full_spec(shape):
    # single block == full array (no grid)
    return pl.BlockSpec(shape, lambda *_, n=len(shape): (0,) * n)


def build_forward(p, nb):
    latent = p.latent_dim
    kks = tuple(int(k) * int(k) for k in p.kernel_size)
    coutns = tuple(int(p.channels[i + 1]) * nb for i in range(6))
    kernel = functools.partial(_vae_kernel, kks=kks, coutns=coutns)

    def forward(x_nchw, eps, consts):
        Nb, C, H, W = x_nchw.shape
        # NCHW -> (N*C, H*W): one cheap layout op on the tiny input.
        x0 = x_nchw.reshape(Nb * C, H * W).astype(jnp.float32)
        in_list = (x0, eps.astype(jnp.float32)) + tuple(consts)
        out_shape = (
            jax.ShapeDtypeStruct((Nb * C, H * W), jnp.float32),   # reconstruction
            jax.ShapeDtypeStruct((3, Nb, latent), jnp.float32),   # [mu | logvar | z]
        )
        bytes_accessed = int(sum(int(np.prod(a.shape)) * a.dtype.itemsize
                                 for a in in_list)
                             + sum(int(np.prod(s.shape)) * 4 for s in out_shape))
        cost = pl.CostEstimate(flops=40_000_000, transcendentals=12_000,
                               bytes_accessed=bytes_accessed)
        out_cn, stats = pl.pallas_call(
            kernel,
            out_shape=out_shape,
            in_specs=[_full_spec(a.shape) for a in in_list],
            out_specs=tuple(_full_spec(s.shape) for s in out_shape),
            compiler_params=pltpu.CompilerParams(vmem_limit_bytes=32 * 1024 * 1024),
            cost_estimate=cost,
        )(*in_list)
        x_rec = out_cn.reshape(Nb, C, H, W)
        mu, logvar, z = stats[0], stats[1], stats[2]
        return x_rec, mu, logvar, z

    return forward


# ------------------------------------ main ------------------------------------

if __name__ == "__main__":
    p = Params()
    nb = 2
    key = jax.random.PRNGKey(0)
    k_param, k_x, k_eps = jax.random.split(key, 3)

    params = init_params(k_param, p)
    x = jax.random.normal(k_x, (nb, p.channels[0], 16, 16), dtype=jnp.float32)
    # torch.randn_like(std) equivalent: deterministic host-side epsilon
    eps = jax.random.normal(k_eps, (nb, p.latent_dim), dtype=jnp.float32)

    # One-time host precompute (bf16 selection tensors, stacked weights, masks).
    consts = prepare_constants(params, p, nb)

    forward = build_forward(p, nb)
    run = jax.jit(forward)

    x_rec, mu, logvar, z = run(x, eps, consts)
    jax.block_until_ready((x_rec, mu, logvar, z))

    assert x_rec.shape == (nb, p.channels[0], 16, 16)
    assert mu.shape == (nb, p.latent_dim)
    assert logvar.shape == (nb, p.latent_dim)
    assert z.shape == (nb, p.latent_dim)
    assert bool(jnp.all(jnp.isfinite(x_rec)))
    assert bool(jnp.all((x_rec >= 0.0) & (x_rec <= 1.0)))
    assert bool(jnp.all(jnp.isfinite(mu))) and bool(jnp.all(jnp.isfinite(logvar)))
    print("KERNEL_OK")
</pallas_src>

<mosaic_0001>
module attributes {stable_mosaic.version = 11 : i64} {
  func.func @_vae_kernel(%arg0: memref<8x256xf32, #tpu.memory_space<vmem>>, %arg1: memref<2x16xf32, #tpu.memory_space<vmem>>, %arg2: memref<9x256x196xbf16, #tpu.memory_space<vmem>>, %arg3: memref<144x8xf32, #tpu.memory_space<vmem>>, %arg4: memref<16x16xf32, #tpu.memory_space<vmem>>, %arg5: memref<16x1xf32, #tpu.memory_space<vmem>>, %arg6: memref<16x1xf32, #tpu.memory_space<vmem>>, %arg7: memref<16x196x36xbf16, #tpu.memory_space<vmem>>, %arg8: memref<512x16xf32, #tpu.memory_space<vmem>>, %arg9: memref<32x32xf32, #tpu.memory_space<vmem>>, %arg10: memref<32x1xf32, #tpu.memory_space<vmem>>, %arg11: memref<32x1xf32, #tpu.memory_space<vmem>>, %arg12: memref<9x36x16xbf16, #tpu.memory_space<vmem>>, %arg13: memref<144x32xf32, #tpu.memory_space<vmem>>, %arg14: memref<16x16xf32, #tpu.memory_space<vmem>>, %arg15: memref<16x1xf32, #tpu.memory_space<vmem>>, %arg16: memref<16x1xf32, #tpu.memory_space<vmem>>, %arg17: memref<16x256xf32, #tpu.memory_space<vmem>>, %arg18: memref<16x256xf32, #tpu.memory_space<vmem>>, %arg19: memref<2x16xf32, #tpu.memory_space<vmem>>, %arg20: memref<256x16xf32, #tpu.memory_space<vmem>>, %arg21: memref<256x16xf32, #tpu.memory_space<vmem>>, %arg22: memref<1x16xf32, #tpu.memory_space<vmem>>, %arg23: memref<1x16xf32, #tpu.memory_space<vmem>>, %arg24: memref<16x128xf32, #tpu.memory_space<vmem>>, %arg25: memref<16x2xf32, #tpu.memory_space<vmem>>, %arg26: memref<16x128xf32, #tpu.memory_space<vmem>>, %arg27: memref<128x16xf32, #tpu.memory_space<vmem>>, %arg28: memref<16x16xf32, #tpu.memory_space<vmem>>, %arg29: memref<9x16x36xbf16, #tpu.memory_space<vmem>>, %arg30: memref<288x16xf32, #tpu.memory_space<vmem>>, %arg31: memref<32x32xf32, #tpu.memory_space<vmem>>, %arg32: memref<32x1xf32, #tpu.memory_space<vmem>>, %arg33: memref<32x1xf32, #tpu.memory_space<vmem>>, %arg34: memref<16x36x196xbf16, #tpu.memory_space<vmem>>, %arg35: memref<256x32xf32, #tpu.memory_space<vmem>>, %arg36: memref<16x16xf32, #tpu.memory_space<vmem>>, %arg37: memref<16x1xf32, #tpu.memory_space<vmem>>, %arg38: memref<16x1xf32, #tpu.memory_space<vmem>>, %arg39: memref<9x196x256xbf16, #tpu.memory_space<vmem>>, %arg40: memref<72x16xf32, #tpu.memory_space<vmem>>, %arg41: memref<8x1xf32, #tpu.memory_space<vmem>>, %arg42: memref<8x256xf32, #tpu.memory_space<vmem>>, %arg43: memref<3x2x16xf32, #tpu.memory_space<vmem>>) attributes {dimension_semantics = [], scalar_prefetch = 0 : i64, scratch_operands = 0 : i64, tpu.core_type = #tpu.core_type<tc>} {
    %c0 = arith.constant 0 : index
    %c0_0 = arith.constant 0 : index
    %0 = vector.load %arg0[%c0, %c0_0] : memref<8x256xf32, #tpu.memory_space<vmem>>, vector<8x256xf32>
    %c0_1 = arith.constant 0 : index
    %c0_2 = arith.constant 0 : index
    %1 = vector.load %arg3[%c0_1, %c0_2] : memref<144x8xf32, #tpu.memory_space<vmem>>, vector<144x8xf32>
    %cst = arith.constant dense<0.000000e+00> : vector<144x256xf32>
    %2 = tpu.matmul %1, %0, %cst {dimension_numbers = #tpu.dot_dimension_numbers<[1], [0], [0], [1], [0, 0, 1, 1], [], []>} : vector<144x8xf32>, vector<8x256xf32>, vector<144x256xf32> -> vector<144x256xf32>
    %3 = vector.extract_strided_slice %2 {offsets = [0, 0], sizes = [16, 256], strides = [1, 1]} : vector<144x256xf32> to vector<16x256xf32>
    %4 = arith.truncf %3 : vector<16x256xf32> to vector<16x256xbf16>
    %c0_3 = arith.constant 0 : index
    %c0_4 = arith.constant 0 : index
    %c0_5 = arith.constant 0 : index
    %5 = vector.load %arg2[%c0_3, %c0_4, %c0_5] : memref<9x256x196xbf16, #tpu.memory_space<vmem>>, vector<1x256x196xbf16>
    %6 = vector.shape_cast %5 : vector<1x256x196xbf16> to vector<256x196xbf16>
    %cst_6 = arith.constant dense<0.000000e+00> : vector<16x196xf32>
    %7 = tpu.matmul %4, %6, %cst_6 {dimension_numbers = #tpu.dot_dimension_numbers<[1], [0], [0], [1], [0, 0, 1, 1], [], []>} : vector<16x256xbf16>, vector<256x196xbf16>, vector<16x196xf32> -> vector<16x196xf32>
    %8 = vector.extract_strided_slice %2 {offsets = [16, 0], sizes = [16, 256], strides = [1, 1]} : vector<144x256xf32> to vector<16x256xf32>
    %9 = arith.truncf %8 : vector<16x256xf32> to vector<16x256xbf16>
    %c1 = arith.constant 1 : index
    %c0_7 = arith.constant 0 : index
    %c0_8 = arith.constant 0 : index
    %10 = vector.load %arg2[%c1, %c0_7, %c0_8] : memref<9x256x196xbf16, #tpu.memory_space<vmem>>, vector<1x256x196xbf16>
    %11 = vector.shape_cast %10 : vector<1x256x196xbf16> to vector<256x196xbf16>
    %cst_9 = arith.constant dense<0.000000e+00> : vector<16x196xf32>
    %12 = tpu.matmul %9, %11, %cst_9 {dimension_numbers = #tpu.dot_dimension_numbers<[1], [0], [0], [1], [0, 0, 1, 1], [], []>} : vector<16x256xbf16>, vector<256x196xbf16>, vector<16x196xf32> -> vector<16x196xf32>
    %13 = arith.addf %7, %12 : vector<16x196xf32>
    %14 = vector.extract_strided_slice %2 {offsets = [32, 0], sizes = [16, 256], strides = [1, 1]} : vector<144x256xf32> to vector<16x256xf32>
    %15 = arith.truncf %14 : vector<16x256xf32> to vector<16x256xbf16>
    %c2 = arith.constant 2 : index
    %c0_10 = arith.constant 0 : index
    %c0_11 = arith.constant 0 : index
    %16 = vector.load %arg2[%c2, %c0_10, %c0_11] : memref<9x256x196xbf16, #tpu.memory_space<vmem>>, vector<1x256x196xbf16>
    %17 = vector.shape_cast %16 : vector<1x256x196xbf16> to vector<256x196xbf16>
    %cst_12 = arith.constant dense<0.000000e+00> : vector<16x196xf32>
    %18 = tpu.matmul %15, %17, %cst_12 {dimension_numbers = #tpu.dot_dimension_numbers<[1], [0], [0], [1], [0, 0, 1, 1], [], []>} : vector<16x256xbf16>, vector<256x196xbf16>, vector<16x196xf32> -> vector<16x196xf32>
    %19 = arith.addf %13, %18 : vector<16x196xf32>
    %20 = vector.extract_strided_slice %2 {offsets = [48, 0], sizes = [16, 256], strides = [1, 1]} : vector<144x256xf32> to vector<16x256xf32>
    %21 = arith.truncf %20 : vector<16x256xf32> to vector<16x256xbf16>
    %c3 = arith.constant 3 : index
    %c0_13 = arith.constant 0 : index
    %c0_14 = arith.constant 0 : index
    %22 = vector.load %arg2[%c3, %c0_13, %c0_14] : memref<9x256x196xbf16, #tpu.memory_space<vmem>>, vector<1x256x196xbf16>
    %23 = vector.shape_cast %22 : vector<1x256x196xbf16> to vector<256x196xbf16>
    %cst_15 = arith.constant dense<0.000000e+00> : vector<16x196xf32>
    %24 = tpu.matmul %21, %23, %cst_15 {dimension_numbers = #tpu.dot_dimension_numbers<[1], [0], [0], [1], [0, 0, 1, 1], [], []>} : vector<16x256xbf16>, vector<256x196xbf16>, vector<16x196xf32> -> vector<16x196xf32>
    %25 = arith.addf %19, %24 : vector<16x196xf32>
    %26 = vector.extract_strided_slice %2 {offsets = [64, 0], sizes = [16, 256], strides = [1, 1]} : vector<144x256xf32> to vector<16x256xf32>
    %27 = arith.truncf %26 : vector<16x256xf32> to vector<16x256xbf16>
    %c4 = arith.constant 4 : index
    %c0_16 = arith.constant 0 : index
    %c0_17 = arith.constant 0 : index
    %28 = vector.load %arg2[%c4, %c0_16, %c0_17] : memref<9x256x196xbf16, #tpu.memory_space<vmem>>, vector<1x256x196xbf16>
    %29 = vector.shape_cast %28 : vector<1x256x196xbf16> to vector<256x196xbf16>
    %cst_18 = arith.constant dense<0.000000e+00> : vector<16x196xf32>
    %30 = tpu.matmul %27, %29, %cst_18 {dimension_numbers = #tpu.dot_dimension_numbers<[1], [0], [0], [1], [0, 0, 1, 1], [], []>} : vector<16x256xbf16>, vector<256x196xbf16>, vector<16x196xf32> -> vector<16x196xf32>
    %31 = arith.addf %25, %30 : vector<16x196xf32>
    %32 = vector.extract_strided_slice %2 {offsets = [80, 0], sizes = [16, 256], strides = [1, 1]} : vector<144x256xf32> to vector<16x256xf32>
    %33 = arith.truncf %32 : vector<16x256xf32> to vector<16x256xbf16>
    %c5 = arith.constant 5 : index
    %c0_19 = arith.constant 0 : index
    %c0_20 = arith.constant 0 : index
    %34 = vector.load %arg2[%c5, %c0_19, %c0_20] : memref<9x256x196xbf16, #tpu.memory_space<vmem>>, vector<1x256x196xbf16>
    %35 = vector.shape_cast %34 : vector<1x256x196xbf16> to vector<256x196xbf16>
    %cst_21 = arith.constant dense<0.000000e+00> : vector<16x196xf32>
    %36 = tpu.matmul %33, %35, %cst_21 {dimension_numbers = #tpu.dot_dimension_numbers<[1], [0], [0], [1], [0, 0, 1, 1], [], []>} : vector<16x256xbf16>, vector<256x196xbf16>, vector<16x196xf32> -> vector<16x196xf32>
    %37 = arith.addf %31, %36 : vector<16x196xf32>
    %38 = vector.extract_strided_slice %2 {offsets = [96, 0], sizes = [16, 256], strides = [1, 1]} : vector<144x256xf32> to vector<16x256xf32>
    %39 = arith.truncf %38 : vector<16x256xf32> to vector<16x256xbf16>
    %c6 = arith.constant 6 : index
    %c0_22 = arith.constant 0 : index
    %c0_23 = arith.constant 0 : index
    %40 = vector.load %arg2[%c6, %c0_22, %c0_23] : memref<9x256x196xbf16, #tpu.memory_space<vmem>>, vector<1x256x196xbf16>
    %41 = vector.shape_cast %40 : vector<1x256x196xbf16> to vector<256x196xbf16>
    %cst_24 = arith.constant dense<0.000000e+00> : vector<16x196xf32>
    %42 = tpu.matmul %39, %41, %cst_24 {dimension_numbers = #tpu.dot_dimension_numbers<[1], [0], [0], [1], [0, 0, 1, 1], [], []>} : vector<16x256xbf16>, vector<256x196xbf16>, vector<16x196xf32> -> vector<16x196xf32>
    %43 = arith.addf %37, %42 : vector<16x196xf32>
    %44 = vector.extract_strided_slice %2 {offsets = [112, 0], sizes = [16, 256], strides = [1, 1]} : vector<144x256xf32> to vector<16x256xf32>
    %45 = arith.truncf %44 : vector<16x256xf32> to vector<16x256xbf16>
    %c7 = arith.constant 7 : index
    %c0_25 = arith.constant 0 : index
    %c0_26 = arith.constant 0 : index
    %46 = vector.load %arg2[%c7, %c0_25, %c0_26] : memref<9x256x196xbf16, #tpu.memory_space<vmem>>, vector<1x256x196xbf16>
    %47 = vector.shape_cast %46 : vector<1x256x196xbf16> to vector<256x196xbf16>
    %cst_27 = arith.constant dense<0.000000e+00> : vector<16x196xf32>
    %48 = tpu.matmul %45, %47, %cst_27 {dimension_numbers = #tpu.dot_dimension_numbers<[1], [0], [0], [1], [0, 0, 1, 1], [], []>} : vector<16x256xbf16>, vector<256x196xbf16>, vector<16x196xf32> -> vector<16x196xf32>
    %49 = arith.addf %43, %48 : vector<16x196xf32>
    %50 = vector.extract_strided_slice %2 {offsets = [128, 0], sizes = [16, 256], strides = [1, 1]} : vector<144x256xf32> to vector<16x256xf32>
    %51 = arith.truncf %50 : vector<16x256xf32> to vector<16x256xbf16>
    %c8 = arith.constant 8 : index
    %c0_28 = arith.constant 0 : index
    %c0_29 = arith.constant 0 : index
    %52 = vector.load %arg2[%c8, %c0_28, %c0_29] : memref<9x256x196xbf16, #tpu.memory_space<vmem>>, vector<1x256x196xbf16>
    %53 = vector.shape_cast %52 : vector<1x256x196xbf16> to vector<256x196xbf16>
    %cst_30 = arith.constant dense<0.000000e+00> : vector<16x196xf32>
    %54 = tpu.matmul %51, %53, %cst_30 {dimension_numbers = #tpu.dot_dimension_numbers<[1], [0], [0], [1], [0, 0, 1, 1], [], []>} : vector<16x256xbf16>, vector<256x196xbf16>, vector<16x196xf32> -> vector<16x196xf32>
    %55 = arith.addf %49, %54 : vector<16x196xf32>
    %cst_31 = arith.constant dense<0.000000e+00> : vector<16xf32>
    %56 = vector.multi_reduction <add>, %55, %cst_31 [1] : vector<16x196xf32> to vector<16xf32>
    %57 = vector.shape_cast %56 : vector<16xf32> to vector<16x1xf32>
    %58 = arith.mulf %55, %55 : vector<16x196xf32>
    %cst_32 = arith.constant dense<0.000000e+00> : vector<16xf32>
    %59 = vector.multi_reduction <add>, %58, %cst_32 [1] : vector<16x196xf32> to vector<16xf32>
    %60 = vector.shape_cast %59 : vector<16xf32> to vector<16x1xf32>
    %c0_33 = arith.constant 0 : index
    %c0_34 = arith.constant 0 : index
    %61 = vector.load %arg4[%c0_33, %c0_34] : memref<16x16xf32, #tpu.memory_space<vmem>>, vector<16x16xf32>
    %cst_35 = arith.constant dense<0.000000e+00> : vector<16x1xf32>
    %62 = tpu.matmul %61, %57, %cst_35 {dimension_numbers = #tpu.dot_dimension_numbers<[1], [0], [0], [1], [0, 0, 1, 1], [], []>} : vector<16x16xf32>, vector<16x1xf32>, vector<16x1xf32> -> vector<16x1xf32>
    %c0_36 = arith.constant 0 : index
    %c0_37 = arith.constant 0 : index
    %63 = vector.load %arg4[%c0_36, %c0_37] : memref<16x16xf32, #tpu.memory_space<vmem>>, vector<16x16xf32>
    %cst_38 = arith.constant dense<0.000000e+00> : vector<16x1xf32>
    %64 = tpu.matmul %63, %60, %cst_38 {dimension_numbers = #tpu.dot_dimension_numbers<[1], [0], [0], [1], [0, 0, 1, 1], [], []>} : vector<16x16xf32>, vector<16x1xf32>, vector<16x1xf32> -> vector<16x1xf32>
    %65 = arith.mulf %62, %62 : vector<16x1xf32>
    %66 = arith.subf %64, %65 : vector<16x1xf32>
    %67 = vector.broadcast %62 : vector<16x1xf32> to vector<16x196xf32>
    %68 = arith.subf %55, %67 : vector<16x196xf32>
    %cst_39 = arith.constant 9.99999974E-6 : f32
    %69 = vector.broadcast %cst_39 : f32 to vector<16x1xf32>
    %70 = arith.addf %66, %69 : vector<16x1xf32>
    %71 = math.rsqrt %70 : vector<16x1xf32>
    %72 = vector.broadcast %71 : vector<16x1xf32> to vector<16x196xf32>
    %73 = arith.mulf %68, %72 : vector<16x196xf32>
    %c0_40 = arith.constant 0 : index
    %c0_41 = arith.constant 0 : index
    %74 = vector.load %arg5[%c0_40, %c0_41] : memref<16x1xf32, #tpu.memory_space<vmem>>, vector<16x1xf32>
    %75 = vector.broadcast %74 : vector<16x1xf32> to vector<16x196xf32>
    %76 = arith.mulf %73, %75 : vector<16x196xf32>
    %c0_42 = arith.constant 0 : index
    %c0_43 = arith.constant 0 : index
    %77 = vector.load %arg6[%c0_42, %c0_43] : memref<16x1xf32, #tpu.memory_space<vmem>>, vector<16x1xf32>
    %78 = vector.broadcast %77 : vector<16x1xf32> to vector<16x196xf32>
    %79 = arith.addf %76, %78 : vector<16x196xf32>
    %cst_44 = arith.constant 5.000000e-01 : f32
    %80 = vector.broadcast %cst_44 : f32 to vector<16x196xf32>
    %81 = arith.mulf %80, %79 : vector<16x196xf32>
    %cst_45 = arith.constant 4.471500e-02 : f32
    %82 = vector.broadcast %cst_45 : f32 to vector<16x196xf32>
    %83 = arith.mulf %82, %79 : vector<16x196xf32>
    %84 = arith.mulf %83, %79 : vector<16x196xf32>
    %85 = arith.mulf %84, %79 : vector<16x196xf32>
    %86 = arith.addf %79, %85 : vector<16x196xf32>
    %cst_46 = arith.constant 0.797884583 : f32
    %87 = vector.broadcast %cst_46 : f32 to vector<16x196xf32>
    %88 = arith.mulf %87, %86 : vector<16x196xf32>
    %89 = math.tanh %88 : vector<16x196xf32>
    %cst_47 = arith.constant 1.000000e+00 : f32
    %90 = vector.broadcast %cst_47 : f32 to vector<16x196xf32>
    %91 = arith.addf %90, %89 : vector<16x196xf32>
    %92 = arith.mulf %81, %91 : vector<16x196xf32>
    %c0_48 = arith.constant 0 : index
    %c0_49 = arith.constant 0 : index
    %93 = vector.load %arg8[%c0_48, %c0_49] : memref<512x16xf32, #tpu.memory_space<vmem>>, vector<512x16xf32>
    %cst_50 = arith.constant dense<0.000000e+00> : vector<512x196xf32>
    %94 = tpu.matmul %93, %92, %cst_50 {dimension_numbers = #tpu.dot_dimension_numbers<[1], [0], [0], [1], [0, 0, 1, 1], [], []>} : vector<512x16xf32>, vector<16x196xf32>, vector<512x196xf32> -> vector<512x196xf32>
    %95 = vector.extract_strided_slice %94 {offsets = [0, 0], sizes = [32, 196], strides = [1, 1]} : vector<512x196xf32> to vector<32x196xf32>
    %96 = arith.truncf %95 : vector<32x196xf32> to vector<32x196xbf16>
    %c0_51 = arith.constant 0 : index
    %c0_52 = arith.constant 0 : index
    %c0_53 = arith.constant 0 : index
    %97 = vector.load %arg7[%c0_51, %c0_52, %c0_53] : memref<16x196x36xbf16, #tpu.memory_space<vmem>>, vector<1x196x36xbf16>
    %98 = vector.shape_cast %97 : vector<1x196x36xbf16> to vector<196x36xbf16>
    %cst_54 = arith.constant dense<0.000000e+00> : vector<32x36xf32>
    %99 = tpu.matmul %96, %98, %cst_54 {dimension_numbers = #tpu.dot_dimension_numbers<[1], [0], [0], [1], [0, 0, 1, 1], [], []>} : vector<32x196xbf16>, vector<196x36xbf16>, vector<32x36xf32> -> vector<32x36xf32>
    %100 = vector.extract_strided_slice %94 {offsets = [32, 0], sizes = [32, 196], strides = [1, 1]} : vector<512x196xf32> to vector<32x196xf32>
    %101 = arith.truncf %100 : vector<32x196xf32> to vector<32x196xbf16>
    %c1_55 = arith.constant 1 : index
    %c0_56 = arith.constant 0 : index
    %c0_57 = arith.constant 0 : index
    %102 = vector.load %arg7[%c1_55, %c0_56, %c0_57] : memref<16x196x36xbf16, #tpu.memory_space<vmem>>, vector<1x196x36xbf16>
    %103 = vector.shape_cast %102 : vector<1x196x36xbf16> to vector<196x36xbf16>
    %cst_58 = arith.constant dense<0.000000e+00> : vector<32x36xf32>
    %104 = tpu.matmul %101, %103, %cst_58 {dimension_numbers = #tpu.dot_dimension_numbers<[1], [0], [0], [1], [0, 0, 1, 1], [], []>} : vector<32x196xbf16>, vector<196x36xbf16>, vector<32x36xf32> -> vector<32x36xf32>
    %105 = arith.addf %99, %104 : vector<32x36xf32>
    %106 = vector.extract_strided_slice %94 {offsets = [64, 0], sizes = [32, 196], strides = [1, 1]} : vector<512x196xf32> to vector<32x196xf32>
    %107 = arith.truncf %106 : vector<32x196xf32> to vector<32x196xbf16>
    %c2_59 = arith.constant 2 : index
    %c0_60 = arith.constant 0 : index
    %c0_61 = arith.constant 0 : index
    %108 = vector.load %arg7[%c2_59, %c0_60, %c0_61] : memref<16x196x36xbf16, #tpu.memory_space<vmem>>, vector<1x196x36xbf16>
    %109 = vector.shape_cast %108 : vector<1x196x36xbf16> to vector<196x36xbf16>
    %cst_62 = arith.constant dense<0.000000e+00> : vector<32x36xf32>
    %110 = tpu.matmul %107, %109, %cst_62 {dimension_numbers = #tpu.dot_dimension_numbers<[1], [0], [0], [1], [0, 0, 1, 1], [], []>} : vector<32x196xbf16>, vector<196x36xbf16>, vector<32x36xf32> -> vector<32x36xf32>
    %111 = arith.addf %105, %110 : vector<32x36xf32>
    %112 = vector.extract_strided_slice %94 {offsets = [96, 0], sizes = [32, 196], strides = [1, 1]} : vector<512x196xf32> to vector<32x196xf32>
    %113 = arith.truncf %112 : vector<32x196xf32> to vector<32x196xbf16>
    %c3_63 = arith.constant 3 : index
    %c0_64 = arith.constant 0 : index
    %c0_65 = arith.constant 0 : index
    %114 = vector.load %arg7[%c3_63, %c0_64, %c0_65] : memref<16x196x36xbf16, #tpu.memory_space<vmem>>, vector<1x196x36xbf16>
    %115 = vector.shape_cast %114 : vector<1x196x36xbf16> to vector<196x36xbf16>
    %cst_66 = arith.constant dense<0.000000e+00> : vector<32x36xf32>
    %116 = tpu.matmul %113, %115, %cst_66 {dimension_numbers = #tpu.dot_dimension_numbers<[1], [0], [0], [1], [0, 0, 1, 1], [], []>} : vector<32x196xbf16>, vector<196x36xbf16>, vector<32x36xf32> -> vector<32x36xf32>
    %117 = arith.addf %111, %116 : vector<32x36xf32>
    %118 = vector.extract_strided_slice %94 {offsets = [128, 0], sizes = [32, 196], strides = [1, 1]} : vector<512x196xf32> to vector<32x196xf32>
    %119 = arith.truncf %118 : vector<32x196xf32> to vector<32x196xbf16>
    %c4_67 = arith.constant 4 : index
    %c0_68 = arith.constant 0 : index
    %c0_69 = arith.constant 0 : index
    %120 = vector.load %arg7[%c4_67, %c0_68, %c0_69] : memref<16x196x36xbf16, #tpu.memory_space<vmem>>, vector<1x196x36xbf16>
    %121 = vector.shape_cast %120 : vector<1x196x36xbf16> to vector<196x36xbf16>
    %cst_70 = arith.constant dense<0.000000e+00> : vector<32x36xf32>
    %122 = tpu.matmul %119, %121, %cst_70 {dimension_numbers = #tpu.dot_dimension_numbers<[1], [0], [0], [1], [0, 0, 1, 1], [], []>} : vector<32x196xbf16>, vector<196x36xbf16>, vector<32x36xf32> -> vector<32x36xf32>
    %123 = arith.addf %117, %122 : vector<32x36xf32>
    %124 = vector.extract_strided_slice %94 {offsets = [160, 0], sizes = [32, 196], strides = [1, 1]} : vector<512x196xf32> to vector<32x196xf32>
    %125 = arith.truncf %124 : vector<32x196xf32> to vector<32x196xbf16>
    %c5_71 = arith.constant 5 : index
    %c0_72 = arith.constant 0 : index
    %c0_73 = arith.constant 0 : index
    %126 = vector.load %arg7[%c5_71, %c0_72, %c0_73] : memref<16x196x36xbf16, #tpu.memory_space<vmem>>, vector<1x196x36xbf16>
    %127 = vector.shape_cast %126 : vector<1x196x36xbf16> to vector<196x36xbf16>
    %cst_74 = arith.constant dense<0.000000e+00> : vector<32x36xf32>
    %128 = tpu.matmul %125, %127, %cst_74 {dimension_numbers = #tpu.dot_dimension_numbers<[1], [0], [0], [1], [0, 0, 1, 1], [], []>} : vector<32x196xbf16>, vector<196x36xbf16>, vector<32x36xf32> -> vector<32x36xf32>
    %129 = arith.addf %123, %128 : vector<32x36xf32>
    %130 = vector.extract_strided_slice %94 {offsets = [192, 0], sizes = [32, 196], strides = [1, 1]} : vector<512x196xf32> to vector<32x196xf32>
    %131 = arith.truncf %130 : vector<32x196xf32> to vector<32x196xbf16>
    %c6_75 = arith.constant 6 : index
    %c0_76 = arith.constant 0 : index
    %c0_77 = arith.constant 0 : index
    %132 = vector.load %arg7[%c6_75, %c0_76, %c0_77] : memref<16x196x36xbf16, #tpu.memory_space<vmem>>, vector<1x196x36xbf16>
    %133 = vector.shape_cast %132 : vector<1x196x36xbf16> to vector<196x36xbf16>
    %cst_78 = arith.constant dense<0.000000e+00> : vector<32x36xf32>
    %134 = tpu.matmul %131, %133, %cst_78 {dimension_numbers = #tpu.dot_dimension_numbers<[1], [0], [0], [1], [0, 0, 1, 1], [], []>} : vector<32x196xbf16>, vector<196x36xbf16>, vector<32x36xf32> -> vector<32x36xf32>
    %135 = arith.addf %129, %134 : vector<32x36xf32>
    %136 = vector.extract_strided_slice %94 {offsets = [224, 0], sizes = [32, 196], strides = [1, 1]} : vector<512x196xf32> to vector<32x196xf32>
    %137 = arith.truncf %136 : vector<32x196xf32> to vector<32x196xbf16>
    %c7_79 = arith.constant 7 : index
    %c0_80 = arith.constant 0 : index
    %c0_81 = arith.constant 0 : index
    %138 = vector.load %arg7[%c7_79, %c0_80, %c0_81] : memref<16x196x36xbf16, #tpu.memory_space<vmem>>, vector<1x196x36xbf16>
    %139 = vector.shape_cast %138 : vector<1x196x36xbf16> to vector<196x36xbf16>
    %cst_82 = arith.constant dense<0.000000e+00> : vector<32x36xf32>
    %140 = tpu.matmul %137, %139, %cst_82 {dimension_numbers = #tpu.dot_dimension_numbers<[1], [0], [0], [1], [0, 0, 1, 1], [], []>} : vector<32x196xbf16>, vector<196x36xbf16>, vector<32x36xf32> -> vector<32x36xf32>
    %141 = arith.addf %135, %140 : vector<32x36xf32>
    %142 = vector.extract_strided_slice %94 {offsets = [256, 0], sizes = [32, 196], strides = [1, 1]} : vector<512x196xf32> to vector<32x196xf32>
    %143 = arith.truncf %142 : vector<32x196xf32> to vector<32x196xbf16>
    %c8_83 = arith.constant 8 : index
    %c0_84 = arith.constant 0 : index
    %c0_85 = arith.constant 0 : index
    %144 = vector.load %arg7[%c8_83, %c0_84, %c0_85] : memref<16x196x36xbf16, #tpu.memory_space<vmem>>, vector<1x196x36xbf16>
    %145 = vector.shape_cast %144 : vector<1x196x36xbf16> to vector<196x36xbf16>
    %cst_86 = arith.constant dense<0.000000e+00> : vector<32x36xf32>
    %146 = tpu.matmul %143, %145, %cst_86 {dimension_numbers = #tpu.dot_dimension_numbers<[1], [0], [0], [1], [0, 0, 1, 1], [], []>} : vector<32x196xbf16>, vector<196x36xbf16>, vector<32x36xf32> -> vector<32x36xf32>
    %147 = arith.addf %141, %146 : vector<32x36xf32>
    %148 = vector.extract_strided_slice %94 {offsets = [288, 0], sizes = [32, 196], strides = [1, 1]} : vector<512x196xf32> to vector<32x196xf32>
    %149 = arith.truncf %148 : vector<32x196xf32> to vector<32x196xbf16>
    %c9 = arith.constant 9 : index
    %c0_87 = arith.constant 0 : index
    %c0_88 = arith.constant 0 : index
    %150 = vector.load %arg7[%c9, %c0_87, %c0_88] : memref<16x196x36xbf16, #tpu.memory_space<vmem>>, vector<1x196x36xbf16>
    %151 = vector.shape_cast %150 : vector<1x196x36xbf16> to vector<196x36xbf16>
    %cst_89 = arith.constant dense<0.000000e+00> : vector<32x36xf32>
    %152 = tpu.matmul %149, %151, %cst_89 {dimension_numbers = #tpu.dot_dimension_numbers<[1], [0], [0], [1], [0, 0, 1, 1], [], []>} : vector<32x196xbf16>, vector<196x36xbf16>, vector<32x36xf32> -> vector<32x36xf32>
    %153 = arith.addf %147, %152 : vector<32x36xf32>
    %154 = vector.extract_strided_slice %94 {offsets = [320, 0], sizes = [32, 196], strides = [1, 1]} : vector<512x196xf32> to vector<32x196xf32>
    %155 = arith.truncf %154 : vector<32x196xf32> to vector<32x196xbf16>
    %c10 = arith.constant 10 : index
    %c0_90 = arith.constant 0 : index
    %c0_91 = arith.constant 0 : index
    %156 = vector.load %arg7[%c10, %c0_90, %c0_91] : memref<16x196x36xbf16, #tpu.memory_space<vmem>>, vector<1x196x36xbf16>
    %157 = vector.shape_cast %156 : vector<1x196x36xbf16> to vector<196x36xbf16>
    %cst_92 = arith.constant dense<0.000000e+00> : vector<32x36xf32>
    %158 = tpu.matmul %155, %157, %cst_92 {dimension_numbers = #tpu.dot_dimension_numbers<[1], [0], [0], [1], [0, 0, 1, 1], [], []>} : vector<32x196xbf16>, vector<196x36xbf16>, vector<32x36xf32> -> vector<32x36xf32>
    %159 = arith.addf %153, %158 : vector<32x36xf32>
    %160 = vector.extract_strided_slice %94 {offsets = [352, 0], sizes = [32, 196], strides = [1, 1]} : vector<512x196xf32> to vector<32x196xf32>
    %161 = arith.truncf %160 : vector<32x196xf32> to vector<32x196xbf16>
    %c11 = arith.constant 11 : index
    %c0_93 = arith.constant 0 : index
    %c0_94 = arith.constant 0 : index
    %162 = vector.load %arg7[%c11, %c0_93, %c0_94] : memref<16x196x36xbf16, #tpu.memory_space<vmem>>, vector<1x196x36xbf16>
    %163 = vector.shape_cast %162 : vector<1x196x36xbf16> to vector<196x36xbf16>
    %cst_95 = arith.constant dense<0.000000e+00> : vector<32x36xf32>
    %164 = tpu.matmul %161, %163, %cst_95 {dimension_numbers = #tpu.dot_dimension_numbers<[1], [0], [0], [1], [0, 0, 1, 1], [], []>} : vector<32x196xbf16>, vector<196x36xbf16>, vector<32x36xf32> -> vector<32x36xf32>
    %165 = arith.addf %159, %164 : vector<32x36xf32>
    %166 = vector.extract_strided_slice %94 {offsets = [384, 0], sizes = [32, 196], strides = [1, 1]} : vector<512x196xf32> to vector<32x196xf32>
    %167 = arith.truncf %166 : vector<32x196xf32> to vector<32x196xbf16>
    %c12 = arith.constant 12 : index
    %c0_96 = arith.constant 0 : index
    %c0_97 = arith.constant 0 : index
    %168 = vector.load %arg7[%c12, %c0_96, %c0_97] : memref<16x196x36xbf16, #tpu.memory_space<vmem>>, vector<1x196x36xbf16>
    %169 = vector.shape_cast %168 : vector<1x196x36xbf16> to vector<196x36xbf16>
    %cst_98 = arith.constant dense<0.000000e+00> : vector<32x36xf32>
    %170 = tpu.matmul %167, %169, %cst_98 {dimension_numbers = #tpu.dot_dimension_numbers<[1], [0], [0], [1], [0, 0, 1, 1], [], []>} : vector<32x196xbf16>, vector<196x36xbf16>, vector<32x36xf32> -> vector<32x36xf32>
    %171 = arith.addf %165, %170 : vector<32x36xf32>
    %172 = vector.extract_strided_slice %94 {offsets = [416, 0], sizes = [32, 196], strides = [1, 1]} : vector<512x196xf32> to vector<32x196xf32>
    %173 = arith.truncf %172 : vector<32x196xf32> to vector<32x196xbf16>
    %c13 = arith.constant 13 : index
    %c0_99 = arith.constant 0 : index
    %c0_100 = arith.constant 0 : index
    %174 = vector.load %arg7[%c13, %c0_99, %c0_100] : memref<16x196x36xbf16, #tpu.memory_space<vmem>>, vector<1x196x36xbf16>
    %175 = vector.shape_cast %174 : vector<1x196x36xbf16> to vector<196x36xbf16>
    %cst_101 = arith.constant dense<0.000000e+00> : vector<32x36xf32>
    %176 = tpu.matmul %173, %175, %cst_101 {dimension_numbers = #tpu.dot_dimension_numbers<[1], [0], [0], [1], [0, 0, 1, 1], [], []>} : vector<32x196xbf16>, vector<196x36xbf16>, vector<32x36xf32> -> vector<32x36xf32>
    %177 = arith.addf %171, %176 : vector<32x36xf32>
    %178 = vector.extract_strided_slice %94 {offsets = [448, 0], sizes = [32, 196], strides = [1, 1]} : vector<512x196xf32> to vector<32x196xf32>
    %179 = arith.truncf %178 : vector<32x196xf32> to vector<32x196xbf16>
    %c14 = arith.constant 14 : index
    %c0_102 = arith.constant 0 : index
    %c0_103 = arith.constant 0 : index
    %180 = vector.load %arg7[%c14, %c0_102, %c0_103] : memref<16x196x36xbf16, #tpu.memory_space<vmem>>, vector<1x196x36xbf16>
    %181 = vector.shape_cast %180 : vector<1x196x36xbf16> to vector<196x36xbf16>
    %cst_104 = arith.constant dense<0.000000e+00> : vector<32x36xf32>
    %182 = tpu.matmul %179, %181, %cst_104 {dimension_numbers = #tpu.dot_dimension_numbers<[1], [0], [0], [1], [0, 0, 1, 1], [], []>} : vector<32x196xbf16>, vector<196x36xbf16>, vector<32x36xf32> -> vector<32x36xf32>
    %183 = arith.addf %177, %182 : vector<32x36xf32>
    %184 = vector.extract_strided_slice %94 {offsets = [480, 0], sizes = [32, 196], strides = [1, 1]} : vector<512x196xf32> to vector<32x196xf32>
    %185 = arith.truncf %184 : vector<32x196xf32> to vector<32x196xbf16>
    %c15 = arith.constant 15 : index
    %c0_105 = arith.constant 0 : index
    %c0_106 = arith.constant 0 : index
    %186 = vector.load %arg7[%c15, %c0_105, %c0_106] : memref<16x196x36xbf16, #tpu.memory_space<vmem>>, vector<1x196x36xbf16>
    %187 = vector.shape_cast %186 : vector<1x196x36xbf16> to vector<196x36xbf16>
    %cst_107 = arith.constant dense<0.000000e+00> : vector<32x36xf32>
    %188 = tpu.matmul %185, %187, %cst_107 {dimension_numbers = #tpu.dot_dimension_numbers<[1], [0], [0], [1], [0, 0, 1, 1], [], []>} : vector<32x196xbf16>, vector<196x36xbf16>, vector<32x36xf32> -> vector<32x36xf32>
    %189 = arith.addf %183, %188 : vector<32x36xf32>
    %cst_108 = arith.constant dense<0.000000e+00> : vector<32xf32>
    %190 = vector.multi_reduction <add>, %189, %cst_108 [1] : vector<32x36xf32> to vector<32xf32>
    %191 = vector.shape_cast %190 : vector<32xf32> to vector<32x1xf32>
    %192 = arith.mulf %189, %189 : vector<32x36xf32>
    %cst_109 = arith.constant dense<0.000000e+00> : vector<32xf32>
    %193 = vector.multi_reduction <add>, %192, %cst_109 [1] : vector<32x36xf32> to vector<32xf32>
    %194 = vector.shape_cast %193 : vector<32xf32> to vector<32x1xf32>
    %c0_110 = arith.constant 0 : index
    %c0_111 = arith.constant 0 : index
    %195 = vector.load %arg9[%c0_110, %c0_111] : memref<32x32xf32, #tpu.memory_space<vmem>>, vector<32x32xf32>
    %cst_112 = arith.constant dense<0.000000e+00> : vector<32x1xf32>
    %196 = tpu.matmul %195, %191, %cst_112 {dimension_numbers = #tpu.dot_dimension_numbers<[1], [0], [0], [1], [0, 0, 1, 1], [], []>} : vector<32x32xf32>, vector<32x1xf32>, vector<32x1xf32> -> vector<32x1xf32>
    %c0_113 = arith.constant 0 : index
    %c0_114 = arith.constant 0 : index
    %197 = vector.load %arg9[%c0_113, %c0_114] : memref<32x32xf32, #tpu.memory_space<vmem>>, vector<32x32xf32>
    %cst_115 = arith.constant dense<0.000000e+00> : vector<32x1xf32>
    %198 = tpu.matmul %197, %194, %cst_115 {dimension_numbers = #tpu.dot_dimension_numbers<[1], [0], [0], [1], [0, 0, 1, 1], [], []>} : vector<32x32xf32>, vector<32x1xf32>, vector<32x1xf32> -> vector<32x1xf32>
    %199 = arith.mulf %196, %196 : vector<32x1xf32>
    %200 = arith.subf %198, %199 : vector<32x1xf32>
    %201 = vector.broadcast %196 : vector<32x1xf32> to vector<32x36xf32>
    %202 = arith.subf %189, %201 : vector<32x36xf32>
    %cst_116 = arith.constant 9.99999974E-6 : f32
    %203 = vector.broadcast %cst_116 : f32 to vector<32x1xf32>
    %204 = arith.addf %200, %203 : vector<32x1xf32>
    %205 = math.rsqrt %204 : vector<32x1xf32>
    %206 = vector.broadcast %205 : vector<32x1xf32> to vector<32x36xf32>
    %207 = arith.mulf %202, %206 : vector<32x36xf32>
    %c0_117 = arith.constant 0 : index
    %c0_118 = arith.constant 0 : index
    %208 = vector.load %arg10[%c0_117, %c0_118] : memref<32x1xf32, #tpu.memory_space<vmem>>, vector<32x1xf32>
    %209 = vector.broadcast %208 : vector<32x1xf32> to vector<32x36xf32>
    %210 = arith.mulf %207, %209 : vector<32x36xf32>
    %c0_119 = arith.constant 0 : index
    %c0_120 = arith.constant 0 : index
    %211 = vector.load %arg11[%c0_119, %c0_120] : memref<32x1xf32, #tpu.memory_space<vmem>>, vector<32x1xf32>
    %212 = vector.broadcast %211 : vector<32x1xf32> to vector<32x36xf32>
    %213 = arith.addf %210, %212 : vector<32x36xf32>
    %cst_121 = arith.constant 5.000000e-01 : f32
    %214 = vector.broadcast %cst_121 : f32 to vector<32x36xf32>
    %215 = arith.mulf %214, %213 : vector<32x36xf32>
    %cst_122 = arith.constant 4.471500e-02 : f32
    %216 = vector.broadcast %cst_122 : f32 to vector<32x36xf32>
    %217 = arith.mulf %216, %213 : vector<32x36xf32>
    %218 = arith.mulf %217, %213 : vector<32x36xf32>
    %219 = arith.mulf %218, %213 : vector<32x36xf32>
    %220 = arith.addf %213, %219 : vector<32x36xf32>
    %cst_123 = arith.constant 0.797884583 : f32
    %221 = vector.broadcast %cst_123 : f32 to vector<32x36xf32>
    %222 = arith.mulf %221, %220 : vector<32x36xf32>
    %223 = math.tanh %222 : vector<32x36xf32>
    %cst_124 = arith.constant 1.000000e+00 : f32
    %224 = vector.broadcast %cst_124 : f32 to vector<32x36xf32>
    %225 = arith.addf %224, %223 : vector<32x36xf32>
    %226 = arith.mulf %215, %225 : vector<32x36xf32>
    %c0_125 = arith.constant 0 : index
    %c0_126 = arith.constant 0 : index
    %227 = vector.load %arg13[%c0_125, %c0_126] : memref<144x32xf32, #tpu.memory_space<vmem>>, vector<144x32xf32>
    %cst_127 = arith.constant dense<0.000000e+00> : vector<144x36xf32>
    %228 = tpu.matmul %227, %226, %cst_127 {dimension_numbers = #tpu.dot_dimension_numbers<[1], [0], [0], [1], [0, 0, 1, 1], [], []>} : vector<144x32xf32>, vector<32x36xf32>, vector<144x36xf32> -> vector<144x36xf32>
    %229 = vector.extract_strided_slice %228 {offsets = [0, 0], sizes = [16, 36], strides = [1, 1]} : vector<144x36xf32> to vector<16x36xf32>
    %230 = arith.truncf %229 : vector<16x36xf32> to vector<16x36xbf16>
    %c0_128 = arith.constant 0 : index
    %c0_129 = arith.constant 0 : index
    %c0_130 = arith.constant 0 : index
    %231 = vector.load %arg12[%c0_128, %c0_129, %c0_130] : memref<9x36x16xbf16, #tpu.memory_space<vmem>>, vector<1x36x16xbf16>
    %232 = vector.shape_cast %231 : vector<1x36x16xbf16> to vector<36x16xbf16>
    %cst_131 = arith.constant dense<0.000000e+00> : vector<16x16xf32>
    %233 = tpu.matmul %230, %232, %cst_131 {dimension_numbers = #tpu.dot_dimension_numbers<[1], [0], [0], [1], [0, 0, 1, 1], [], []>} : vector<16x36xbf16>, vector<36x16xbf16>, vector<16x16xf32> -> vector<16x16xf32>
    %234 = vector.extract_strided_slice %228 {offsets = [16, 0], sizes = [16, 36], strides = [1, 1]} : vector<144x36xf32> to vector<16x36xf32>
    %235 = arith.truncf %234 : vector<16x36xf32> to vector<16x36xbf16>
    %c1_132 = arith.constant 1 : index
    %c0_133 = arith.constant 0 : index
    %c0_134 = arith.constant 0 : index
    %236 = vector.load %arg12[%c1_132, %c0_133, %c0_134] : memref<9x36x16xbf16, #tpu.memory_space<vmem>>, vector<1x36x16xbf16>
    %237 = vector.shape_cast %236 : vector<1x36x16xbf16> to vector<36x16xbf16>
    %cst_135 = arith.constant dense<0.000000e+00> : vector<16x16xf32>
    %238 = tpu.matmul %235, %237, %cst_135 {dimension_numbers = #tpu.dot_dimension_numbers<[1], [0], [0], [1], [0, 0, 1, 1], [], []>} : vector<16x36xbf16>, vector<36x16xbf16>, vector<16x16xf32> -> vector<16x16xf32>
    %239 = arith.addf %233, %238 : vector<16x16xf32>
    %240 = vector.extract_strided_slice %228 {offsets = [32, 0], sizes = [16, 36], strides = [1, 1]} : vector<144x36xf32> to vector<16x36xf32>
    %241 = arith.truncf %240 : vector<16x36xf32> to vector<16x36xbf16>
    %c2_136 = arith.constant 2 : index
    %c0_137 = arith.constant 0 : index
    %c0_138 = arith.constant 0 : index
    %242 = vector.load %arg12[%c2_136, %c0_137, %c0_138] : memref<9x36x16xbf16, #tpu.memory_space<vmem>>, vector<1x36x16xbf16>
    %243 = vector.shape_cast %242 : vector<1x36x16xbf16> to vector<36x16xbf16>
    %cst_139 = arith.constant dense<0.000000e+00> : vector<16x16xf32>
    %244 = tpu.matmul %241, %243, %cst_139 {dimension_numbers = #tpu.dot_dimension_numbers<[1], [0], [0], [1], [0, 0, 1, 1], [], []>} : vector<16x36xbf16>, vector<36x16xbf16>, vector<16x16xf32> -> vector<16x16xf32>
    %245 = arith.addf %239, %244 : vector<16x16xf32>
    %246 = vector.extract_strided_slice %228 {offsets = [48, 0], sizes = [16, 36], strides = [1, 1]} : vector<144x36xf32> to vector<16x36xf32>
    %247 = arith.truncf %246 : vector<16x36xf32> to vector<16x36xbf16>
    %c3_140 = arith.constant 3 : index
    %c0_141 = arith.constant 0 : index
    %c0_142 = arith.constant 0 : index
    %248 = vector.load %arg12[%c3_140, %c0_141, %c0_142] : memref<9x36x16xbf16, #tpu.memory_space<vmem>>, vector<1x36x16xbf16>
    %249 = vector.shape_cast %248 : vector<1x36x16xbf16> to vector<36x16xbf16>
    %cst_143 = arith.constant dense<0.000000e+00> : vector<16x16xf32>
    %250 = tpu.matmul %247, %249, %cst_143 {dimension_numbers = #tpu.dot_dimension_numbers<[1], [0], [0], [1], [0, 0, 1, 1], [], []>} : vector<16x36xbf16>, vector<36x16xbf16>, vector<16x16xf32> -> vector<16x16xf32>
    %251 = arith.addf %245, %250 : vector<16x16xf32>
    %252 = vector.extract_strided_slice %228 {offsets = [64, 0], sizes = [16, 36], strides = [1, 1]} : vector<144x36xf32> to vector<16x36xf32>
    %253 = arith.truncf %252 : vector<16x36xf32> to vector<16x36xbf16>
    %c4_144 = arith.constant 4 : index
    %c0_145 = arith.constant 0 : index
    %c0_146 = arith.constant 0 : index
    %254 = vector.load %arg12[%c4_144, %c0_145, %c0_146] : memref<9x36x16xbf16, #tpu.memory_space<vmem>>, vector<1x36x16xbf16>
    %255 = vector.shape_cast %254 : vector<1x36x16xbf16> to vector<36x16xbf16>
    %cst_147 = arith.constant dense<0.000000e+00> : vector<16x16xf32>
    %256 = tpu.matmul %253, %255, %cst_147 {dimension_numbers = #tpu.dot_dimension_numbers<[1], [0], [0], [1], [0, 0, 1, 1], [], []>} : vector<16x36xbf16>, vector<36x16xbf16>, vector<16x16xf32> -> vector<16x16xf32>
    %257 = arith.addf %251, %256 : vector<16x16xf32>
    %258 = vector.extract_strided_slice %228 {offsets = [80, 0], sizes = [16, 36], strides = [1, 1]} : vector<144x36xf32> to vector<16x36xf32>
    %259 = arith.truncf %258 : vector<16x36xf32> to vector<16x36xbf16>
    %c5_148 = arith.constant 5 : index
    %c0_149 = arith.constant 0 : index
    %c0_150 = arith.constant 0 : index
    %260 = vector.load %arg12[%c5_148, %c0_149, %c0_150] : memref<9x36x16xbf16, #tpu.memory_space<vmem>>, vector<1x36x16xbf16>
    %261 = vector.shape_cast %260 : vector<1x36x16xbf16> to vector<36x16xbf16>
    %cst_151 = arith.constant dense<0.000000e+00> : vector<16x16xf32>
    %262 = tpu.matmul %259, %261, %cst_151 {dimension_numbers = #tpu.dot_dimension_numbers<[1], [0], [0], [1], [0, 0, 1, 1], [], []>} : vector<16x36xbf16>, vector<36x16xbf16>, vector<16x16xf32> -> vector<16x16xf32>
    %263 = arith.addf %257, %262 : vector<16x16xf32>
    %264 = vector.extract_strided_slice %228 {offsets = [96, 0], sizes = [16, 36], strides = [1, 1]} : vector<144x36xf32> to vector<16x36xf32>
    %265 = arith.truncf %264 : vector<16x36xf32> to vector<16x36xbf16>
    %c6_152 = arith.constant 6 : index
    %c0_153 = arith.constant 0 : index
    %c0_154 = arith.constant 0 : index
    %266 = vector.load %arg12[%c6_152, %c0_153, %c0_154] : memref<9x36x16xbf16, #tpu.memory_space<vmem>>, vector<1x36x16xbf16>
    %267 = vector.shape_cast %266 : vector<1x36x16xbf16> to vector<36x16xbf16>
    %cst_155 = arith.constant dense<0.000000e+00> : vector<16x16xf32>
    %268 = tpu.matmul %265, %267, %cst_155 {dimension_numbers = #tpu.dot_dimension_numbers<[1], [0], [0], [1], [0, 0, 1, 1], [], []>} : vector<16x36xbf16>, vector<36x16xbf16>, vector<16x16xf32> -> vector<16x16xf32>
    %269 = arith.addf %263, %268 : vector<16x16xf32>
    %270 = vector.extract_strided_slice %228 {offsets = [112, 0], sizes = [16, 36], strides = [1, 1]} : vector<144x36xf32> to vector<16x36xf32>
    %271 = arith.truncf %270 : vector<16x36xf32> to vector<16x36xbf16>
    %c7_156 = arith.constant 7 : index
    %c0_157 = arith.constant 0 : index
    %c0_158 = arith.constant 0 : index
    %272 = vector.load %arg12[%c7_156, %c0_157, %c0_158] : memref<9x36x16xbf16, #tpu.memory_space<vmem>>, vector<1x36x16xbf16>
    %273 = vector.shape_cast %272 : vector<1x36x16xbf16> to vector<36x16xbf16>
    %cst_159 = arith.constant dense<0.000000e+00> : vector<16x16xf32>
    %274 = tpu.matmul %271, %273, %cst_159 {dimension_numbers = #tpu.dot_dimension_numbers<[1], [0], [0], [1], [0, 0, 1, 1], [], []>} : vector<16x36xbf16>, vector<36x16xbf16>, vector<16x16xf32> -> vector<16x16xf32>
    %275 = arith.addf %269, %274 : vector<16x16xf32>
    %276 = vector.extract_strided_slice %228 {offsets = [128, 0], sizes = [16, 36], strides = [1, 1]} : vector<144x36xf32> to vector<16x36xf32>
    %277 = arith.truncf %276 : vector<16x36xf32> to vector<16x36xbf16>
    %c8_160 = arith.constant 8 : index
    %c0_161 = arith.constant 0 : index
    %c0_162 = arith.constant 0 : index
    %278 = vector.load %arg12[%c8_160, %c0_161, %c0_162] : memref<9x36x16xbf16, #tpu.memory_space<vmem>>, vector<1x36x16xbf16>
    %279 = vector.shape_cast %278 : vector<1x36x16xbf16> to vector<36x16xbf16>
    %cst_163 = arith.constant dense<0.000000e+00> : vector<16x16xf32>
    %280 = tpu.matmul %277, %279, %cst_163 {dimension_numbers = #tpu.dot_dimension_numbers<[1], [0], [0], [1], [0, 0, 1, 1], [], []>} : vector<16x36xbf16>, vector<36x16xbf16>, vector<16x16xf32> -> vector<16x16xf32>
    %281 = arith.addf %275, %280 : vector<16x16xf32>
    %cst_164 = arith.constant dense<0.000000e+00> : vector<16xf32>
    %282 = vector.multi_reduction <add>, %281, %cst_164 [1] : vector<16x16xf32> to vector<16xf32>
    %283 = vector.shape_cast %282 : vector<16xf32> to vector<16x1xf32>
    %284 = arith.mulf %281, %281 : vector<16x16xf32>
    %cst_165 = arith.constant dense<0.000000e+00> : vector<16xf32>
    %285 = vector.multi_reduction <add>, %284, %cst_165 [1] : vector<16x16xf32> to vector<16xf32>
    %286 = vector.shape_cast %285 : vector<16xf32> to vector<16x1xf32>
    %c0_166 = arith.constant 0 : index
    %c0_167 = arith.constant 0 : index
    %287 = vector.load %arg14[%c0_166, %c0_167] : memref<16x16xf32, #tpu.memory_space<vmem>>, vector<16x16xf32>
    %cst_168 = arith.constant dense<0.000000e+00> : vector<16x1xf32>
    %288 = tpu.matmul %287, %283, %cst_168 {dimension_numbers = #tpu.dot_dimension_numbers<[1], [0], [0], [1], [0, 0, 1, 1], [], []>} : vector<16x16xf32>, vector<16x1xf32>, vector<16x1xf32> -> vector<16x1xf32>
    %c0_169 = arith.constant 0 : index
    %c0_170 = arith.constant 0 : index
    %289 = vector.load %arg14[%c0_169, %c0_170] : memref<16x16xf32, #tpu.memory_space<vmem>>, vector<16x16xf32>
    %cst_171 = arith.constant dense<0.000000e+00> : vector<16x1xf32>
    %290 = tpu.matmul %289, %286, %cst_171 {dimension_numbers = #tpu.dot_dimension_numbers<[1], [0], [0], [1], [0, 0, 1, 1], [], []>} : vector<16x16xf32>, vector<16x1xf32>, vector<16x1xf32> -> vector<16x1xf32>
    %291 = arith.mulf %288, %288 : vector<16x1xf32>
    %292 = arith.subf %290, %291 : vector<16x1xf32>
    %293 = vector.broadcast %288 : vector<16x1xf32> to vector<16x16xf32>
    %294 = arith.subf %281, %293 : vector<16x16xf32>
    %cst_172 = arith.constant 9.99999974E-6 : f32
    %295 = vector.broadcast %cst_172 : f32 to vector<16x1xf32>
    %296 = arith.addf %292, %295 : vector<16x1xf32>
    %297 = math.rsqrt %296 : vector<16x1xf32>
    %298 = vector.broadcast %297 : vector<16x1xf32> to vector<16x16xf32>
    %299 = arith.mulf %294, %298 : vector<16x16xf32>
    %c0_173 = arith.constant 0 : index
    %c0_174 = arith.constant 0 : index
    %300 = vector.load %arg15[%c0_173, %c0_174] : memref<16x1xf32, #tpu.memory_space<vmem>>, vector<16x1xf32>
    %301 = vector.broadcast %300 : vector<16x1xf32> to vector<16x16xf32>
    %302 = arith.mulf %299, %301 : vector<16x16xf32>
    %c0_175 = arith.constant 0 : index
    %c0_176 = arith.constant 0 : index
    %303 = vector.load %arg16[%c0_175, %c0_176] : memref<16x1xf32, #tpu.memory_space<vmem>>, vector<16x1xf32>
    %304 = vector.broadcast %303 : vector<16x1xf32> to vector<16x16xf32>
    %305 = arith.addf %302, %304 : vector<16x16xf32>
    %cst_177 = arith.constant 5.000000e-01 : f32
    %306 = vector.broadcast %cst_177 : f32 to vector<16x16xf32>
    %307 = arith.mulf %306, %305 : vector<16x16xf32>
    %cst_178 = arith.constant 4.471500e-02 : f32
    %308 = vector.broadcast %cst_178 : f32 to vector<16x16xf32>
    %309 = arith.mulf %308, %305 : vector<16x16xf32>
    %310 = arith.mulf %309, %305 : vector<16x16xf32>
    %311 = arith.mulf %310, %305 : vector<16x16xf32>
    %312 = arith.addf %305, %311 : vector<16x16xf32>
    %cst_179 = arith.constant 0.797884583 : f32
    %313 = vector.broadcast %cst_179 : f32 to vector<16x16xf32>
    %314 = arith.mulf %313, %312 : vector<16x16xf32>
    %315 = math.tanh %314 : vector<16x16xf32>
    %cst_180 = arith.constant 1.000000e+00 : f32
    %316 = vector.broadcast %cst_180 : f32 to vector<16x16xf32>
    %317 = arith.addf %316, %315 : vector<16x16xf32>
    %318 = arith.mulf %307, %317 : vector<16x16xf32>
    %c0_181 = arith.constant 0 : index
    %c0_182 = arith.constant 0 : index
    %319 = vector.load %arg17[%c0_181, %c0_182] : memref<16x256xf32, #tpu.memory_space<vmem>>, vector<16x256xf32>
    %cst_183 = arith.constant dense<0.000000e+00> : vector<16x256xf32>
    %320 = tpu.matmul %318, %319, %cst_183 {dimension_numbers = #tpu.dot_dimension_numbers<[1], [0], [0], [1], [0, 0, 1, 1], [], []>} : vector<16x16xf32>, vector<16x256xf32>, vector<16x256xf32> -> vector<16x256xf32>
    %c0_184 = arith.constant 0 : index
    %c0_185 = arith.constant 0 : index
    %321 = vector.load %arg19[%c0_184, %c0_185] : memref<2x16xf32, #tpu.memory_space<vmem>>, vector<2x16xf32>
    %c0_186 = arith.constant 0 : index
    %c0_187 = arith.constant 0 : index
    %322 = vector.load %arg18[%c0_186, %c0_187] : memref<16x256xf32, #tpu.memory_space<vmem>>, vector<16x256xf32>
    %323 = arith.mulf %320, %322 : vector<16x256xf32>
    %cst_188 = arith.constant dense<0.000000e+00> : vector<2x256xf32>
    %324 = tpu.matmul %321, %323, %cst_188 {dimension_numbers = #tpu.dot_dimension_numbers<[1], [0], [0], [1], [0, 0, 1, 1], [], []>} : vector<2x16xf32>, vector<16x256xf32>, vector<2x256xf32> -> vector<2x256xf32>
    %c0_189 = arith.constant 0 : index
    %c0_190 = arith.constant 0 : index
    %325 = vector.load %arg20[%c0_189, %c0_190] : memref<256x16xf32, #tpu.memory_space<vmem>>, vector<256x16xf32>
    %cst_191 = arith.constant dense<0.000000e+00> : vector<2x16xf32>
    %326 = tpu.matmul %324, %325, %cst_191 {dimension_numbers = #tpu.dot_dimension_numbers<[1], [0], [0], [1], [0, 0, 1, 1], [], []>} : vector<2x256xf32>, vector<256x16xf32>, vector<2x16xf32> -> vector<2x16xf32>
    %c0_192 = arith.constant 0 : index
    %c0_193 = arith.constant 0 : index
    %327 = vector.load %arg22[%c0_192, %c0_193] : memref<1x16xf32, #tpu.memory_space<vmem>>, vector<1x16xf32>
    %328 = vector.broadcast %327 : vector<1x16xf32> to vector<2x16xf32>
    %329 = arith.addf %326, %328 : vector<2x16xf32>
    %cst_194 = arith.constant 5.000000e-01 : f32
    %330 = vector.broadcast %cst_194 : f32 to vector<2x16xf32>
    %331 = arith.mulf %330, %329 : vector<2x16xf32>
    %cst_195 = arith.constant 4.471500e-02 : f32
    %332 = vector.broadcast %cst_195 : f32 to vector<2x16xf32>
    %333 = arith.mulf %332, %329 : vector<2x16xf32>
    %334 = arith.mulf %333, %329 : vector<2x16xf32>
    %335 = arith.mulf %334, %329 : vector<2x16xf32>
    %336 = arith.addf %329, %335 : vector<2x16xf32>
    %cst_196 = arith.constant 0.797884583 : f32
    %337 = vector.broadcast %cst_196 : f32 to vector<2x16xf32>
    %338 = arith.mulf %337, %336 : vector<2x16xf32>
    %339 = math.tanh %338 : vector<2x16xf32>
    %cst_197 = arith.constant 1.000000e+00 : f32
    %340 = vector.broadcast %cst_197 : f32 to vector<2x16xf32>
    %341 = arith.addf %340, %339 : vector<2x16xf32>
    %342 = arith.mulf %331, %341 : vector<2x16xf32>
    %c0_198 = arith.constant 0 : index
    %c0_199 = arith.constant 0 : index
    %343 = vector.load %arg21[%c0_198, %c0_199] : memref<256x16xf32, #tpu.memory_space<vmem>>, vector<256x16xf32>
    %cst_200 = arith.constant dense<0.000000e+00> : vector<2x16xf32>
    %344 = tpu.matmul %324, %343, %cst_200 {dimension_numbers = #tpu.dot_dimension_numbers<[1], [0], [0], [1], [0, 0, 1, 1], [], []>} : vector<2x256xf32>, vector<256x16xf32>, vector<2x16xf32> -> vector<2x16xf32>
    %c0_201 = arith.constant 0 : index
    %c0_202 = arith.constant 0 : index
    %345 = vector.load %arg23[%c0_201, %c0_202] : memref<1x16xf32, #tpu.memory_space<vmem>>, vector<1x16xf32>
    %346 = vector.broadcast %345 : vector<1x16xf32> to vector<2x16xf32>
    %347 = arith.addf %344, %346 : vector<2x16xf32>
    %cst_203 = arith.constant 5.000000e-01 : f32
    %348 = vector.broadcast %cst_203 : f32 to vector<2x16xf32>
    %349 = arith.mulf %348, %347 : vector<2x16xf32>
    %cst_204 = arith.constant 4.471500e-02 : f32
    %350 = vector.broadcast %cst_204 : f32 to vector<2x16xf32>
    %351 = arith.mulf %350, %347 : vector<2x16xf32>
    %352 = arith.mulf %351, %347 : vector<2x16xf32>
    %353 = arith.mulf %352, %347 : vector<2x16xf32>
    %354 = arith.addf %347, %353 : vector<2x16xf32>
    %cst_205 = arith.constant 0.797884583 : f32
    %355 = vector.broadcast %cst_205 : f32 to vector<2x16xf32>
    %356 = arith.mulf %355, %354 : vector<2x16xf32>
    %357 = math.tanh %356 : vector<2x16xf32>
    %cst_206 = arith.constant 1.000000e+00 : f32
    %358 = vector.broadcast %cst_206 : f32 to vector<2x16xf32>
    %359 = arith.addf %358, %357 : vector<2x16xf32>
    %360 = arith.mulf %349, %359 : vector<2x16xf32>
    %c0_207 = arith.constant 0 : index
    %c0_208 = arith.constant 0 : index
    %361 = vector.load %arg1[%c0_207, %c0_208] : memref<2x16xf32, #tpu.memory_space<vmem>>, vector<2x16xf32>
    %cst_209 = arith.constant 5.000000e-01 : f32
    %362 = vector.broadcast %cst_209 : f32 to vector<2x16xf32>
    %363 = arith.mulf %362, %360 : vector<2x16xf32>
    %364 = math.exp %363 : vector<2x16xf32>
    %365 = arith.mulf %361, %364 : vector<2x16xf32>
    %366 = arith.addf %342, %365 : vector<2x16xf32>
    %c0_210 = arith.constant 0 : index
    %c0_211 = arith.constant 0 : index
    %c0_212 = arith.constant 0 : index
    %367 = vector.load %arg43[%c0_210, %c0_211, %c0_212] : memref<3x2x16xf32, #tpu.memory_space<vmem>>, vector<1x2x16xf32>
    %368 = vector.shape_cast %367 : vector<1x2x16xf32> to vector<2x16xf32>
    %369 = vector.shape_cast %342 : vector<2x16xf32> to vector<1x2x16xf32>
    tpu.vector_store %arg43[%c0_210, %c0_211, %c0_212], %369 {strides = array<i32>} : memref<3x2x16xf32, #tpu.memory_space<vmem>>, vector<1x2x16xf32>,
    %c1_213 = arith.constant 1 : index
    %c0_214 = arith.constant 0 : index
    %c0_215 = arith.constant 0 : index
    %370 = vector.load %arg43[%c1_213, %c0_214, %c0_215] : memref<3x2x16xf32, #tpu.memory_space<vmem>>, vector<1x2x16xf32>
    %371 = vector.shape_cast %370 : vector<1x2x16xf32> to vector<2x16xf32>
    %372 = vector.shape_cast %360 : vector<2x16xf32> to vector<1x2x16xf32>
    tpu.vector_store %arg43[%c1_213, %c0_214, %c0_215], %372 {strides = array<i32>} : memref<3x2x16xf32, #tpu.memory_space<vmem>>, vector<1x2x16xf32>,
    %c2_216 = arith.constant 2 : index
    %c0_217 = arith.constant 0 : index
    %c0_218 = arith.constant 0 : index
    %373 = vector.load %arg43[%c2_216, %c0_217, %c0_218] : memref<3x2x16xf32, #tpu.memory_space<vmem>>, vector<1x2x16xf32>
    %374 = vector.shape_cast %373 : vector<1x2x16xf32> to vector<2x16xf32>
    %375 = vector.shape_cast %366 : vector<2x16xf32> to vector<1x2x16xf32>
    tpu.vector_store %arg43[%c2_216, %c0_217, %c0_218], %375 {strides = array<i32>} : memref<3x2x16xf32, #tpu.memory_space<vmem>>, vector<1x2x16xf32>,
    %c0_219 = arith.constant 0 : index
    %c0_220 = arith.constant 0 : index
    %376 = vector.load %arg24[%c0_219, %c0_220] : memref<16x128xf32, #tpu.memory_space<vmem>>, vector<16x128xf32>
    %cst_221 = arith.constant dense<0.000000e+00> : vector<2x128xf32>
    %377 = tpu.matmul %366, %376, %cst_221 {dimension_numbers = #tpu.dot_dimension_numbers<[1], [0], [0], [1], [0, 0, 1, 1], [], []>} : vector<2x16xf32>, vector<16x128xf32>, vector<2x128xf32> -> vector<2x128xf32>
    %c0_222 = arith.constant 0 : index
    %c0_223 = arith.constant 0 : index
    %378 = vector.load %arg25[%c0_222, %c0_223] : memref<16x2xf32, #tpu.memory_space<vmem>>, vector<16x2xf32>
    %cst_224 = arith.constant dense<0.000000e+00> : vector<16x128xf32>
    %379 = tpu.matmul %378, %377, %cst_224 {dimension_numbers = #tpu.dot_dimension_numbers<[1], [0], [0], [1], [0, 0, 1, 1], [], []>} : vector<16x2xf32>, vector<2x128xf32>, vector<16x128xf32> -> vector<16x128xf32>
    %c0_225 = arith.constant 0 : index
    %c0_226 = arith.constant 0 : index
    %380 = vector.load %arg26[%c0_225, %c0_226] : memref<16x128xf32, #tpu.memory_space<vmem>>, vector<16x128xf32>
    %381 = arith.mulf %379, %380 : vector<16x128xf32>
    %c0_227 = arith.constant 0 : index
    %c0_228 = arith.constant 0 : index
    %382 = vector.load %arg27[%c0_227, %c0_228] : memref<128x16xf32, #tpu.memory_space<vmem>>, vector<128x16xf32>
    %cst_229 = arith.constant dense<0.000000e+00> : vector<16x16xf32>
    %383 = tpu.matmul %381, %382, %cst_229 {dimension_numbers = #tpu.dot_dimension_numbers<[1], [0], [0], [1], [0, 0, 1, 1], [], []>} : vector<16x128xf32>, vector<128x16xf32>, vector<16x16xf32> -> vector<16x16xf32>
    %c0_230 = arith.constant 0 : index
    %c0_231 = arith.constant 0 : index
    %384 = vector.load %arg28[%c0_230, %c0_231] : memref<16x16xf32, #tpu.memory_space<vmem>>, vector<16x16xf32>
    %385 = arith.addf %383, %384 : vector<16x16xf32>
    %cst_232 = arith.constant 5.000000e-01 : f32
    %386 = vector.broadcast %cst_232 : f32 to vector<16x16xf32>
    %387 = arith.mulf %386, %385 : vector<16x16xf32>
    %cst_233 = arith.constant 4.471500e-02 : f32
    %388 = vector.broadcast %cst_233 : f32 to vector<16x16xf32>
    %389 = arith.mulf %388, %385 : vector<16x16xf32>
    %390 = arith.mulf %389, %385 : vector<16x16xf32>
    %391 = arith.mulf %390, %385 : vector<16x16xf32>
    %392 = arith.addf %385, %391 : vector<16x16xf32>
    %cst_234 = arith.constant 0.797884583 : f32
    %393 = vector.broadcast %cst_234 : f32 to vector<16x16xf32>
    %394 = arith.mulf %393, %392 : vector<16x16xf32>
    %395 = math.tanh %394 : vector<16x16xf32>
    %cst_235 = arith.constant 1.000000e+00 : f32
    %396 = vector.broadcast %cst_235 : f32 to vector<16x16xf32>
    %397 = arith.addf %396, %395 : vector<16x16xf32>
    %398 = arith.mulf %387, %397 : vector<16x16xf32>
    %c0_236 = arith.constant 0 : index
    %c0_237 = arith.constant 0 : index
    %399 = vector.load %arg30[%c0_236, %c0_237] : memref<288x16xf32, #tpu.memory_space<vmem>>, vector<288x16xf32>
    %cst_238 = arith.constant dense<0.000000e+00> : vector<288x16xf32>
    %400 = tpu.matmul %399, %398, %cst_238 {dimension_numbers = #tpu.dot_dimension_numbers<[1], [0], [0], [1], [0, 0, 1, 1], [], []>} : vector<288x16xf32>, vector<16x16xf32>, vector<288x16xf32> -> vector<288x16xf32>
    %401 = vector.extract_strided_slice %400 {offsets = [0, 0], sizes = [32, 16], strides = [1, 1]} : vector<288x16xf32> to vector<32x16xf32>
    %402 = arith.truncf %401 : vector<32x16xf32> to vector<32x16xbf16>
    %c0_239 = arith.constant 0 : index
    %c0_240 = arith.constant 0 : index
    %c0_241 = arith.constant 0 : index
    %403 = vector.load %arg29[%c0_239, %c0_240, %c0_241] : memref<9x16x36xbf16, #tpu.memory_space<vmem>>, vector<1x16x36xbf16>
    %404 = vector.shape_cast %403 : vector<1x16x36xbf16> to vector<16x36xbf16>
    %cst_242 = arith.constant dense<0.000000e+00> : vector<32x36xf32>
    %405 = tpu.matmul %402, %404, %cst_242 {dimension_numbers = #tpu.dot_dimension_numbers<[1], [0], [0], [1], [0, 0, 1, 1], [], []>} : vector<32x16xbf16>, vector<16x36xbf16>, vector<32x36xf32> -> vector<32x36xf32>
    %406 = vector.extract_strided_slice %400 {offsets = [32, 0], sizes = [32, 16], strides = [1, 1]} : vector<288x16xf32> to vector<32x16xf32>
    %407 = arith.truncf %406 : vector<32x16xf32> to vector<32x16xbf16>
    %c1_243 = arith.constant 1 : index
    %c0_244 = arith.constant 0 : index
    %c0_245 = arith.constant 0 : index
    %408 = vector.load %arg29[%c1_243, %c0_244, %c0_245] : memref<9x16x36xbf16, #tpu.memory_space<vmem>>, vector<1x16x36xbf16>
    %409 = vector.shape_cast %408 : vector<1x16x36xbf16> to vector<16x36xbf16>
    %cst_246 = arith.constant dense<0.000000e+00> : vector<32x36xf32>
    %410 = tpu.matmul %407, %409, %cst_246 {dimension_numbers = #tpu.dot_dimension_numbers<[1], [0], [0], [1], [0, 0, 1, 1], [], []>} : vector<32x16xbf16>, vector<16x36xbf16>, vector<32x36xf32> -> vector<32x36xf32>
    %411 = arith.addf %405, %410 : vector<32x36xf32>
    %412 = vector.extract_strided_slice %400 {offsets = [64, 0], sizes = [32, 16], strides = [1, 1]} : vector<288x16xf32> to vector<32x16xf32>
    %413 = arith.truncf %412 : vector<32x16xf32> to vector<32x16xbf16>
    %c2_247 = arith.constant 2 : index
    %c0_248 = arith.constant 0 : index
    %c0_249 = arith.constant 0 : index
    %414 = vector.load %arg29[%c2_247, %c0_248, %c0_249] : memref<9x16x36xbf16, #tpu.memory_space<vmem>>, vector<1x16x36xbf16>
    %415 = vector.shape_cast %414 : vector<1x16x36xbf16> to vector<16x36xbf16>
    %cst_250 = arith.constant dense<0.000000e+00> : vector<32x36xf32>
    %416 = tpu.matmul %413, %415, %cst_250 {dimension_numbers = #tpu.dot_dimension_numbers<[1], [0], [0], [1], [0, 0, 1, 1], [], []>} : vector<32x16xbf16>, vector<16x36xbf16>, vector<32x36xf32> -> vector<32x36xf32>
    %417 = arith.addf %411, %416 : vector<32x36xf32>
    %418 = vector.extract_strided_slice %400 {offsets = [96, 0], sizes = [32, 16], strides = [1, 1]} : vector<288x16xf32> to vector<32x16xf32>
    %419 = arith.truncf %418 : vector<32x16xf32> to vector<32x16xbf16>
    %c3_251 = arith.constant 3 : index
    %c0_252 = arith.constant 0 : index
    %c0_253 = arith.constant 0 : index
    %420 = vector.load %arg29[%c3_251, %c0_252, %c0_253] : memref<9x16x36xbf16, #tpu.memory_space<vmem>>, vector<1x16x36xbf16>
    %421 = vector.shape_cast %420 : vector<1x16x36xbf16> to vector<16x36xbf16>
    %cst_254 = arith.constant dense<0.000000e+00> : vector<32x36xf32>
    %422 = tpu.matmul %419, %421, %cst_254 {dimension_numbers = #tpu.dot_dimension_numbers<[1], [0], [0], [1], [0, 0, 1, 1], [], []>} : vector<32x16xbf16>, vector<16x36xbf16>, vector<32x36xf32> -> vector<32x36xf32>
    %423 = arith.addf %417, %422 : vector<32x36xf32>
    %424 = vector.extract_strided_slice %400 {offsets = [128, 0], sizes = [32, 16], strides = [1, 1]} : vector<288x16xf32> to vector<32x16xf32>
    %425 = arith.truncf %424 : vector<32x16xf32> to vector<32x16xbf16>
    %c4_255 = arith.constant 4 : index
    %c0_256 = arith.constant 0 : index
    %c0_257 = arith.constant 0 : index
    %426 = vector.load %arg29[%c4_255, %c0_256, %c0_257] : memref<9x16x36xbf16, #tpu.memory_space<vmem>>, vector<1x16x36xbf16>
    %427 = vector.shape_cast %426 : vector<1x16x36xbf16> to vector<16x36xbf16>
    %cst_258 = arith.constant dense<0.000000e+00> : vector<32x36xf32>
    %428 = tpu.matmul %425, %427, %cst_258 {dimension_numbers = #tpu.dot_dimension_numbers<[1], [0], [0], [1], [0, 0, 1, 1], [], []>} : vector<32x16xbf16>, vector<16x36xbf16>, vector<32x36xf32> -> vector<32x36xf32>
    %429 = arith.addf %423, %428 : vector<32x36xf32>
    %430 = vector.extract_strided_slice %400 {offsets = [160, 0], sizes = [32, 16], strides = [1, 1]} : vector<288x16xf32> to vector<32x16xf32>
    %431 = arith.truncf %430 : vector<32x16xf32> to vector<32x16xbf16>
    %c5_259 = arith.constant 5 : index
    %c0_260 = arith.constant 0 : index
    %c0_261 = arith.constant 0 : index
    %432 = vector.load %arg29[%c5_259, %c0_260, %c0_261] : memref<9x16x36xbf16, #tpu.memory_space<vmem>>, vector<1x16x36xbf16>
    %433 = vector.shape_cast %432 : vector<1x16x36xbf16> to vector<16x36xbf16>
    %cst_262 = arith.constant dense<0.000000e+00> : vector<32x36xf32>
    %434 = tpu.matmul %431, %433, %cst_262 {dimension_numbers = #tpu.dot_dimension_numbers<[1], [0], [0], [1], [0, 0, 1, 1], [], []>} : vector<32x16xbf16>, vector<16x36xbf16>, vector<32x36xf32> -> vector<32x36xf32>
    %435 = arith.addf %429, %434 : vector<32x36xf32>
    %436 = vector.extract_strided_slice %400 {offsets = [192, 0], sizes = [32, 16], strides = [1, 1]} : vector<288x16xf32> to vector<32x16xf32>
    %437 = arith.truncf %436 : vector<32x16xf32> to vector<32x16xbf16>
    %c6_263 = arith.constant 6 : index
    %c0_264 = arith.constant 0 : index
    %c0_265 = arith.constant 0 : index
    %438 = vector.load %arg29[%c6_263, %c0_264, %c0_265] : memref<9x16x36xbf16, #tpu.memory_space<vmem>>, vector<1x16x36xbf16>
    %439 = vector.shape_cast %438 : vector<1x16x36xbf16> to vector<16x36xbf16>
    %cst_266 = arith.constant dense<0.000000e+00> : vector<32x36xf32>
    %440 = tpu.matmul %437, %439, %cst_266 {dimension_numbers = #tpu.dot_dimension_numbers<[1], [0], [0], [1], [0, 0, 1, 1], [], []>} : vector<32x16xbf16>, vector<16x36xbf16>, vector<32x36xf32> -> vector<32x36xf32>
    %441 = arith.addf %435, %440 : vector<32x36xf32>
    %442 = vector.extract_strided_slice %400 {offsets = [224, 0], sizes = [32, 16], strides = [1, 1]} : vector<288x16xf32> to vector<32x16xf32>
    %443 = arith.truncf %442 : vector<32x16xf32> to vector<32x16xbf16>
    %c7_267 = arith.constant 7 : index
    %c0_268 = arith.constant 0 : index
    %c0_269 = arith.constant 0 : index
    %444 = vector.load %arg29[%c7_267, %c0_268, %c0_269] : memref<9x16x36xbf16, #tpu.memory_space<vmem>>, vector<1x16x36xbf16>
    %445 = vector.shape_cast %444 : vector<1x16x36xbf16> to vector<16x36xbf16>
    %cst_270 = arith.constant dense<0.000000e+00> : vector<32x36xf32>
    %446 = tpu.matmul %443, %445, %cst_270 {dimension_numbers = #tpu.dot_dimension_numbers<[1], [0], [0], [1], [0, 0, 1, 1], [], []>} : vector<32x16xbf16>, vector<16x36xbf16>, vector<32x36xf32> -> vector<32x36xf32>
    %447 = arith.addf %441, %446 : vector<32x36xf32>
    %448 = vector.extract_strided_slice %400 {offsets = [256, 0], sizes = [32, 16], strides = [1, 1]} : vector<288x16xf32> to vector<32x16xf32>
    %449 = arith.truncf %448 : vector<32x16xf32> to vector<32x16xbf16>
    %c8_271 = arith.constant 8 : index
    %c0_272 = arith.constant 0 : index
    %c0_273 = arith.constant 0 : index
    %450 = vector.load %arg29[%c8_271, %c0_272, %c0_273] : memref<9x16x36xbf16, #tpu.memory_space<vmem>>, vector<1x16x36xbf16>
    %451 = vector.shape_cast %450 : vector<1x16x36xbf16> to vector<16x36xbf16>
    %cst_274 = arith.constant dense<0.000000e+00> : vector<32x36xf32>
    %452 = tpu.matmul %449, %451, %cst_274 {dimension_numbers = #tpu.dot_dimension_numbers<[1], [0], [0], [1], [0, 0, 1, 1], [], []>} : vector<32x16xbf16>, vector<16x36xbf16>, vector<32x36xf32> -> vector<32x36xf32>
    %453 = arith.addf %447, %452 : vector<32x36xf32>
    %cst_275 = arith.constant dense<0.000000e+00> : vector<32xf32>
    %454 = vector.multi_reduction <add>, %453, %cst_275 [1] : vector<32x36xf32> to vector<32xf32>
    %455 = vector.shape_cast %454 : vector<32xf32> to vector<32x1xf32>
    %456 = arith.mulf %453, %453 : vector<32x36xf32>
    %cst_276 = arith.constant dense<0.000000e+00> : vector<32xf32>
    %457 = vector.multi_reduction <add>, %456, %cst_276 [1] : vector<32x36xf32> to vector<32xf32>
    %458 = vector.shape_cast %457 : vector<32xf32> to vector<32x1xf32>
    %c0_277 = arith.constant 0 : index
    %c0_278 = arith.constant 0 : index
    %459 = vector.load %arg31[%c0_277, %c0_278] : memref<32x32xf32, #tpu.memory_space<vmem>>, vector<32x32xf32>
    %cst_279 = arith.constant dense<0.000000e+00> : vector<32x1xf32>
    %460 = tpu.matmul %459, %455, %cst_279 {dimension_numbers = #tpu.dot_dimension_numbers<[1], [0], [0], [1], [0, 0, 1, 1], [], []>} : vector<32x32xf32>, vector<32x1xf32>, vector<32x1xf32> -> vector<32x1xf32>
    %c0_280 = arith.constant 0 : index
    %c0_281 = arith.constant 0 : index
    %461 = vector.load %arg31[%c0_280, %c0_281] : memref<32x32xf32, #tpu.memory_space<vmem>>, vector<32x32xf32>
    %cst_282 = arith.constant dense<0.000000e+00> : vector<32x1xf32>
    %462 = tpu.matmul %461, %458, %cst_282 {dimension_numbers = #tpu.dot_dimension_numbers<[1], [0], [0], [1], [0, 0, 1, 1], [], []>} : vector<32x32xf32>, vector<32x1xf32>, vector<32x1xf32> -> vector<32x1xf32>
    %463 = arith.mulf %460, %460 : vector<32x1xf32>
    %464 = arith.subf %462, %463 : vector<32x1xf32>
    %465 = vector.broadcast %460 : vector<32x1xf32> to vector<32x36xf32>
    %466 = arith.subf %453, %465 : vector<32x36xf32>
    %cst_283 = arith.constant 9.99999974E-6 : f32
    %467 = vector.broadcast %cst_283 : f32 to vector<32x1xf32>
    %468 = arith.addf %464, %467 : vector<32x1xf32>
    %469 = math.rsqrt %468 : vector<32x1xf32>
    %470 = vector.broadcast %469 : vector<32x1xf32> to vector<32x36xf32>
    %471 = arith.mulf %466, %470 : vector<32x36xf32>
    %c0_284 = arith.constant 0 : index
    %c0_285 = arith.constant 0 : index
    %472 = vector.load %arg32[%c0_284, %c0_285] : memref<32x1xf32, #tpu.memory_space<vmem>>, vector<32x1xf32>
    %473 = vector.broadcast %472 : vector<32x1xf32> to vector<32x36xf32>
    %474 = arith.mulf %471, %473 : vector<32x36xf32>
    %c0_286 = arith.constant 0 : index
    %c0_287 = arith.constant 0 : index
    %475 = vector.load %arg33[%c0_286, %c0_287] : memref<32x1xf32, #tpu.memory_space<vmem>>, vector<32x1xf32>
    %476 = vector.broadcast %475 : vector<32x1xf32> to vector<32x36xf32>
    %477 = arith.addf %474, %476 : vector<32x36xf32>
    %cst_288 = arith.constant 5.000000e-01 : f32
    %478 = vector.broadcast %cst_288 : f32 to vector<32x36xf32>
    %479 = arith.mulf %478, %477 : vector<32x36xf32>
    %cst_289 = arith.constant 4.471500e-02 : f32
    %480 = vector.broadcast %cst_289 : f32 to vector<32x36xf32>
    %481 = arith.mulf %480, %477 : vector<32x36xf32>
    %482 = arith.mulf %481, %477 : vector<32x36xf32>
    %483 = arith.mulf %482, %477 : vector<32x36xf32>
    %484 = arith.addf %477, %483 : vector<32x36xf32>
    %cst_290 = arith.constant 0.797884583 : f32
    %485 = vector.broadcast %cst_290 : f32 to vector<32x36xf32>
    %486 = arith.mulf %485, %484 : vector<32x36xf32>
    %487 = math.tanh %486 : vector<32x36xf32>
    %cst_291 = arith.constant 1.000000e+00 : f32
    %488 = vector.broadcast %cst_291 : f32 to vector<32x36xf32>
    %489 = arith.addf %488, %487 : vector<32x36xf32>
    %490 = arith.mulf %479, %489 : vector<32x36xf32>
    %c0_292 = arith.constant 0 : index
    %c0_293 = arith.constant 0 : index
    %491 = vector.load %arg35[%c0_292, %c0_293] : memref<256x32xf32, #tpu.memory_space<vmem>>, vector<256x32xf32>
    %cst_294 = arith.constant dense<0.000000e+00> : vector<256x36xf32>
    %492 = tpu.matmul %491, %490, %cst_294 {dimension_numbers = #tpu.dot_dimension_numbers<[1], [0], [0], [1], [0, 0, 1, 1], [], []>} : vector<256x32xf32>, vector<32x36xf32>, vector<256x36xf32> -> vector<256x36xf32>
    %493 = vector.extract_strided_slice %492 {offsets = [0, 0], sizes = [16, 36], strides = [1, 1]} : vector<256x36xf32> to vector<16x36xf32>
    %494 = arith.truncf %493 : vector<16x36xf32> to vector<16x36xbf16>
    %c0_295 = arith.constant 0 : index
    %c0_296 = arith.constant 0 : index
    %c0_297 = arith.constant 0 : index
    %495 = vector.load %arg34[%c0_295, %c0_296, %c0_297] : memref<16x36x196xbf16, #tpu.memory_space<vmem>>, vector<1x36x196xbf16>
    %496 = vector.shape_cast %495 : vector<1x36x196xbf16> to vector<36x196xbf16>
    %cst_298 = arith.constant dense<0.000000e+00> : vector<16x196xf32>
    %497 = tpu.matmul %494, %496, %cst_298 {dimension_numbers = #tpu.dot_dimension_numbers<[1], [0], [0], [1], [0, 0, 1, 1], [], []>} : vector<16x36xbf16>, vector<36x196xbf16>, vector<16x196xf32> -> vector<16x196xf32>
    %498 = vector.extract_strided_slice %492 {offsets = [16, 0], sizes = [16, 36], strides = [1, 1]} : vector<256x36xf32> to vector<16x36xf32>
    %499 = arith.truncf %498 : vector<16x36xf32> to vector<16x36xbf16>
    %c1_299 = arith.constant 1 : index
    %c0_300 = arith.constant 0 : index
    %c0_301 = arith.constant 0 : index
    %500 = vector.load %arg34[%c1_299, %c0_300, %c0_301] : memref<16x36x196xbf16, #tpu.memory_space<vmem>>, vector<1x36x196xbf16>
    %501 = vector.shape_cast %500 : vector<1x36x196xbf16> to vector<36x196xbf16>
    %cst_302 = arith.constant dense<0.000000e+00> : vector<16x196xf32>
    %502 = tpu.matmul %499, %501, %cst_302 {dimension_numbers = #tpu.dot_dimension_numbers<[1], [0], [0], [1], [0, 0, 1, 1], [], []>} : vector<16x36xbf16>, vector<36x196xbf16>, vector<16x196xf32> -> vector<16x196xf32>
    %503 = arith.addf %497, %502 : vector<16x196xf32>
    %504 = vector.extract_strided_slice %492 {offsets = [32, 0], sizes = [16, 36], strides = [1, 1]} : vector<256x36xf32> to vector<16x36xf32>
    %505 = arith.truncf %504 : vector<16x36xf32> to vector<16x36xbf16>
    %c2_303 = arith.constant 2 : index
    %c0_304 = arith.constant 0 : index
    %c0_305 = arith.constant 0 : index
    %506 = vector.load %arg34[%c2_303, %c0_304, %c0_305] : memref<16x36x196xbf16, #tpu.memory_space<vmem>>, vector<1x36x196xbf16>
    %507 = vector.shape_cast %506 : vector<1x36x196xbf16> to vector<36x196xbf16>
    %cst_306 = arith.constant dense<0.000000e+00> : vector<16x196xf32>
    %508 = tpu.matmul %505, %507, %cst_306 {dimension_numbers = #tpu.dot_dimension_numbers<[1], [0], [0], [1], [0, 0, 1, 1], [], []>} : vector<16x36xbf16>, vector<36x196xbf16>, vector<16x196xf32> -> vector<16x196xf32>
    %509 = arith.addf %503, %508 : vector<16x196xf32>
    %510 = vector.extract_strided_slice %492 {offsets = [48, 0], sizes = [16, 36], strides = [1, 1]} : vector<256x36xf32> to vector<16x36xf32>
    %511 = arith.truncf %510 : vector<16x36xf32> to vector<16x36xbf16>
    %c3_307 = arith.constant 3 : index
    %c0_308 = arith.constant 0 : index
    %c0_309 = arith.constant 0 : index
    %512 = vector.load %arg34[%c3_307, %c0_308, %c0_309] : memref<16x36x196xbf16, #tpu.memory_space<vmem>>, vector<1x36x196xbf16>
    %513 = vector.shape_cast %512 : vector<1x36x196xbf16> to vector<36x196xbf16>
    %cst_310 = arith.constant dense<0.000000e+00> : vector<16x196xf32>
    %514 = tpu.matmul %511, %513, %cst_310 {dimension_numbers = #tpu.dot_dimension_numbers<[1], [0], [0], [1], [0, 0, 1, 1], [], []>} : vector<16x36xbf16>, vector<36x196xbf16>, vector<16x196xf32> -> vector<16x196xf32>
    %515 = arith.addf %509, %514 : vector<16x196xf32>
    %516 = vector.extract_strided_slice %492 {offsets = [64, 0], sizes = [16, 36], strides = [1, 1]} : vector<256x36xf32> to vector<16x36xf32>
    %517 = arith.truncf %516 : vector<16x36xf32> to vector<16x36xbf16>
    %c4_311 = arith.constant 4 : index
    %c0_312 = arith.constant 0 : index
    %c0_313 = arith.constant 0 : index
    %518 = vector.load %arg34[%c4_311, %c0_312, %c0_313] : memref<16x36x196xbf16, #tpu.memory_space<vmem>>, vector<1x36x196xbf16>
    %519 = vector.shape_cast %518 : vector<1x36x196xbf16> to vector<36x196xbf16>
    %cst_314 = arith.constant dense<0.000000e+00> : vector<16x196xf32>
    %520 = tpu.matmul %517, %519, %cst_314 {dimension_numbers = #tpu.dot_dimension_numbers<[1], [0], [0], [1], [0, 0, 1, 1], [], []>} : vector<16x36xbf16>, vector<36x196xbf16>, vector<16x196xf32> -> vector<16x196xf32>
    %521 = arith.addf %515, %520 : vector<16x196xf32>
    %522 = vector.extract_strided_slice %492 {offsets = [80, 0], sizes = [16, 36], strides = [1, 1]} : vector<256x36xf32> to vector<16x36xf32>
    %523 = arith.truncf %522 : vector<16x36xf32> to vector<16x36xbf16>
    %c5_315 = arith.constant 5 : index
    %c0_316 = arith.constant 0 : index
    %c0_317 = arith.constant 0 : index
    %524 = vector.load %arg34[%c5_315, %c0_316, %c0_317] : memref<16x36x196xbf16, #tpu.memory_space<vmem>>, vector<1x36x196xbf16>
    %525 = vector.shape_cast %524 : vector<1x36x196xbf16> to vector<36x196xbf16>
    %cst_318 = arith.constant dense<0.000000e+00> : vector<16x196xf32>
    %526 = tpu.matmul %523, %525, %cst_318 {dimension_numbers = #tpu.dot_dimension_numbers<[1], [0], [0], [1], [0, 0, 1, 1], [], []>} : vector<16x36xbf16>, vector<36x196xbf16>, vector<16x196xf32> -> vector<16x196xf32>
    %527 = arith.addf %521, %526 : vector<16x196xf32>
    %528 = vector.extract_strided_slice %492 {offsets = [96, 0], sizes = [16, 36], strides = [1, 1]} : vector<256x36xf32> to vector<16x36xf32>
    %529 = arith.truncf %528 : vector<16x36xf32> to vector<16x36xbf16>
    %c6_319 = arith.constant 6 : index
    %c0_320 = arith.constant 0 : index
    %c0_321 = arith.constant 0 : index
    %530 = vector.load %arg34[%c6_319, %c0_320, %c0_321] : memref<16x36x196xbf16, #tpu.memory_space<vmem>>, vector<1x36x196xbf16>
    %531 = vector.shape_cast %530 : vector<1x36x196xbf16> to vector<36x196xbf16>
    %cst_322 = arith.constant dense<0.000000e+00> : vector<16x196xf32>
    %532 = tpu.matmul %529, %531, %cst_322 {dimension_numbers = #tpu.dot_dimension_numbers<[1], [0], [0], [1], [0, 0, 1, 1], [], []>} : vector<16x36xbf16>, vector<36x196xbf16>, vector<16x196xf32> -> vector<16x196xf32>
    %533 = arith.addf %527, %532 : vector<16x196xf32>
    %534 = vector.extract_strided_slice %492 {offsets = [112, 0], sizes = [16, 36], strides = [1, 1]} : vector<256x36xf32> to vector<16x36xf32>
    %535 = arith.truncf %534 : vector<16x36xf32> to vector<16x36xbf16>
    %c7_323 = arith.constant 7 : index
    %c0_324 = arith.constant 0 : index
    %c0_325 = arith.constant 0 : index
    %536 = vector.load %arg34[%c7_323, %c0_324, %c0_325] : memref<16x36x196xbf16, #tpu.memory_space<vmem>>, vector<1x36x196xbf16>
    %537 = vector.shape_cast %536 : vector<1x36x196xbf16> to vector<36x196xbf16>
    %cst_326 = arith.constant dense<0.000000e+00> : vector<16x196xf32>
    %538 = tpu.matmul %535, %537, %cst_326 {dimension_numbers = #tpu.dot_dimension_numbers<[1], [0], [0], [1], [0, 0, 1, 1], [], []>} : vector<16x36xbf16>, vector<36x196xbf16>, vector<16x196xf32> -> vector<16x196xf32>
    %539 = arith.addf %533, %538 : vector<16x196xf32>
    %540 = vector.extract_strided_slice %492 {offsets = [128, 0], sizes = [16, 36], strides = [1, 1]} : vector<256x36xf32> to vector<16x36xf32>
    %541 = arith.truncf %540 : vector<16x36xf32> to vector<16x36xbf16>
    %c8_327 = arith.constant 8 : index
    %c0_328 = arith.constant 0 : index
    %c0_329 = arith.constant 0 : index
    %542 = vector.load %arg34[%c8_327, %c0_328, %c0_329] : memref<16x36x196xbf16, #tpu.memory_space<vmem>>, vector<1x36x196xbf16>
    %543 = vector.shape_cast %542 : vector<1x36x196xbf16> to vector<36x196xbf16>
    %cst_330 = arith.constant dense<0.000000e+00> : vector<16x196xf32>
    %544 = tpu.matmul %541, %543, %cst_330 {dimension_numbers = #tpu.dot_dimension_numbers<[1], [0], [0], [1], [0, 0, 1, 1], [], []>} : vector<16x36xbf16>, vector<36x196xbf16>, vector<16x196xf32> -> vector<16x196xf32>
    %545 = arith.addf %539, %544 : vector<16x196xf32>
    %546 = vector.extract_strided_slice %492 {offsets = [144, 0], sizes = [16, 36], strides = [1, 1]} : vector<256x36xf32> to vector<16x36xf32>
    %547 = arith.truncf %546 : vector<16x36xf32> to vector<16x36xbf16>
    %c9_331 = arith.constant 9 : index
    %c0_332 = arith.constant 0 : index
    %c0_333 = arith.constant 0 : index
    %548 = vector.load %arg34[%c9_331, %c0_332, %c0_333] : memref<16x36x196xbf16, #tpu.memory_space<vmem>>, vector<1x36x196xbf16>
    %549 = vector.shape_cast %548 : vector<1x36x196xbf16> to vector<36x196xbf16>
    %cst_334 = arith.constant dense<0.000000e+00> : vector<16x196xf32>
    %550 = tpu.matmul %547, %549, %cst_334 {dimension_numbers = #tpu.dot_dimension_numbers<[1], [0], [0], [1], [0, 0, 1, 1], [], []>} : vector<16x36xbf16>, vector<36x196xbf16>, vector<16x196xf32> -> vector<16x196xf32>
    %551 = arith.addf %545, %550 : vector<16x196xf32>
    %552 = vector.extract_strided_slice %492 {offsets = [160, 0], sizes = [16, 36], strides = [1, 1]} : vector<256x36xf32> to vector<16x36xf32>
    %553 = arith.truncf %552 : vector<16x36xf32> to vector<16x36xbf16>
    %c10_335 = arith.constant 10 : index
    %c0_336 = arith.constant 0 : index
    %c0_337 = arith.constant 0 : index
    %554 = vector.load %arg34[%c10_335, %c0_336, %c0_337] : memref<16x36x196xbf16, #tpu.memory_space<vmem>>, vector<1x36x196xbf16>
    %555 = vector.shape_cast %554 : vector<1x36x196xbf16> to vector<36x196xbf16>
    %cst_338 = arith.constant dense<0.000000e+00> : vector<16x196xf32>
    %556 = tpu.matmul %553, %555, %cst_338 {dimension_numbers = #tpu.dot_dimension_numbers<[1], [0], [0], [1], [0, 0, 1, 1], [], []>} : vector<16x36xbf16>, vector<36x196xbf16>, vector<16x196xf32> -> vector<16x196xf32>
    %557 = arith.addf %551, %556 : vector<16x196xf32>
    %558 = vector.extract_strided_slice %492 {offsets = [176, 0], sizes = [16, 36], strides = [1, 1]} : vector<256x36xf32> to vector<16x36xf32>
    %559 = arith.truncf %558 : vector<16x36xf32> to vector<16x36xbf16>
    %c11_339 = arith.constant 11 : index
    %c0_340 = arith.constant 0 : index
    %c0_341 = arith.constant 0 : index
    %560 = vector.load %arg34[%c11_339, %c0_340, %c0_341] : memref<16x36x196xbf16, #tpu.memory_space<vmem>>, vector<1x36x196xbf16>
    %561 = vector.shape_cast %560 : vector<1x36x196xbf16> to vector<36x196xbf16>
    %cst_342 = arith.constant dense<0.000000e+00> : vector<16x196xf32>
    %562 = tpu.matmul %559, %561, %cst_342 {dimension_numbers = #tpu.dot_dimension_numbers<[1], [0], [0], [1], [0, 0, 1, 1], [], []>} : vector<16x36xbf16>, vector<36x196xbf16>, vector<16x196xf32> -> vector<16x196xf32>
    %563 = arith.addf %557, %562 : vector<16x196xf32>
    %564 = vector.extract_strided_slice %492 {offsets = [192, 0], sizes = [16, 36], strides = [1, 1]} : vector<256x36xf32> to vector<16x36xf32>
    %565 = arith.truncf %564 : vector<16x36xf32> to vector<16x36xbf16>
    %c12_343 = arith.constant 12 : index
    %c0_344 = arith.constant 0 : index
    %c0_345 = arith.constant 0 : index
    %566 = vector.load %arg34[%c12_343, %c0_344, %c0_345] : memref<16x36x196xbf16, #tpu.memory_space<vmem>>, vector<1x36x196xbf16>
    %567 = vector.shape_cast %566 : vector<1x36x196xbf16> to vector<36x196xbf16>
    %cst_346 = arith.constant dense<0.000000e+00> : vector<16x196xf32>
    %568 = tpu.matmul %565, %567, %cst_346 {dimension_numbers = #tpu.dot_dimension_numbers<[1], [0], [0], [1], [0, 0, 1, 1], [], []>} : vector<16x36xbf16>, vector<36x196xbf16>, vector<16x196xf32> -> vector<16x196xf32>
    %569 = arith.addf %563, %568 : vector<16x196xf32>
    %570 = vector.extract_strided_slice %492 {offsets = [208, 0], sizes = [16, 36], strides = [1, 1]} : vector<256x36xf32> to vector<16x36xf32>
    %571 = arith.truncf %570 : vector<16x36xf32> to vector<16x36xbf16>
    %c13_347 = arith.constant 13 : index
    %c0_348 = arith.constant 0 : index
    %c0_349 = arith.constant 0 : index
    %572 = vector.load %arg34[%c13_347, %c0_348, %c0_349] : memref<16x36x196xbf16, #tpu.memory_space<vmem>>, vector<1x36x196xbf16>
    %573 = vector.shape_cast %572 : vector<1x36x196xbf16> to vector<36x196xbf16>
    %cst_350 = arith.constant dense<0.000000e+00> : vector<16x196xf32>
    %574 = tpu.matmul %571, %573, %cst_350 {dimension_numbers = #tpu.dot_dimension_numbers<[1], [0], [0], [1], [0, 0, 1, 1], [], []>} : vector<16x36xbf16>, vector<36x196xbf16>, vector<16x196xf32> -> vector<16x196xf32>
    %575 = arith.addf %569, %574 : vector<16x196xf32>
    %576 = vector.extract_strided_slice %492 {offsets = [224, 0], sizes = [16, 36], strides = [1, 1]} : vector<256x36xf32> to vector<16x36xf32>
    %577 = arith.truncf %576 : vector<16x36xf32> to vector<16x36xbf16>
    %c14_351 = arith.constant 14 : index
    %c0_352 = arith.constant 0 : index
    %c0_353 = arith.constant 0 : index
    %578 = vector.load %arg34[%c14_351, %c0_352, %c0_353] : memref<16x36x196xbf16, #tpu.memory_space<vmem>>, vector<1x36x196xbf16>
    %579 = vector.shape_cast %578 : vector<1x36x196xbf16> to vector<36x196xbf16>
    %cst_354 = arith.constant dense<0.000000e+00> : vector<16x196xf32>
    %580 = tpu.matmul %577, %579, %cst_354 {dimension_numbers = #tpu.dot_dimension_numbers<[1], [0], [0], [1], [0, 0, 1, 1], [], []>} : vector<16x36xbf16>, vector<36x196xbf16>, vector<16x196xf32> -> vector<16x196xf32>
    %581 = arith.addf %575, %580 : vector<16x196xf32>
    %582 = vector.extract_strided_slice %492 {offsets = [240, 0], sizes = [16, 36], strides = [1, 1]} : vector<256x36xf32> to vector<16x36xf32>
    %583 = arith.truncf %582 : vector<16x36xf32> to vector<16x36xbf16>
    %c15_355 = arith.constant 15 : index
    %c0_356 = arith.constant 0 : index
    %c0_357 = arith.constant 0 : index
    %584 = vector.load %arg34[%c15_355, %c0_356, %c0_357] : memref<16x36x196xbf16, #tpu.memory_space<vmem>>, vector<1x36x196xbf16>
    %585 = vector.shape_cast %584 : vector<1x36x196xbf16> to vector<36x196xbf16>
    %cst_358 = arith.constant dense<0.000000e+00> : vector<16x196xf32>
    %586 = tpu.matmul %583, %585, %cst_358 {dimension_numbers = #tpu.dot_dimension_numbers<[1], [0], [0], [1], [0, 0, 1, 1], [], []>} : vector<16x36xbf16>, vector<36x196xbf16>, vector<16x196xf32> -> vector<16x196xf32>
    %587 = arith.addf %581, %586 : vector<16x196xf32>
    %cst_359 = arith.constant dense<0.000000e+00> : vector<16xf32>
    %588 = vector.multi_reduction <add>, %587, %cst_359 [1] : vector<16x196xf32> to vector<16xf32>
    %589 = vector.shape_cast %588 : vector<16xf32> to vector<16x1xf32>
    %590 = arith.mulf %587, %587 : vector<16x196xf32>
    %cst_360 = arith.constant dense<0.000000e+00> : vector<16xf32>
    %591 = vector.multi_reduction <add>, %590, %cst_360 [1] : vector<16x196xf32> to vector<16xf32>
    %592 = vector.shape_cast %591 : vector<16xf32> to vector<16x1xf32>
    %c0_361 = arith.constant 0 : index
    %c0_362 = arith.constant 0 : index
    %593 = vector.load %arg36[%c0_361, %c0_362] : memref<16x16xf32, #tpu.memory_space<vmem>>, vector<16x16xf32>
    %cst_363 = arith.constant dense<0.000000e+00> : vector<16x1xf32>
    %594 = tpu.matmul %593, %589, %cst_363 {dimension_numbers = #tpu.dot_dimension_numbers<[1], [0], [0], [1], [0, 0, 1, 1], [], []>} : vector<16x16xf32>, vector<16x1xf32>, vector<16x1xf32> -> vector<16x1xf32>
    %c0_364 = arith.constant 0 : index
    %c0_365 = arith.constant 0 : index
    %595 = vector.load %arg36[%c0_364, %c0_365] : memref<16x16xf32, #tpu.memory_space<vmem>>, vector<16x16xf32>
    %cst_366 = arith.constant dense<0.000000e+00> : vector<16x1xf32>
    %596 = tpu.matmul %595, %592, %cst_366 {dimension_numbers = #tpu.dot_dimension_numbers<[1], [0], [0], [1], [0, 0, 1, 1], [], []>} : vector<16x16xf32>, vector<16x1xf32>, vector<16x1xf32> -> vector<16x1xf32>
    %597 = arith.mulf %594, %594 : vector<16x1xf32>
    %598 = arith.subf %596, %597 : vector<16x1xf32>
    %599 = vector.broadcast %594 : vector<16x1xf32> to vector<16x196xf32>
    %600 = arith.subf %587, %599 : vector<16x196xf32>
    %cst_367 = arith.constant 9.99999974E-6 : f32
    %601 = vector.broadcast %cst_367 : f32 to vector<16x1xf32>
    %602 = arith.addf %598, %601 : vector<16x1xf32>
    %603 = math.rsqrt %602 : vector<16x1xf32>
    %604 = vector.broadcast %603 : vector<16x1xf32> to vector<16x196xf32>
    %605 = arith.mulf %600, %604 : vector<16x196xf32>
    %c0_368 = arith.constant 0 : index
    %c0_369 = arith.constant 0 : index
    %606 = vector.load %arg37[%c0_368, %c0_369] : memref<16x1xf32, #tpu.memory_space<vmem>>, vector<16x1xf32>
    %607 = vector.broadcast %606 : vector<16x1xf32> to vector<16x196xf32>
    %608 = arith.mulf %605, %607 : vector<16x196xf32>
    %c0_370 = arith.constant 0 : index
    %c0_371 = arith.constant 0 : index
    %609 = vector.load %arg38[%c0_370, %c0_371] : memref<16x1xf32, #tpu.memory_space<vmem>>, vector<16x1xf32>
    %610 = vector.broadcast %609 : vector<16x1xf32> to vector<16x196xf32>
    %611 = arith.addf %608, %610 : vector<16x196xf32>
    %cst_372 = arith.constant 5.000000e-01 : f32
    %612 = vector.broadcast %cst_372 : f32 to vector<16x196xf32>
    %613 = arith.mulf %612, %611 : vector<16x196xf32>
    %cst_373 = arith.constant 4.471500e-02 : f32
    %614 = vector.broadcast %cst_373 : f32 to vector<16x196xf32>
    %615 = arith.mulf %614, %611 : vector<16x196xf32>
    %616 = arith.mulf %615, %611 : vector<16x196xf32>
    %617 = arith.mulf %616, %611 : vector<16x196xf32>
    %618 = arith.addf %611, %617 : vector<16x196xf32>
    %cst_374 = arith.constant 0.797884583 : f32
    %619 = vector.broadcast %cst_374 : f32 to vector<16x196xf32>
    %620 = arith.mulf %619, %618 : vector<16x196xf32>
    %621 = math.tanh %620 : vector<16x196xf32>
    %cst_375 = arith.constant 1.000000e+00 : f32
    %622 = vector.broadcast %cst_375 : f32 to vector<16x196xf32>
    %623 = arith.addf %622, %621 : vector<16x196xf32>
    %624 = arith.mulf %613, %623 : vector<16x196xf32>
    %c0_376 = arith.constant 0 : index
    %c0_377 = arith.constant 0 : index
    %625 = vector.load %arg40[%c0_376, %c0_377] : memref<72x16xf32, #tpu.memory_space<vmem>>, vector<72x16xf32>
    %cst_378 = arith.constant dense<0.000000e+00> : vector<72x196xf32>
    %626 = tpu.matmul %625, %624, %cst_378 {dimension_numbers = #tpu.dot_dimension_numbers<[1], [0], [0], [1], [0, 0, 1, 1], [], []>} : vector<72x16xf32>, vector<16x196xf32>, vector<72x196xf32> -> vector<72x196xf32>
    %627 = vector.extract_strided_slice %626 {offsets = [0, 0], sizes = [8, 196], strides = [1, 1]} : vector<72x196xf32> to vector<8x196xf32>
    %628 = arith.truncf %627 : vector<8x196xf32> to vector<8x196xbf16>
    %c0_379 = arith.constant 0 : index
    %c0_380 = arith.constant 0 : index
    %c0_381 = arith.constant 0 : index
    %629 = vector.load %arg39[%c0_379, %c0_380, %c0_381] : memref<9x196x256xbf16, #tpu.memory_space<vmem>>, vector<1x196x256xbf16>
    %630 = vector.shape_cast %629 : vector<1x196x256xbf16> to vector<196x256xbf16>
    %cst_382 = arith.constant dense<0.000000e+00> : vector<8x256xf32>
    %631 = tpu.matmul %628, %630, %cst_382 {dimension_numbers = #tpu.dot_dimension_numbers<[1], [0], [0], [1], [0, 0, 1, 1], [], []>} : vector<8x196xbf16>, vector<196x256xbf16>, vector<8x256xf32> -> vector<8x256xf32>
    %632 = vector.extract_strided_slice %626 {offsets = [8, 0], sizes = [8, 196], strides = [1, 1]} : vector<72x196xf32> to vector<8x196xf32>
    %633 = arith.truncf %632 : vector<8x196xf32> to vector<8x196xbf16>
    %c1_383 = arith.constant 1 : index
    %c0_384 = arith.constant 0 : index
    %c0_385 = arith.constant 0 : index
    %634 = vector.load %arg39[%c1_383, %c0_384, %c0_385] : memref<9x196x256xbf16, #tpu.memory_space<vmem>>, vector<1x196x256xbf16>
    %635 = vector.shape_cast %634 : vector<1x196x256xbf16> to vector<196x256xbf16>
    %cst_386 = arith.constant dense<0.000000e+00> : vector<8x256xf32>
    %636 = tpu.matmul %633, %635, %cst_386 {dimension_numbers = #tpu.dot_dimension_numbers<[1], [0], [0], [1], [0, 0, 1, 1], [], []>} : vector<8x196xbf16>, vector<196x256xbf16>, vector<8x256xf32> -> vector<8x256xf32>
    %637 = arith.addf %631, %636 : vector<8x256xf32>
    %638 = vector.extract_strided_slice %626 {offsets = [16, 0], sizes = [8, 196], strides = [1, 1]} : vector<72x196xf32> to vector<8x196xf32>
    %639 = arith.truncf %638 : vector<8x196xf32> to vector<8x196xbf16>
    %c2_387 = arith.constant 2 : index
    %c0_388 = arith.constant 0 : index
    %c0_389 = arith.constant 0 : index
    %640 = vector.load %arg39[%c2_387, %c0_388, %c0_389] : memref<9x196x256xbf16, #tpu.memory_space<vmem>>, vector<1x196x256xbf16>
    %641 = vector.shape_cast %640 : vector<1x196x256xbf16> to vector<196x256xbf16>
    %cst_390 = arith.constant dense<0.000000e+00> : vector<8x256xf32>
    %642 = tpu.matmul %639, %641, %cst_390 {dimension_numbers = #tpu.dot_dimension_numbers<[1], [0], [0], [1], [0, 0, 1, 1], [], []>} : vector<8x196xbf16>, vector<196x256xbf16>, vector<8x256xf32> -> vector<8x256xf32>
    %643 = arith.addf %637, %642 : vector<8x256xf32>
    %644 = vector.extract_strided_slice %626 {offsets = [24, 0], sizes = [8, 196], strides = [1, 1]} : vector<72x196xf32> to vector<8x196xf32>
    %645 = arith.truncf %644 : vector<8x196xf32> to vector<8x196xbf16>
    %c3_391 = arith.constant 3 : index
    %c0_392 = arith.constant 0 : index
    %c0_393 = arith.constant 0 : index
    %646 = vector.load %arg39[%c3_391, %c0_392, %c0_393] : memref<9x196x256xbf16, #tpu.memory_space<vmem>>, vector<1x196x256xbf16>
    %647 = vector.shape_cast %646 : vector<1x196x256xbf16> to vector<196x256xbf16>
    %cst_394 = arith.constant dense<0.000000e+00> : vector<8x256xf32>
    %648 = tpu.matmul %645, %647, %cst_394 {dimension_numbers = #tpu.dot_dimension_numbers<[1], [0], [0], [1], [0, 0, 1, 1], [], []>} : vector<8x196xbf16>, vector<196x256xbf16>, vector<8x256xf32> -> vector<8x256xf32>
    %649 = arith.addf %643, %648 : vector<8x256xf32>
    %650 = vector.extract_strided_slice %626 {offsets = [32, 0], sizes = [8, 196], strides = [1, 1]} : vector<72x196xf32> to vector<8x196xf32>
    %651 = arith.truncf %650 : vector<8x196xf32> to vector<8x196xbf16>
    %c4_395 = arith.constant 4 : index
    %c0_396 = arith.constant 0 : index
    %c0_397 = arith.constant 0 : index
    %652 = vector.load %arg39[%c4_395, %c0_396, %c0_397] : memref<9x196x256xbf16, #tpu.memory_space<vmem>>, vector<1x196x256xbf16>
    %653 = vector.shape_cast %652 : vector<1x196x256xbf16> to vector<196x256xbf16>
    %cst_398 = arith.constant dense<0.000000e+00> : vector<8x256xf32>
    %654 = tpu.matmul %651, %653, %cst_398 {dimension_numbers = #tpu.dot_dimension_numbers<[1], [0], [0], [1], [0, 0, 1, 1], [], []>} : vector<8x196xbf16>, vector<196x256xbf16>, vector<8x256xf32> -> vector<8x256xf32>
    %655 = arith.addf %649, %654 : vector<8x256xf32>
    %656 = vector.extract_strided_slice %626 {offsets = [40, 0], sizes = [8, 196], strides = [1, 1]} : vector<72x196xf32> to vector<8x196xf32>
    %657 = arith.truncf %656 : vector<8x196xf32> to vector<8x196xbf16>
    %c5_399 = arith.constant 5 : index
    %c0_400 = arith.constant 0 : index
    %c0_401 = arith.constant 0 : index
    %658 = vector.load %arg39[%c5_399, %c0_400, %c0_401] : memref<9x196x256xbf16, #tpu.memory_space<vmem>>, vector<1x196x256xbf16>
    %659 = vector.shape_cast %658 : vector<1x196x256xbf16> to vector<196x256xbf16>
    %cst_402 = arith.constant dense<0.000000e+00> : vector<8x256xf32>
    %660 = tpu.matmul %657, %659, %cst_402 {dimension_numbers = #tpu.dot_dimension_numbers<[1], [0], [0], [1], [0, 0, 1, 1], [], []>} : vector<8x196xbf16>, vector<196x256xbf16>, vector<8x256xf32> -> vector<8x256xf32>
    %661 = arith.addf %655, %660 : vector<8x256xf32>
    %662 = vector.extract_strided_slice %626 {offsets = [48, 0], sizes = [8, 196], strides = [1, 1]} : vector<72x196xf32> to vector<8x196xf32>
    %663 = arith.truncf %662 : vector<8x196xf32> to vector<8x196xbf16>
    %c6_403 = arith.constant 6 : index
    %c0_404 = arith.constant 0 : index
    %c0_405 = arith.constant 0 : index
    %664 = vector.load %arg39[%c6_403, %c0_404, %c0_405] : memref<9x196x256xbf16, #tpu.memory_space<vmem>>, vector<1x196x256xbf16>
    %665 = vector.shape_cast %664 : vector<1x196x256xbf16> to vector<196x256xbf16>
    %cst_406 = arith.constant dense<0.000000e+00> : vector<8x256xf32>
    %666 = tpu.matmul %663, %665, %cst_406 {dimension_numbers = #tpu.dot_dimension_numbers<[1], [0], [0], [1], [0, 0, 1, 1], [], []>} : vector<8x196xbf16>, vector<196x256xbf16>, vector<8x256xf32> -> vector<8x256xf32>
    %667 = arith.addf %661, %666 : vector<8x256xf32>
    %668 = vector.extract_strided_slice %626 {offsets = [56, 0], sizes = [8, 196], strides = [1, 1]} : vector<72x196xf32> to vector<8x196xf32>
    %669 = arith.truncf %668 : vector<8x196xf32> to vector<8x196xbf16>
    %c7_407 = arith.constant 7 : index
    %c0_408 = arith.constant 0 : index
    %c0_409 = arith.constant 0 : index
    %670 = vector.load %arg39[%c7_407, %c0_408, %c0_409] : memref<9x196x256xbf16, #tpu.memory_space<vmem>>, vector<1x196x256xbf16>
    %671 = vector.shape_cast %670 : vector<1x196x256xbf16> to vector<196x256xbf16>
    %cst_410 = arith.constant dense<0.000000e+00> : vector<8x256xf32>
    %672 = tpu.matmul %669, %671, %cst_410 {dimension_numbers = #tpu.dot_dimension_numbers<[1], [0], [0], [1], [0, 0, 1, 1], [], []>} : vector<8x196xbf16>, vector<196x256xbf16>, vector<8x256xf32> -> vector<8x256xf32>
    %673 = arith.addf %667, %672 : vector<8x256xf32>
    %674 = vector.extract_strided_slice %626 {offsets = [64, 0], sizes = [8, 196], strides = [1, 1]} : vector<72x196xf32> to vector<8x196xf32>
    %675 = arith.truncf %674 : vector<8x196xf32> to vector<8x196xbf16>
    %c8_411 = arith.constant 8 : index
    %c0_412 = arith.constant 0 : index
    %c0_413 = arith.constant 0 : index
    %676 = vector.load %arg39[%c8_411, %c0_412, %c0_413] : memref<9x196x256xbf16, #tpu.memory_space<vmem>>, vector<1x196x256xbf16>
    %677 = vector.shape_cast %676 : vector<1x196x256xbf16> to vector<196x256xbf16>
    %cst_414 = arith.constant dense<0.000000e+00> : vector<8x256xf32>
    %678 = tpu.matmul %675, %677, %cst_414 {dimension_numbers = #tpu.dot_dimension_numbers<[1], [0], [0], [1], [0, 0, 1, 1], [], []>} : vector<8x196xbf16>, vector<196x256xbf16>, vector<8x256xf32> -> vector<8x256xf32>
    %679 = arith.addf %673, %678 : vector<8x256xf32>
    %c0_415 = arith.constant 0 : index
    %c0_416 = arith.constant 0 : index
    %680 = vector.load %arg41[%c0_415, %c0_416] : memref<8x1xf32, #tpu.memory_space<vmem>>, vector<8x1xf32>
    %681 = vector.broadcast %680 : vector<8x1xf32> to vector<8x256xf32>
    %682 = arith.addf %679, %681 : vector<8x256xf32>
    %cst_417 = arith.constant 5.000000e-01 : f32
    %683 = vector.broadcast %cst_417 : f32 to vector<8x256xf32>
    %684 = arith.mulf %683, %682 : vector<8x256xf32>
    %685 = math.tanh %684 : vector<8x256xf32>
    %cst_418 = arith.constant 1.000000e+00 : f32
    %686 = vector.broadcast %cst_418 : f32 to vector<8x256xf32>
    %687 = arith.addf %685, %686 : vector<8x256xf32>
    %cst_419 = arith.constant 5.000000e-01 : f32
    %688 = vector.broadcast %cst_419 : f32 to vector<8x256xf32>
    %689 = arith.mulf %688, %687 : vector<8x256xf32>
    %c0_420 = arith.constant 0 : index
    %c0_421 = arith.constant 0 : index
    %690 = vector.load %arg42[%c0_420, %c0_421] : memref<8x256xf32, #tpu.memory_space<vmem>>, vector<8x256xf32>
    tpu.vector_store %arg42[%c0_420, %c0_421], %689 {strides = array<i32>} : memref<8x256xf32, #tpu.memory_space<vmem>>, vector<8x256xf32>,
    return
  }
}

</mosaic_0001>

<bundles_post_ra>
// kernel: forward.1
= control target key start
LH: loop header
LB: loop body
LE: loop exit
PB: predicated region body
PF: predicated region fallthrough
CT: control target
= control target key end

     0   :  { %v21604_v0 = vmov 0.0   ;;  %s18543_s6 = smov 3   ;;  %s18544_s10 = smov 2   ;;  %vm198_vm0 = vcmask 64512   ;;  %vm2595_vm1 = vcmask 556032   ;;  %vm2618_vm2 = vcmask 130048   ;;  %s21603_s0 = inlined_call_operand.smem [shape: u32[44], index: -1, kind: input, shape index: {}] }
   0x1   :  { %s1_s5 = sld [smem:[%s21603_s0]]   ;;  %317 = vmatprep.mubr.f32.mxu0 %v21604_v0  ;;  %323 = vmatprep.mubr.f32.mxu1 %v21604_v0  ;;  %s18545_s14 = smov 4   ;;  %vm3724_vm3 = vcmask 1041408   ;;  %vm6248_vm4 = vcmask 293888   ;;  %vm6281_vm5 = vcmask 261120   ;;  %vm18556_vm6 = vmmov 0  }
   0x2   :  { %s18602_s9 = sld [smem:[%s21603_s0 + %s18543_s6]]   ;;  %s18547_s18 = smov 5   ;;  %vm8143_vm7 = vcmask 123904   ;;  %vm8226_vm8 = vcmask 15360  }
   0x3   :  { %s18607_s13 = sld [smem:[%s21603_s0 + %s18544_s10]]   ;;  %s18548_s22 = smov 6  }
   0x4   :  { %s13864_s17 = sld [smem:[%s21603_s0 + %s18545_s14]]   ;;  %s18549_s26 = smov 7  }
   0x5   :  { %s13865_s21 = sld [smem:[%s21603_s0 + %s18547_s18]]   ;;  %s18550_s30 = smov 8  }
   0x6   :  { %s13866_s25 = sld [smem:[%s21603_s0 + %s18548_s22]]   ;;  %s18551_s4 = smov 9  }
   0x7   :  { %v179_v1 = vld [vmem:[%s1_s5 + $0x8] sm:$0xff]  ;;  %v178_v2 = vld [vmem:[%s1_s5] sm:$0xff]  ;;  %s19127_s29 = sld [smem:[%s21603_s0 + %s18549_s26]]   ;;  %s18552_s8 = smov 10  }
   0x8   :  { %v180_v3 = vld [vmem:[%s18602_s9] sm:$0xff]  ;;  %253 = vmatprep.subr.mxu0 %v179_v1  ;;  %16991 = vmatprep.subr.mxu1 %v179_v1  ;;  %v181_v4 = vld [vmem:[%s18602_s9 + $0x8] sm:$0xff]  ;;  %v182_v7 = vld [vmem:[%s18602_s9 + $0x10] sm:$0xff]  ;;  %s19136_s3 = sld [smem:[%s21603_s0 + %s18550_s30]]   ;;  %s18553_s12 = smov 11  }
   0x9   :  { %254 = vmatpush1.msra.mxu0 %v178_v2  ;;  %16992 = vmatpush1.msra.mxu1 %v178_v2  ;;  %v17318_v5 = vld [vmem:[%s18607_s13 + $0x100] ss:$8 sps:$4 sm:$0xff]   ;;  %v17320_v6 = vld [vmem:[%s18607_s13 + $0x104] ss:$8 sps:$4 sm:$0xff]   ;;  %v17323_v8 = vld [vmem:[%s18607_s13 + $0x114] ss:$8 sps:$4 sm:$0xff]   ;;  %s20364_s7 = sld [smem:[%s21603_s0 + %s18551_s4]]  }
   0xa   :  { %13904 = vmatmul.mubr.msk.f32.vlgmr.msra.gmra.mrb[0].mxu0 %vm198_vm0, %v180_v3  ;;  %13905 = vmatmul.mubr.msk.f32.vlgmr.msra.gmra.mrb[0].mxu1 %vm198_vm0, %v181_v4  ;;  %v17321_v9 = vld [vmem:[%s18607_s13 + $0x110] ss:$8 sps:$4 sm:$0xff]   ;;  %v17326_v10 = vld [vmem:[%s18607_s13 + $0x124] ss:$8 sps:$4 sm:$0xff]   ;;  %v17324_v12 = vld [vmem:[%s18607_s13 + $0x120] ss:$8 sps:$4 sm:$0xff]   ;;  %s13870_s11 = sld [smem:[%s21603_s0 + %s18552_s8]]  }
   0xb   :  { %329 = vmatprep.mubr.f32.mxu1 %v21604_v0  ;;  %655 = vmatprep.subr.bf16.mxu1 %v17320_v6  ;;  %v183_v11 = vld [vmem:[%s18602_s9 + $0x18] sm:$0xff]  ;;  %v184_v14 = vld [vmem:[%s18602_s9 + $0x20] sm:$0xff]  ;;  %v185_v17 = vld [vmem:[%s18602_s9 + $0x28] sm:$0xff]  ;;  %s20372_s15 = sld [smem:[%s21603_s0 + %s18553_s12]]   ;;  %s18554_s16 = smov 13  }
   0xc   :  { %656 = vmatpush1.bf16.msra.mxu1 %v17318_v5  ;;  %v17329_v13 = vld [vmem:[%s18607_s13 + $0x134] ss:$8 sps:$4 sm:$0xff]   ;;  %v17327_v15 = vld [vmem:[%s18607_s13 + $0x130] ss:$8 sps:$4 sm:$0xff]   ;;  %v17332_v16 = vld [vmem:[%s18607_s13 + $0x144] ss:$8 sps:$4 sm:$0xff]   ;;  %s20393_s19 = sld [smem:[%s21603_s0 + %s18554_s16]]  }
   0xd   :  { %657 = vmatprep.subr.bf16.mxu1 %v17323_v8  ;;  %v17330_v18 = vld [vmem:[%s18607_s13 + $0x140] ss:$8 sps:$4 sm:$0xff]   ;;  %v17335_v19 = vld [vmem:[%s18607_s13 + $0x154] ss:$8 sps:$4 sm:$0xff]   ;;  %v17333_v22 = vld [vmem:[%s18607_s13 + $0x150] ss:$8 sps:$4 sm:$0xff]  }
   0xe   :  { %13906 = vmatmul.mubr.msk.f32.gmra.mrb[2].mxu1 %vm198_vm0, %v182_v7  ;;  %v186_v20 = vld [vmem:[%s18602_s9 + $0x30] sm:$0xff]  ;;  %v187_v21 = vld [vmem:[%s18602_s9 + $0x38] sm:$0xff]  ;;  %v17338_v23 = vld [vmem:[%s18607_s13 + $0x164] ss:$8 sps:$4 sm:$0xff]   ;;  %s18555_s20 = smov 12   ;;  %s18557_s24 = smov 14  }
   0xf   :  { %335 = vmatprep.mubr.f32.mxu1 %v21604_v0  ;;  %v17336_v24 = vld [vmem:[%s18607_s13 + $0x160] ss:$8 sps:$4 sm:$0xff]   ;;  %v17341_v25 = vld [vmem:[%s18607_s13 + $0x174] ss:$8 sps:$4 sm:$0xff]   ;;  %v17339_v27 = vld [vmem:[%s18607_s13 + $0x170] ss:$8 sps:$4 sm:$0xff]   ;;  %s20400_s23 = sld [smem:[%s21603_s0 + %s18555_s20]]  }
  0x10   :  { %658 = vmatpush1.bf16.msra.mxu1 %v17321_v9  ;;  %v188_v26 = vld [vmem:[%s18602_s9 + $0x40] sm:$0xff]  ;;  %v189_v29 = vld [vmem:[%s18602_s9 + $0x48] sm:$0xff]  ;;  %v17347_v31 = vld [vmem:[%s18607_s13 + $0x194] ss:$8 sps:$4 sm:$0xff]   ;;  %s13874_s27 = sld [smem:[%s21603_s0 + %s18557_s24]]   ;;  %s18558_s28 = smov 15  }
  0x11   :  { %659 = vmatprep.subr.bf16.mxu1 %v17326_v10  ;;  %v17344_v28 = vld [vmem:[%s18607_s13 + $0x184] ss:$8 sps:$4 sm:$0xff]   ;;  %v17342_v30 = vld [vmem:[%s18607_s13 + $0x180] ss:$8 sps:$4 sm:$0xff]   ;;  %v190_v32 = vld [vmem:[%s18602_s9 + $0x50] sm:$0xff]  ;;  %s13875_s1 = sld [smem:[%s21603_s0 + %s18558_s28]]   ;;  %s18559_s2 = smov 16  }
  0x12   :  { %13907 = vmatmul.mubr.msk.f32.gmra.mrb[4].mxu1 %vm198_vm0, %v183_v11  ;;  %v17345_v33 = vld [vmem:[%s18607_s13 + $0x190] ss:$8 sps:$4 sm:$0xff]   ;;  %v17350_v34 = vld [vmem:[%s18607_s13 + $0x1a4] ss:$8 sps:$4 sm:$0xff]   ;;  %v17348_v36 = vld [vmem:[%s18607_s13 + $0x1a0] ss:$8 sps:$4 sm:$0xff]   ;;  %s13876_s5 = sld [smem:[%s21603_s0 + %s18559_s2]]  }
  0x13   :  { %341 = vmatprep.mubr.f32.mxu1 %v21604_v0  ;;  %v191_v35 = vld [vmem:[%s18602_s9 + $0x58] sm:$0xff]  ;;  %v192_v38 = vld [vmem:[%s18602_s9 + $0x60] sm:$0xff]  ;;  %v193_v41 = vld [vmem:[%s18602_s9 + $0x68] sm:$0xff]  ;;  %s18560_s6 = smov 17   ;;  %s18561_s10 = smov 20  }
  0x14   :  { %660 = vmatpush1.bf16.msra.mxu1 %v17324_v12  ;;  %v17353_v37 = vld [vmem:[%s18607_s13 + $0x1b4] ss:$8 sps:$4 sm:$0xff]   ;;  %v17351_v39 = vld [vmem:[%s18607_s13 + $0x1b0] ss:$8 sps:$4 sm:$0xff]   ;;  %v17356_v40 = vld [vmem:[%s18607_s13 + $0x1c4] ss:$8 sps:$4 sm:$0xff]  }
  0x15   :  { %661 = vmatprep.subr.bf16.mxu1 %v17329_v13  ;;  %v17354_v42 = vld [vmem:[%s18607_s13 + $0x1c0] ss:$8 sps:$4 sm:$0xff]   ;;  %v194_v43 = vld [vmem:[%s18602_s9 + $0x70] sm:$0xff]  ;;  %v195_v44 = vld [vmem:[%s18602_s9 + $0x78] sm:$0xff]  ;;  %s18562_s14 = smov 18   ;;  %s18563_s18 = smov 21  }
  0x16   :  { %13908 = vmatmul.mubr.msk.f32.gmra.mrb[6].mxu1 %vm198_vm0, %v184_v14  ;;  %v17359_v45 = vld [vmem:[%s18607_s13 + $0x1d4] ss:$8 sps:$4 sm:$0xff]   ;;  %v196_v46 = vld [vmem:[%s18602_s9 + $0x80] sm:$0xff]  ;;  %v17357_v47 = vld [vmem:[%s18607_s13 + $0x1d0] ss:$8 sps:$4 sm:$0xff]   ;;  %s18564_s22 = smov 19  }
  0x17   :  { %347 = vmatprep.mubr.f32.mxu1 %v21604_v0  ;;  %v17362_v48 = vld [vmem:[%s18607_s13 + $0x1e4] ss:$8 sps:$4 sm:$0xff]   ;;  %v17360_v50 = vld [vmem:[%s18607_s13 + $0x1e0] ss:$8 sps:$4 sm:$0xff]   ;;  %v17365_v51 = vld [vmem:[%s18607_s13 + $0x1f4] ss:$8 sps:$4 sm:$0xff]  }
  0x18   :  { %662 = vmatpush1.bf16.msra.mxu1 %v17327_v15  ;;  %v197_v49 = vld [vmem:[%s18602_s9 + $0x88] sm:$0xff]  ;;  %v17363_v52 = vld [vmem:[%s18607_s13 + $0x1f0] ss:$8 sps:$4 sm:$0xff]   ;;  %v17371_v4 = vld [vmem:[%s18607_s13 + $0x14] ss:$8 sps:$4 sm:$0xff]   ;;  %s13877_s9 = sld [smem:[%s21603_s0 + %s18560_s6]]   ;;  %s18566_s26 = smov 24  }
  0x19   :  { %663 = vmatprep.subr.bf16.mxu1 %v17332_v16  ;;  %v17368_v53 = vld [vmem:[%s18607_s13 + $0x4] ss:$8 sps:$4 sm:$0xff]   ;;  %v17366_v3 = vld [vmem:[%s18607_s13] ss:$8 sps:$4 sm:$0xff]   ;;  %v17369_v7 = vld [vmem:[%s18607_s13 + $0x10] ss:$8 sps:$4 sm:$0xff]  }
  0x1a   :  { %13909 = vmatmul.mubr.msk.f32.gmra.mrb[8].mxu1 %vm198_vm0, %v185_v17  ;;  %v17374_v8 = vld [vmem:[%s18607_s13 + $0x24] ss:$8 sps:$4 sm:$0xff]   ;;  %v17372_v12 = vld [vmem:[%s18607_s13 + $0x20] ss:$8 sps:$4 sm:$0xff]   ;;  %v17377_v14 = vld [vmem:[%s18607_s13 + $0x34] ss:$8 sps:$4 sm:$0xff]  }
  0x1b   :  { %353 = vmatprep.mubr.f32.mxu1 %v21604_v0  ;;  %v17375_v15 = vld [vmem:[%s18607_s13 + $0x30] ss:$8 sps:$4 sm:$0xff]   ;;  %v17380_v16 = vld [vmem:[%s18607_s13 + $0x44] ss:$8 sps:$4 sm:$0xff]   ;;  %v17378_v17 = vld [vmem:[%s18607_s13 + $0x40] ss:$8 sps:$4 sm:$0xff]  }
  0x1c   :  { %664 = vmatpush1.bf16.msra.mxu1 %v17330_v18  ;;  %v17383_v18 = vld [vmem:[%s18607_s13 + $0x54] ss:$8 sps:$4 sm:$0xff]   ;;  %s18567_s30 = smov 22   ;;  %s18568_s4 = smov 23  }
  0x1d   :  { %665 = vmatprep.subr.bf16.mxu1 %v17335_v19  ;;  %v17381_v19 = vld [vmem:[%s18607_s13 + $0x50] ss:$8 sps:$4 sm:$0xff]   ;;  %s18569_s8 = smov 43   ;;  %s18570_s12 = smov 1  }
  0x1e   :  { %13910 = vmatmul.mubr.msk.f32.gmra.mrb[10].mxu1 %vm198_vm0, %v186_v20  ;;  %v17386_v20 = vld [vmem:[%s18607_s13 + $0x64] ss:$8 sps:$4 sm:$0xff]   ;;  %s18571_s16 = smov 25   ;;  %s18572_s20 = smov 27  }
  0x1f   :  { %359 = vmatprep.mubr.f32.mxu1 %v21604_v0  ;;  %s18573_s24 = smov 26   ;;  %s18574_s28 = smov 30  }
  0x20   :  { %666 = vmatpush1.bf16.msra.mxu1 %v17333_v22  ;;  %v17389_v22 = vld [vmem:[%s18607_s13 + $0x74] ss:$8 sps:$4 sm:$0xff]   ;;  %s18575_s2 = smov 29   ;;  %s18576_s6 = smov 28  }
  0x21   :  { %667 = vmatprep.subr.bf16.mxu1 %v17338_v23  ;;  %v17387_v23 = vld [vmem:[%s18607_s13 + $0x70] ss:$8 sps:$4 sm:$0xff]  }
  0x22   :  { %13911 = vmatmul.mubr.msk.f32.gmra.mrb[12].mxu1 %vm198_vm0, %v187_v21  ;;  %v17384_v21 = vld [vmem:[%s18607_s13 + $0x60] ss:$8 sps:$4 sm:$0xff]  }
  0x23   :  { %365 = vmatprep.mubr.f32.mxu1 %v21604_v0 }
  0x24   :  { %668 = vmatpush1.bf16.msra.mxu1 %v17336_v24  ;;  %v17392_v24 = vld [vmem:[%s18607_s13 + $0x84] ss:$8 sps:$4 sm:$0xff]  }
  0x25   :  { %669 = vmatprep.subr.bf16.mxu1 %v17341_v25  ;;  %v17390_v25 = vld [vmem:[%s18607_s13 + $0x80] ss:$8 sps:$4 sm:$0xff]  }
  0x26   :  { %13912 = vmatmul.mubr.msk.f32.gmra.mrb[14].mxu1 %vm198_vm0, %v188_v26  ;;  %v17395_v26 = vld [vmem:[%s18607_s13 + $0x94] ss:$8 sps:$4 sm:$0xff]  }
  0x27   :  { %371 = vmatprep.mubr.f32.mxu1 %v21604_v0 }
  0x28   :  { %670 = vmatpush1.bf16.msra.mxu1 %v17339_v27 }
  0x29   :  { %671 = vmatprep.subr.bf16.mxu1 %v17344_v28  ;;  %v17393_v28 = vld [vmem:[%s18607_s13 + $0x90] ss:$8 sps:$4 sm:$0xff]  }
  0x2a   :  { %13913 = vmatmul.mubr.msk.f32.gmra.mrb[16].mxu1 %vm198_vm0, %v189_v29 }
  0x2b   :  { %377 = vmatprep.mubr.f32.mxu1 %v21604_v0 }
  0x2c   :  { %672 = vmatpush1.bf16.msra.mxu1 %v17342_v30  ;;  %v17398_v30 = vld [vmem:[%s18607_s13 + $0xa4] ss:$8 sps:$4 sm:$0xff]  }
  0x2d   :  { %673 = vmatprep.subr.bf16.mxu1 %v17347_v31 }
  0x2e   :  { %13914 = vmatmul.mubr.msk.f32.gmra.mrb[18].mxu1 %vm198_vm0, %v190_v32 }
  0x2f   :  { %383 = vmatprep.mubr.f32.mxu1 %v21604_v0 }
  0x30   :  { %674 = vmatpush1.bf16.msra.mxu1 %v17345_v33 }
  0x31   :  { %675 = vmatprep.subr.bf16.mxu1 %v17350_v34 }
  0x32   :  { %13915 = vmatmul.mubr.msk.f32.gmra.mrb[20].mxu1 %vm198_vm0, %v191_v35  ;;  %v17396_v35 = vld [vmem:[%s18607_s13 + $0xa0] ss:$8 sps:$4 sm:$0xff]  }
  0x33   :  { %389 = vmatprep.mubr.f32.mxu1 %v21604_v0 }
  0x34   :  { %676 = vmatpush1.bf16.msra.mxu1 %v17348_v36  ;;  %v17401_v36 = vld [vmem:[%s18607_s13 + $0xb4] ss:$8 sps:$4 sm:$0xff]  }
  0x35   :  { %677 = vmatprep.subr.bf16.mxu1 %v17353_v37 }
  0x36   :  { %13916 = vmatmul.mubr.msk.f32.gmra.mrb[22].mxu1 %vm198_vm0, %v192_v38  ;;  %v17399_v38 = vld [vmem:[%s18607_s13 + $0xb0] ss:$8 sps:$4 sm:$0xff]  }
  0x37   :  { %395 = vmatprep.mubr.f32.mxu1 %v21604_v0 }
  0x38   :  { %678 = vmatpush1.bf16.msra.mxu1 %v17351_v39 }
  0x39   :  { %679 = vmatprep.subr.bf16.mxu1 %v17356_v40  ;;  %v17404_v40 = vld [vmem:[%s18607_s13 + $0xc4] ss:$8 sps:$4 sm:$0xff]  }
  0x3a   :  { %13917 = vmatmul.mubr.msk.f32.gmra.mrb[24].mxu1 %vm198_vm0, %v193_v41 }
  0x3b   :  { %401 = vmatprep.mubr.f32.mxu1 %v21604_v0 }
  0x3c   :  { %680 = vmatpush1.bf16.msra.mxu1 %v17354_v42 }
  0x3d   :  { %681 = vmatprep.subr.bf16.mxu1 %v17359_v45  ;;  %v17402_v45 = vld [vmem:[%s18607_s13 + $0xc0] ss:$8 sps:$4 sm:$0xff]  }
  0x3e   :  { %13918 = vmatmul.mubr.msk.f32.gmra.mrb[26].mxu1 %vm198_vm0, %v194_v43 }
  0x3f   :  { %407 = vmatprep.mubr.f32.mxu1 %v21604_v0 }
  0x40   :  { %682 = vmatpush1.bf16.msra.mxu1 %v17357_v47 }
  0x41   :  { %683 = vmatprep.subr.bf16.mxu1 %v17362_v48  ;;  %v17405_v48 = vld [vmem:[%s18607_s13 + $0xd0] ss:$8 sps:$4 sm:$0xff]  }
  0x42   :  { %13919 = vmatmul.mubr.msk.f32.gmra.mrb[28].mxu1 %vm198_vm0, %v195_v44 }
  0x43   :  { %413 = vmatprep.mubr.f32.mxu1 %v21604_v0 }
  0x44   :  { %684 = vmatpush1.bf16.msra.mxu1 %v17360_v50  ;;  %v17410_v50 = vld [vmem:[%s18607_s13 + $0xe4] ss:$8 sps:$4 sm:$0xff]  }
  0x45   :  { %685 = vmatprep.subr.bf16.mxu1 %v17365_v51 }
  0x46   :  { %13920 = vmatmul.mubr.msk.f32.gmra.mrb[30].mxu1 %vm198_vm0, %v196_v46  ;;  %v17407_v46 = vld [vmem:[%s18607_s13 + $0xd4] ss:$8 sps:$4 sm:$0xff]  }
  0x47   :  { %419 = vmatprep.mubr.f32.mxu1 %v21604_v0 }
  0x48   :  { %686 = vmatpush1.bf16.msra.mxu1 %v17363_v52 }
  0x49   :  { %858 = vmatprep.subr.bf16.mxu1 %v17368_v53 }
  0x4a   :  { %13921 = vmatmul.mubr.msk.f32.gmra.mrb[32].mxu1 %vm198_vm0, %v197_v49 }
  0xdd   :  { %v18694_v54 = vpop.f32.mrb[0].mxu0  ;;  %v18696_v55 = vpop.f32.mrb[0].mxu1 }
  0xde   :  { %v426_v56 = vpack.c.bf16 %v18696_v55, %v18694_v54  ;;  %v321_v57 = vpop.f32.mrb[1].mxu0  ;;  %v327_v58 = vpop.f32.mrb[1].mxu1 }
  0xdf   :  { %v427_v59 = vpack.c.bf16 %v327_v58, %v321_v57  ;;  %v17408_v58 = vld [vmem:[%s18607_s13 + $0xe0] ss:$8 sps:$4 sm:$0xff]  }
  0xe1   :  { %v331_v60 = vpop.f32.mrb[2].mxu1 }
  0xe2   :  { %v333_v61 = vpop.f32.mrb[3].mxu1 }
  0xe5   :  { %v337_v62 = vpop.f32.mrb[4].mxu1 }
  0xe6   :  { %v460_v63 = vpack.c.bf16 %v337_v62, %v331_v60  ;;  %v339_v1 = vpop.f32.mrb[5].mxu1 }
  0xe7   :  { %v461_v2 = vpack.c.bf16 %v339_v1, %v333_v61  ;;  %v17411_v61 = vld [vmem:[%s18607_s13 + $0xf0] ss:$8 sps:$4 sm:$0xff]  }
  0xe9   :  { %687 = vmatprep.mubr.bf16.mxu1 %v461_v2  ;;  %v18702_v5 = vpop.f32.mrb[6].mxu1 }
  0xea   :  { %688 = vmatmul.mubr.bf16.vlgmr.msra.gmra.mrb[36].mxu1 %v460_v63  ;;  %v18704_v6 = vpop.f32.mrb[7].mxu1  ;;  %v17416_v63 = vld [vmem:[%s18607_s13 + $0x204] ss:$8 sps:$4 sm:$0xff]  }
  0xeb   :  { %859 = vmatpush1.bf16.msra.mxu1 %v17366_v3  ;;  %890 = vmatprep.mubr.bf16.mxu1 %v427_v59  ;;  %v17413_v59 = vld [vmem:[%s18607_s13 + $0xf4] ss:$8 sps:$4 sm:$0xff]  }
  0xec   :  { %860 = vmatprep.subr.bf16.mxu1 %v17371_v4 }
  0xed   :  { %v18708_v9 = vpop.f32.mrb[8].mxu1 }
  0xee   :  { %v901_v10 = vpack.c.bf16 %v18708_v9, %v18702_v5  ;;  %v18712_v11 = vpop.f32.mrb[9].mxu1  ;;  %v17471_v5 = vld [vmem:[%s18607_s13 + $0x330] ss:$8 sps:$4 sm:$0xff]   ;;  %v17476_v9 = vld [vmem:[%s18607_s13 + $0x344] ss:$8 sps:$4 sm:$0xff]  }
  0xef   :  { %861 = vmatpush1.bf16.msra.mxu1 %v17369_v7  ;;  %v902_v13 = vpack.c.bf16 %v18712_v11, %v18704_v6  ;;  %v17414_v7 = vld [vmem:[%s18607_s13 + $0x200] ss:$8 sps:$4 sm:$0xff]   ;;  %v17425_v6 = vld [vmem:[%s18607_s13 + $0x234] ss:$8 sps:$4 sm:$0xff]  }
  0xf0   :  { %862 = vmatprep.subr.bf16.mxu1 %v17374_v8  ;;  %v17419_v8 = vld [vmem:[%s18607_s13 + $0x214] ss:$8 sps:$4 sm:$0xff]  }
  0xf1   :  { %v18730_v27 = vpop.f32.mrb[10].mxu1 }
  0xf2   :  { %v18733_v29 = vpop.f32.mrb[11].mxu1 }
  0xf3   :  { %863 = vmatpush1.bf16.msra.mxu1 %v17372_v12 }
  0xf4   :  { %864 = vmatprep.subr.bf16.mxu1 %v17377_v14  ;;  %v17417_v14 = vld [vmem:[%s18607_s13 + $0x210] ss:$8 sps:$4 sm:$0xff]  }
  0xf5   :  { %v18736_v31 = vpop.f32.mrb[12].mxu1 }
  0xf6   :  { %v1143_v32 = vpack.c.bf16 %v18736_v31, %v18730_v27  ;;  %v18740_v33 = vpop.f32.mrb[13].mxu1  ;;  %v17519_v27 = vld [vmem:[%s18607_s13 + $0x430] ss:$8 sps:$4 sm:$0xff]   ;;  %v17524_v31 = vld [vmem:[%s18607_s13 + $0x444] ss:$8 sps:$4 sm:$0xff]  }
  0xf7   :  { %865 = vmatpush1.bf16.msra.mxu1 %v17375_v15  ;;  %v1144_v34 = vpack.c.bf16 %v18740_v33, %v18733_v29  ;;  %v17479_v29 = vld [vmem:[%s18607_s13 + $0x354] ss:$8 sps:$4 sm:$0xff]   ;;  %v17477_v33 = vld [vmem:[%s18607_s13 + $0x350] ss:$8 sps:$4 sm:$0xff]  }
  0xf8   :  { %866 = vmatprep.subr.bf16.mxu1 %v17380_v16  ;;  %v17422_v16 = vld [vmem:[%s18607_s13 + $0x224] ss:$8 sps:$4 sm:$0xff]  }
  0xf9   :  { %v18746_v37 = vpop.f32.mrb[14].mxu1 }
  0xfa   :  { %v18749_v39 = vpop.f32.mrb[15].mxu1 }
  0xfb   :  { %867 = vmatpush1.bf16.msra.mxu1 %v17378_v17 }
  0xfc   :  { %868 = vmatprep.subr.bf16.mxu1 %v17383_v18  ;;  %v17420_v18 = vld [vmem:[%s18607_s13 + $0x220] ss:$8 sps:$4 sm:$0xff]  }
  0xfd   :  { %v18752_v41 = vpop.f32.mrb[16].mxu1 }
  0xfe   :  { %v1385_v42 = vpack.c.bf16 %v18752_v41, %v18746_v37  ;;  %v18756_v43 = vpop.f32.mrb[17].mxu1  ;;  %v17567_v37 = vld [vmem:[%s18607_s13 + $0x530] ss:$8 sps:$4 sm:$0xff]   ;;  %v17572_v41 = vld [vmem:[%s18607_s13 + $0x544] ss:$8 sps:$4 sm:$0xff]  }
  0xff   :  { %869 = vmatpush1.bf16.msra.mxu1 %v17381_v19  ;;  %v1386_v44 = vpack.c.bf16 %v18756_v43, %v18749_v39  ;;  %v17527_v39 = vld [vmem:[%s18607_s13 + $0x454] ss:$8 sps:$4 sm:$0xff]   ;;  %v17525_v43 = vld [vmem:[%s18607_s13 + $0x450] ss:$8 sps:$4 sm:$0xff]  }
 0x100   :  { %870 = vmatprep.subr.bf16.mxu1 %v17386_v20  ;;  %v17428_v20 = vld [vmem:[%s18607_s13 + $0x244] ss:$8 sps:$4 sm:$0xff]  }
 0x101   :  { %v18762_v47 = vpop.f32.mrb[18].mxu1 }
 0x102   :  { %v18765_v49 = vpop.f32.mrb[19].mxu1 }
 0x103   :  { %871 = vmatpush1.bf16.msra.mxu1 %v17384_v21 }
 0x104   :  { %872 = vmatprep.subr.bf16.mxu1 %v17389_v22 }
 0x105   :  { %v18768_v51 = vpop.f32.mrb[20].mxu1 }
 0x106   :  { %v1627_v52 = vpack.c.bf16 %v18768_v51, %v18762_v47  ;;  %v18772_v53 = vpop.f32.mrb[21].mxu1  ;;  %v17615_v47 = vld [vmem:[%s18607_s13 + $0x630] ss:$8 sps:$4 sm:$0xff]   ;;  %v17620_v51 = vld [vmem:[%s18607_s13 + $0x644] ss:$8 sps:$4 sm:$0xff]  }
 0x107   :  { %873 = vmatpush1.bf16.msra.mxu1 %v17387_v23  ;;  %v1628_v57 = vpack.c.bf16 %v18772_v53, %v18765_v49  ;;  %v17575_v49 = vld [vmem:[%s18607_s13 + $0x554] ss:$8 sps:$4 sm:$0xff]   ;;  %v17573_v53 = vld [vmem:[%s18607_s13 + $0x550] ss:$8 sps:$4 sm:$0xff]  }
 0x108   :  { %874 = vmatprep.subr.bf16.mxu1 %v17392_v24 }
 0x109   :  { %v18778_v60 = vpop.f32.mrb[22].mxu1 }
 0x10a   :  { %v18781_v62 = vpop.f32.mrb[23].mxu1 }
 0x10b   :  { %875 = vmatpush1.bf16.msra.mxu1 %v17390_v25  ;;  %v17426_v25 = vld [vmem:[%s18607_s13 + $0x240] ss:$8 sps:$4 sm:$0xff]  }
 0x10c   :  { %876 = vmatprep.subr.bf16.mxu1 %v17395_v26  ;;  %v17431_v26 = vld [vmem:[%s18607_s13 + $0x254] ss:$8 sps:$4 sm:$0xff]  }
 0x10d   :  { %v18784_v1 = vpop.f32.mrb[24].mxu1 }
 0x10e   :  { %v1869_v2 = vpack.c.bf16 %v18784_v1, %v18778_v60  ;;  %v18788_v3 = vpop.f32.mrb[25].mxu1  ;;  %v17663_v60 = vld [vmem:[%s18607_s13 + $0x730] ss:$8 sps:$4 sm:$0xff]   ;;  %v17668_v1 = vld [vmem:[%s18607_s13 + $0x744] ss:$8 sps:$4 sm:$0xff]  }
 0x10f   :  { %877 = vmatpush1.bf16.msra.mxu1 %v17393_v28  ;;  %v1870_v4 = vpack.c.bf16 %v18788_v3, %v18781_v62  ;;  %v17429_v28 = vld [vmem:[%s18607_s13 + $0x250] ss:$8 sps:$4 sm:$0xff]   ;;  %v17623_v62 = vld [vmem:[%s18607_s13 + $0x654] ss:$8 sps:$4 sm:$0xff]  }
 0x110   :  { %878 = vmatprep.subr.bf16.mxu1 %v17398_v30  ;;  %v17434_v30 = vld [vmem:[%s18607_s13 + $0x264] ss:$8 sps:$4 sm:$0xff]   ;;  %v17621_v3 = vld [vmem:[%s18607_s13 + $0x650] ss:$8 sps:$4 sm:$0xff]  }
 0x111   :  { %v18797_v12 = vpop.f32.mrb[26].mxu1 }
 0x112   :  { %v18803_v15 = vpop.f32.mrb[27].mxu1 }
 0x113   :  { %879 = vmatpush1.bf16.msra.mxu1 %v17396_v35  ;;  %v17432_v35 = vld [vmem:[%s18607_s13 + $0x260] ss:$8 sps:$4 sm:$0xff]  }
 0x114   :  { %880 = vmatprep.subr.bf16.mxu1 %v17401_v36  ;;  %v17437_v36 = vld [vmem:[%s18607_s13 + $0x274] ss:$8 sps:$4 sm:$0xff]  }
 0x115   :  { %v18806_v17 = vpop.f32.mrb[28].mxu1 }
 0x116   :  { %v2111_v54 = vpack.c.bf16 %v18806_v17, %v18797_v12  ;;  %v18810_v55 = vpop.f32.mrb[29].mxu1  ;;  %v17711_v12 = vld [vmem:[%s18607_s13 + $0x830] ss:$8 sps:$4 sm:$0xff]   ;;  %v17716_v17 = vld [vmem:[%s18607_s13 + $0x844] ss:$8 sps:$4 sm:$0xff]  }
 0x117   :  { %881 = vmatpush1.bf16.msra.mxu1 %v17399_v38  ;;  %v17435_v38 = vld [vmem:[%s18607_s13 + $0x270] ss:$8 sps:$4 sm:$0xff]  }
 0x118   :  { %882 = vmatprep.subr.bf16.mxu1 %v17404_v40  ;;  %v17440_v40 = vld [vmem:[%s18607_s13 + $0x284] ss:$8 sps:$4 sm:$0xff]  }
 0x119   :  { %v18816_v11 = vpop.f32.mrb[30].mxu1 }
 0x11a   :  { %v18819_v19 = vpop.f32.mrb[31].mxu1 }
 0x11b   :  { %883 = vmatpush1.bf16.msra.mxu1 %v17402_v45  ;;  %v17438_v45 = vld [vmem:[%s18607_s13 + $0x280] ss:$8 sps:$4 sm:$0xff]  }
 0x11c   :  { %884 = vmatprep.subr.bf16.mxu1 %v17407_v46  ;;  %v17443_v46 = vld [vmem:[%s18607_s13 + $0x294] ss:$8 sps:$4 sm:$0xff]  }
 0x11d   :  { %v18822_v21 = vpop.f32.mrb[32].mxu1 }
 0x11e   :  { %v2353_v22 = vpack.c.bf16 %v18822_v21, %v18816_v11  ;;  %v18826_v23 = vpop.f32.mrb[33].mxu1 }
 0x11f   :  { %885 = vmatpush1.bf16.msra.mxu1 %v17405_v48  ;;  %v2354_v24 = vpack.c.bf16 %v18826_v23, %v18819_v19  ;;  %v17441_v48 = vld [vmem:[%s18607_s13 + $0x290] ss:$8 sps:$4 sm:$0xff]   ;;  %v17719_v19 = vld [vmem:[%s18607_s13 + $0x854] ss:$8 sps:$4 sm:$0xff]  }
 0x120   :  { %886 = vmatprep.subr.bf16.mxu1 %v17410_v50  ;;  %v17446_v50 = vld [vmem:[%s18607_s13 + $0x2a4] ss:$8 sps:$4 sm:$0xff]   ;;  %v17717_v23 = vld [vmem:[%s18607_s13 + $0x850] ss:$8 sps:$4 sm:$0xff]  }
 0x123   :  { %887 = vmatpush1.bf16.msra.mxu1 %v17408_v58  ;;  %v17444_v58 = vld [vmem:[%s18607_s13 + $0x2a0] ss:$8 sps:$4 sm:$0xff]  }
 0x124   :  { %888 = vmatprep.subr.bf16.mxu1 %v17413_v59  ;;  %v17449_v59 = vld [vmem:[%s18607_s13 + $0x2b4] ss:$8 sps:$4 sm:$0xff]  }
 0x127   :  { %889 = vmatpush1.bf16.msra.mxu1 %v17411_v61  ;;  %v17447_v61 = vld [vmem:[%s18607_s13 + $0x2b0] ss:$8 sps:$4 sm:$0xff]  }
 0x128   :  { %1096 = vmatprep.subr.bf16.mxu1 %v17416_v63  ;;  %v17452_v63 = vld [vmem:[%s18607_s13 + $0x2c4] ss:$8 sps:$4 sm:$0xff]  }
 0x12a   :  { %891 = vmatmul.mubr.bf16.vlgmr.msra.gmra.mrb[36].mxu1 %v426_v56  ;;  %v2112_v56 = vpack.c.bf16 %v18810_v55, %v18803_v15  ;;  %v17671_v15 = vld [vmem:[%s18607_s13 + $0x754] ss:$8 sps:$4 sm:$0xff]   ;;  %v17669_v55 = vld [vmem:[%s18607_s13 + $0x750] ss:$8 sps:$4 sm:$0xff]  }
 0x12b   :  { %1097 = vmatpush1.bf16.msra.mxu1 %v17414_v7  ;;  %1128 = vmatprep.mubr.bf16.mxu1 %v902_v13  ;;  %v17423_v13 = vld [vmem:[%s18607_s13 + $0x230] ss:$8 sps:$4 sm:$0xff]   ;;  %v17450_v7 = vld [vmem:[%s18607_s13 + $0x2c0] ss:$8 sps:$4 sm:$0xff]  }
 0x12c   :  { %1098 = vmatprep.subr.bf16.mxu1 %v17419_v8  ;;  %v17455_v8 = vld [vmem:[%s18607_s13 + $0x2d4] ss:$8 sps:$4 sm:$0xff]  }
 0x12f   :  { %1099 = vmatpush1.bf16.msra.mxu1 %v17417_v14  ;;  %v17453_v14 = vld [vmem:[%s18607_s13 + $0x2d0] ss:$8 sps:$4 sm:$0xff]  }
 0x130   :  { %1100 = vmatprep.subr.bf16.mxu1 %v17422_v16  ;;  %v17458_v16 = vld [vmem:[%s18607_s13 + $0x2e4] ss:$8 sps:$4 sm:$0xff]  }
 0x133   :  { %1101 = vmatpush1.bf16.msra.mxu1 %v17420_v18  ;;  %v17456_v18 = vld [vmem:[%s18607_s13 + $0x2e0] ss:$8 sps:$4 sm:$0xff]  }
 0x134   :  { %1102 = vmatprep.subr.bf16.mxu1 %v17425_v6  ;;  %v17461_v6 = vld [vmem:[%s18607_s13 + $0x2f4] ss:$8 sps:$4 sm:$0xff]  }
 0x137   :  { %1103 = vmatpush1.bf16.msra.mxu1 %v17423_v13  ;;  %v17459_v13 = vld [vmem:[%s18607_s13 + $0x2f0] ss:$8 sps:$4 sm:$0xff]  }
 0x138   :  { %1104 = vmatprep.subr.bf16.mxu1 %v17428_v20  ;;  %v17464_v20 = vld [vmem:[%s18607_s13 + $0x304] ss:$8 sps:$4 sm:$0xff]  }
 0x13b   :  { %1105 = vmatpush1.bf16.msra.mxu1 %v17426_v25  ;;  %v17462_v25 = vld [vmem:[%s18607_s13 + $0x300] ss:$8 sps:$4 sm:$0xff]  }
 0x13c   :  { %1106 = vmatprep.subr.bf16.mxu1 %v17431_v26  ;;  %v17467_v26 = vld [vmem:[%s18607_s13 + $0x314] ss:$8 sps:$4 sm:$0xff]  }
 0x13f   :  { %1107 = vmatpush1.bf16.msra.mxu1 %v17429_v28  ;;  %v17465_v28 = vld [vmem:[%s18607_s13 + $0x310] ss:$8 sps:$4 sm:$0xff]  }
 0x140   :  { %1108 = vmatprep.subr.bf16.mxu1 %v17434_v30  ;;  %v17470_v30 = vld [vmem:[%s18607_s13 + $0x324] ss:$8 sps:$4 sm:$0xff]  }
 0x143   :  { %1109 = vmatpush1.bf16.msra.mxu1 %v17432_v35  ;;  %v17468_v35 = vld [vmem:[%s18607_s13 + $0x320] ss:$8 sps:$4 sm:$0xff]  }
 0x144   :  { %1110 = vmatprep.subr.bf16.mxu1 %v17437_v36  ;;  %v17473_v36 = vld [vmem:[%s18607_s13 + $0x334] ss:$8 sps:$4 sm:$0xff]  }
 0x147   :  { %1111 = vmatpush1.bf16.msra.mxu1 %v17435_v38  ;;  %v17480_v38 = vld [vmem:[%s18607_s13 + $0x360] ss:$8 sps:$4 sm:$0xff]  }
 0x148   :  { %1112 = vmatprep.subr.bf16.mxu1 %v17440_v40  ;;  %v17485_v40 = vld [vmem:[%s18607_s13 + $0x374] ss:$8 sps:$4 sm:$0xff]  }
 0x14b   :  { %1113 = vmatpush1.bf16.msra.mxu1 %v17438_v45  ;;  %v17483_v45 = vld [vmem:[%s18607_s13 + $0x370] ss:$8 sps:$4 sm:$0xff]  }
 0x14c   :  { %1114 = vmatprep.subr.bf16.mxu1 %v17443_v46  ;;  %v17488_v46 = vld [vmem:[%s18607_s13 + $0x384] ss:$8 sps:$4 sm:$0xff]  }
 0x14f   :  { %1115 = vmatpush1.bf16.msra.mxu1 %v17441_v48  ;;  %v17486_v48 = vld [vmem:[%s18607_s13 + $0x380] ss:$8 sps:$4 sm:$0xff]  }
 0x150   :  { %1116 = vmatprep.subr.bf16.mxu1 %v17446_v50  ;;  %v17491_v50 = vld [vmem:[%s18607_s13 + $0x394] ss:$8 sps:$4 sm:$0xff]  }
 0x153   :  { %1117 = vmatpush1.bf16.msra.mxu1 %v17444_v58  ;;  %v17489_v58 = vld [vmem:[%s18607_s13 + $0x390] ss:$8 sps:$4 sm:$0xff]  }
 0x154   :  { %1118 = vmatprep.subr.bf16.mxu1 %v17449_v59  ;;  %v17494_v59 = vld [vmem:[%s18607_s13 + $0x3a4] ss:$8 sps:$4 sm:$0xff]  }
 0x157   :  { %1119 = vmatpush1.bf16.msra.mxu1 %v17447_v61  ;;  %v17492_v61 = vld [vmem:[%s18607_s13 + $0x3a0] ss:$8 sps:$4 sm:$0xff]  }
 0x158   :  { %1120 = vmatprep.subr.bf16.mxu1 %v17452_v63  ;;  %v17497_v63 = vld [vmem:[%s18607_s13 + $0x3b4] ss:$8 sps:$4 sm:$0xff]  }
 0x15b   :  { %1121 = vmatpush1.bf16.msra.mxu1 %v17450_v7  ;;  %v17495_v7 = vld [vmem:[%s18607_s13 + $0x3b0] ss:$8 sps:$4 sm:$0xff]  }
 0x15c   :  { %1122 = vmatprep.subr.bf16.mxu1 %v17455_v8  ;;  %v17500_v8 = vld [vmem:[%s18607_s13 + $0x3c4] ss:$8 sps:$4 sm:$0xff]  }
 0x15f   :  { %1123 = vmatpush1.bf16.msra.mxu1 %v17453_v14  ;;  %v17498_v14 = vld [vmem:[%s18607_s13 + $0x3c0] ss:$8 sps:$4 sm:$0xff]  }
 0x160   :  { %1124 = vmatprep.subr.bf16.mxu1 %v17458_v16  ;;  %v17503_v16 = vld [vmem:[%s18607_s13 + $0x3d4] ss:$8 sps:$4 sm:$0xff]  }
 0x163   :  { %1125 = vmatpush1.bf16.msra.mxu1 %v17456_v18  ;;  %v17501_v18 = vld [vmem:[%s18607_s13 + $0x3d0] ss:$8 sps:$4 sm:$0xff]  }
 0x164   :  { %1126 = vmatprep.subr.bf16.mxu1 %v17461_v6  ;;  %v17506_v6 = vld [vmem:[%s18607_s13 + $0x3e4] ss:$8 sps:$4 sm:$0xff]  }
 0x167   :  { %1127 = vmatpush1.bf16.msra.mxu1 %v17459_v13  ;;  %v17504_v13 = vld [vmem:[%s18607_s13 + $0x3e0] ss:$8 sps:$4 sm:$0xff]  }
 0x168   :  { %1338 = vmatprep.subr.bf16.mxu1 %v17464_v20  ;;  %v17509_v20 = vld [vmem:[%s18607_s13 + $0x3f4] ss:$8 sps:$4 sm:$0xff]  }
 0x16a   :  { %1129 = vmatmul.mubr.bf16.vlgmr.msra.gmra.mrb[36].mxu1 %v901_v10  ;;  %v17474_v10 = vld [vmem:[%s18607_s13 + $0x340] ss:$8 sps:$4 sm:$0xff]  }
 0x16b   :  { %1339 = vmatpush1.bf16.msra.mxu1 %v17462_v25  ;;  %1370 = vmatprep.mubr.bf16.mxu1 %v1144_v34  ;;  %v17482_v34 = vld [vmem:[%s18607_s13 + $0x364] ss:$8 sps:$4 sm:$0xff]   ;;  %v17507_v25 = vld [vmem:[%s18607_s13 + $0x3f0] ss:$8 sps:$4 sm:$0xff]  }
 0x16c   :  { %1340 = vmatprep.subr.bf16.mxu1 %v17467_v26  ;;  %v17512_v26 = vld [vmem:[%s18607_s13 + $0x404] ss:$8 sps:$4 sm:$0xff]  }
 0x16f   :  { %1341 = vmatpush1.bf16.msra.mxu1 %v17465_v28  ;;  %v17510_v28 = vld [vmem:[%s18607_s13 + $0x400] ss:$8 sps:$4 sm:$0xff]  }
 0x170   :  { %1342 = vmatprep.subr.bf16.mxu1 %v17470_v30  ;;  %v17515_v30 = vld [vmem:[%s18607_s13 + $0x414] ss:$8 sps:$4 sm:$0xff]  }
 0x173   :  { %1343 = vmatpush1.bf16.msra.mxu1 %v17468_v35  ;;  %v17513_v35 = vld [vmem:[%s18607_s13 + $0x410] ss:$8 sps:$4 sm:$0xff]  }
 0x174   :  { %1344 = vmatprep.subr.bf16.mxu1 %v17473_v36  ;;  %v17518_v36 = vld [vmem:[%s18607_s13 + $0x424] ss:$8 sps:$4 sm:$0xff]  }
 0x177   :  { %1345 = vmatpush1.bf16.msra.mxu1 %v17471_v5  ;;  %v17516_v5 = vld [vmem:[%s18607_s13 + $0x420] ss:$8 sps:$4 sm:$0xff]  }
 0x178   :  { %1346 = vmatprep.subr.bf16.mxu1 %v17476_v9  ;;  %v17521_v9 = vld [vmem:[%s18607_s13 + $0x434] ss:$8 sps:$4 sm:$0xff]  }
 0x17b   :  { %1347 = vmatpush1.bf16.msra.mxu1 %v17474_v10  ;;  %v17528_v10 = vld [vmem:[%s18607_s13 + $0x460] ss:$8 sps:$4 sm:$0xff]  }
 0x17c   :  { %1348 = vmatprep.subr.bf16.mxu1 %v17479_v29  ;;  %v17533_v29 = vld [vmem:[%s18607_s13 + $0x474] ss:$8 sps:$4 sm:$0xff]  }
 0x17f   :  { %1349 = vmatpush1.bf16.msra.mxu1 %v17477_v33  ;;  %v17531_v33 = vld [vmem:[%s18607_s13 + $0x470] ss:$8 sps:$4 sm:$0xff]  }
 0x180   :  { %1350 = vmatprep.subr.bf16.mxu1 %v17482_v34  ;;  %v17536_v34 = vld [vmem:[%s18607_s13 + $0x484] ss:$8 sps:$4 sm:$0xff]  }
 0x183   :  { %1351 = vmatpush1.bf16.msra.mxu1 %v17480_v38  ;;  %v17534_v38 = vld [vmem:[%s18607_s13 + $0x480] ss:$8 sps:$4 sm:$0xff]  }
 0x184   :  { %1352 = vmatprep.subr.bf16.mxu1 %v17485_v40  ;;  %v17539_v40 = vld [vmem:[%s18607_s13 + $0x494] ss:$8 sps:$4 sm:$0xff]  }
 0x187   :  { %1353 = vmatpush1.bf16.msra.mxu1 %v17483_v45  ;;  %v17537_v45 = vld [vmem:[%s18607_s13 + $0x490] ss:$8 sps:$4 sm:$0xff]  }
 0x188   :  { %1354 = vmatprep.subr.bf16.mxu1 %v17488_v46  ;;  %v17542_v46 = vld [vmem:[%s18607_s13 + $0x4a4] ss:$8 sps:$4 sm:$0xff]  }
 0x18b   :  { %1355 = vmatpush1.bf16.msra.mxu1 %v17486_v48  ;;  %v17540_v48 = vld [vmem:[%s18607_s13 + $0x4a0] ss:$8 sps:$4 sm:$0xff]  }
 0x18c   :  { %1356 = vmatprep.subr.bf16.mxu1 %v17491_v50  ;;  %v17545_v50 = vld [vmem:[%s18607_s13 + $0x4b4] ss:$8 sps:$4 sm:$0xff]  }
 0x18f   :  { %1357 = vmatpush1.bf16.msra.mxu1 %v17489_v58  ;;  %v17543_v58 = vld [vmem:[%s18607_s13 + $0x4b0] ss:$8 sps:$4 sm:$0xff]  }
 0x190   :  { %1358 = vmatprep.subr.bf16.mxu1 %v17494_v59  ;;  %v17548_v59 = vld [vmem:[%s18607_s13 + $0x4c4] ss:$8 sps:$4 sm:$0xff]  }
 0x193   :  { %1359 = vmatpush1.bf16.msra.mxu1 %v17492_v61  ;;  %v17546_v61 = vld [vmem:[%s18607_s13 + $0x4c0] ss:$8 sps:$4 sm:$0xff]  }
 0x194   :  { %1360 = vmatprep.subr.bf16.mxu1 %v17497_v63  ;;  %v17551_v63 = vld [vmem:[%s18607_s13 + $0x4d4] ss:$8 sps:$4 sm:$0xff]  }
 0x197   :  { %1361 = vmatpush1.bf16.msra.mxu1 %v17495_v7  ;;  %v17549_v7 = vld [vmem:[%s18607_s13 + $0x4d0] ss:$8 sps:$4 sm:$0xff]  }
 0x198   :  { %1362 = vmatprep.subr.bf16.mxu1 %v17500_v8  ;;  %v17554_v8 = vld [vmem:[%s18607_s13 + $0x4e4] ss:$8 sps:$4 sm:$0xff]  }
 0x19b   :  { %1363 = vmatpush1.bf16.msra.mxu1 %v17498_v14  ;;  %v17552_v14 = vld [vmem:[%s18607_s13 + $0x4e0] ss:$8 sps:$4 sm:$0xff]  }
 0x19c   :  { %1364 = vmatprep.subr.bf16.mxu1 %v17503_v16  ;;  %v17557_v16 = vld [vmem:[%s18607_s13 + $0x4f4] ss:$8 sps:$4 sm:$0xff]  }
 0x19f   :  { %1365 = vmatpush1.bf16.msra.mxu1 %v17501_v18  ;;  %v17555_v18 = vld [vmem:[%s18607_s13 + $0x4f0] ss:$8 sps:$4 sm:$0xff]  }
 0x1a0   :  { %1366 = vmatprep.subr.bf16.mxu1 %v17506_v6  ;;  %v17560_v6 = vld [vmem:[%s18607_s13 + $0x504] ss:$8 sps:$4 sm:$0xff]  }
 0x1a3   :  { %1367 = vmatpush1.bf16.msra.mxu1 %v17504_v13  ;;  %v17558_v13 = vld [vmem:[%s18607_s13 + $0x500] ss:$8 sps:$4 sm:$0xff]  }
 0x1a4   :  { %1368 = vmatprep.subr.bf16.mxu1 %v17509_v20  ;;  %v17563_v20 = vld [vmem:[%s18607_s13 + $0x514] ss:$8 sps:$4 sm:$0xff]  }
 0x1a7   :  { %1369 = vmatpush1.bf16.msra.mxu1 %v17507_v25  ;;  %v17561_v25 = vld [vmem:[%s18607_s13 + $0x510] ss:$8 sps:$4 sm:$0xff]  }
 0x1a8   :  { %1580 = vmatprep.subr.bf16.mxu1 %v17512_v26  ;;  %v17566_v26 = vld [vmem:[%s18607_s13 + $0x524] ss:$8 sps:$4 sm:$0xff]  }
 0x1aa   :  { %1371 = vmatmul.mubr.bf16.vlgmr.msra.gmra.mrb[36].mxu1 %v1143_v32  ;;  %v17522_v32 = vld [vmem:[%s18607_s13 + $0x440] ss:$8 sps:$4 sm:$0xff]  }
 0x1ab   :  { %1581 = vmatpush1.bf16.msra.mxu1 %v17510_v28  ;;  %1612 = vmatprep.mubr.bf16.mxu1 %v1386_v44  ;;  %v17530_v44 = vld [vmem:[%s18607_s13 + $0x464] ss:$8 sps:$4 sm:$0xff]   ;;  %v17564_v28 = vld [vmem:[%s18607_s13 + $0x520] ss:$8 sps:$4 sm:$0xff]  }
 0x1ac   :  { %1582 = vmatprep.subr.bf16.mxu1 %v17515_v30  ;;  %v17569_v30 = vld [vmem:[%s18607_s13 + $0x534] ss:$8 sps:$4 sm:$0xff]  }
 0x1af   :  { %1583 = vmatpush1.bf16.msra.mxu1 %v17513_v35  ;;  %v17576_v35 = vld [vmem:[%s18607_s13 + $0x560] ss:$8 sps:$4 sm:$0xff]  }
 0x1b0   :  { %1584 = vmatprep.subr.bf16.mxu1 %v17518_v36  ;;  %v17581_v36 = vld [vmem:[%s18607_s13 + $0x574] ss:$8 sps:$4 sm:$0xff]  }
 0x1b3   :  { %1585 = vmatpush1.bf16.msra.mxu1 %v17516_v5  ;;  %v17579_v5 = vld [vmem:[%s18607_s13 + $0x570] ss:$8 sps:$4 sm:$0xff]  }
 0x1b4   :  { %1586 = vmatprep.subr.bf16.mxu1 %v17521_v9  ;;  %v17584_v9 = vld [vmem:[%s18607_s13 + $0x584] ss:$8 sps:$4 sm:$0xff]  }
 0x1b7   :  { %1587 = vmatpush1.bf16.msra.mxu1 %v17519_v27  ;;  %v17582_v27 = vld [vmem:[%s18607_s13 + $0x580] ss:$8 sps:$4 sm:$0xff]  }
 0x1b8   :  { %1588 = vmatprep.subr.bf16.mxu1 %v17524_v31  ;;  %v17587_v31 = vld [vmem:[%s18607_s13 + $0x594] ss:$8 sps:$4 sm:$0xff]  }
 0x1bb   :  { %1589 = vmatpush1.bf16.msra.mxu1 %v17522_v32  ;;  %v17585_v32 = vld [vmem:[%s18607_s13 + $0x590] ss:$8 sps:$4 sm:$0xff]  }
 0x1bc   :  { %1590 = vmatprep.subr.bf16.mxu1 %v17527_v39  ;;  %v17590_v39 = vld [vmem:[%s18607_s13 + $0x5a4] ss:$8 sps:$4 sm:$0xff]  }
 0x1bf   :  { %1591 = vmatpush1.bf16.msra.mxu1 %v17525_v43  ;;  %v17588_v43 = vld [vmem:[%s18607_s13 + $0x5a0] ss:$8 sps:$4 sm:$0xff]  }
 0x1c0   :  { %1592 = vmatprep.subr.bf16.mxu1 %v17530_v44  ;;  %v17593_v44 = vld [vmem:[%s18607_s13 + $0x5b4] ss:$8 sps:$4 sm:$0xff]  }
 0x1c3   :  { %1593 = vmatpush1.bf16.msra.mxu1 %v17528_v10  ;;  %v17591_v10 = vld [vmem:[%s18607_s13 + $0x5b0] ss:$8 sps:$4 sm:$0xff]  }
 0x1c4   :  { %1594 = vmatprep.subr.bf16.mxu1 %v17533_v29  ;;  %v17596_v29 = vld [vmem:[%s18607_s13 + $0x5c4] ss:$8 sps:$4 sm:$0xff]  }
 0x1c7   :  { %1595 = vmatpush1.bf16.msra.mxu1 %v17531_v33  ;;  %v17594_v33 = vld [vmem:[%s18607_s13 + $0x5c0] ss:$8 sps:$4 sm:$0xff]  }
 0x1c8   :  { %1596 = vmatprep.subr.bf16.mxu1 %v17536_v34  ;;  %v17599_v34 = vld [vmem:[%s18607_s13 + $0x5d4] ss:$8 sps:$4 sm:$0xff]  }
 0x1cb   :  { %1597 = vmatpush1.bf16.msra.mxu1 %v17534_v38  ;;  %v17597_v38 = vld [vmem:[%s18607_s13 + $0x5d0] ss:$8 sps:$4 sm:$0xff]  }
 0x1cc   :  { %1598 = vmatprep.subr.bf16.mxu1 %v17539_v40  ;;  %v17602_v40 = vld [vmem:[%s18607_s13 + $0x5e4] ss:$8 sps:$4 sm:$0xff]  }
 0x1cf   :  { %1599 = vmatpush1.bf16.msra.mxu1 %v17537_v45  ;;  %v17600_v45 = vld [vmem:[%s18607_s13 + $0x5e0] ss:$8 sps:$4 sm:$0xff]  }
 0x1d0   :  { %1600 = vmatprep.subr.bf16.mxu1 %v17542_v46  ;;  %v17605_v46 = vld [vmem:[%s18607_s13 + $0x5f4] ss:$8 sps:$4 sm:$0xff]  }
 0x1d3   :  { %1601 = vmatpush1.bf16.msra.mxu1 %v17540_v48  ;;  %v17603_v48 = vld [vmem:[%s18607_s13 + $0x5f0] ss:$8 sps:$4 sm:$0xff]  }
 0x1d4   :  { %1602 = vmatprep.subr.bf16.mxu1 %v17545_v50  ;;  %v17608_v50 = vld [vmem:[%s18607_s13 + $0x604] ss:$8 sps:$4 sm:$0xff]  }
 0x1d7   :  { %1603 = vmatpush1.bf16.msra.mxu1 %v17543_v58  ;;  %v17606_v58 = vld [vmem:[%s18607_s13 + $0x600] ss:$8 sps:$4 sm:$0xff]  }
 0x1d8   :  { %1604 = vmatprep.subr.bf16.mxu1 %v17548_v59  ;;  %v17611_v59 = vld [vmem:[%s18607_s13 + $0x614] ss:$8 sps:$4 sm:$0xff]  }
 0x1db   :  { %1605 = vmatpush1.bf16.msra.mxu1 %v17546_v61  ;;  %v17609_v61 = vld [vmem:[%s18607_s13 + $0x610] ss:$8 sps:$4 sm:$0xff]  }
 0x1dc   :  { %1606 = vmatprep.subr.bf16.mxu1 %v17551_v63  ;;  %v17614_v63 = vld [vmem:[%s18607_s13 + $0x624] ss:$8 sps:$4 sm:$0xff]  }
 0x1df   :  { %1607 = vmatpush1.bf16.msra.mxu1 %v17549_v7  ;;  %v17612_v7 = vld [vmem:[%s18607_s13 + $0x620] ss:$8 sps:$4 sm:$0xff]  }
 0x1e0   :  { %1608 = vmatprep.subr.bf16.mxu1 %v17554_v8  ;;  %v17617_v8 = vld [vmem:[%s18607_s13 + $0x634] ss:$8 sps:$4 sm:$0xff]  }
 0x1e3   :  { %1609 = vmatpush1.bf16.msra.mxu1 %v17552_v14  ;;  %v17624_v14 = vld [vmem:[%s18607_s13 + $0x660] ss:$8 sps:$4 sm:$0xff]  }
 0x1e4   :  { %1610 = vmatprep.subr.bf16.mxu1 %v17557_v16  ;;  %v17629_v16 = vld [vmem:[%s18607_s13 + $0x674] ss:$8 sps:$4 sm:$0xff]  }
 0x1e7   :  { %1611 = vmatpush1.bf16.msra.mxu1 %v17555_v18  ;;  %v17627_v18 = vld [vmem:[%s18607_s13 + $0x670] ss:$8 sps:$4 sm:$0xff]  }
 0x1e8   :  { %1822 = vmatprep.subr.bf16.mxu1 %v17560_v6  ;;  %v17632_v6 = vld [vmem:[%s18607_s13 + $0x684] ss:$8 sps:$4 sm:$0xff]  }
 0x1ea   :  { %1613 = vmatmul.mubr.bf16.vlgmr.msra.gmra.mrb[36].mxu1 %v1385_v42  ;;  %v17570_v42 = vld [vmem:[%s18607_s13 + $0x540] ss:$8 sps:$4 sm:$0xff]  }
 0x1eb   :  { %1823 = vmatpush1.bf16.msra.mxu1 %v17558_v13  ;;  %1854 = vmatprep.mubr.bf16.mxu1 %v1628_v57  ;;  %v17578_v57 = vld [vmem:[%s18607_s13 + $0x564] ss:$8 sps:$4 sm:$0xff]   ;;  %v17630_v13 = vld [vmem:[%s18607_s13 + $0x680] ss:$8 sps:$4 sm:$0xff]  }
 0x1ec   :  { %1824 = vmatprep.subr.bf16.mxu1 %v17563_v20  ;;  %v17635_v20 = vld [vmem:[%s18607_s13 + $0x694] ss:$8 sps:$4 sm:$0xff]  }
 0x1ef   :  { %1825 = vmatpush1.bf16.msra.mxu1 %v17561_v25  ;;  %v17633_v25 = vld [vmem:[%s18607_s13 + $0x690] ss:$8 sps:$4 sm:$0xff]  }
 0x1f0   :  { %1826 = vmatprep.subr.bf16.mxu1 %v17566_v26  ;;  %v17638_v26 = vld [vmem:[%s18607_s13 + $0x6a4] ss:$8 sps:$4 sm:$0xff]  }
 0x1f3   :  { %1827 = vmatpush1.bf16.msra.mxu1 %v17564_v28  ;;  %v17636_v28 = vld [vmem:[%s18607_s13 + $0x6a0] ss:$8 sps:$4 sm:$0xff]  }
 0x1f4   :  { %1828 = vmatprep.subr.bf16.mxu1 %v17569_v30  ;;  %v17641_v30 = vld [vmem:[%s18607_s13 + $0x6b4] ss:$8 sps:$4 sm:$0xff]  }
 0x1f7   :  { %1829 = vmatpush1.bf16.msra.mxu1 %v17567_v37  ;;  %v17639_v37 = vld [vmem:[%s18607_s13 + $0x6b0] ss:$8 sps:$4 sm:$0xff]  }
 0x1f8   :  { %1830 = vmatprep.subr.bf16.mxu1 %v17572_v41  ;;  %v17644_v41 = vld [vmem:[%s18607_s13 + $0x6c4] ss:$8 sps:$4 sm:$0xff]  }
 0x1fb   :  { %1831 = vmatpush1.bf16.msra.mxu1 %v17570_v42  ;;  %v17642_v42 = vld [vmem:[%s18607_s13 + $0x6c0] ss:$8 sps:$4 sm:$0xff]  }
 0x1fc   :  { %1832 = vmatprep.subr.bf16.mxu1 %v17575_v49  ;;  %v17647_v49 = vld [vmem:[%s18607_s13 + $0x6d4] ss:$8 sps:$4 sm:$0xff]  }
 0x1ff   :  { %1833 = vmatpush1.bf16.msra.mxu1 %v17573_v53  ;;  %v17645_v53 = vld [vmem:[%s18607_s13 + $0x6d0] ss:$8 sps:$4 sm:$0xff]  }
 0x200   :  { %1834 = vmatprep.subr.bf16.mxu1 %v17578_v57  ;;  %v17650_v57 = vld [vmem:[%s18607_s13 + $0x6e4] ss:$8 sps:$4 sm:$0xff]  }
 0x203   :  { %1835 = vmatpush1.bf16.msra.mxu1 %v17576_v35  ;;  %v17648_v35 = vld [vmem:[%s18607_s13 + $0x6e0] ss:$8 sps:$4 sm:$0xff]  }
 0x204   :  { %1836 = vmatprep.subr.bf16.mxu1 %v17581_v36  ;;  %v17653_v36 = vld [vmem:[%s18607_s13 + $0x6f4] ss:$8 sps:$4 sm:$0xff]  }
 0x207   :  { %1837 = vmatpush1.bf16.msra.mxu1 %v17579_v5  ;;  %v17651_v5 = vld [vmem:[%s18607_s13 + $0x6f0] ss:$8 sps:$4 sm:$0xff]  }
 0x208   :  { %1838 = vmatprep.subr.bf16.mxu1 %v17584_v9  ;;  %v17656_v9 = vld [vmem:[%s18607_s13 + $0x704] ss:$8 sps:$4 sm:$0xff]  }
 0x20b   :  { %1839 = vmatpush1.bf16.msra.mxu1 %v17582_v27  ;;  %v17654_v27 = vld [vmem:[%s18607_s13 + $0x700] ss:$8 sps:$4 sm:$0xff]  }
 0x20c   :  { %1840 = vmatprep.subr.bf16.mxu1 %v17587_v31  ;;  %v17659_v31 = vld [vmem:[%s18607_s13 + $0x714] ss:$8 sps:$4 sm:$0xff]  }
 0x20f   :  { %1841 = vmatpush1.bf16.msra.mxu1 %v17585_v32  ;;  %v17657_v32 = vld [vmem:[%s18607_s13 + $0x710] ss:$8 sps:$4 sm:$0xff]  }
 0x210   :  { %1842 = vmatprep.subr.bf16.mxu1 %v17590_v39  ;;  %v17662_v39 = vld [vmem:[%s18607_s13 + $0x724] ss:$8 sps:$4 sm:$0xff]  }
 0x213   :  { %1843 = vmatpush1.bf16.msra.mxu1 %v17588_v43  ;;  %v17660_v43 = vld [vmem:[%s18607_s13 + $0x720] ss:$8 sps:$4 sm:$0xff]  }
 0x214   :  { %1844 = vmatprep.subr.bf16.mxu1 %v17593_v44  ;;  %v17665_v44 = vld [vmem:[%s18607_s13 + $0x734] ss:$8 sps:$4 sm:$0xff]  }
 0x217   :  { %1845 = vmatpush1.bf16.msra.mxu1 %v17591_v10  ;;  %v17672_v10 = vld [vmem:[%s18607_s13 + $0x760] ss:$8 sps:$4 sm:$0xff]  }
 0x218   :  { %1846 = vmatprep.subr.bf16.mxu1 %v17596_v29  ;;  %v17677_v29 = vld [vmem:[%s18607_s13 + $0x774] ss:$8 sps:$4 sm:$0xff]  }
 0x21b   :  { %1847 = vmatpush1.bf16.msra.mxu1 %v17594_v33  ;;  %v17675_v33 = vld [vmem:[%s18607_s13 + $0x770] ss:$8 sps:$4 sm:$0xff]  }
 0x21c   :  { %1848 = vmatprep.subr.bf16.mxu1 %v17599_v34  ;;  %v17680_v34 = vld [vmem:[%s18607_s13 + $0x784] ss:$8 sps:$4 sm:$0xff]  }
 0x21f   :  { %1849 = vmatpush1.bf16.msra.mxu1 %v17597_v38  ;;  %v17678_v38 = vld [vmem:[%s18607_s13 + $0x780] ss:$8 sps:$4 sm:$0xff]  }
 0x220   :  { %1850 = vmatprep.subr.bf16.mxu1 %v17602_v40  ;;  %v17683_v40 = vld [vmem:[%s18607_s13 + $0x794] ss:$8 sps:$4 sm:$0xff]  }
 0x223   :  { %1851 = vmatpush1.bf16.msra.mxu1 %v17600_v45  ;;  %v17681_v45 = vld [vmem:[%s18607_s13 + $0x790] ss:$8 sps:$4 sm:$0xff]  }
 0x224   :  { %1852 = vmatprep.subr.bf16.mxu1 %v17605_v46  ;;  %v17686_v46 = vld [vmem:[%s18607_s13 + $0x7a4] ss:$8 sps:$4 sm:$0xff]  }
 0x227   :  { %1853 = vmatpush1.bf16.msra.mxu1 %v17603_v48  ;;  %v17684_v48 = vld [vmem:[%s18607_s13 + $0x7a0] ss:$8 sps:$4 sm:$0xff]  }
 0x228   :  { %2064 = vmatprep.subr.bf16.mxu1 %v17608_v50  ;;  %v17689_v50 = vld [vmem:[%s18607_s13 + $0x7b4] ss:$8 sps:$4 sm:$0xff]  }
 0x22a   :  { %1855 = vmatmul.mubr.bf16.vlgmr.msra.gmra.mrb[36].mxu1 %v1627_v52  ;;  %v17618_v52 = vld [vmem:[%s18607_s13 + $0x640] ss:$8 sps:$4 sm:$0xff]  }
 0x22b   :  { %2065 = vmatpush1.bf16.msra.mxu1 %v17606_v58  ;;  %2096 = vmatprep.mubr.bf16.mxu1 %v1870_v4  ;;  %v17626_v4 = vld [vmem:[%s18607_s13 + $0x664] ss:$8 sps:$4 sm:$0xff]   ;;  %v17687_v58 = vld [vmem:[%s18607_s13 + $0x7b0] ss:$8 sps:$4 sm:$0xff]  }
 0x22c   :  { %2066 = vmatprep.subr.bf16.mxu1 %v17611_v59  ;;  %v17692_v59 = vld [vmem:[%s18607_s13 + $0x7c4] ss:$8 sps:$4 sm:$0xff]  }
 0x22f   :  { %2067 = vmatpush1.bf16.msra.mxu1 %v17609_v61  ;;  %v17690_v61 = vld [vmem:[%s18607_s13 + $0x7c0] ss:$8 sps:$4 sm:$0xff]  }
 0x230   :  { %2068 = vmatprep.subr.bf16.mxu1 %v17614_v63  ;;  %v17695_v63 = vld [vmem:[%s18607_s13 + $0x7d4] ss:$8 sps:$4 sm:$0xff]  }
 0x233   :  { %2069 = vmatpush1.bf16.msra.mxu1 %v17612_v7  ;;  %v17693_v7 = vld [vmem:[%s18607_s13 + $0x7d0] ss:$8 sps:$4 sm:$0xff]  }
 0x234   :  { %2070 = vmatprep.subr.bf16.mxu1 %v17617_v8  ;;  %v17698_v8 = vld [vmem:[%s18607_s13 + $0x7e4] ss:$8 sps:$4 sm:$0xff]  }
 0x237   :  { %2071 = vmatpush1.bf16.msra.mxu1 %v17615_v47  ;;  %v17696_v47 = vld [vmem:[%s18607_s13 + $0x7e0] ss:$8 sps:$4 sm:$0xff]  }
 0x238   :  { %2072 = vmatprep.subr.bf16.mxu1 %v17620_v51  ;;  %v17701_v51 = vld [vmem:[%s18607_s13 + $0x7f4] ss:$8 sps:$4 sm:$0xff]  }
 0x23b   :  { %2073 = vmatpush1.bf16.msra.mxu1 %v17618_v52  ;;  %v17699_v52 = vld [vmem:[%s18607_s13 + $0x7f0] ss:$8 sps:$4 sm:$0xff]  }
 0x23c   :  { %2074 = vmatprep.subr.bf16.mxu1 %v17623_v62  ;;  %v17704_v62 = vld [vmem:[%s18607_s13 + $0x804] ss:$8 sps:$4 sm:$0xff]  }
 0x23f   :  { %2075 = vmatpush1.bf16.msra.mxu1 %v17621_v3  ;;  %v17702_v3 = vld [vmem:[%s18607_s13 + $0x800] ss:$8 sps:$4 sm:$0xff]  }
 0x240   :  { %2076 = vmatprep.subr.bf16.mxu1 %v17626_v4  ;;  %v17707_v4 = vld [vmem:[%s18607_s13 + $0x814] ss:$8 sps:$4 sm:$0xff]  }
 0x243   :  { %2077 = vmatpush1.bf16.msra.mxu1 %v17624_v14  ;;  %v17705_v14 = vld [vmem:[%s18607_s13 + $0x810] ss:$8 sps:$4 sm:$0xff]  }
 0x244   :  { %2078 = vmatprep.subr.bf16.mxu1 %v17629_v16  ;;  %v17710_v16 = vld [vmem:[%s18607_s13 + $0x824] ss:$8 sps:$4 sm:$0xff]  }
 0x247   :  { %2079 = vmatpush1.bf16.msra.mxu1 %v17627_v18  ;;  %v17708_v18 = vld [vmem:[%s18607_s13 + $0x820] ss:$8 sps:$4 sm:$0xff]  }
 0x248   :  { %2080 = vmatprep.subr.bf16.mxu1 %v17632_v6  ;;  %v17713_v6 = vld [vmem:[%s18607_s13 + $0x834] ss:$8 sps:$4 sm:$0xff]  }
 0x24b   :  { %2081 = vmatpush1.bf16.msra.mxu1 %v17630_v13  ;;  %v17720_v13 = vld [vmem:[%s18607_s13 + $0x860] ss:$8 sps:$4 sm:$0xff]  }
 0x24c   :  { %2082 = vmatprep.subr.bf16.mxu1 %v17635_v20  ;;  %v17725_v20 = vld [vmem:[%s18607_s13 + $0x874] ss:$8 sps:$4 sm:$0xff]  }
 0x24f   :  { %2083 = vmatpush1.bf16.msra.mxu1 %v17633_v25  ;;  %v17723_v25 = vld [vmem:[%s18607_s13 + $0x870] ss:$8 sps:$4 sm:$0xff]  }
 0x250   :  { %2084 = vmatprep.subr.bf16.mxu1 %v17638_v26  ;;  %v17728_v26 = vld [vmem:[%s18607_s13 + $0x884] ss:$8 sps:$4 sm:$0xff]  }
 0x253   :  { %2085 = vmatpush1.bf16.msra.mxu1 %v17636_v28  ;;  %v17726_v28 = vld [vmem:[%s18607_s13 + $0x880] ss:$8 sps:$4 sm:$0xff]  }
 0x254   :  { %2086 = vmatprep.subr.bf16.mxu1 %v17641_v30  ;;  %v17731_v30 = vld [vmem:[%s18607_s13 + $0x894] ss:$8 sps:$4 sm:$0xff]  }
 0x257   :  { %2087 = vmatpush1.bf16.msra.mxu1 %v17639_v37  ;;  %v17729_v37 = vld [vmem:[%s18607_s13 + $0x890] ss:$8 sps:$4 sm:$0xff]  }
 0x258   :  { %2088 = vmatprep.subr.bf16.mxu1 %v17644_v41  ;;  %v17734_v41 = vld [vmem:[%s18607_s13 + $0x8a4] ss:$8 sps:$4 sm:$0xff]  }
 0x25b   :  { %2089 = vmatpush1.bf16.msra.mxu1 %v17642_v42  ;;  %v17732_v42 = vld [vmem:[%s18607_s13 + $0x8a0] ss:$8 sps:$4 sm:$0xff]  }
 0x25c   :  { %2090 = vmatprep.subr.bf16.mxu1 %v17647_v49  ;;  %v17737_v49 = vld [vmem:[%s18607_s13 + $0x8b4] ss:$8 sps:$4 sm:$0xff]  }
 0x25f   :  { %2091 = vmatpush1.bf16.msra.mxu1 %v17645_v53  ;;  %v17735_v53 = vld [vmem:[%s18607_s13 + $0x8b0] ss:$8 sps:$4 sm:$0xff]  }
 0x260   :  { %2092 = vmatprep.subr.bf16.mxu1 %v17650_v57  ;;  %v17740_v57 = vld [vmem:[%s18607_s13 + $0x8c4] ss:$8 sps:$4 sm:$0xff]  }
 0x263   :  { %2093 = vmatpush1.bf16.msra.mxu1 %v17648_v35  ;;  %v17738_v35 = vld [vmem:[%s18607_s13 + $0x8c0] ss:$8 sps:$4 sm:$0xff]  }
 0x264   :  { %2094 = vmatprep.subr.bf16.mxu1 %v17653_v36  ;;  %v17743_v36 = vld [vmem:[%s18607_s13 + $0x8d4] ss:$8 sps:$4 sm:$0xff]  }
 0x267   :  { %2095 = vmatpush1.bf16.msra.mxu1 %v17651_v5  ;;  %v17741_v5 = vld [vmem:[%s18607_s13 + $0x8d0] ss:$8 sps:$4 sm:$0xff]  }
 0x268   :  { %2306 = vmatprep.subr.bf16.mxu1 %v17656_v9  ;;  %v17746_v9 = vld [vmem:[%s18607_s13 + $0x8e4] ss:$8 sps:$4 sm:$0xff]  }
 0x26a   :  { %2097 = vmatmul.mubr.bf16.vlgmr.msra.gmra.mrb[36].mxu1 %v1869_v2  ;;  %v17666_v2 = vld [vmem:[%s18607_s13 + $0x740] ss:$8 sps:$4 sm:$0xff]  }
 0x26b   :  { %2307 = vmatpush1.bf16.msra.mxu1 %v17654_v27  ;;  %2338 = vmatprep.mubr.bf16.mxu1 %v2112_v56  ;;  %v17674_v56 = vld [vmem:[%s18607_s13 + $0x764] ss:$8 sps:$4 sm:$0xff]   ;;  %v17744_v27 = vld [vmem:[%s18607_s13 + $0x8e0] ss:$8 sps:$4 sm:$0xff]  }
 0x26c   :  { %2308 = vmatprep.subr.bf16.mxu1 %v17659_v31  ;;  %v17749_v31 = vld [vmem:[%s18607_s13 + $0x8f4] ss:$8 sps:$4 sm:$0xff]  }
 0x26f   :  { %2309 = vmatpush1.bf16.msra.mxu1 %v17657_v32  ;;  %v17747_v32 = vld [vmem:[%s18607_s13 + $0x8f0] ss:$8 sps:$4 sm:$0xff]  }
 0x270   :  { %2310 = vmatprep.subr.bf16.mxu1 %v17662_v39 }
 0x273   :  { %2311 = vmatpush1.bf16.msra.mxu1 %v17660_v43 }
 0x274   :  { %2312 = vmatprep.subr.bf16.mxu1 %v17665_v44 }
 0x277   :  { %2313 = vmatpush1.bf16.msra.mxu1 %v17663_v60 }
 0x278   :  { %2314 = vmatprep.subr.bf16.mxu1 %v17668_v1 }
 0x27b   :  { %2315 = vmatpush1.bf16.msra.mxu1 %v17666_v2 }
 0x27c   :  { %2316 = vmatprep.subr.bf16.mxu1 %v17671_v15 }
 0x27f   :  { %2317 = vmatpush1.bf16.msra.mxu1 %v17669_v55 }
 0x280   :  { %2318 = vmatprep.subr.bf16.mxu1 %v17674_v56 }
 0x283   :  { %2319 = vmatpush1.bf16.msra.mxu1 %v17672_v10 }
 0x284   :  { %2320 = vmatprep.subr.bf16.mxu1 %v17677_v29 }
 0x287   :  { %2321 = vmatpush1.bf16.msra.mxu1 %v17675_v33 }
 0x288   :  { %2322 = vmatprep.subr.bf16.mxu1 %v17680_v34 }
 0x28b   :  { %2323 = vmatpush1.bf16.msra.mxu1 %v17678_v38  ;;  %v2616_v38 = vld [vmem:[%s13864_s17] sm:$0xff] }
 0x28c   :  { %2324 = vmatprep.subr.bf16.mxu1 %v17683_v40  ;;  %16366 = vmatprep.mubr.msk.f32.mxu0 %vm2618_vm2, %v2616_v38  ;;  %v21606_v40 = vmov 0  }
 0x28d   :  { %17317 = vset.pattern.permute.xlu1 %v21606_v40  ;;  %17316 = vset.pattern.permute.xlu0 %v21606_v40 }
 0x28f   :  { %2325 = vmatpush1.bf16.msra.mxu1 %v17681_v45 }
 0x290   :  { %2326 = vmatprep.subr.bf16.mxu1 %v17686_v46 }
 0x293   :  { %2327 = vmatpush1.bf16.msra.mxu1 %v17684_v48 }
 0x294   :  { %2328 = vmatprep.subr.bf16.mxu1 %v17689_v50 }
 0x297   :  { %2329 = vmatpush1.bf16.msra.mxu1 %v17687_v58 }
 0x298   :  { %2330 = vmatprep.subr.bf16.mxu1 %v17692_v59 }
 0x29b   :  { %2331 = vmatpush1.bf16.msra.mxu1 %v17690_v61  ;;  %v2617_v61 = vld [vmem:[%s13864_s17 + $0x8] sm:$0xff]  ;;  %s13878_s17 = sld [smem:[%s21603_s0 + %s18562_s14]]   ;;  %s18578_s14 = smov 31  }
 0x29c   :  { %2332 = vmatprep.subr.bf16.mxu1 %v17695_v63 }
 0x29f   :  { %2333 = vmatpush1.bf16.msra.mxu1 %v17693_v7 }
 0x2a0   :  { %2334 = vmatprep.subr.bf16.mxu1 %v17698_v8  ;;  %v2811_v8 = vld [vmem:[%s13865_s21] sm:$0xff] }
 0x2a3   :  { %2335 = vmatpush1.bf16.msra.mxu1 %v17696_v47 }
 0x2a4   :  { %2336 = vmatprep.subr.bf16.mxu1 %v17701_v51 }
 0x2a7   :  { %2337 = vmatpush1.bf16.msra.mxu1 %v17699_v52 }
 0x2a8   :  { %2548 = vmatprep.subr.bf16.mxu1 %v17704_v62 }
 0x2aa   :  { %2339 = vmatmul.mubr.bf16.vlgmr.msra.gmra.mrb[36].mxu1 %v2111_v54  ;;  %v17714_v54 = vld [vmem:[%s18607_s13 + $0x840] ss:$8 sps:$4 sm:$0xff]  }
 0x2ab   :  { %2549 = vmatpush1.bf16.msra.mxu1 %v17702_v3  ;;  %2580 = vmatprep.mubr.bf16.mxu1 %v2354_v24  ;;  %v17722_v24 = vld [vmem:[%s18607_s13 + $0x864] ss:$8 sps:$4 sm:$0xff]   ;;  %s20591_s13 = sld [smem:[%s21603_s0 + %s18561_s10]]   ;;  %s18577_s10 = smov 32  }
 0x2ac   :  { %2550 = vmatprep.subr.bf16.mxu1 %v17707_v4 }
 0x2af   :  { %2551 = vmatpush1.bf16.msra.mxu1 %v17705_v14  ;;  %v2812_v14 = vld [vmem:[%s13865_s21 + $0x8] sm:$0xff]  ;;  %s20629_s21 = sld [smem:[%s21603_s0 + %s18563_s18]]   ;;  %s18579_s18 = smov 33  }
 0x2b0   :  { %2552 = vmatprep.subr.bf16.mxu1 %v17710_v16 }
 0x2b3   :  { %2553 = vmatpush1.bf16.msra.mxu1 %v17708_v18 }
 0x2b4   :  { %2554 = vmatprep.subr.bf16.mxu1 %v17713_v6  ;;  %v2827_v6 = vld [vmem:[%s13866_s25] sm:$0xff] }
 0x2b7   :  { %2555 = vmatpush1.bf16.msra.mxu1 %v17711_v12 }
 0x2b8   :  { %2556 = vmatprep.subr.bf16.mxu1 %v17716_v17 }
 0x2bb   :  { %2557 = vmatpush1.bf16.msra.mxu1 %v17714_v54  ;;  %v2828_v54 = vld [vmem:[%s13866_s25 + $0x8] sm:$0xff]  ;;  %s13879_s25 = sld [smem:[%s21603_s0 + %s18564_s22]]   ;;  %s18580_s22 = smov 35  }
 0x2bc   :  { %2558 = vmatprep.subr.bf16.mxu1 %v17719_v19 }
 0x2bf   :  { %2559 = vmatpush1.bf16.msra.mxu1 %v17717_v23 }
 0x2c0   :  { %2560 = vmatprep.subr.bf16.mxu1 %v17722_v24 }
 0x2c3   :  { %2561 = vmatpush1.bf16.msra.mxu1 %v17720_v13 }
 0x2c4   :  { %2562 = vmatprep.subr.bf16.mxu1 %v17725_v20 }
 0x2c7   :  { %2563 = vmatpush1.bf16.msra.mxu1 %v17723_v25 }
 0x2c8   :  { %2564 = vmatprep.subr.bf16.mxu1 %v17728_v26 }
 0x2cb   :  { %2565 = vmatpush1.bf16.msra.mxu1 %v17726_v28 }
 0x2cc   :  { %2566 = vmatprep.subr.bf16.mxu1 %v17731_v30 }
 0x2cf   :  { %2567 = vmatpush1.bf16.msra.mxu1 %v17729_v37 }
 0x2d0   :  { %2568 = vmatprep.subr.bf16.mxu1 %v17734_v41 }
 0x2d3   :  { %2569 = vmatpush1.bf16.msra.mxu1 %v17732_v42 }
 0x2d4   :  { %2570 = vmatprep.subr.bf16.mxu1 %v17737_v49 }
 0x2d7   :  { %2571 = vmatpush1.bf16.msra.mxu1 %v17735_v53 }
 0x2d8   :  { %2572 = vmatprep.subr.bf16.mxu1 %v17740_v57 }
 0x2db   :  { %2573 = vmatpush1.bf16.msra.mxu1 %v17738_v35 }
 0x2dc   :  { %2574 = vmatprep.subr.bf16.mxu1 %v17743_v36 }
 0x2df   :  { %2575 = vmatpush1.bf16.msra.mxu1 %v17741_v5 }
 0x2e0   :  { %2576 = vmatprep.subr.bf16.mxu1 %v17746_v9 }
 0x2e3   :  { %2577 = vmatpush1.bf16.msra.mxu1 %v17744_v27 }
 0x2e4   :  { %2578 = vmatprep.subr.bf16.mxu1 %v17749_v31 }
 0x2e7   :  { %2579 = vmatpush1.bf16.msra.mxu1 %v17747_v32 }
 0x2ea   :  { %2581 = vmatmul.mubr.bf16.vlgmr.msra.gmra.mrb[36].mxu1 %v2353_v22 }
 0x3bd   :  { %v19084_v39 = vpop.f32.mrb[36].mxu1 }
 0x3be   :  { %v19086_v43 = vpop.f32.mrb[37].mxu1  ;;  %v2604_v11 = vmul.f32 %v19084_v39, %v19084_v39 }
 0x3bf   :  { %v19088_v44 = vpop.f32.mrb[38].mxu1  ;;  %v2596_v60 = vsel %vm2595_vm1, %v19086_v43, 0.0  ;;  %v2605_v1 = vmul.f32 %v19086_v43, %v19086_v43 }
 0x3c0   :  { %v19094_v2 = vpop.f32.mrb[39].mxu1  ;;  %v2597_v15 = vadd.f32 %v2596_v60, %v19084_v39  ;;  %v2606_v29 = vmul.f32 %v19088_v44, %v19088_v44 }
 0x3c1   :  { %v2607_v21 = vmul.f32 %v19094_v2, %v19094_v2  ;;  %v2608_v22 = vsel %vm2595_vm1, %v2605_v1, 0.0  ;;  %v2600_v55 = vsel %vm2595_vm1, %v19094_v2, 0.0 }
 0x3c2   :  { %2598 = vadd.xlane.f32.xlu0 %v2597_v15  ;;  %v2609_v56 = vadd.f32 %v2608_v22, %v2604_v11  ;;  %v2601_v10 = vadd.f32 %v2600_v55, %v19088_v44 }
 0x3c3   :  { %v2612_v33 = vsel %vm2595_vm1, %v2607_v21, 0.0 }
 0x3c4   :  { %2610 = vadd.xlane.f32.xlu1 %v2609_v56  ;;  %v2613_v34 = vadd.f32 %v2612_v33, %v2606_v29 }
 0x3c6   :  { %2602 = vadd.xlane.f32.xlu0 %v2601_v10 }
 0x3c8   :  { %2614 = vadd.xlane.f32.xlu1 %v2613_v34 }
 0x44f   :  { %v2599_v45 = vpop.xlane.xlu0 %2598 }
 0x451   :  { %v2611_v46 = vpop.xlane.xlu1 %2610 }
 0x453   :  { %v2603_v48 = vpop.xlane.xlu0 %2602 }
 0x454   :  { %v16800_v50 = vpack.c.bf16 %v2603_v48, %v2599_v45 }
 0x455   :  { %v2615_v58 = vpop.xlane.xlu1 %2614 }
 0x456   :  { %v16804_v59 = vpack.c.bf16 %v2615_v58, %v2611_v46  ;;  %16801 = vmatprep.subr.bf16.mxu0 %v16800_v50 }
 0x457   :  { %16803 = vmatpush3.bf16.msra.mxu0 %v16800_v50 }
 0x458   :  { %16805 = vmatprep.subr.bf16.mxu0 %v16804_v59 }
 0x45a   :  { %16367 = vmatmul.mubr.msk.f32.vlgmr.msra.gmra.mrb[2].mxu0 %vm2618_vm2, %v2617_v61 }
 0x45b   :  { %16807 = vmatpush3.bf16.msra.mxu0 %v16804_v59  ;;  %16373 = vmatprep.mubr.msk.f32.mxu0 %vm2618_vm2, %v2616_v38 }
 0x45e   :  { %16374 = vmatmul.mubr.msk.f32.vlgmr.msra.gmra.mrb[4].mxu0 %vm2618_vm2, %v2617_v61 }
 0x45f   :  { %3199 = vmatprep.mubr.f32.mxu0 %v21604_v0 }
 0x52d   :  { %v16368_v63 = vpop.f32.mrb[2].mxu0 }
 0x52e   :  { %2786 = vperm.xlu1 %17317, %v16368_v63   ;;  %v2691_v7 = vpop.f32.mrb[3].mxu0  ;;  %v2776_v47 = vmul.f32 %v16368_v63, %v16368_v63 }
 0x52f   :  { %2781 = vperm.xlu0 %17316, %v2691_v7   ;;  %v2775_v51 = vmul.f32 %v2691_v7, %v2691_v7 }
 0x531   :  { %v16375_v52 = vpop.f32.mrb[4].mxu0 }
 0x532   :  { %v2778_v62 = vsub.f32 %v16375_v52, %v2776_v47  ;;  %2815 = vperm.xlu1 %17317, %v2811_v8   ;;  %v2766_v3 = vpop.f32.mrb[5].mxu0 }
 0x533   :  { %v2777_v4 = vsub.f32 %v2766_v3, %v2775_v51 }
 0x534   :  { %v2794_v16 = vadd.f32 1e-05, %v2778_v62 }
 0x535   :  { %v2793_v18 = vadd.f32 1e-05, %v2777_v4 }
 0x536   :  { %18464 = vrsqrt.f32 %v2794_v16  ;;  %2820 = vperm.xlu1 %17317, %v2812_v14  }
 0x537   :  { %18466 = vrsqrt.f32 %v2793_v18 }
 0x53a   :  { %2831 = vperm.xlu1 %17317, %v2827_v6  }
 0x540   :  { %v18465_v12 = vpop.eup %18464 }
 0x541   :  { %2804 = vperm.xlu1 %17317, %v18465_v12   ;;  %v18467_v17 = vpop.eup %18466 }
 0x545   :  { %2799 = vperm.xlu1 %17317, %v18467_v17  }
 0x549   :  { %2836 = vperm.xlu1 %17317, %v2828_v54  }
 0x5ad   :  { %v2787_v19 = vpop.permute.xlu1 %2786 }
 0x5ae   :  { %v2782_v20 = vpop.permute.xlu0 %2781  ;;  %v2791_v26 = vsub.f32 %v19088_v44, %v2787_v19  ;;  %v2792_v28 = vsub.f32 %v19094_v2, %v2787_v19  ;;  %v2879_v19 = vld [vmem:[%s19136_s3] sm:$0xff] }
 0x5af   :  { %v2789_v30 = vsub.f32 %v19084_v39, %v2782_v20  ;;  %v2790_v37 = vsub.f32 %v19086_v43, %v2782_v20  ;;  %v2881_v20 = vld [vmem:[%s19136_s3 + $0x10] sm:$0xff] }
 0x5b1   :  { %v2816_v23 = vpop.permute.xlu1 %2815 }
 0x5b5   :  { %v2821_v24 = vpop.permute.xlu1 %2820 }
 0x5b9   :  { %v2832_v13 = vpop.permute.xlu1 %2831 }
 0x5c0   :  { %v2805_v25 = vpop.permute.xlu1 %2804 }
 0x5c1   :  { %v2809_v41 = vmul.f32 %v2805_v25, %v2791_v26  ;;  %v2810_v42 = vmul.f32 %v2805_v25, %v2792_v28  ;;  %v17752_v25 = vld [vmem:[%s19127_s29 + $0x74] sm:$0xff]   ;;  %v17753_v28 = vld [vmem:[%s19127_s29 + $0x7c] sm:$0xff]  }
 0x5c2   :  { %v2882_v26 = vld [vmem:[%s19136_s3 + $0x18] sm:$0xff] }
 0x5c3   :  { %v2825_v5 = vmul.f32 %v2821_v24, %v2809_v41  ;;  %v2826_v9 = vmul.f32 %v2821_v24, %v2810_v42  ;;  %v2880_v24 = vld [vmem:[%s19136_s3 + $0x8] sm:$0xff] }
 0x5c4   :  { %v2800_v49 = vpop.permute.xlu1 %2799  ;;  %v2884_v41 = vld [vmem:[%s19136_s3 + $0x28] sm:$0xff] }
 0x5c5   :  { %v2807_v53 = vmul.f32 %v2800_v49, %v2789_v30  ;;  %v2808_v57 = vmul.f32 %v2800_v49, %v2790_v37  ;;  %v2883_v30 = vld [vmem:[%s19136_s3 + $0x20] sm:$0xff]  ;;  %v17755_v42 = vld [vmem:[%s19127_s29 + $0x8c] sm:$0xff]  }
 0x5c6   :  { %v17754_v37 = vld [vmem:[%s19127_s29 + $0x84] sm:$0xff]   ;;  %v2885_v49 = vld [vmem:[%s19136_s3 + $0x30] sm:$0xff] }
 0x5c7   :  { %v2823_v35 = vmul.f32 %v2816_v23, %v2807_v53  ;;  %v2824_v36 = vmul.f32 %v2816_v23, %v2808_v57  ;;  %v17750_v23 = vld [vmem:[%s19127_s29 + $0x64] sm:$0xff]   ;;  %v17756_v53 = vld [vmem:[%s19127_s29 + $0x94] sm:$0xff]  }
 0x5c8   :  { %v2837_v27 = vpop.permute.xlu1 %2836  ;;  %v2886_v57 = vld [vmem:[%s19136_s3 + $0x38] sm:$0xff] }
 0x5c9   :  { %v2839_v31 = vadd.f32 %v2832_v13, %v2823_v35  ;;  %v2840_v32 = vadd.f32 %v2832_v13, %v2824_v36  ;;  %v2841_v60 = vadd.f32 %v2837_v27, %v2825_v5  ;;  %v2842_v44 = vadd.f32 %v2837_v27, %v2826_v9  ;;  %v17751_v13 = vld [vmem:[%s19127_s29 + $0x6c] sm:$0xff]   ;;  %v17757_v35 = vld [vmem:[%s19127_s29 + $0x9c] sm:$0xff]   ;;  %v17758_v9 = vld [vmem:[%s19127_s29 + $0xa4] sm:$0xff]  }
 0x5ca   :  { %v2887_v36 = vld [vmem:[%s19136_s3 + $0x40] sm:$0xff]  ;;  %v2888_v5 = vld [vmem:[%s19136_s3 + $0x48] sm:$0xff]  ;;  %v2889_v27 = vld [vmem:[%s19136_s3 + $0x50] sm:$0xff] }
 0x5cb   :  { %v2847_v1 = vmul.f32 0.044715, %v2839_v31  ;;  %v2849_v2 = vmul.f32 0.044715, %v2841_v60  ;;  %v2850_v15 = vmul.f32 0.044715, %v2842_v44 }
 0x5cc   :  { %v2848_v39 = vmul.f32 0.044715, %v2840_v32  ;;  %v2846_v63 = vmul.f32 0.5, %v2842_v44  ;;  %v2844_v47 = vmul.f32 0.5, %v2840_v32  ;;  %v2843_v3 = vmul.f32 0.5, %v2839_v31 }
 0x5cd   :  { %v2851_v11 = vmul.f32 %v2847_v1, %v2839_v31  ;;  %v2853_v43 = vmul.f32 %v2849_v2, %v2841_v60  ;;  %v2854_v21 = vmul.f32 %v2850_v15, %v2842_v44  ;;  %v2845_v16 = vmul.f32 0.5, %v2841_v60  ;;  %v17759_v1 = vld [vmem:[%s19127_s29 + $0xac] sm:$0xff]   ;;  %v2894_v2 = vld [vmem:[%s19136_s3 + $0x78] sm:$0xff]  ;;  %v2895_v15 = vld [vmem:[%s19136_s3 + $0x80] sm:$0xff] }
 0x5ce   :  { %v2852_v22 = vmul.f32 %v2848_v39, %v2840_v32  ;;  %v2896_v39 = vld [vmem:[%s19136_s3 + $0x88] sm:$0xff] }
 0x5cf   :  { %v2857_v55 = vmul.f32 %v2853_v43, %v2841_v60  ;;  %v2858_v56 = vmul.f32 %v2854_v21, %v2842_v44  ;;  %v2855_v10 = vmul.f32 %v2851_v11, %v2839_v31  ;;  %v2897_v11 = vld [vmem:[%s19136_s3 + $0x90] sm:$0xff]  ;;  %v2898_v21 = vld [vmem:[%s19136_s3 + $0x98] sm:$0xff] }
 0x5d0   :  { %v2856_v29 = vmul.f32 %v2852_v22, %v2840_v32  ;;  %v17760_v43 = vld [vmem:[%s19127_s29 + $0xb4] sm:$0xff]   ;;  %v2899_v22 = vld [vmem:[%s19136_s3 + $0xa0] sm:$0xff] }
 0x5d1   :  { %v2861_v33 = vadd.f32 %v2857_v55, %v2841_v60  ;;  %v2862_v34 = vadd.f32 %v2858_v56, %v2842_v44  ;;  %v2859_v38 = vadd.f32 %v2855_v10, %v2839_v31  ;;  %v2890_v31 = vld [vmem:[%s19136_s3 + $0x58] sm:$0xff]  ;;  %v2892_v60 = vld [vmem:[%s19136_s3 + $0x68] sm:$0xff]  ;;  %v2893_v44 = vld [vmem:[%s19136_s3 + $0x70] sm:$0xff] }
 0x5d2   :  { %v2860_v45 = vadd.f32 %v2856_v29, %v2840_v32  ;;  %v2891_v32 = vld [vmem:[%s19136_s3 + $0x60] sm:$0xff]  ;;  %v2900_v55 = vld [vmem:[%s19136_s3 + $0xa8] sm:$0xff]  ;;  %v2901_v56 = vld [vmem:[%s19136_s3 + $0xb0] sm:$0xff] }
 0x5d3   :  { %v2866_v46 = vmul.f32 0.7978846, %v2862_v34  ;;  %v2863_v48 = vmul.f32 0.7978846, %v2859_v38  ;;  %v2865_v58 = vmul.f32 0.7978846, %v2861_v33 }
 0x5d4   :  { %v2864_v50 = vmul.f32 0.7978846, %v2860_v45  ;;  %v2902_v10 = vld [vmem:[%s19136_s3 + $0xb8] sm:$0xff]  ;;  %v2903_v33 = vld [vmem:[%s19136_s3 + $0xc0] sm:$0xff]  ;;  %v2904_v34 = vld [vmem:[%s19136_s3 + $0xc8] sm:$0xff] }
 0x5d5   :  { %18468 = vtanh.f32 %v2866_v46  ;;  %v17761_v29 = vld [vmem:[%s19127_s29 + $0xbc] sm:$0xff]   ;;  %v2905_v38 = vld [vmem:[%s19136_s3 + $0xd0] sm:$0xff] }
 0x5d6   :  { %18470 = vtanh.f32 %v2864_v50  ;;  %v2906_v45 = vld [vmem:[%s19136_s3 + $0xd8] sm:$0xff]  ;;  %v2907_v46 = vld [vmem:[%s19136_s3 + $0xe0] sm:$0xff] }
 0x5d7   :  { %18472 = vtanh.f32 %v2863_v48  ;;  %v2908_v48 = vld [vmem:[%s19136_s3 + $0xe8] sm:$0xff]  ;;  %v17762_v50 = vld [vmem:[%s19127_s29 + $0xc4] ss:$0 sps:$4 sm:$0x33]  }
 0x5d8   :  { %18474 = vtanh.f32 %v2865_v58  ;;  %v3726_v58 = vsel %vm3724_vm3, %v17762_v50, 0 }
 0x5df   :  { %v18469_v59 = vpop.eup %18468 }
 0x5e0   :  { %v18471_v61 = vpop.eup %18470  ;;  %v2874_v7 = vadd.f32 1.0, %v18469_v59  ;;  %v2909_v59 = vld [vmem:[%s19136_s3 + $0xf0] sm:$0xff] }
 0x5e1   :  { %v18473_v8 = vpop.eup %18472  ;;  %v2872_v51 = vadd.f32 1.0, %v18471_v61  ;;  %v2910_v61 = vld [vmem:[%s19136_s3 + $0xf8] sm:$0xff] }
 0x5e2   :  { %v18475_v52 = vpop.eup %18474  ;;  %v2878_v62 = vmul.f32 %v2874_v7, %v2846_v63  ;;  %v2871_v4 = vadd.f32 1.0, %v18473_v8  ;;  %v2911_v63 = vld [vmem:[%s19136_s3 + $0x100] sm:$0xff]  ;;  %v2912_v7 = vld [vmem:[%s19136_s3 + $0x108] sm:$0xff]  ;;  %v2913_v8 = vld [vmem:[%s19136_s3 + $0x110] sm:$0xff] }
 0x5e3   :  { %v2876_v14 = vmul.f32 %v2872_v51, %v2844_v47  ;;  %v2873_v18 = vadd.f32 1.0, %v18475_v52  ;;  %v2914_v47 = vld [vmem:[%s19136_s3 + $0x118] sm:$0xff]  ;;  %v2915_v51 = vld [vmem:[%s19136_s3 + $0x120] sm:$0xff]  ;;  %v2916_v52 = vld [vmem:[%s19136_s3 + $0x128] sm:$0xff] }
 0x5e4   :  { %v2875_v6 = vmul.f32 %v2871_v4, %v2843_v3  ;;  %v2918_v3 = vld [vmem:[%s19136_s3 + $0x138] sm:$0xff]  ;;  %v2919_v4 = vld [vmem:[%s19136_s3 + $0x140] sm:$0xff] }
 0x5e5   :  { %v16808_v12 = vpack.c.bf16 %v2878_v62, %v2876_v14  ;;  %v2877_v17 = vmul.f32 %v2873_v18, %v2845_v16  ;;  %v2917_v62 = vld [vmem:[%s19136_s3 + $0x130] sm:$0xff]  ;;  %v2920_v14 = vld [vmem:[%s19136_s3 + $0x148] sm:$0xff]  ;;  %v2922_v18 = vld [vmem:[%s19136_s3 + $0x158] sm:$0xff] }
 0x5e6   :  { %v2921_v16 = vld [vmem:[%s19136_s3 + $0x150] sm:$0xff] }
 0x5e7   :  { %16809 = vmatprep.subr.bf16.mxu0 %v16808_v12  ;;  %v16810_v54 = vpack.c.bf16 %v2877_v17, %v2875_v6  ;;  %v2923_v6 = vld [vmem:[%s19136_s3 + $0x160] sm:$0xff]  ;;  %v2924_v12 = vld [vmem:[%s19136_s3 + $0x168] sm:$0xff]  ;;  %v2925_v17 = vld [vmem:[%s19136_s3 + $0x170] sm:$0xff] }
 0x5e9   :  { %16811 = vmatpush1.bf16.msra.mxu0 %v16810_v54  ;;  %v2926_v54 = vld [vmem:[%s19136_s3 + $0x178] sm:$0xff] }
 0x5ea   :  { %3728 = vmatprep.subr.bf16.mxu0 %v21606_v40 }
 0x5ec   :  { %14470 = vmatmul.mubr.msk.f32.vlgmr.msra.gmra.mrb[6].mxu0 %vm2618_vm2, %v2879_v19  ;;  %v2927_v19 = vld [vmem:[%s19136_s3 + $0x180] sm:$0xff] }
 0x5ed   :  { %3205 = vmatprep.mubr.f32.mxu0 %v21604_v0  ;;  %3729 = vmatpush1.bf16.msra.mxu0 %v17750_v23  ;;  %v2928_v23 = vld [vmem:[%s19136_s3 + $0x188] sm:$0xff] }
 0x5ee   :  { %3730 = vmatprep.subr.bf16.mxu0 %v21606_v40 }
 0x5f0   :  { %14471 = vmatmul.mubr.msk.f32.gmra.mrb[8].mxu0 %vm2618_vm2, %v2880_v24  ;;  %v2929_v24 = vld [vmem:[%s19136_s3 + $0x190] sm:$0xff] }
 0x5f1   :  { %3211 = vmatprep.mubr.f32.mxu0 %v21604_v0  ;;  %3731 = vmatpush1.bf16.msra.mxu0 %v17751_v13  ;;  %v2930_v13 = vld [vmem:[%s19136_s3 + $0x198] sm:$0xff] }
 0x5f2   :  { %3732 = vmatprep.subr.bf16.mxu0 %v21606_v40 }
 0x5f4   :  { %14472 = vmatmul.mubr.msk.f32.gmra.mrb[10].mxu0 %vm2618_vm2, %v2881_v20  ;;  %v2931_v20 = vld [vmem:[%s19136_s3 + $0x1a0] sm:$0xff] }
 0x5f5   :  { %3217 = vmatprep.mubr.f32.mxu0 %v21604_v0  ;;  %3733 = vmatpush1.bf16.msra.mxu0 %v17752_v25  ;;  %v2932_v25 = vld [vmem:[%s19136_s3 + $0x1a8] sm:$0xff] }
 0x5f6   :  { %3734 = vmatprep.subr.bf16.mxu0 %v21606_v40 }
 0x5f8   :  { %14473 = vmatmul.mubr.msk.f32.gmra.mrb[12].mxu0 %vm2618_vm2, %v2882_v26 }
 0x5f9   :  { %3223 = vmatprep.mubr.f32.mxu0 %v21604_v0  ;;  %3735 = vmatpush1.bf16.msra.mxu0 %v17753_v28 }
 0x5fa   :  { %3736 = vmatprep.subr.bf16.mxu0 %v21606_v40 }
 0x5fc   :  { %14474 = vmatmul.mubr.msk.f32.gmra.mrb[14].mxu0 %vm2618_vm2, %v2883_v30  ;;  %v2933_v30 = vld [vmem:[%s19136_s3 + $0x1b0] sm:$0xff] }
 0x5fd   :  { %3229 = vmatprep.mubr.f32.mxu0 %v21604_v0  ;;  %3737 = vmatpush1.bf16.msra.mxu0 %v17754_v37 }
 0x5fe   :  { %3738 = vmatprep.subr.bf16.mxu0 %v21606_v40 }
 0x600   :  { %14475 = vmatmul.mubr.msk.f32.gmra.mrb[16].mxu0 %vm2618_vm2, %v2884_v41 }
 0x601   :  { %3235 = vmatprep.mubr.f32.mxu0 %v21604_v0  ;;  %3739 = vmatpush1.bf16.msra.mxu0 %v17755_v42 }
 0x602   :  { %3740 = vmatprep.subr.bf16.mxu0 %v21606_v40 }
 0x604   :  { %14476 = vmatmul.mubr.msk.f32.gmra.mrb[18].mxu0 %vm2618_vm2, %v2885_v49 }
 0x605   :  { %3241 = vmatprep.mubr.f32.mxu0 %v21604_v0  ;;  %3741 = vmatpush1.bf16.msra.mxu0 %v17756_v53  ;;  %v2934_v53 = vld [vmem:[%s19136_s3 + $0x1b8] sm:$0xff] }
 0x606   :  { %3742 = vmatprep.subr.bf16.mxu0 %v21606_v40 }
 0x608   :  { %14477 = vmatmul.mubr.msk.f32.gmra.mrb[20].mxu0 %vm2618_vm2, %v2886_v57 }
 0x609   :  { %3247 = vmatprep.mubr.f32.mxu0 %v21604_v0  ;;  %3743 = vmatpush1.bf16.msra.mxu0 %v17757_v35 }
 0x60a   :  { %3744 = vmatprep.subr.bf16.mxu0 %v21606_v40 }
 0x60c   :  { %14478 = vmatmul.mubr.msk.f32.gmra.mrb[22].mxu0 %vm2618_vm2, %v2887_v36  ;;  %v2935_v36 = vld [vmem:[%s19136_s3 + $0x1c0] sm:$0xff] }
 0x60d   :  { %3253 = vmatprep.mubr.f32.mxu0 %v21604_v0  ;;  %3745 = vmatpush1.bf16.msra.mxu0 %v17758_v9 }
 0x60e   :  { %3746 = vmatprep.subr.bf16.mxu0 %v21606_v40 }
 0x610   :  { %14479 = vmatmul.mubr.msk.f32.gmra.mrb[24].mxu0 %vm2618_vm2, %v2888_v5 }
 0x611   :  { %3259 = vmatprep.mubr.f32.mxu0 %v21604_v0  ;;  %3747 = vmatpush1.bf16.msra.mxu0 %v17759_v1  ;;  %v2937_v1 = vld [vmem:[%s19136_s3 + $0x1d0] sm:$0xff] }
 0x612   :  { %3748 = vmatprep.subr.bf16.mxu0 %v21606_v40 }
 0x614   :  { %14480 = vmatmul.mubr.msk.f32.gmra.mrb[26].mxu0 %vm2618_vm2, %v2889_v27 }
 0x615   :  { %3265 = vmatprep.mubr.f32.mxu0 %v21604_v0  ;;  %3749 = vmatpush1.bf16.msra.mxu0 %v17760_v43  ;;  %v2938_v43 = vld [vmem:[%s19136_s3 + $0x1d8] sm:$0xff] }
 0x616   :  { %3750 = vmatprep.subr.bf16.mxu0 %v21606_v40 }
 0x618   :  { %14481 = vmatmul.mubr.msk.f32.gmra.mrb[28].mxu0 %vm2618_vm2, %v2890_v31 }
 0x619   :  { %3271 = vmatprep.mubr.f32.mxu0 %v21604_v0  ;;  %3751 = vmatpush1.bf16.msra.mxu0 %v17761_v29 }
 0x61a   :  { %3752 = vmatprep.subr.bf16.mxu0 %v21606_v40 }
 0x61c   :  { %14482 = vmatmul.mubr.msk.f32.gmra.mrb[30].mxu0 %vm2618_vm2, %v2891_v32  ;;  %v2936_v32 = vld [vmem:[%s19136_s3 + $0x1c8] sm:$0xff] }
 0x61d   :  { %3277 = vmatprep.mubr.f32.mxu0 %v21604_v0  ;;  %3753 = vmatpush1.bf16.msra.mxu0 %v3726_v58 }
 0x61e   :  { %3861 = vmatprep.subr.bf16.mxu0 %v21606_v40 }
 0x620   :  { %14483 = vmatmul.mubr.msk.f32.gmra.mrb[32].mxu0 %vm2618_vm2, %v2892_v60 }
 0x621   :  { %3283 = vmatprep.mubr.f32.mxu0 %v21604_v0 }
 0x624   :  { %14484 = vmatmul.mubr.msk.f32.gmra.mrb[34].mxu0 %vm2618_vm2, %v2893_v44 }
 0x625   :  { %3289 = vmatprep.mubr.f32.mxu0 %v21604_v0 }
 0x628   :  { %14485 = vmatmul.mubr.msk.f32.gmra.mrb[36].mxu0 %vm2618_vm2, %v2894_v2 }
 0x629   :  { %3295 = vmatprep.mubr.f32.mxu0 %v21604_v0 }
 0x62c   :  { %14486 = vmatmul.mubr.msk.f32.gmra.mrb[38].mxu0 %vm2618_vm2, %v2895_v15 }
 0x62d   :  { %3301 = vmatprep.mubr.f32.mxu0 %v21604_v0 }
 0x630   :  { %14487 = vmatmul.mubr.msk.f32.gmra.mrb[40].mxu0 %vm2618_vm2, %v2896_v39 }
 0x631   :  { %3307 = vmatprep.mubr.f32.mxu0 %v21604_v0 }
 0x634   :  { %14488 = vmatmul.mubr.msk.f32.gmra.mrb[42].mxu0 %vm2618_vm2, %v2897_v11 }
 0x635   :  { %3313 = vmatprep.mubr.f32.mxu0 %v21604_v0 }
 0x638   :  { %14489 = vmatmul.mubr.msk.f32.gmra.mrb[44].mxu0 %vm2618_vm2, %v2898_v21 }
 0x639   :  { %3319 = vmatprep.mubr.f32.mxu0 %v21604_v0 }
 0x63c   :  { %14490 = vmatmul.mubr.msk.f32.gmra.mrb[46].mxu0 %vm2618_vm2, %v2899_v22 }
 0x63d   :  { %3325 = vmatprep.mubr.f32.mxu0 %v21604_v0 }
 0x640   :  { %14491 = vmatmul.mubr.msk.f32.gmra.mrb[48].mxu0 %vm2618_vm2, %v2900_v55  ;;  %v2939_v55 = vld [vmem:[%s19136_s3 + $0x1e0] sm:$0xff] }
 0x641   :  { %3331 = vmatprep.mubr.f32.mxu0 %v21604_v0 }
 0x644   :  { %14492 = vmatmul.mubr.msk.f32.gmra.mrb[50].mxu0 %vm2618_vm2, %v2901_v56 }
 0x645   :  { %3337 = vmatprep.mubr.f32.mxu0 %v21604_v0 }
 0x648   :  { %14493 = vmatmul.mubr.msk.f32.gmra.mrb[52].mxu0 %vm2618_vm2, %v2902_v10 }
 0x649   :  { %3343 = vmatprep.mubr.f32.mxu0 %v21604_v0 }
 0x64c   :  { %14494 = vmatmul.mubr.msk.f32.gmra.mrb[54].mxu0 %vm2618_vm2, %v2903_v33 }
 0x64d   :  { %3349 = vmatprep.mubr.f32.mxu0 %v21604_v0 }
 0x650   :  { %14495 = vmatmul.mubr.msk.f32.gmra.mrb[56].mxu0 %vm2618_vm2, %v2904_v34  ;;  %v2940_v34 = vld [vmem:[%s19136_s3 + $0x1e8] sm:$0xff] }
 0x651   :  { %3355 = vmatprep.mubr.f32.mxu0 %v21604_v0 }
 0x654   :  { %14496 = vmatmul.mubr.msk.f32.gmra.mrb[58].mxu0 %vm2618_vm2, %v2905_v38 }
 0x655   :  { %3361 = vmatprep.mubr.f32.mxu0 %v21604_v0 }
 0x658   :  { %14497 = vmatmul.mubr.msk.f32.gmra.mrb[60].mxu0 %vm2618_vm2, %v2906_v45 }
 0x659   :  { %3367 = vmatprep.mubr.f32.mxu0 %v21604_v0 }
 0x65c   :  { %14498 = vmatmul.mubr.msk.f32.gmra.mrb[62].mxu0 %vm2618_vm2, %v2907_v46  ;;  %v2941_v46 = vld [vmem:[%s19136_s3 + $0x1f0] sm:$0xff] }
 0x65d   :  { %3373 = vmatprep.mubr.f32.mxu0 %v21604_v0 }
 0x660   :  { %14499 = vmatmul.mubr.msk.f32.gmra.mrb[64].mxu0 %vm2618_vm2, %v2908_v48 }
 0x661   :  { %3379 = vmatprep.mubr.f32.mxu0 %v21604_v0 }
 0x664   :  { %14500 = vmatmul.mubr.msk.f32.gmra.mrb[66].mxu0 %vm2618_vm2, %v2909_v59 }
 0x665   :  { %3385 = vmatprep.mubr.f32.mxu0 %v21604_v0 }
 0x668   :  { %14501 = vmatmul.mubr.msk.f32.gmra.mrb[68].mxu0 %vm2618_vm2, %v2910_v61  ;;  %v2942_v61 = vld [vmem:[%s19136_s3 + $0x1f8] sm:$0xff]  ;;  %s13882_s3 = sld [smem:[%s21603_s0 + %s18567_s30]]   ;;  %s18582_s30 = smov 37  }
 0x669   :  { %3391 = vmatprep.mubr.f32.mxu0 %v21604_v0 }
 0x66c   :  { %14502 = vmatmul.mubr.msk.f32.gmra.mrb[70].mxu0 %vm2618_vm2, %v2911_v63 }
 0x66d   :  { %3397 = vmatprep.mubr.f32.mxu0 %v21604_v0 }
 0x670   :  { %14503 = vmatmul.mubr.msk.f32.gmra.mrb[72].mxu0 %vm2618_vm2, %v2912_v7 }
 0x671   :  { %3403 = vmatprep.mubr.f32.mxu0 %v21604_v0 }
 0x674   :  { %14504 = vmatmul.mubr.msk.f32.gmra.mrb[74].mxu0 %vm2618_vm2, %v2913_v8  ;;  %v17763_v8 = vld [vmem:[%s19127_s29] sm:$0xff]  }
 0x675   :  { %3409 = vmatprep.mubr.f32.mxu0 %v21604_v0 }
 0x678   :  { %14505 = vmatmul.mubr.msk.f32.gmra.mrb[76].mxu0 %vm2618_vm2, %v2914_v47 }
 0x679   :  { %3415 = vmatprep.mubr.f32.mxu0 %v21604_v0 }
 0x67c   :  { %14506 = vmatmul.mubr.msk.f32.gmra.mrb[78].mxu0 %vm2618_vm2, %v2915_v51 }
 0x67d   :  { %3421 = vmatprep.mubr.f32.mxu0 %v21604_v0 }
 0x680   :  { %14507 = vmatmul.mubr.msk.f32.gmra.mrb[80].mxu0 %vm2618_vm2, %v2916_v52 }
 0x681   :  { %3427 = vmatprep.mubr.f32.mxu0 %v21604_v0 }
 0x684   :  { %14508 = vmatmul.mubr.msk.f32.gmra.mrb[82].mxu0 %vm2618_vm2, %v2917_v62  ;;  %v17789_v62 = vld [vmem:[%s19127_s29 + $0x12c] sm:$0xff]  }
 0x685   :  { %3433 = vmatprep.mubr.f32.mxu0 %v21604_v0 }
 0x688   :  { %14509 = vmatmul.mubr.msk.f32.gmra.mrb[84].mxu0 %vm2618_vm2, %v2918_v3  ;;  %v17764_v3 = vld [vmem:[%s19127_s29 + $0x8] sm:$0xff]  }
 0x689   :  { %3439 = vmatprep.mubr.f32.mxu0 %v21604_v0 }
 0x68c   :  { %14510 = vmatmul.mubr.msk.f32.gmra.mrb[86].mxu0 %vm2618_vm2, %v2919_v4 }
 0x68d   :  { %3445 = vmatprep.mubr.f32.mxu0 %v21604_v0 }
 0x690   :  { %14511 = vmatmul.mubr.msk.f32.gmra.mrb[88].mxu0 %vm2618_vm2, %v2920_v14 }
 0x691   :  { %3451 = vmatprep.mubr.f32.mxu0 %v21604_v0 }
 0x694   :  { %14512 = vmatmul.mubr.msk.f32.gmra.mrb[90].mxu0 %vm2618_vm2, %v2921_v16  ;;  %v17765_v16 = vld [vmem:[%s19127_s29 + $0x10] sm:$0xff]  }
 0x695   :  { %3457 = vmatprep.mubr.f32.mxu0 %v21604_v0 }
 0x698   :  { %14513 = vmatmul.mubr.msk.f32.gmra.mrb[92].mxu0 %vm2618_vm2, %v2922_v18 }
 0x699   :  { %3463 = vmatprep.mubr.f32.mxu0 %v21604_v0 }
 0x69c   :  { %14514 = vmatmul.mubr.msk.f32.gmra.mrb[94].mxu0 %vm2618_vm2, %v2923_v6 }
 0x69d   :  { %3469 = vmatprep.mubr.f32.mxu0 %v21604_v0 }
 0x6a0   :  { %14515 = vmatmul.mubr.msk.f32.gmra.mrb[96].mxu0 %vm2618_vm2, %v2924_v12 }
 0x6a1   :  { %3475 = vmatprep.mubr.f32.mxu0 %v21604_v0 }
 0x6a4   :  { %14516 = vmatmul.mubr.msk.f32.gmra.mrb[98].mxu0 %vm2618_vm2, %v2925_v17 }
 0x6a5   :  { %3481 = vmatprep.mubr.f32.mxu0 %v21604_v0 }
 0x6a8   :  { %14517 = vmatmul.mubr.msk.f32.gmra.mrb[100].mxu0 %vm2618_vm2, %v2926_v54  ;;  %v17766_v54 = vld [vmem:[%s19127_s29 + $0x18] sm:$0xff]  }
 0x6a9   :  { %3487 = vmatprep.mubr.f32.mxu0 %v21604_v0 }
 0x6ac   :  { %14518 = vmatmul.mubr.msk.f32.gmra.mrb[102].mxu0 %vm2618_vm2, %v2927_v19 }
 0x6ad   :  { %3493 = vmatprep.mubr.f32.mxu0 %v21604_v0 }
 0x6b0   :  { %14519 = vmatmul.mubr.msk.f32.gmra.mrb[104].mxu0 %vm2618_vm2, %v2928_v23 }
 0x6b1   :  { %3499 = vmatprep.mubr.f32.mxu0 %v21604_v0 }
 0x6b4   :  { %14520 = vmatmul.mubr.msk.f32.gmra.mrb[106].mxu0 %vm2618_vm2, %v2929_v24  ;;  %v17767_v24 = vld [vmem:[%s19127_s29 + $0x20] sm:$0xff]  }
 0x6b5   :  { %3505 = vmatprep.mubr.f32.mxu0 %v21604_v0 }
 0x6b8   :  { %14521 = vmatmul.mubr.msk.f32.gmra.mrb[108].mxu0 %vm2618_vm2, %v2930_v13 }
 0x6b9   :  { %3511 = vmatprep.mubr.f32.mxu0 %v21604_v0 }
 0x6bc   :  { %14522 = vmatmul.mubr.msk.f32.gmra.mrb[110].mxu0 %vm2618_vm2, %v2931_v20  ;;  %v17787_v20 = vld [vmem:[%s19127_s29 + $0x120] sm:$0xff]  }
 0x6bd   :  { %3517 = vmatprep.mubr.f32.mxu0 %v21604_v0 }
 0x6bf   :  { %v19326_v26 = vpop.f32.mrb[6].mxu0 }
 0x6c0   :  { %v19328_v28 = vpop.f32.mrb[7].mxu0  ;;  %14523 = vmatmul.mubr.msk.f32.gmra.mrb[112].mxu0 %vm2618_vm2, %v2932_v25 }
 0x6c1   :  { %3523 = vmatprep.mubr.f32.mxu0 %v21604_v0 }
 0x6c3   :  { %v19333_v37 = vpop.f32.mrb[8].mxu0 }
 0x6c4   :  { %v3584_v41 = vpack.c.bf16 %v19333_v37, %v19326_v26  ;;  %v19337_v42 = vpop.f32.mrb[9].mxu0  ;;  %14524 = vmatmul.mubr.msk.f32.gmra.mrb[114].mxu0 %vm2618_vm2, %v2933_v30  ;;  %v17768_v30 = vld [vmem:[%s19127_s29 + $0x28] sm:$0xff]   ;;  %v17778_v37 = vld [vmem:[%s19127_s29 + $0xd8] sm:$0xff]   ;;  %v17783_v26 = vld [vmem:[%s19127_s29 + $0x100] sm:$0xff]  }
 0x6c5   :  { %v3585_v49 = vpack.c.bf16 %v19337_v42, %v19328_v28  ;;  %3529 = vmatprep.mubr.f32.mxu0 %v21604_v0  ;;  %v17788_v28 = vld [vmem:[%s19127_s29 + $0x128] ss:$0 sps:$4 sm:$0x33]  }
 0x6c7   :  { %v19344_v57 = vpop.f32.mrb[10].mxu0 }
 0x6c8   :  { %v19346_v35 = vpop.f32.mrb[11].mxu0  ;;  %14525 = vmatmul.mubr.msk.f32.gmra.mrb[116].mxu0 %vm2618_vm2, %v2934_v53  ;;  %v17769_v53 = vld [vmem:[%s19127_s29 + $0x30] sm:$0xff]  }
 0x6c9   :  { %3535 = vmatprep.mubr.f32.mxu0 %v21604_v0 }
 0x6cb   :  { %v19351_v5 = vpop.f32.mrb[12].mxu0 }
 0x6cc   :  { %v3586_v9 = vpack.c.bf16 %v19351_v5, %v19344_v57  ;;  %v19355_v27 = vpop.f32.mrb[13].mxu0  ;;  %14526 = vmatmul.mubr.msk.f32.gmra.mrb[118].mxu0 %vm2618_vm2, %v2935_v36  ;;  %v17782_v5 = vld [vmem:[%s19127_s29 + $0xf8] sm:$0xff]  }
 0x6cd   :  { %v3587_v31 = vpack.c.bf16 %v19355_v27, %v19346_v35  ;;  %3541 = vmatprep.mubr.f32.mxu0 %v21604_v0  ;;  %v17779_v27 = vld [vmem:[%s19127_s29 + $0xe0] sm:$0xff]  }
 0x6cf   :  { %v3225_v60 = vpop.f32.mrb[14].mxu0 }
 0x6d0   :  { %v3227_v44 = vpop.f32.mrb[15].mxu0  ;;  %14527 = vmatmul.mubr.msk.f32.gmra.mrb[120].mxu0 %vm2618_vm2, %v2936_v32  ;;  %v17786_v32 = vld [vmem:[%s19127_s29 + $0x118] sm:$0xff]  }
 0x6d1   :  { %3547 = vmatprep.mubr.f32.mxu0 %v21604_v0 }
 0x6d3   :  { %v3231_v2 = vpop.f32.mrb[16].mxu0 }
 0x6d4   :  { %v3613_v15 = vpack.c.bf16 %v3231_v2, %v3225_v60  ;;  %v3233_v39 = vpop.f32.mrb[17].mxu0  ;;  %14528 = vmatmul.mubr.msk.f32.gmra.mrb[122].mxu0 %vm2618_vm2, %v2937_v1  ;;  %v17770_v1 = vld [vmem:[%s19127_s29 + $0x38] sm:$0xff]  }
 0x6d5   :  { %v3614_v11 = vpack.c.bf16 %v3233_v39, %v3227_v44  ;;  %3553 = vmatprep.mubr.f32.mxu0 %v21604_v0  ;;  %v17771_v39 = vld [vmem:[%s19127_s29 + $0x40] sm:$0xff]  }
 0x6d7   :  { %v3237_v21 = vpop.f32.mrb[18].mxu0 }
 0x6d8   :  { %v3239_v22 = vpop.f32.mrb[19].mxu0  ;;  %14529 = vmatmul.mubr.msk.f32.gmra.mrb[124].mxu0 %vm2618_vm2, %v2938_v43  ;;  %v17785_v43 = vld [vmem:[%s19127_s29 + $0x110] sm:$0xff]  }
 0x6d9   :  { %3559 = vmatprep.mubr.f32.mxu0 %v21604_v0 }
 0x6db   :  { %v3243_v56 = vpop.f32.mrb[20].mxu0 }
 0x6dc   :  { %v3615_v10 = vpack.c.bf16 %v3243_v56, %v3237_v21  ;;  %v3245_v29 = vpop.f32.mrb[21].mxu0  ;;  %14530 = vmatmul.mubr.msk.f32.gmra.mrb[126].mxu0 %vm2618_vm2, %v2939_v55  ;;  %v17772_v55 = vld [vmem:[%s19127_s29 + $0x48] sm:$0xff]  }
 0x6dd   :  { %v3616_v33 = vpack.c.bf16 %v3245_v29, %v3239_v22  ;;  %3565 = vmatprep.mubr.f32.mxu0 %v21604_v0  ;;  %v17773_v29 = vld [vmem:[%s19127_s29 + $0x50] sm:$0xff]  }
 0x6df   :  { %v19374_v38 = vpop.f32.mrb[22].mxu0 }
 0x6e0   :  { %v19376_v45 = vpop.f32.mrb[23].mxu0  ;;  %14531 = vmatmul.mubr.msk.f32.gmra.mrb[128].mxu0 %vm2618_vm2, %v2940_v34  ;;  %v17784_v34 = vld [vmem:[%s19127_s29 + $0x108] sm:$0xff]  }
 0x6e1   :  { %3571 = vmatprep.mubr.f32.mxu0 %v21604_v0 }
 0x6e3   :  { %v19381_v48 = vpop.f32.mrb[24].mxu0 }
 0x6e4   :  { %v3910_v50 = vpack.c.bf16 %v19381_v48, %v19374_v38  ;;  %v19385_v58 = vpop.f32.mrb[25].mxu0  ;;  %14532 = vmatmul.mubr.msk.f32.gmra.mrb[130].mxu0 %vm2618_vm2, %v2941_v46  ;;  %v17791_v38 = vld [vmem:[%s19127_s29 + $0x13c] sm:$0xff]  }
 0x6e5   :  { %v3911_v59 = vpack.c.bf16 %v19385_v58, %v19376_v45  ;;  %3577 = vmatprep.mubr.f32.mxu0 %v21604_v0 }
 0x6e7   :  { %v19392_v63 = vpop.f32.mrb[26].mxu0 }
 0x6e8   :  { %v19394_v7 = vpop.f32.mrb[27].mxu0  ;;  %14533 = vmatmul.mubr.msk.f32.gmra.mrb[132].mxu0 %vm2618_vm2, %v2942_v61 }
 0x6e9   :  { %14572 = vmatprep.mubr.msk.bf16.mxu0 %vm2595_vm1, %v3614_v11 }
 0x6eb   :  { %v19399_v47 = vpop.f32.mrb[28].mxu0 }
 0x6ec   :  { %v19403_v52 = vpop.f32.mrb[29].mxu0  ;;  %3761 = vmatmul.mubr.bf16.vlgmr.msra.gmra.mrb[136].mxu0 %v3613_v15 }
 0x6ed   :  { %3862 = vmatpush1.bf16.msra.mxu0 %v17763_v8  ;;  %14573 = vmatprep.mubr.msk.bf16.mxu0 %vm2595_vm1, %v3616_v33  ;;  %v17774_v8 = vld [vmem:[%s19127_s29 + $0x58] sm:$0xff]  }
 0x6ee   :  { %3863 = vmatprep.subr.bf16.mxu0 %v21606_v40 }
 0x6ef   :  { %v19410_v4 = vpop.f32.mrb[30].mxu0 }
 0x6f0   :  { %v19412_v14 = vpop.f32.mrb[31].mxu0 }
 0x6f1   :  { %3864 = vmatpush1.bf16.msra.mxu0 %v17764_v3  ;;  %v17775_v3 = vld [vmem:[%s19127_s29 + $0x60] ss:$0 sps:$4 sm:$0x33]  }
 0x6f2   :  { %3865 = vmatprep.subr.bf16.mxu0 %v21606_v40 }
 0x6f3   :  { %v19416_v18 = vpop.f32.mrb[32].mxu0 }
 0x6f4   :  { %v19420_v12 = vpop.f32.mrb[33].mxu0  ;;  %3769 = vmatmul.mubr.bf16.gmra.mrb[140].mxu0 %v3615_v10 }
 0x6f5   :  { %3866 = vmatpush1.bf16.msra.mxu0 %v17765_v16  ;;  %14587 = vmatprep.mubr.msk.bf16.mxu0 %vm2595_vm1, %v3585_v49 }
 0x6f6   :  { %3867 = vmatprep.subr.bf16.mxu0 %v21606_v40 }
 0x6f7   :  { %v19430_v19 = vpop.f32.mrb[34].mxu0 }
 0x6f8   :  { %v19432_v23 = vpop.f32.mrb[35].mxu0 }
 0x6f9   :  { %3868 = vmatpush1.bf16.msra.mxu0 %v17766_v54 }
 0x6fa   :  { %3869 = vmatprep.subr.bf16.mxu0 %v21606_v40 }
 0x6fb   :  { %v19436_v13 = vpop.f32.mrb[36].mxu0 }
 0x6fc   :  { %v19440_v25 = vpop.f32.mrb[37].mxu0 }
 0x6fd   :  { %3870 = vmatpush1.bf16.msra.mxu0 %v17767_v24  ;;  %v3859_v24 = vsel %vm3724_vm3, %v17775_v3, 0  ;;  %v17777_v3 = vld [vmem:[%s19127_s29 + $0xd0] sm:$0xff]  }
 0x6fe   :  { %3871 = vmatprep.subr.bf16.mxu0 %v21606_v40 }
 0x6ff   :  { %v19446_v42 = vpop.f32.mrb[38].mxu0 }
 0x700   :  { %v19448_v49 = vpop.f32.mrb[39].mxu0 }
 0x701   :  { %3872 = vmatpush1.bf16.msra.mxu0 %v17768_v30 }
 0x702   :  { %3873 = vmatprep.subr.bf16.mxu0 %v21606_v40 }
 0x703   :  { %v19452_v36 = vpop.f32.mrb[40].mxu0 }
 0x704   :  { %v19456_v60 = vpop.f32.mrb[41].mxu0 }
 0x705   :  { %3874 = vmatpush1.bf16.msra.mxu0 %v17769_v53 }
 0x706   :  { %3875 = vmatprep.subr.bf16.mxu0 %v21606_v40 }
 0x707   :  { %v19462_v2 = vpop.f32.mrb[42].mxu0 }
 0x708   :  { %v19464_v15 = vpop.f32.mrb[43].mxu0 }
 0x709   :  { %3876 = vmatpush1.bf16.msra.mxu0 %v17770_v1 }
 0x70a   :  { %3877 = vmatprep.subr.bf16.mxu0 %v21606_v40 }
 0x70b   :  { %v19468_v11 = vpop.f32.mrb[44].mxu0 }
 0x70c   :  { %v19472_v21 = vpop.f32.mrb[45].mxu0 }
 0x70d   :  { %3878 = vmatpush1.bf16.msra.mxu0 %v17771_v39 }
 0x70e   :  { %3879 = vmatprep.subr.bf16.mxu0 %v21606_v40 }
 0x70f   :  { %v19478_v56 = vpop.f32.mrb[46].mxu0 }
 0x710   :  { %v19480_v10 = vpop.f32.mrb[47].mxu0 }
 0x711   :  { %3880 = vmatpush1.bf16.msra.mxu0 %v17772_v55  ;;  %v17776_v55 = vld [vmem:[%s19127_s29 + $0xc8] sm:$0xff]  }
 0x712   :  { %3881 = vmatprep.subr.bf16.mxu0 %v21606_v40 }
 0x713   :  { %v19484_v33 = vpop.f32.mrb[48].mxu0 }
 0x714   :  { %v19488_v46 = vpop.f32.mrb[49].mxu0 }
 0x715   :  { %3882 = vmatpush1.bf16.msra.mxu0 %v17773_v29 }
 0x716   :  { %3883 = vmatprep.subr.bf16.mxu0 %v21606_v40 }
 0x717   :  { %v19495_v16 = vpop.f32.mrb[50].mxu0 }
 0x718   :  { %v19497_v54 = vpop.f32.mrb[51].mxu0 }
 0x719   :  { %3884 = vmatpush1.bf16.msra.mxu0 %v17774_v8 }
 0x71a   :  { %3885 = vmatprep.subr.bf16.mxu0 %v21606_v40 }
 0x71b   :  { %v19501_v30 = vpop.f32.mrb[52].mxu0 }
 0x71c   :  { %v19505_v1 = vpop.f32.mrb[53].mxu0 }
 0x71d   :  { %3886 = vmatpush1.bf16.msra.mxu0 %v3859_v24 }
 0x71e   :  { %4024 = vmatprep.subr.bf16.mxu0 %v21606_v40 }
 0x71f   :  { %v19511_v29 = vpop.f32.mrb[54].mxu0 }
 0x720   :  { %3894 = vmatmul.mubr.bf16.vlgmr.msra.gmra.mrb[136].mxu0 %v3584_v41  ;;  %v19516_v8 = vpop.f32.mrb[55].mxu0 }
 0x721   :  { %14588 = vmatprep.mubr.msk.bf16.mxu0 %vm2595_vm1, %v3587_v31  ;;  %4025 = vmatpush1.bf16.msra.mxu0 %v17776_v55 }
 0x722   :  { %4026 = vmatprep.subr.bf16.mxu0 %v21606_v40 }
 0x723   :  { %v19524_v24 = vpop.f32.mrb[56].mxu0 }
 0x724   :  { %v19528_v53 = vpop.f32.mrb[57].mxu0 }
 0x725   :  { %4027 = vmatpush1.bf16.msra.mxu0 %v17777_v3 }
 0x726   :  { %4028 = vmatprep.subr.bf16.mxu0 %v21606_v40 }
 0x727   :  { %v19534_v41 = vpop.f32.mrb[58].mxu0 }
 0x728   :  { %3902 = vmatmul.mubr.bf16.gmra.mrb[140].mxu0 %v3586_v9  ;;  %v19539_v35 = vpop.f32.mrb[59].mxu0  ;;  %v17780_v9 = vld [vmem:[%s19127_s29 + $0xe8] sm:$0xff]  }
 0x729   :  { %4029 = vmatpush1.bf16.msra.mxu0 %v17778_v37  ;;  %14627 = vmatprep.mubr.msk.bf16.mxu0 %vm2595_vm1, %v3911_v59  ;;  %v17781_v59 = vld [vmem:[%s19127_s29 + $0xf0] sm:$0xff]  }
 0x72a   :  { %4030 = vmatprep.subr.bf16.mxu0 %v21606_v40 }
 0x72b   :  { %v19547_v31 = vpop.f32.mrb[60].mxu0 }
 0x72c   :  { %v19551_v57 = vpop.f32.mrb[61].mxu0 }
 0x72d   :  { %4031 = vmatpush1.bf16.msra.mxu0 %v17779_v27 }
 0x72e   :  { %4032 = vmatprep.subr.bf16.mxu0 %v21606_v40 }
 0x72f   :  { %v19557_v45 = vpop.f32.mrb[62].mxu0 }
 0x730   :  { %v19559_v58 = vpop.f32.mrb[63].mxu0 }
 0x731   :  { %4033 = vmatpush1.bf16.msra.mxu0 %v17780_v9 }
 0x732   :  { %4034 = vmatprep.subr.bf16.mxu0 %v21606_v40 }
 0x733   :  { %v19563_v3 = vpop.f32.mrb[64].mxu0 }
 0x734   :  { %v19567_v55 = vpop.f32.mrb[65].mxu0 }
 0x735   :  { %4035 = vmatpush1.bf16.msra.mxu0 %v17781_v59 }
 0x736   :  { %4036 = vmatprep.subr.bf16.mxu0 %v21606_v40 }
 0x737   :  { %v19573_v9 = vpop.f32.mrb[66].mxu0 }
 0x738   :  { %v19575_v0 = vpop.f32.mrb[67].mxu0 }
 0x739   :  { %4037 = vmatpush1.bf16.msra.mxu0 %v17782_v5 }
 0x73a   :  { %4038 = vmatprep.subr.bf16.mxu0 %v21606_v40 }
 0x73b   :  { %v19579_v37 = vpop.f32.mrb[68].mxu0 }
 0x73c   :  { %v19583_v27 = vpop.f32.mrb[69].mxu0 }
 0x73d   :  { %4039 = vmatpush1.bf16.msra.mxu0 %v17783_v26 }
 0x73e   :  { %4040 = vmatprep.subr.bf16.mxu0 %v21606_v40 }
 0x73f   :  { %v19589_v5 = vpop.f32.mrb[70].mxu0 }
 0x740   :  { %v19591_v61 = vpop.f32.mrb[71].mxu0 }
 0x741   :  { %4041 = vmatpush1.bf16.msra.mxu0 %v17784_v34 }
 0x742   :  { %4042 = vmatprep.subr.bf16.mxu0 %v21606_v40 }
 0x743   :  { %v19595_v39 = vpop.f32.mrb[72].mxu0 }
 0x744   :  { %v19599_v59 = vpop.f32.mrb[73].mxu0 }
 0x745   :  { %4043 = vmatpush1.bf16.msra.mxu0 %v17785_v43 }
 0x746   :  { %4044 = vmatprep.subr.bf16.mxu0 %v21606_v40 }
 0x747   :  { %v19605_v44 = vpop.f32.mrb[74].mxu0 }
 0x748   :  { %21645 = vst [vmem:[#allocation2_spill] sm:$0xff] %v19605_v44  ;;  %v19607_v34 = vpop.f32.mrb[75].mxu0  ;;  %v21648_v44 = vmov 0  }
 0x749   :  { %4045 = vmatpush1.bf16.msra.mxu0 %v17786_v32  ;;  %v4022_v32 = vsel %vm3724_vm3, %v17788_v28, 0  ;;  %v17795_v28 = vld [vmem:[%s19127_s29 + $0x15c] sm:$0xff]  }
 0x74a   :  { %4046 = vmatprep.subr.bf16.mxu0 %v21606_v40 }
 0x74b   :  { %v19612_v22 = vpop.f32.mrb[76].mxu0 }
 0x74c   :  { %v19616_v26 = vpop.f32.mrb[77].mxu0 }
 0x74d   :  { %4047 = vmatpush1.bf16.msra.mxu0 %v17787_v20 }
 0x74e   :  { %4048 = vmatprep.subr.bf16.mxu0 %v21606_v40 }
 0x74f   :  { %v19622_v17 = vpop.f32.mrb[78].mxu0 }
 0x750   :  { %21646 = vst [vmem:[#allocation3_spill] sm:$0xff] %v19622_v17  ;;  %v19624_v51 = vpop.f32.mrb[79].mxu0 }
 0x751   :  { %4049 = vmatpush1.bf16.msra.mxu0 %v4022_v32  ;;  %v21647_v32 = vpack.c.bf16 %v19403_v52, %v19394_v7  ;;  %v21649_v7 = vpack.c.bf16 %v19399_v47, %v19392_v63  ;;  %v17793_v47 = vld [vmem:[%s19127_s29 + $0x14c] sm:$0xff]  }
 0x752   :  { %4191 = vmatprep.subr.bf16.mxu0 %v21606_v40  ;;  %v17790_v40 = vld [vmem:[%s19127_s29 + $0x134] sm:$0xff]  }
 0x753   :  { %v19628_v6 = vpop.f32.mrb[80].mxu0 }
 0x754   :  { %4057 = vmatmul.mubr.bf16.vlgmr.msra.gmra.mrb[136].mxu0 %v3910_v50  ;;  %v19635_v20 = vpop.f32.mrb[81].mxu0 }
 0x755   :  { %14628 = vmatprep.mubr.msk.bf16.mxu0 %vm2595_vm1, %v21647_v32  ;;  %4192 = vmatpush1.bf16.msra.mxu0 %v17789_v62  ;;  %v17792_v32 = vld [vmem:[%s19127_s29 + $0x144] sm:$0xff]  }
 0x756   :  { %4193 = vmatprep.subr.bf16.mxu0 %v21648_v44 }
 0x757   :  { %v19645_v43 = vpop.f32.mrb[82].mxu0 }
 0x758   :  { %v19647_v17 = vpop.f32.mrb[83].mxu0 }
 0x759   :  { %4194 = vmatpush1.bf16.msra.mxu0 %v17790_v40  ;;  %v21650_v40 = vpack.c.bf16 %v19420_v12, %v19412_v14 }
 0x75a   :  { %4195 = vmatprep.subr.bf16.mxu0 %v21648_v44 }
 0x75b   :  { %v19651_v48 = vpop.f32.mrb[84].mxu0 }
 0x75c   :  { %4065 = vmatmul.mubr.bf16.gmra.mrb[140].mxu0 %v21649_v7  ;;  %v19658_v52 = vpop.f32.mrb[85].mxu0 }
 0x75d   :  { %4196 = vmatpush1.bf16.msra.mxu0 %v17791_v38  ;;  %14667 = vmatprep.mubr.msk.bf16.mxu0 %vm2595_vm1, %v21650_v40  ;;  %v17794_v40 = vld [vmem:[%s19127_s29 + $0x154] sm:$0xff]  }
 0x75e   :  { %4197 = vmatprep.subr.bf16.mxu0 %v21648_v44 }
 0x75f   :  { %v19668_v50 = vpop.f32.mrb[86].mxu0 }
 0x760   :  { %21651 = vst [vmem:[#allocation4_spill] sm:$0xff] %v19668_v50  ;;  %v19670_v63 = vpop.f32.mrb[87].mxu0 }
 0x761   :  { %21652 = vst [vmem:[#allocation5_spill] sm:$0xff] %v19670_v63  ;;  %4198 = vmatpush1.bf16.msra.mxu0 %v17792_v32 }
 0x762   :  { %4199 = vmatprep.subr.bf16.mxu0 %v21648_v44 }
 0x763   :  { %v19674_v7 = vpop.f32.mrb[88].mxu0 }
 0x764   :  { %21653 = vst [vmem:[#allocation6_spill] sm:$0xff] %v19674_v7  ;;  %v19678_v14 = vpop.f32.mrb[89].mxu0  ;;  %v17796_v7 = vld [vmem:[%s19127_s29 + $0x164] sm:$0xff]  }
 0x765   :  { %21654 = vst [vmem:[#allocation7_spill] sm:$0xff] %v19678_v14  ;;  %4200 = vmatpush1.bf16.msra.mxu0 %v17793_v47  ;;  %v17797_v14 = vld [vmem:[%s19127_s29 + $0x16c] sm:$0xff]  }
 0x766   :  { %4201 = vmatprep.subr.bf16.mxu0 %v21648_v44 }
 0x767   :  { %v19684_v32 = vpop.f32.mrb[90].mxu0 }
 0x768   :  { %21655 = vst [vmem:[#allocation8_spill] sm:$0xff] %v19684_v32  ;;  %v19686_v62 = vpop.f32.mrb[91].mxu0 }
 0x769   :  { %21656 = vst [vmem:[#allocation9_spill] sm:$0xff] %v19686_v62  ;;  %4202 = vmatpush1.bf16.msra.mxu0 %v17794_v40 }
 0x76a   :  { %4203 = vmatprep.subr.bf16.mxu0 %v21648_v44 }
 0x76b   :  { %v19690_v38 = vpop.f32.mrb[92].mxu0 }
 0x76c   :  { %21657 = vst [vmem:[#allocation10_spill] sm:$0xff] %v19690_v38  ;;  %v19694_v12 = vpop.f32.mrb[93].mxu0  ;;  %v17798_v38 = vld [vmem:[%s19127_s29 + $0x174] sm:$0xff]  }
 0x76d   :  { %21658 = vst [vmem:[#allocation11_spill] sm:$0xff] %v19694_v12  ;;  %4204 = vmatpush1.bf16.msra.mxu0 %v17795_v28  ;;  %v17799_v12 = vld [vmem:[%s19127_s29 + $0x17c] sm:$0xff]   ;;  %v17800_v28 = vld [vmem:[%s19127_s29 + $0x184] sm:$0xff]  }
 0x76e   :  { %4205 = vmatprep.subr.bf16.mxu0 %v21648_v44 }
 0x76f   :  { %v19700_v40 = vpop.f32.mrb[94].mxu0 }
 0x770   :  { %21659 = vst [vmem:[#allocation12_spill] sm:$0xff] %v19700_v40  ;;  %v19702_v63 = vpop.f32.mrb[95].mxu0 }
 0x771   :  { %21660 = vst [vmem:[#allocation13_spill] sm:$0xff] %v19702_v63  ;;  %4206 = vmatpush1.bf16.msra.mxu0 %v17796_v7  ;;  %v17801_v63 = vld [vmem:[%s19127_s29 + $0x18c] ss:$0 sps:$4 sm:$0x33]  }
 0x772   :  { %4207 = vmatprep.subr.bf16.mxu0 %v21648_v44  ;;  %v4189_v40 = vsel %vm3724_vm3, %v17801_v63, 0  ;;  %v21669_v63 = vpack.c.bf16 %v19416_v18, %v19410_v4  ;;  %v17804_v18 = vld [vmem:[%s19127_s29 + $0x1a0] sm:$0xff]  }
 0x773   :  { %v19706_v50 = vpop.f32.mrb[96].mxu0  ;;  %v17808_v4 = vld [vmem:[%s19127_s29 + $0x1c0] sm:$0xff]  }
 0x774   :  { %21661 = vst [vmem:[#allocation14_spill] sm:$0xff] %v19706_v50  ;;  %v19710_v47 = vpop.f32.mrb[97].mxu0 }
 0x775   :  { %21662 = vst [vmem:[#allocation15_spill] sm:$0xff] %v19710_v47  ;;  %4208 = vmatpush1.bf16.msra.mxu0 %v17797_v14  ;;  %v21670_v14 = vpack.c.bf16 %v19440_v25, %v19432_v23  ;;  %v21672_v25 = vpack.c.bf16 %v19436_v13, %v19430_v19 }
 0x776   :  { %4209 = vmatprep.subr.bf16.mxu0 %v21648_v44 }
 0x777   :  { %v19716_v7 = vpop.f32.mrb[98].mxu0 }
 0x778   :  { %21663 = vst [vmem:[#allocation16_spill] sm:$0xff] %v19716_v7  ;;  %v19718_v62 = vpop.f32.mrb[99].mxu0 }
 0x779   :  { %21664 = vst [vmem:[#allocation17_spill] sm:$0xff] %v19718_v62  ;;  %4210 = vmatpush1.bf16.msra.mxu0 %v17798_v38  ;;  %v17802_v62 = vld [vmem:[%s19127_s29 + $0x190] sm:$0xff]  }
 0x77a   :  { %4211 = vmatprep.subr.bf16.mxu0 %v21648_v44 }
 0x77b   :  { %v19722_v32 = vpop.f32.mrb[100].mxu0 }
 0x77c   :  { %21665 = vst [vmem:[#allocation18_spill] sm:$0xff] %v19722_v32  ;;  %v19726_v50 = vpop.f32.mrb[101].mxu0  ;;  %v17803_v32 = vld [vmem:[%s19127_s29 + $0x198] sm:$0xff]  }
 0x77d   :  { %21666 = vst [vmem:[#allocation19_spill] sm:$0xff] %v19726_v50  ;;  %4212 = vmatpush1.bf16.msra.mxu0 %v17799_v12 }
 0x77e   :  { %4213 = vmatprep.subr.bf16.mxu0 %v21648_v44 }
 0x77f   :  { %v19733_v38 = vpop.f32.mrb[102].mxu0 }
 0x780   :  { %21667 = vst [vmem:[#allocation20_spill] sm:$0xff] %v19733_v38  ;;  %v19735_v47 = vpop.f32.mrb[103].mxu0 }
 0x781   :  { %4214 = vmatpush1.bf16.msra.mxu0 %v17800_v28 }
 0x782   :  { %4215 = vmatprep.subr.bf16.mxu0 %v21648_v44 }
 0x783   :  { %v19739_v7 = vpop.f32.mrb[104].mxu0 }
 0x784   :  { %21668 = vst [vmem:[#allocation21_spill] sm:$0xff] %v19739_v7  ;;  %v19743_v12 = vpop.f32.mrb[105].mxu0 }
 0x785   :  { %4216 = vmatpush1.bf16.msra.mxu0 %v4189_v40 }
 0x786   :  { %4358 = vmatprep.subr.bf16.mxu0 %v21648_v44 }
 0x787   :  { %v19749_v28 = vpop.f32.mrb[106].mxu0 }
 0x788   :  { %4224 = vmatmul.mubr.bf16.vlgmr.msra.gmra.mrb[136].mxu0 %v21669_v63  ;;  %v19754_v50 = vpop.f32.mrb[107].mxu0  ;;  %v17805_v63 = vld [vmem:[%s19127_s29 + $0x1a8] sm:$0xff]  }
 0x789   :  { %14668 = vmatprep.mubr.msk.bf16.mxu0 %vm2595_vm1, %v21670_v14  ;;  %4359 = vmatpush1.bf16.msra.mxu0 %v17802_v62  ;;  %v21674_v14 = vpack.c.bf16 %v19456_v60, %v19448_v49 }
 0x78a   :  { %4360 = vmatprep.subr.bf16.mxu0 %v21648_v44 }
 0x78b   :  { %v19762_v40 = vpop.f32.mrb[108].mxu0 }
 0x78c   :  { %v19766_v7 = vpop.f32.mrb[109].mxu0 }
 0x78d   :  { %4361 = vmatpush1.bf16.msra.mxu0 %v17803_v32 }
 0x78e   :  { %4362 = vmatprep.subr.bf16.mxu0 %v21648_v44 }
 0x78f   :  { %v19772_v23 = vpop.f32.mrb[110].mxu0 }
 0x790   :  { %21671 = vst [vmem:[#allocation22_spill] sm:$0xff] %v19772_v23  ;;  %4232 = vmatmul.mubr.bf16.gmra.mrb[140].mxu0 %v21672_v25  ;;  %v19777_v62 = vpop.f32.mrb[111].mxu0  ;;  %v17807_v25 = vld [vmem:[%s19127_s29 + $0x1b8] sm:$0xff]  }
 0x791   :  { %21673 = vst [vmem:[#allocation23_spill] sm:$0xff] %v19777_v62  ;;  %4363 = vmatpush1.bf16.msra.mxu0 %v17804_v18  ;;  %14707 = vmatprep.mubr.msk.bf16.mxu0 %vm2595_vm1, %v21674_v14  ;;  %v17806_v18 = vld [vmem:[%s19127_s29 + $0x1b0] sm:$0xff]  }
 0x792   :  { %4364 = vmatprep.subr.bf16.mxu0 %v21648_v44  ;;  %v17814_v62 = vld [vmem:[%s19127_s29 + $0x1f0] ss:$0 sps:$4 sm:$0x33]  }
 0x793   :  { %v19785_v32 = vpop.f32.mrb[112].mxu0 }
 0x794   :  { %21675 = vst [vmem:[#allocation24_spill] sm:$0xff] %v19785_v32  ;;  %v19789_v19 = vpop.f32.mrb[113].mxu0  ;;  %v17809_v32 = vld [vmem:[%s19127_s29 + $0x1c8] sm:$0xff]  }
 0x795   :  { %4365 = vmatpush1.bf16.msra.mxu0 %v17805_v63 }
 0x796   :  { %4366 = vmatprep.subr.bf16.mxu0 %v21648_v44 }
 0x797   :  { %v19795_v49 = vpop.f32.mrb[114].mxu0 }
 0x798   :  { %21676 = vst [vmem:[#allocation25_spill] sm:$0xff] %v19795_v49  ;;  %v19797_v60 = vpop.f32.mrb[115].mxu0 }
 0x799   :  { %21677 = vst [vmem:[#allocation26_spill] sm:$0xff] %v19797_v60  ;;  %4367 = vmatpush1.bf16.msra.mxu0 %v17806_v18 }
 0x79a   :  { %4368 = vmatprep.subr.bf16.mxu0 %v21648_v44 }
 0x79b   :  { %v19801_v14 = vpop.f32.mrb[116].mxu0 }
 0x79c   :  { %21678 = vst [vmem:[#allocation27_spill] sm:$0xff] %v19801_v14  ;;  %v19805_v13 = vpop.f32.mrb[117].mxu0  ;;  %v17810_v14 = vld [vmem:[%s19127_s29 + $0x1d0] sm:$0xff]  }
 0x79d   :  { %21679 = vst [vmem:[#allocation28_spill] sm:$0xff] %v19805_v13  ;;  %4369 = vmatpush1.bf16.msra.mxu0 %v17807_v25  ;;  %v17811_v13 = vld [vmem:[%s19127_s29 + $0x1d8] sm:$0xff]  }
 0x79e   :  { %4370 = vmatprep.subr.bf16.mxu0 %v21648_v44 }
 0x79f   :  { %v19811_v18 = vpop.f32.mrb[118].mxu0 }
 0x7a0   :  { %21680 = vst [vmem:[#allocation29_spill] sm:$0xff] %v19811_v18  ;;  %v19813_v23 = vpop.f32.mrb[119].mxu0 }
 0x7a1   :  { %21681 = vst [vmem:[#allocation30_spill] sm:$0xff] %v19813_v23  ;;  %4371 = vmatpush1.bf16.msra.mxu0 %v17808_v4 }
 0x7a2   :  { %4372 = vmatprep.subr.bf16.mxu0 %v21648_v44 }
 0x7a3   :  { %v19817_v38 = vpop.f32.mrb[120].mxu0 }
 0x7a4   :  { %21682 = vst [vmem:[#allocation31_spill] sm:$0xff] %v19817_v38  ;;  %v19821_v63 = vpop.f32.mrb[121].mxu0  ;;  %v17812_v38 = vld [vmem:[%s19127_s29 + $0x1e0] sm:$0xff]  }
 0x7a5   :  { %21683 = vst [vmem:[#allocation32_spill] sm:$0xff] %v19821_v63  ;;  %4373 = vmatpush1.bf16.msra.mxu0 %v17809_v32  ;;  %v17813_v63 = vld [vmem:[%s19127_s29 + $0x1e8] sm:$0xff]  }
 0x7a6   :  { %4374 = vmatprep.subr.bf16.mxu0 %v21648_v44 }
 0x7a7   :  { %v19827_v4 = vpop.f32.mrb[122].mxu0 }
 0x7a8   :  { %21684 = vst [vmem:[#allocation33_spill] sm:$0xff] %v19827_v4  ;;  %v19829_v60 = vpop.f32.mrb[123].mxu0 }
 0x7a9   :  { %21685 = vst [vmem:[#allocation34_spill] sm:$0xff] %v19829_v60  ;;  %4375 = vmatpush1.bf16.msra.mxu0 %v17810_v14 }
 0x7aa   :  { %4376 = vmatprep.subr.bf16.mxu0 %v21648_v44 }
 0x7ab   :  { %v19833_v49 = vpop.f32.mrb[124].mxu0 }
 0x7ac   :  { %21686 = vst [vmem:[#allocation35_spill] sm:$0xff] %v19833_v49  ;;  %v19837_v25 = vpop.f32.mrb[125].mxu0 }
 0x7ad   :  { %21687 = vst [vmem:[#allocation36_spill] sm:$0xff] %v19837_v25  ;;  %4377 = vmatpush1.bf16.msra.mxu0 %v17811_v13  ;;  %v17815_v25 = vld [vmem:[%s19127_s29 + $0x1f4] sm:$0xff]  }
 0x7ae   :  { %4378 = vmatprep.subr.bf16.mxu0 %v21648_v44 }
 0x7af   :  { %v19843_v23 = vpop.f32.mrb[126].mxu0 }
 0x7b0   :  { %21688 = vst [vmem:[#allocation37_spill] sm:$0xff] %v19843_v23  ;;  %v19845_v14 = vpop.f32.mrb[127].mxu0 }
 0x7b1   :  { %4379 = vmatpush1.bf16.msra.mxu0 %v17812_v38  ;;  %v4356_v38 = vsel %vm3724_vm3, %v17814_v62, 0 }
 0x7b2   :  { %4380 = vmatprep.subr.bf16.mxu0 %v21648_v44 }
 0x7b3   :  { %v19850_v18 = vpop.f32.mrb[128].mxu0 }
 0x7b4   :  { %21689 = vst [vmem:[#allocation38_spill] sm:$0xff] %v19850_v18  ;;  %v19854_v32 = vpop.f32.mrb[129].mxu0  ;;  %v17816_v18 = vld [vmem:[%s19127_s29 + $0x1fc] sm:$0xff]  }
 0x7b5   :  { %4381 = vmatpush1.bf16.msra.mxu0 %v17813_v63  ;;  %v21690_v63 = vpack.c.bf16 %v19452_v36, %v19446_v42  ;;  %v17817_v42 = vld [vmem:[%s19127_s29 + $0x204] sm:$0xff]   ;;  %v21692_v36 = vpack.c.bf16 %v19468_v11, %v19462_v2  ;;  %v17820_v2 = vld [vmem:[%s19127_s29 + $0x21c] sm:$0xff]  }
 0x7b6   :  { %4382 = vmatprep.subr.bf16.mxu0 %v21648_v44  ;;  %v17821_v11 = vld [vmem:[%s19127_s29 + $0x224] sm:$0xff]  }
 0x7b7   :  { %v19860_v49 = vpop.f32.mrb[130].mxu0 }
 0x7b8   :  { %v19862_v60 = vpop.f32.mrb[131].mxu0 }
 0x7b9   :  { %4383 = vmatpush1.bf16.msra.mxu0 %v4356_v38  ;;  %v21691_v38 = vpack.c.bf16 %v19472_v21, %v19464_v15  ;;  %v21693_v15 = vpack.c.bf16 %v19488_v46, %v19480_v10  ;;  %v17818_v21 = vld [vmem:[%s19127_s29 + $0x20c] sm:$0xff]   ;;  %v17823_v46 = vld [vmem:[%s19127_s29 + $0x234] sm:$0xff]  }
 0x7ba   :  { %4525 = vmatprep.subr.bf16.mxu0 %v21648_v44  ;;  %v17822_v10 = vld [vmem:[%s19127_s29 + $0x22c] sm:$0xff]  }
 0x7bb   :  { %v19866_v4 = vpop.f32.mrb[132].mxu0 }
 0x7bc   :  { %v6083_v13 = vpack.c.bf16 %v19866_v4, %v19860_v49  ;;  %4391 = vmatmul.mubr.bf16.vlgmr.msra.gmra.mrb[136].mxu0 %v21690_v63  ;;  %v19873_v62 = vpop.f32.mrb[133].mxu0  ;;  %v17825_v63 = vld [vmem:[%s19127_s29 + $0x244] sm:$0xff]  }
 0x7bd   :  { %v6084_v23 = vpack.c.bf16 %v19873_v62, %v19862_v60  ;;  %14708 = vmatprep.mubr.msk.bf16.mxu0 %vm2595_vm1, %v21691_v38  ;;  %4526 = vmatpush1.bf16.msra.mxu0 %v17815_v25  ;;  %v17824_v25 = vld [vmem:[%s19127_s29 + $0x23c] sm:$0xff]   ;;  %v17826_v38 = vld [vmem:[%s19127_s29 + $0x24c] sm:$0xff]  }
 0x7be   :  { %4527 = vmatprep.subr.bf16.mxu0 %v21648_v44 }
 0x7c1   :  { %4528 = vmatpush1.bf16.msra.mxu0 %v17816_v18  ;;  %v17819_v18 = vld [vmem:[%s19127_s29 + $0x214] sm:$0xff]  }
 0x7c2   :  { %4529 = vmatprep.subr.bf16.mxu0 %v21648_v44 }
 0x7c4   :  { %4399 = vmatmul.mubr.bf16.gmra.mrb[140].mxu0 %v21692_v36 }
 0x7c5   :  { %4530 = vmatpush1.bf16.msra.mxu0 %v17817_v42  ;;  %14747 = vmatprep.mubr.msk.bf16.mxu0 %vm2595_vm1, %v21693_v15  ;;  %v17827_v42 = vld [vmem:[%s19127_s29 + $0x254] ss:$0 sps:$4 sm:$0x33]   ;;  %v17828_v15 = vld [vmem:[%s19127_s29 + $0x258] sm:$0xff]  }
 0x7c6   :  { %4531 = vmatprep.subr.bf16.mxu0 %v21648_v44  ;;  %v4523_v36 = vsel %vm3724_vm3, %v17827_v42, 0  ;;  %v17841_v42 = vld [vmem:[%s19127_s29 + $0x2bc] sm:$0xff]  }
 0x7c9   :  { %4532 = vmatpush1.bf16.msra.mxu0 %v17818_v21  ;;  %v21694_v21 = vpack.c.bf16 %v19484_v33, %v19478_v56  ;;  %v21697_v56 = vpack.c.bf16 %v19528_v53, %v19516_v8  ;;  %v17831_v33 = vld [vmem:[%s19127_s29 + $0x270] sm:$0xff]   ;;  %v17837_v8 = vld [vmem:[%s19127_s29 + $0x2a0] sm:$0xff]  }
 0x7ca   :  { %4533 = vmatprep.subr.bf16.mxu0 %v21648_v44  ;;  %v17835_v53 = vld [vmem:[%s19127_s29 + $0x290] sm:$0xff]  }
 0x7cd   :  { %4534 = vmatpush1.bf16.msra.mxu0 %v17819_v18  ;;  %v21695_v18 = vpack.c.bf16 %v19505_v1, %v19497_v54  ;;  %v17832_v54 = vld [vmem:[%s19127_s29 + $0x278] sm:$0xff]  }
 0x7ce   :  { %4535 = vmatprep.subr.bf16.mxu0 %v21648_v44  ;;  %v17836_v1 = vld [vmem:[%s19127_s29 + $0x298] sm:$0xff]  }
 0x7d1   :  { %4536 = vmatpush1.bf16.msra.mxu0 %v17820_v2  ;;  %v17829_v2 = vld [vmem:[%s19127_s29 + $0x260] sm:$0xff]  }
 0x7d2   :  { %4537 = vmatprep.subr.bf16.mxu0 %v21648_v44 }
 0x7d5   :  { %4538 = vmatpush1.bf16.msra.mxu0 %v17821_v11  ;;  %v17830_v11 = vld [vmem:[%s19127_s29 + $0x268] sm:$0xff]  }
 0x7d6   :  { %4539 = vmatprep.subr.bf16.mxu0 %v21648_v44 }
 0x7d9   :  { %4540 = vmatpush1.bf16.msra.mxu0 %v17822_v10  ;;  %v21696_v10 = vpack.c.bf16 %v19501_v30, %v19495_v16  ;;  %v17833_v16 = vld [vmem:[%s19127_s29 + $0x280] sm:$0xff]   ;;  %v17834_v30 = vld [vmem:[%s19127_s29 + $0x288] sm:$0xff]  }
 0x7da   :  { %4541 = vmatprep.subr.bf16.mxu0 %v21648_v44 }
 0x7dd   :  { %4542 = vmatpush1.bf16.msra.mxu0 %v17823_v46  ;;  %v17838_v46 = vld [vmem:[%s19127_s29 + $0x2a8] sm:$0xff]  }
 0x7de   :  { %4543 = vmatprep.subr.bf16.mxu0 %v21648_v44 }
 0x7e1   :  { %4544 = vmatpush1.bf16.msra.mxu0 %v17824_v25  ;;  %v17839_v25 = vld [vmem:[%s19127_s29 + $0x2b0] sm:$0xff]  }
 0x7e2   :  { %4545 = vmatprep.subr.bf16.mxu0 %v21648_v44 }
 0x7e5   :  { %4546 = vmatpush1.bf16.msra.mxu0 %v17825_v63  ;;  %v17840_v63 = vld [vmem:[%s19127_s29 + $0x2b8] ss:$0 sps:$4 sm:$0x33]  }
 0x7e6   :  { %4547 = vmatprep.subr.bf16.mxu0 %v21648_v44 }
 0x7e9   :  { %4548 = vmatpush1.bf16.msra.mxu0 %v17826_v38  ;;  %v4690_v38 = vsel %vm3724_vm3, %v17840_v63, 0  ;;  %v17866_v63 = vld [vmem:[%s19127_s29 + $0x380] ss:$0 sps:$4 sm:$0x33]  }
 0x7ea   :  { %4549 = vmatprep.subr.bf16.mxu0 %v21648_v44 }
 0x7ed   :  { %4550 = vmatpush1.bf16.msra.mxu0 %v4523_v36  ;;  %v21698_v36 = vpack.c.bf16 %v19524_v24, %v19511_v29  ;;  %v21701_v29 = vpack.c.bf16 %v19567_v55, %v19559_v58  ;;  %v17844_v24 = vld [vmem:[%s19127_s29 + $0x2d4] sm:$0xff]   ;;  %v17850_v58 = vld [vmem:[%s19127_s29 + $0x304] sm:$0xff]  }
 0x7ee   :  { %4692 = vmatprep.subr.bf16.mxu0 %v21648_v44  ;;  %v17848_v55 = vld [vmem:[%s19127_s29 + $0x2f4] sm:$0xff]  }
 0x7f0   :  { %4558 = vmatmul.mubr.bf16.vlgmr.msra.gmra.mrb[136].mxu0 %v21694_v21  ;;  %v17842_v21 = vld [vmem:[%s19127_s29 + $0x2c4] sm:$0xff]  }
 0x7f1   :  { %14748 = vmatprep.mubr.msk.bf16.mxu0 %vm2595_vm1, %v21695_v18  ;;  %4693 = vmatpush1.bf16.msra.mxu0 %v17828_v15  ;;  %v21699_v15 = vpack.c.bf16 %v19551_v57, %v19539_v35  ;;  %v17843_v18 = vld [vmem:[%s19127_s29 + $0x2cc] sm:$0xff]   ;;  %v17845_v35 = vld [vmem:[%s19127_s29 + $0x2dc] sm:$0xff]  }
 0x7f2   :  { %4694 = vmatprep.subr.bf16.mxu0 %v21648_v44  ;;  %v17849_v57 = vld [vmem:[%s19127_s29 + $0x2fc] sm:$0xff]  }
 0x7f5   :  { %4695 = vmatpush1.bf16.msra.mxu0 %v17829_v2  ;;  %v21700_v2 = vpack.c.bf16 %v19547_v31, %v19534_v41  ;;  %v17846_v41 = vld [vmem:[%s19127_s29 + $0x2e4] sm:$0xff]   ;;  %v17847_v31 = vld [vmem:[%s19127_s29 + $0x2ec] sm:$0xff]  }
 0x7f6   :  { %4696 = vmatprep.subr.bf16.mxu0 %v21648_v44 }
 0x7f8   :  { %4566 = vmatmul.mubr.bf16.gmra.mrb[140].mxu0 %v21696_v10  ;;  %v17852_v10 = vld [vmem:[%s19127_s29 + $0x314] sm:$0xff]  }
 0x7f9   :  { %4697 = vmatpush1.bf16.msra.mxu0 %v17830_v11  ;;  %14787 = vmatprep.mubr.msk.bf16.mxu0 %vm2595_vm1, %v21697_v56  ;;  %v17851_v11 = vld [vmem:[%s19127_s29 + $0x30c] sm:$0xff]   ;;  %v17853_v56 = vld [vmem:[%s19127_s29 + $0x31c] ss:$0 sps:$4 sm:$0x33]  }
 0x7fa   :  { %4698 = vmatprep.subr.bf16.mxu0 %v21648_v44 }
 0x7fd   :  { %4699 = vmatpush1.bf16.msra.mxu0 %v17831_v33  ;;  %v4857_v33 = vsel %vm3724_vm3, %v17853_v56, 0  ;;  %v17881_v56 = vld [vmem:[%s19127_s29 + $0x3f0] sm:$0xff]  }
 0x7fe   :  { %4700 = vmatprep.subr.bf16.mxu0 %v21648_v44 }
 0x801   :  { %4701 = vmatpush1.bf16.msra.mxu0 %v17832_v54  ;;  %v17854_v54 = vld [vmem:[%s19127_s29 + $0x320] sm:$0xff]  }
 0x802   :  { %4702 = vmatprep.subr.bf16.mxu0 %v21648_v44 }
 0x805   :  { %4703 = vmatpush1.bf16.msra.mxu0 %v17833_v16  ;;  %v21702_v16 = vpack.c.bf16 %v19563_v3, %v19557_v45  ;;  %v17857_v45 = vld [vmem:[%s19127_s29 + $0x338] sm:$0xff]   ;;  %v17858_v3 = vld [vmem:[%s19127_s29 + $0x340] sm:$0xff]  }
 0x806   :  { %4704 = vmatprep.subr.bf16.mxu0 %v21648_v44 }
 0x809   :  { %4705 = vmatpush1.bf16.msra.mxu0 %v17834_v30  ;;  %v21703_v30 = vpack.c.bf16 %v19583_v27, %v19575_v0  ;;  %v21705_v0 = vpack.c.bf16 %v19599_v59, %v19591_v61  ;;  %v17860_v27 = vld [vmem:[%s19127_s29 + $0x350] sm:$0xff]   ;;  %v17861_v61 = vld [vmem:[%s19127_s29 + $0x358] sm:$0xff]   ;;  %v17863_v59 = vld [vmem:[%s19127_s29 + $0x368] sm:$0xff]  }
 0x80a   :  { %4706 = vmatprep.subr.bf16.mxu0 %v21648_v44 }
 0x80d   :  { %4707 = vmatpush1.bf16.msra.mxu0 %v17835_v53  ;;  %v17855_v53 = vld [vmem:[%s19127_s29 + $0x328] sm:$0xff]  }
 0x80e   :  { %4708 = vmatprep.subr.bf16.mxu0 %v21648_v44 }
 0x811   :  { %4709 = vmatpush1.bf16.msra.mxu0 %v17836_v1  ;;  %v17856_v1 = vld [vmem:[%s19127_s29 + $0x330] sm:$0xff]  }
 0x812   :  { %4710 = vmatprep.subr.bf16.mxu0 %v21648_v44 }
 0x815   :  { %4711 = vmatpush1.bf16.msra.mxu0 %v17837_v8  ;;  %v21704_v8 = vpack.c.bf16 %v19579_v37, %v19573_v9  ;;  %v17859_v37 = vld [vmem:[%s19127_s29 + $0x348] sm:$0xff]   ;;  %v17862_v9 = vld [vmem:[%s19127_s29 + $0x360] sm:$0xff]  }
 0x816   :  { %4712 = vmatprep.subr.bf16.mxu0 %v21648_v44 }
 0x819   :  { %4713 = vmatpush1.bf16.msra.mxu0 %v17838_v46  ;;  %v17864_v46 = vld [vmem:[%s19127_s29 + $0x370] sm:$0xff]  }
 0x81a   :  { %4714 = vmatprep.subr.bf16.mxu0 %v21648_v44 }
 0x81d   :  { %4715 = vmatpush1.bf16.msra.mxu0 %v17839_v25  ;;  %v17865_v25 = vld [vmem:[%s19127_s29 + $0x378] sm:$0xff]  }
 0x81e   :  { %4716 = vmatprep.subr.bf16.mxu0 %v21648_v44 }
 0x821   :  { %4717 = vmatpush1.bf16.msra.mxu0 %v4690_v38  ;;  %v5024_v38 = vsel %vm3724_vm3, %v17866_v63, 0 }
 0x822   :  { %4859 = vmatprep.subr.bf16.mxu0 %v21648_v44 }
 0x824   :  { %4725 = vmatmul.mubr.bf16.vlgmr.msra.gmra.mrb[136].mxu0 %v21698_v36  ;;  %v21706_v36 = vpack.c.bf16 %v19595_v39, %v19589_v5  ;;  %v21710_v39 = vpack.c.bf16 %v19635_v20, %v19624_v51  ;;  %v17870_v5 = vld [vmem:[%s19127_s29 + $0x39c] sm:$0xff]   ;;  %v17875_v20 = vld [vmem:[%s19127_s29 + $0x3c4] sm:$0xff]  }
 0x825   :  { %14788 = vmatprep.mubr.msk.bf16.mxu0 %vm2595_vm1, %v21699_v15  ;;  %4860 = vmatpush1.bf16.msra.mxu0 %v17841_v42  ;;  %v17867_v42 = vld [vmem:[%s19127_s29 + $0x384] sm:$0xff]   ;;  %v21707_v15 = vpack.c.bf16 %v19616_v26, %v19607_v34  ;;  %v17873_v34 = vld [vmem:[%s19127_s29 + $0x3b4] sm:$0xff]   ;;  %v17874_v51 = vld [vmem:[%s19127_s29 + $0x3bc] sm:$0xff]  }
 0x826   :  { %4861 = vmatprep.subr.bf16.mxu0 %v21648_v44  ;;  %v17871_v26 = vld [vmem:[%s19127_s29 + $0x3a4] sm:$0xff]  }
 0x829   :  { %4862 = vmatpush1.bf16.msra.mxu0 %v17842_v21  ;;  %v17868_v21 = vld [vmem:[%s19127_s29 + $0x38c] sm:$0xff]  }
 0x82a   :  { %4863 = vmatprep.subr.bf16.mxu0 %v21648_v44 }
 0x82c   :  { %4733 = vmatmul.mubr.bf16.gmra.mrb[140].mxu0 %v21700_v2  ;;  %v21708_v2 = vld [vmem:[#allocation2_spill] sm:$0xff] }
 0x82d   :  { %4864 = vmatpush1.bf16.msra.mxu0 %v17843_v18  ;;  %14827 = vmatprep.mubr.msk.bf16.mxu0 %vm2595_vm1, %v21701_v29  ;;  %v17869_v18 = vld [vmem:[%s19127_s29 + $0x394] sm:$0xff]   ;;  %v21709_v29 = vpack.c.bf16 %v19612_v22, %v21708_v2  ;;  %v17872_v22 = vld [vmem:[%s19127_s29 + $0x3ac] sm:$0xff]  }
 0x82e   :  { %4865 = vmatprep.subr.bf16.mxu0 %v21648_v44  ;;  %v21728_v2 = vld [vmem:[#allocation13_spill] sm:$0xff] }
 0x831   :  { %4866 = vmatpush1.bf16.msra.mxu0 %v17844_v24  ;;  %v17876_v24 = vld [vmem:[%s19127_s29 + $0x3cc] sm:$0xff]  }
 0x832   :  { %4867 = vmatprep.subr.bf16.mxu0 %v21648_v44 }
 0x835   :  { %4868 = vmatpush1.bf16.msra.mxu0 %v17845_v35  ;;  %v17877_v35 = vld [vmem:[%s19127_s29 + $0x3d4] sm:$0xff]  }
 0x836   :  { %4869 = vmatprep.subr.bf16.mxu0 %v21648_v44 }
 0x839   :  { %4870 = vmatpush1.bf16.msra.mxu0 %v17846_v41  ;;  %v17878_v41 = vld [vmem:[%s19127_s29 + $0x3dc] sm:$0xff]  }
 0x83a   :  { %4871 = vmatprep.subr.bf16.mxu0 %v21648_v44 }
 0x83d   :  { %4872 = vmatpush1.bf16.msra.mxu0 %v17847_v31  ;;  %v17879_v31 = vld [vmem:[%s19127_s29 + $0x3e4] ss:$0 sps:$4 sm:$0x33]  }
 0x83e   :  { %4873 = vmatprep.subr.bf16.mxu0 %v21648_v44 }
 0x841   :  { %4874 = vmatpush1.bf16.msra.mxu0 %v17848_v55  ;;  %v5191_v55 = vsel %vm3724_vm3, %v17879_v31, 0 }
 0x842   :  { %4875 = vmatprep.subr.bf16.mxu0 %v21648_v44 }
 0x845   :  { %4876 = vmatpush1.bf16.msra.mxu0 %v17849_v57  ;;  %v17880_v57 = vld [vmem:[%s19127_s29 + $0x3e8] sm:$0xff]  }
 0x846   :  { %4877 = vmatprep.subr.bf16.mxu0 %v21648_v44 }
 0x849   :  { %4878 = vmatpush1.bf16.msra.mxu0 %v17850_v58  ;;  %v21711_v58 = vld [vmem:[#allocation3_spill] sm:$0xff] }
 0x84a   :  { %4879 = vmatprep.subr.bf16.mxu0 %v21648_v44 }
 0x84d   :  { %4880 = vmatpush1.bf16.msra.mxu0 %v17851_v11  ;;  %v21712_v11 = vpack.c.bf16 %v19628_v6, %v21711_v58  ;;  %v21715_v6 = vld [vmem:[#allocation7_spill] sm:$0xff]  ;;  %v21731_v58 = vld [vmem:[#allocation12_spill] sm:$0xff] }
 0x84e   :  { %4881 = vmatprep.subr.bf16.mxu0 %v21648_v44 }
 0x851   :  { %4882 = vmatpush1.bf16.msra.mxu0 %v17852_v10  ;;  %v21713_v10 = vpack.c.bf16 %v19658_v52, %v19647_v17  ;;  %v21716_v17 = vld [vmem:[#allocation5_spill] sm:$0xff] }
 0x852   :  { %4883 = vmatprep.subr.bf16.mxu0 %v21648_v44  ;;  %v21717_v52 = vpack.c.bf16 %v21715_v6, %v21716_v17  ;;  %v17908_v6 = vld [vmem:[%s19127_s29 + $0x4c0] sm:$0xff]  }
 0x853   :  { %v21736_v17 = vld [vmem:[#allocation18_spill] sm:$0xff] }
 0x855   :  { %4884 = vmatpush1.bf16.msra.mxu0 %v4857_v33  ;;  %v17882_v33 = vld [vmem:[%s19127_s29 + $0x3f8] sm:$0xff]  }
 0x856   :  { %5026 = vmatprep.subr.bf16.mxu0 %v21648_v44 }
 0x858   :  { %4892 = vmatmul.mubr.bf16.vlgmr.msra.gmra.mrb[136].mxu0 %v21702_v16  ;;  %v17883_v16 = vld [vmem:[%s19127_s29 + $0x400] sm:$0xff]  }
 0x859   :  { %14828 = vmatprep.mubr.msk.bf16.mxu0 %vm2595_vm1, %v21703_v30  ;;  %5027 = vmatpush1.bf16.msra.mxu0 %v17854_v54  ;;  %v21714_v54 = vpack.c.bf16 %v19651_v48, %v19645_v43  ;;  %v17884_v30 = vld [vmem:[%s19127_s29 + $0x408] sm:$0xff]   ;;  %v17885_v43 = vld [vmem:[%s19127_s29 + $0x410] sm:$0xff]   ;;  %v17886_v48 = vld [vmem:[%s19127_s29 + $0x418] sm:$0xff]  }
 0x85a   :  { %5028 = vmatprep.subr.bf16.mxu0 %v21648_v44 }
 0x85d   :  { %5029 = vmatpush1.bf16.msra.mxu0 %v17855_v53  ;;  %v17887_v53 = vld [vmem:[%s19127_s29 + $0x420] sm:$0xff]  }
 0x85e   :  { %5030 = vmatprep.subr.bf16.mxu0 %v21648_v44 }
 0x860   :  { %4900 = vmatmul.mubr.bf16.gmra.mrb[140].mxu0 %v21704_v8  ;;  %v17889_v8 = vld [vmem:[%s19127_s29 + $0x430] sm:$0xff]  }
 0x861   :  { %5031 = vmatpush1.bf16.msra.mxu0 %v17856_v1  ;;  %14867 = vmatprep.mubr.msk.bf16.mxu0 %vm2595_vm1, %v21705_v0  ;;  %v17888_v1 = vld [vmem:[%s19127_s29 + $0x428] sm:$0xff]   ;;  %v17890_v0 = vld [vmem:[%s19127_s29 + $0x438] sm:$0xff]  }
 0x862   :  { %5032 = vmatprep.subr.bf16.mxu0 %v21648_v44 }
 0x865   :  { %5033 = vmatpush1.bf16.msra.mxu0 %v17857_v45  ;;  %v17891_v45 = vld [vmem:[%s19127_s29 + $0x440] sm:$0xff]  }
 0x866   :  { %5034 = vmatprep.subr.bf16.mxu0 %v21648_v44 }
 0x869   :  { %5035 = vmatpush1.bf16.msra.mxu0 %v17858_v3  ;;  %v17892_v3 = vld [vmem:[%s19127_s29 + $0x448] ss:$0 sps:$4 sm:$0x33]  }
 0x86a   :  { %5036 = vmatprep.subr.bf16.mxu0 %v21648_v44 }
 0x86d   :  { %5037 = vmatpush1.bf16.msra.mxu0 %v17859_v37  ;;  %v5358_v37 = vsel %vm3724_vm3, %v17892_v3, 0  ;;  %v17918_v3 = vld [vmem:[%s19127_s29 + $0x510] ss:$0 sps:$4 sm:$0x33]  }
 0x86e   :  { %5038 = vmatprep.subr.bf16.mxu0 %v21648_v44 }
 0x871   :  { %5039 = vmatpush1.bf16.msra.mxu0 %v17860_v27  ;;  %v17893_v27 = vld [vmem:[%s19127_s29 + $0x44c] sm:$0xff]  }
 0x872   :  { %5040 = vmatprep.subr.bf16.mxu0 %v21648_v44 }
 0x875   :  { %5041 = vmatpush1.bf16.msra.mxu0 %v17861_v61  ;;  %v21718_v61 = vld [vmem:[#allocation6_spill] sm:$0xff] }
 0x876   :  { %5042 = vmatprep.subr.bf16.mxu0 %v21648_v44 }
 0x879   :  { %5043 = vmatpush1.bf16.msra.mxu0 %v17862_v9  ;;  %v21719_v9 = vld [vmem:[#allocation4_spill] sm:$0xff] }
 0x87a   :  { %5044 = vmatprep.subr.bf16.mxu0 %v21648_v44 }
 0x87d   :  { %5045 = vmatpush1.bf16.msra.mxu0 %v17863_v59  ;;  %v21720_v59 = vpack.c.bf16 %v21718_v61, %v21719_v9  ;;  %v21740_v61 = vld [vmem:[#allocation21_spill] sm:$0xff]  ;;  %v21741_v9 = vld [vmem:[#allocation20_spill] sm:$0xff] }
 0x87e   :  { %5046 = vmatprep.subr.bf16.mxu0 %v21648_v44 }
 0x881   :  { %5047 = vmatpush1.bf16.msra.mxu0 %v17864_v46  ;;  %v21721_v46 = vld [vmem:[#allocation11_spill] sm:$0xff] }
 0x882   :  { %5048 = vmatprep.subr.bf16.mxu0 %v21648_v44 }
 0x885   :  { %5049 = vmatpush1.bf16.msra.mxu0 %v17865_v25  ;;  %v21722_v25 = vld [vmem:[#allocation9_spill] sm:$0xff] }
 0x886   :  { %5050 = vmatprep.subr.bf16.mxu0 %v21648_v44  ;;  %v21723_v63 = vpack.c.bf16 %v21721_v46, %v21722_v25  ;;  %v21743_v46 = vpack.c.bf16 %v19766_v7, %v19754_v50  ;;  %v17920_v25 = vld [vmem:[%s19127_s29 + $0x51c] sm:$0xff]   ;;  %v21745_v50 = vld [vmem:[#allocation23_spill] sm:$0xff] }
 0x887   :  { %v21746_v7 = vpack.c.bf16 %v19789_v19, %v21745_v50  ;;  %v17926_v19 = vld [vmem:[%s19127_s29 + $0x54c] sm:$0xff]  }
 0x888   :  { %v17951_v50 = vld [vmem:[%s19127_s29 + $0x60c] sm:$0xff]  }
 0x889   :  { %5051 = vmatpush1.bf16.msra.mxu0 %v5024_v38  ;;  %v17894_v38 = vld [vmem:[%s19127_s29 + $0x454] sm:$0xff]  }
 0x88a   :  { %5193 = vmatprep.subr.bf16.mxu0 %v21648_v44 }
 0x88c   :  { %5059 = vmatmul.mubr.bf16.vlgmr.msra.gmra.mrb[136].mxu0 %v21706_v36  ;;  %v21724_v36 = vld [vmem:[#allocation10_spill] sm:$0xff] }
 0x88d   :  { %14868 = vmatprep.mubr.msk.bf16.mxu0 %vm2595_vm1, %v21707_v15  ;;  %5194 = vmatpush1.bf16.msra.mxu0 %v17867_v42  ;;  %v17895_v42 = vld [vmem:[%s19127_s29 + $0x45c] sm:$0xff]   ;;  %v21725_v15 = vld [vmem:[#allocation8_spill] sm:$0xff] }
 0x88e   :  { %5195 = vmatprep.subr.bf16.mxu0 %v21648_v44 }
 0x891   :  { %5196 = vmatpush1.bf16.msra.mxu0 %v17868_v21  ;;  %v21726_v21 = vpack.c.bf16 %v21724_v36, %v21725_v15  ;;  %v17923_v36 = vld [vmem:[%s19127_s29 + $0x534] sm:$0xff]  }
 0x892   :  { %5197 = vmatprep.subr.bf16.mxu0 %v21648_v44  ;;  %v17927_v15 = vld [vmem:[%s19127_s29 + $0x554] sm:$0xff]  }
 0x894   :  { %5067 = vmatmul.mubr.bf16.gmra.mrb[140].mxu0 %v21709_v29 }
 0x895   :  { %5198 = vmatpush1.bf16.msra.mxu0 %v17869_v18  ;;  %14907 = vmatprep.mubr.msk.bf16.mxu0 %vm2595_vm1, %v21710_v39  ;;  %v21727_v18 = vld [vmem:[#allocation15_spill] sm:$0xff] }
 0x896   :  { %5199 = vmatprep.subr.bf16.mxu0 %v21648_v44  ;;  %v21729_v29 = vpack.c.bf16 %v21727_v18, %v21728_v2  ;;  %v17896_v39 = vld [vmem:[%s19127_s29 + $0x464] sm:$0xff]   ;;  %v17930_v2 = vld [vmem:[%s19127_s29 + $0x56c] sm:$0xff]  }
 0x897   :  { %v17929_v18 = vld [vmem:[%s19127_s29 + $0x564] sm:$0xff]  }
 0x899   :  { %5200 = vmatpush1.bf16.msra.mxu0 %v17870_v5  ;;  %v17897_v5 = vld [vmem:[%s19127_s29 + $0x46c] sm:$0xff]  }
 0x89a   :  { %5201 = vmatprep.subr.bf16.mxu0 %v21648_v44 }
 0x89d   :  { %5202 = vmatpush1.bf16.msra.mxu0 %v17871_v26  ;;  %v17898_v26 = vld [vmem:[%s19127_s29 + $0x474] sm:$0xff]  }
 0x89e   :  { %5203 = vmatprep.subr.bf16.mxu0 %v21648_v44 }
 0x8a1   :  { %5204 = vmatpush1.bf16.msra.mxu0 %v17872_v22  ;;  %v17899_v22 = vld [vmem:[%s19127_s29 + $0x47c] sm:$0xff]  }
 0x8a2   :  { %5205 = vmatprep.subr.bf16.mxu0 %v21648_v44 }
 0x8a5   :  { %5206 = vmatpush1.bf16.msra.mxu0 %v17873_v34  ;;  %v17900_v34 = vld [vmem:[%s19127_s29 + $0x484] sm:$0xff]  }
 0x8a6   :  { %5207 = vmatprep.subr.bf16.mxu0 %v21648_v44 }
 0x8a9   :  { %5208 = vmatpush1.bf16.msra.mxu0 %v17874_v51  ;;  %v17901_v51 = vld [vmem:[%s19127_s29 + $0x48c] sm:$0xff]  }
 0x8aa   :  { %5209 = vmatprep.subr.bf16.mxu0 %v21648_v44 }
 0x8ad   :  { %5210 = vmatpush1.bf16.msra.mxu0 %v17875_v20  ;;  %v17902_v20 = vld [vmem:[%s19127_s29 + $0x494] sm:$0xff]  }
 0x8ae   :  { %5211 = vmatprep.subr.bf16.mxu0 %v21648_v44 }
 0x8b1   :  { %5212 = vmatpush1.bf16.msra.mxu0 %v17876_v24  ;;  %v17903_v24 = vld [vmem:[%s19127_s29 + $0x49c] sm:$0xff]  }
 0x8b2   :  { %5213 = vmatprep.subr.bf16.mxu0 %v21648_v44 }
 0x8b5   :  { %5214 = vmatpush1.bf16.msra.mxu0 %v17877_v35  ;;  %v17904_v35 = vld [vmem:[%s19127_s29 + $0x4a4] sm:$0xff]  }
 0x8b6   :  { %5215 = vmatprep.subr.bf16.mxu0 %v21648_v44 }
 0x8b9   :  { %5216 = vmatpush1.bf16.msra.mxu0 %v17878_v41  ;;  %v17905_v41 = vld [vmem:[%s19127_s29 + $0x4ac] ss:$0 sps:$4 sm:$0x33]  }
 0x8ba   :  { %5217 = vmatprep.subr.bf16.mxu0 %v21648_v44  ;;  %v5525_v31 = vsel %vm3724_vm3, %v17905_v41, 0  ;;  %v17934_v41 = vld [vmem:[%s19127_s29 + $0x588] sm:$0xff]  }
 0x8bd   :  { %5218 = vmatpush1.bf16.msra.mxu0 %v5191_v55  ;;  %v17906_v55 = vld [vmem:[%s19127_s29 + $0x4b0] sm:$0xff]  }
 0x8be   :  { %5360 = vmatprep.subr.bf16.mxu0 %v21648_v44 }
 0x8c0   :  { %5226 = vmatmul.mubr.bf16.vlgmr.msra.gmra.mrb[136].mxu0 %v21712_v11 }
 0x8c1   :  { %14908 = vmatprep.mubr.msk.bf16.mxu0 %vm2595_vm1, %v21713_v10  ;;  %5361 = vmatpush1.bf16.msra.mxu0 %v17880_v57  ;;  %v21730_v57 = vld [vmem:[#allocation14_spill] sm:$0xff]  ;;  %v21733_v10 = vld [vmem:[#allocation19_spill] sm:$0xff] }
 0x8c2   :  { %5362 = vmatprep.subr.bf16.mxu0 %v21648_v44  ;;  %v21732_v11 = vpack.c.bf16 %v21730_v57, %v21731_v58  ;;  %v21756_v58 = vld [vmem:[#allocation32_spill] sm:$0xff] }
 0x8c5   :  { %5363 = vmatpush1.bf16.msra.mxu0 %v17881_v56  ;;  %v21734_v56 = vld [vmem:[#allocation17_spill] sm:$0xff] }
 0x8c6   :  { %5364 = vmatprep.subr.bf16.mxu0 %v21648_v44 }
 0x8c8   :  { %5234 = vmatmul.mubr.bf16.gmra.mrb[140].mxu0 %v21714_v54  ;;  %v17907_v54 = vld [vmem:[%s19127_s29 + $0x4b8] sm:$0xff]  }
 0x8c9   :  { %5365 = vmatpush1.bf16.msra.mxu0 %v17882_v33  ;;  %14947 = vmatprep.mubr.msk.bf16.mxu0 %vm2595_vm1, %v21717_v52  ;;  %v21735_v33 = vpack.c.bf16 %v21733_v10, %v21734_v56  ;;  %v21737_v52 = vld [vmem:[#allocation16_spill] sm:$0xff] }
 0x8ca   :  { %5366 = vmatprep.subr.bf16.mxu0 %v21648_v44  ;;  %v17935_v56 = vld [vmem:[%s19127_s29 + $0x590] sm:$0xff]  }
 0x8cd   :  { %5367 = vmatpush1.bf16.msra.mxu0 %v17883_v16  ;;  %v21738_v16 = vpack.c.bf16 %v21736_v17, %v21737_v52  ;;  %v17939_v17 = vld [vmem:[%s19127_s29 + $0x5b0] sm:$0xff]   ;;  %v17940_v52 = vld [vmem:[%s19127_s29 + $0x5b8] sm:$0xff]  }
 0x8ce   :  { %5368 = vmatprep.subr.bf16.mxu0 %v21648_v44 }
 0x8d1   :  { %5369 = vmatpush1.bf16.msra.mxu0 %v17884_v30  ;;  %v21739_v30 = vpack.c.bf16 %v19743_v12, %v19735_v47  ;;  %v17913_v47 = vld [vmem:[%s19127_s29 + $0x4e8] sm:$0xff]   ;;  %v17914_v12 = vld [vmem:[%s19127_s29 + $0x4f0] sm:$0xff]  }
 0x8d2   :  { %5370 = vmatprep.subr.bf16.mxu0 %v21648_v44 }
 0x8d5   :  { %5371 = vmatpush1.bf16.msra.mxu0 %v17885_v43  ;;  %v17909_v43 = vld [vmem:[%s19127_s29 + $0x4c8] sm:$0xff]  }
 0x8d6   :  { %5372 = vmatprep.subr.bf16.mxu0 %v21648_v44 }
 0x8d9   :  { %5373 = vmatpush1.bf16.msra.mxu0 %v17886_v48  ;;  %v17910_v48 = vld [vmem:[%s19127_s29 + $0x4d0] sm:$0xff]  }
 0x8da   :  { %5374 = vmatprep.subr.bf16.mxu0 %v21648_v44 }
 0x8dd   :  { %5375 = vmatpush1.bf16.msra.mxu0 %v17887_v53  ;;  %v17911_v53 = vld [vmem:[%s19127_s29 + $0x4d8] sm:$0xff]  }
 0x8de   :  { %5376 = vmatprep.subr.bf16.mxu0 %v21648_v44 }
 0x8e1   :  { %5377 = vmatpush1.bf16.msra.mxu0 %v17888_v1  ;;  %v17912_v1 = vld [vmem:[%s19127_s29 + $0x4e0] sm:$0xff]  }
 0x8e2   :  { %5378 = vmatprep.subr.bf16.mxu0 %v21648_v44 }
 0x8e5   :  { %5379 = vmatpush1.bf16.msra.mxu0 %v17889_v8  ;;  %v17915_v8 = vld [vmem:[%s19127_s29 + $0x4f8] sm:$0xff]  }
 0x8e6   :  { %5380 = vmatprep.subr.bf16.mxu0 %v21648_v44 }
 0x8e9   :  { %5381 = vmatpush1.bf16.msra.mxu0 %v17890_v0  ;;  %v17916_v0 = vld [vmem:[%s19127_s29 + $0x500] sm:$0xff]  }
 0x8ea   :  { %5382 = vmatprep.subr.bf16.mxu0 %v21648_v44 }
 0x8ed   :  { %5383 = vmatpush1.bf16.msra.mxu0 %v17891_v45  ;;  %v17917_v45 = vld [vmem:[%s19127_s29 + $0x508] sm:$0xff]  }
 0x8ee   :  { %5384 = vmatprep.subr.bf16.mxu0 %v21648_v44 }
 0x8f1   :  { %5385 = vmatpush1.bf16.msra.mxu0 %v5358_v37  ;;  %v5692_v37 = vsel %vm3724_vm3, %v17918_v3, 0 }
 0x8f2   :  { %5527 = vmatprep.subr.bf16.mxu0 %v21648_v44 }
 0x8f4   :  { %5393 = vmatmul.mubr.bf16.vlgmr.msra.gmra.mrb[136].mxu0 %v21720_v59  ;;  %v21742_v59 = vpack.c.bf16 %v21740_v61, %v21741_v9  ;;  %v21765_v61 = vld [vmem:[#allocation35_spill] sm:$0xff]  ;;  %v21766_v9 = vld [vmem:[#allocation33_spill] sm:$0xff] }
 0x8f5   :  { %14948 = vmatprep.mubr.msk.bf16.mxu0 %vm2595_vm1, %v21723_v63  ;;  %5528 = vmatpush1.bf16.msra.mxu0 %v17893_v27  ;;  %v17919_v27 = vld [vmem:[%s19127_s29 + $0x514] sm:$0xff]   ;;  %v17921_v63 = vld [vmem:[%s19127_s29 + $0x524] sm:$0xff]  }
 0x8f6   :  { %5529 = vmatprep.subr.bf16.mxu0 %v21648_v44 }
 0x8f9   :  { %5530 = vmatpush1.bf16.msra.mxu0 %v17894_v38  ;;  %v21744_v38 = vpack.c.bf16 %v19762_v40, %v19749_v28  ;;  %v17924_v28 = vld [vmem:[%s19127_s29 + $0x53c] sm:$0xff]   ;;  %v17925_v40 = vld [vmem:[%s19127_s29 + $0x544] sm:$0xff]  }
 0x8fa   :  { %5531 = vmatprep.subr.bf16.mxu0 %v21648_v44 }
 0x8fc   :  { %5401 = vmatmul.mubr.bf16.gmra.mrb[140].mxu0 %v21726_v21  ;;  %v17928_v21 = vld [vmem:[%s19127_s29 + $0x55c] sm:$0xff]  }
 0x8fd   :  { %5532 = vmatpush1.bf16.msra.mxu0 %v17895_v42  ;;  %14987 = vmatprep.mubr.msk.bf16.mxu0 %vm2595_vm1, %v21729_v29  ;;  %v17922_v42 = vld [vmem:[%s19127_s29 + $0x52c] sm:$0xff]   ;;  %v17931_v29 = vld [vmem:[%s19127_s29 + $0x574] ss:$0 sps:$4 sm:$0x33]  }
 0x8fe   :  { %5533 = vmatprep.subr.bf16.mxu0 %v21648_v44 }
 0x901   :  { %5534 = vmatpush1.bf16.msra.mxu0 %v17896_v39  ;;  %v5859_v39 = vsel %vm3724_vm3, %v17931_v29, 0 }
 0x902   :  { %5535 = vmatprep.subr.bf16.mxu0 %v21648_v44 }
 0x905   :  { %5536 = vmatpush1.bf16.msra.mxu0 %v17897_v5  ;;  %v17932_v5 = vld [vmem:[%s19127_s29 + $0x578] sm:$0xff]  }
 0x906   :  { %5537 = vmatprep.subr.bf16.mxu0 %v21648_v44 }
 0x909   :  { %5538 = vmatpush1.bf16.msra.mxu0 %v17898_v26  ;;  %v21747_v26 = vld [vmem:[#allocation24_spill] sm:$0xff] }
 0x90a   :  { %5539 = vmatprep.subr.bf16.mxu0 %v21648_v44 }
 0x90d   :  { %5540 = vmatpush1.bf16.msra.mxu0 %v17899_v22  ;;  %v21748_v22 = vld [vmem:[#allocation22_spill] sm:$0xff] }
 0x90e   :  { %5541 = vmatprep.subr.bf16.mxu0 %v21648_v44 }
 0x911   :  { %5542 = vmatpush1.bf16.msra.mxu0 %v17900_v34  ;;  %v21749_v34 = vpack.c.bf16 %v21747_v26, %v21748_v22 }
 0x912   :  { %5543 = vmatprep.subr.bf16.mxu0 %v21648_v44 }
 0x915   :  { %5544 = vmatpush1.bf16.msra.mxu0 %v17901_v51  ;;  %v21750_v51 = vld [vmem:[#allocation28_spill] sm:$0xff] }
 0x916   :  { %5545 = vmatprep.subr.bf16.mxu0 %v21648_v44 }
 0x919   :  { %5546 = vmatpush1.bf16.msra.mxu0 %v17902_v20  ;;  %v21751_v20 = vld [vmem:[#allocation26_spill] sm:$0xff] }
 0x91a   :  { %5547 = vmatprep.subr.bf16.mxu0 %v21648_v44 }
 0x91d   :  { %5548 = vmatpush1.bf16.msra.mxu0 %v17903_v24  ;;  %v21752_v24 = vpack.c.bf16 %v21750_v51, %v21751_v20 }
 0x91e   :  { %5549 = vmatprep.subr.bf16.mxu0 %v21648_v44 }
 0x921   :  { %5550 = vmatpush1.bf16.msra.mxu0 %v17904_v35  ;;  %v17933_v35 = vld [vmem:[%s19127_s29 + $0x580] sm:$0xff]  }
 0x922   :  { %5551 = vmatprep.subr.bf16.mxu0 %v21648_v44 }
 0x925   :  { %5552 = vmatpush1.bf16.msra.mxu0 %v5525_v31  ;;  %v21753_v31 = vld [vmem:[#allocation27_spill] sm:$0xff] }
 0x926   :  { %5694 = vmatprep.subr.bf16.mxu0 %v21648_v44 }
 0x928   :  { %5560 = vmatmul.mubr.bf16.vlgmr.msra.gmra.mrb[136].mxu0 %v21732_v11  ;;  %v21757_v11 = vld [vmem:[#allocation30_spill] sm:$0xff] }
 0x929   :  { %14988 = vmatprep.mubr.msk.bf16.mxu0 %vm2595_vm1, %v21735_v33  ;;  %5695 = vmatpush1.bf16.msra.mxu0 %v17906_v55  ;;  %v21754_v55 = vld [vmem:[#allocation25_spill] sm:$0xff]  ;;  %v21758_v10 = vpack.c.bf16 %v21756_v58, %v21757_v11  ;;  %v6529_v58 = vld [vmem:[%s13870_s11 + $0x8] sm:$0xff]  ;;  %v6556_v11 = vld [vmem:[%s20372_s15] sm:$0xff] }
 0x92a   :  { %5696 = vmatprep.subr.bf16.mxu0 %v21648_v44  ;;  %v21755_v57 = vpack.c.bf16 %v21753_v31, %v21754_v55  ;;  %v17936_v33 = vld [vmem:[%s19127_s29 + $0x598] sm:$0xff]   ;;  %v6277_v55 = vld [vmem:[%s20364_s7] sm:$0xff] }
 0x92b   :  { %16384 = vmatprep.mubr.msk.f32.mxu1 %vm6281_vm5, %v6277_v55 }
 0x92d   :  { %5697 = vmatpush1.bf16.msra.mxu0 %v17907_v54  ;;  %v17937_v54 = vld [vmem:[%s19127_s29 + $0x5a0] sm:$0xff]  }
 0x92e   :  { %5698 = vmatprep.subr.bf16.mxu0 %v21648_v44 }
 0x930   :  { %5568 = vmatmul.mubr.bf16.gmra.mrb[140].mxu0 %v21738_v16  ;;  %v17941_v16 = vld [vmem:[%s19127_s29 + $0x5c0] sm:$0xff]  }
 0x931   :  { %5699 = vmatpush1.bf16.msra.mxu0 %v17908_v6  ;;  %15027 = vmatprep.mubr.msk.bf16.mxu0 %vm2595_vm1, %v21739_v30  ;;  %v17938_v6 = vld [vmem:[%s19127_s29 + $0x5a8] sm:$0xff]  }
 0x932   :  { %5700 = vmatprep.subr.bf16.mxu0 %v21648_v44  ;;  %v17942_v30 = vld [vmem:[%s19127_s29 + $0x5c8] sm:$0xff]  }
 0x935   :  { %5701 = vmatpush1.bf16.msra.mxu0 %v17909_v43  ;;  %v17943_v43 = vld [vmem:[%s19127_s29 + $0x5d0] sm:$0xff]  }
 0x936   :  { %5702 = vmatprep.subr.bf16.mxu0 %v21648_v44 }
 0x939   :  { %5703 = vmatpush1.bf16.msra.mxu0 %v17910_v48  ;;  %v17944_v48 = vld [vmem:[%s19127_s29 + $0x5d8] ss:$0 sps:$4 sm:$0x33]  }
 0x93a   :  { %5704 = vmatprep.subr.bf16.mxu0 %v21648_v44 }
 0x93d   :  { %5705 = vmatpush1.bf16.msra.mxu0 %v17911_v53  ;;  %v6026_v53 = vsel %vm3724_vm3, %v17944_v48, 0 }
 0x93e   :  { %5706 = vmatprep.subr.bf16.mxu0 %v21648_v44 }
 0x941   :  { %5707 = vmatpush1.bf16.msra.mxu0 %v17912_v1  ;;  %v17945_v1 = vld [vmem:[%s19127_s29 + $0x5dc] sm:$0xff]  }
 0x942   :  { %5708 = vmatprep.subr.bf16.mxu0 %v21648_v44 }
 0x945   :  { %5709 = vmatpush1.bf16.msra.mxu0 %v17913_v47  ;;  %v21759_v47 = vld [vmem:[#allocation31_spill] sm:$0xff] }
 0x946   :  { %5710 = vmatprep.subr.bf16.mxu0 %v21648_v44 }
 0x949   :  { %5711 = vmatpush1.bf16.msra.mxu0 %v17914_v12  ;;  %v21760_v12 = vld [vmem:[#allocation29_spill] sm:$0xff] }
 0x94a   :  { %5712 = vmatprep.subr.bf16.mxu0 %v21648_v44 }
 0x94d   :  { %5713 = vmatpush1.bf16.msra.mxu0 %v17915_v8  ;;  %v21761_v8 = vpack.c.bf16 %v21759_v47, %v21760_v12  ;;  %v6279_v47 = vld [vmem:[%s20364_s7 + $0x10] sm:$0xff] }
 0x94e   :  { %5714 = vmatprep.subr.bf16.mxu0 %v21648_v44 }
 0x951   :  { %5715 = vmatpush1.bf16.msra.mxu0 %v17916_v0  ;;  %v21762_v0 = vld [vmem:[#allocation36_spill] sm:$0xff] }
 0x952   :  { %5716 = vmatprep.subr.bf16.mxu0 %v21648_v44 }
 0x955   :  { %5717 = vmatpush1.bf16.msra.mxu0 %v17917_v45  ;;  %v21763_v45 = vld [vmem:[#allocation34_spill] sm:$0xff] }
 0x956   :  { %5718 = vmatprep.subr.bf16.mxu0 %v21648_v44  ;;  %v21764_v3 = vpack.c.bf16 %v21762_v0, %v21763_v45  ;;  %v6280_v0 = vld [vmem:[%s20364_s7 + $0x18] sm:$0xff] }
 0x959   :  { %5719 = vmatpush1.bf16.msra.mxu0 %v5692_v37  ;;  %v17946_v37 = vld [vmem:[%s19127_s29 + $0x5e4] sm:$0xff]  }
 0x95a   :  { %5861 = vmatprep.subr.bf16.mxu0 %v21648_v44 }
 0x95c   :  { %5727 = vmatmul.mubr.bf16.vlgmr.msra.gmra.mrb[136].mxu0 %v21742_v59  ;;  %v21767_v59 = vpack.c.bf16 %v21765_v61, %v21766_v9 }
 0x95d   :  { %15028 = vmatprep.mubr.msk.bf16.mxu0 %vm2595_vm1, %v21743_v46  ;;  %5862 = vmatpush1.bf16.msra.mxu0 %v17919_v27  ;;  %v17947_v27 = vld [vmem:[%s19127_s29 + $0x5ec] sm:$0xff]   ;;  %v21768_v46 = vpack.c.bf16 %v19854_v32, %v19845_v14  ;;  %v17952_v32 = vld [vmem:[%s19127_s29 + $0x614] sm:$0xff]   ;;  %v17953_v14 = vld [vmem:[%s19127_s29 + $0x61c] sm:$0xff]  }
 0x95e   :  { %5863 = vmatprep.subr.bf16.mxu0 %v21648_v44 }
 0x961   :  { %5864 = vmatpush1.bf16.msra.mxu0 %v17920_v25  ;;  %v17948_v25 = vld [vmem:[%s19127_s29 + $0x5f4] sm:$0xff]  }
 0x962   :  { %5865 = vmatprep.subr.bf16.mxu0 %v21648_v44 }
 0x964   :  { %5735 = vmatmul.mubr.bf16.gmra.mrb[140].mxu0 %v21744_v38  ;;  %v17950_v38 = vld [vmem:[%s19127_s29 + $0x604] sm:$0xff]  }
 0x965   :  { %5866 = vmatpush1.bf16.msra.mxu0 %v17921_v63  ;;  %15067 = vmatprep.mubr.msk.bf16.mxu0 %vm2595_vm1, %v21746_v7  ;;  %v17949_v63 = vld [vmem:[%s19127_s29 + $0x5fc] sm:$0xff]   ;;  %v17954_v7 = vld [vmem:[%s19127_s29 + $0x624] sm:$0xff]  }
 0x966   :  { %5867 = vmatprep.subr.bf16.mxu0 %v21648_v44 }
 0x969   :  { %5868 = vmatpush1.bf16.msra.mxu0 %v17922_v42  ;;  %v17955_v42 = vld [vmem:[%s19127_s29 + $0x62c] sm:$0xff]  }
 0x96a   :  { %5869 = vmatprep.subr.bf16.mxu0 %v21648_v44 }
 0x96d   :  { %5870 = vmatpush1.bf16.msra.mxu0 %v17923_v36  ;;  %v17956_v36 = vld [vmem:[%s19127_s29 + $0x634] sm:$0xff]  }
 0x96e   :  { %5871 = vmatprep.subr.bf16.mxu0 %v21648_v44 }
 0x971   :  { %5872 = vmatpush1.bf16.msra.mxu0 %v17924_v28  ;;  %v17957_v28 = vld [vmem:[%s19127_s29 + $0x63c] ss:$0 sps:$4 sm:$0x33]   ;;  %s13884_s29 = sld [smem:[%s21603_s0 + %s18566_s26]]   ;;  %s18581_s26 = smov 34  }
 0x972   :  { %5873 = vmatprep.subr.bf16.mxu0 %v21648_v44 }
 0x975   :  { %5874 = vmatpush1.bf16.msra.mxu0 %v17925_v40  ;;  %v6193_v40 = vsel %vm3724_vm3, %v17957_v28, 0 }
 0x976   :  { %5875 = vmatprep.subr.bf16.mxu0 %v21648_v44 }
 0x979   :  { %5876 = vmatpush1.bf16.msra.mxu0 %v17926_v19  ;;  %v21769_v19 = vld [vmem:[#allocation38_spill] sm:$0xff] }
 0x97a   :  { %5877 = vmatprep.subr.bf16.mxu0 %v21648_v44 }
 0x97d   :  { %5878 = vmatpush1.bf16.msra.mxu0 %v17927_v15  ;;  %v21770_v15 = vld [vmem:[#allocation37_spill] sm:$0xff] }
 0x97e   :  { %5879 = vmatprep.subr.bf16.mxu0 %v21648_v44 }
 0x981   :  { %5880 = vmatpush1.bf16.msra.mxu0 %v17928_v21  ;;  %v21771_v21 = vpack.c.bf16 %v21769_v19, %v21770_v15 }
 0x982   :  { %5881 = vmatprep.subr.bf16.mxu0 %v21648_v44 }
 0x985   :  { %5882 = vmatpush1.bf16.msra.mxu0 %v17929_v18 }
 0x986   :  { %5883 = vmatprep.subr.bf16.mxu0 %v21648_v44 }
 0x989   :  { %5884 = vmatpush1.bf16.msra.mxu0 %v17930_v2 }
 0x98a   :  { %5885 = vmatprep.subr.bf16.mxu0 %v21648_v44 }
 0x98d   :  { %5886 = vmatpush1.bf16.msra.mxu0 %v5859_v39 }
 0x98e   :  { %6028 = vmatprep.subr.bf16.mxu0 %v21648_v44 }
 0x990   :  { %5894 = vmatmul.mubr.bf16.vlgmr.msra.gmra.mrb[136].mxu0 %v21749_v34 }
 0x991   :  { %15068 = vmatprep.mubr.msk.bf16.mxu0 %vm2595_vm1, %v21752_v24  ;;  %6029 = vmatpush1.bf16.msra.mxu0 %v17932_v5 }
 0x992   :  { %6030 = vmatprep.subr.bf16.mxu0 %v21648_v44 }
 0x995   :  { %6031 = vmatpush1.bf16.msra.mxu0 %v17933_v35 }
 0x996   :  { %6032 = vmatprep.subr.bf16.mxu0 %v21648_v44 }
 0x998   :  { %5902 = vmatmul.mubr.bf16.gmra.mrb[140].mxu0 %v21755_v57  ;;  %v6528_v57 = vld [vmem:[%s13870_s11] sm:$0xff] }
 0x999   :  { %6033 = vmatpush1.bf16.msra.mxu0 %v17934_v41  ;;  %15107 = vmatprep.mubr.msk.bf16.mxu0 %vm2595_vm1, %v21758_v10  ;;  %v6557_v10 = vld [vmem:[%s20372_s15 + $0x8] sm:$0xff] }
 0x99a   :  { %6034 = vmatprep.subr.bf16.mxu0 %v21648_v44 }
 0x99d   :  { %6035 = vmatpush1.bf16.msra.mxu0 %v17935_v56  ;;  %v6530_v56 = vld [vmem:[%s13870_s11 + $0x10] sm:$0xff] }
 0x99e   :  { %6036 = vmatprep.subr.bf16.mxu0 %v21648_v44 }
 0x9a1   :  { %6037 = vmatpush1.bf16.msra.mxu0 %v17936_v33  ;;  %v6531_v33 = vld [vmem:[%s13870_s11 + $0x18] sm:$0xff]  ;;  %s13903_s11 = sld [smem:[%s21603_s0 + %s18569_s8]]   ;;  %s18584_s8 = smov 38  }
 0x9a2   :  { %6038 = vmatprep.subr.bf16.mxu0 %v21648_v44 }
 0x9a5   :  { %6039 = vmatpush1.bf16.msra.mxu0 %v17937_v54 }
 0x9a6   :  { %6040 = vmatprep.subr.bf16.mxu0 %v21648_v44 }
 0x9a9   :  { %6041 = vmatpush1.bf16.msra.mxu0 %v17938_v6 }
 0x9aa   :  { %6042 = vmatprep.subr.bf16.mxu0 %v21648_v44 }
 0x9ad   :  { %6043 = vmatpush1.bf16.msra.mxu0 %v17939_v17 }
 0x9ae   :  { %6044 = vmatprep.subr.bf16.mxu0 %v21648_v44 }
 0x9b1   :  { %6045 = vmatpush1.bf16.msra.mxu0 %v17940_v52 }
 0x9b2   :  { %6046 = vmatprep.subr.bf16.mxu0 %v21648_v44 }
 0x9b5   :  { %6047 = vmatpush1.bf16.msra.mxu0 %v17941_v16 }
 0x9b6   :  { %6048 = vmatprep.subr.bf16.mxu0 %v21648_v44 }
 0x9b9   :  { %6049 = vmatpush1.bf16.msra.mxu0 %v17942_v30 }
 0x9ba   :  { %6050 = vmatprep.subr.bf16.mxu0 %v21648_v44 }
 0x9bd   :  { %6051 = vmatpush1.bf16.msra.mxu0 %v17943_v43 }
 0x9be   :  { %6052 = vmatprep.subr.bf16.mxu0 %v21648_v44 }
 0x9c1   :  { %6053 = vmatpush1.bf16.msra.mxu0 %v6026_v53  ;;  %v6278_v53 = vld [vmem:[%s20364_s7 + $0x8] sm:$0xff]  ;;  %s13883_s7 = sld [smem:[%s21603_s0 + %s18568_s4]]   ;;  %s18583_s4 = smov 36  }
 0x9c2   :  { %6195 = vmatprep.subr.bf16.mxu0 %v21648_v44 }
 0x9c4   :  { %6061 = vmatmul.mubr.bf16.vlgmr.msra.gmra.mrb[136].mxu0 %v21761_v8 }
 0x9c5   :  { %15108 = vmatprep.mubr.msk.bf16.mxu0 %vm2595_vm1, %v21764_v3  ;;  %6196 = vmatpush1.bf16.msra.mxu0 %v17945_v1 }
 0x9c6   :  { %6197 = vmatprep.subr.bf16.mxu0 %v21648_v44 }
 0x9c9   :  { %6198 = vmatpush1.bf16.msra.mxu0 %v17946_v37 }
 0x9ca   :  { %6199 = vmatprep.subr.bf16.mxu0 %v21648_v44 }
 0x9cc   :  { %6069 = vmatmul.mubr.bf16.gmra.mrb[140].mxu0 %v21767_v59 }
 0x9cd   :  { %6200 = vmatpush1.bf16.msra.mxu0 %v17947_v27  ;;  %15147 = vmatprep.mubr.msk.bf16.mxu0 %vm2595_vm1, %v21768_v46 }
 0x9ce   :  { %6201 = vmatprep.subr.bf16.mxu0 %v21648_v44 }
 0x9d1   :  { %6202 = vmatpush1.bf16.msra.mxu0 %v17948_v25 }
 0x9d2   :  { %6203 = vmatprep.subr.bf16.mxu0 %v21648_v44 }
 0x9d5   :  { %6204 = vmatpush1.bf16.msra.mxu0 %v17949_v63 }
 0x9d6   :  { %6205 = vmatprep.subr.bf16.mxu0 %v21648_v44 }
 0x9d9   :  { %6206 = vmatpush1.bf16.msra.mxu0 %v17950_v38 }
 0x9da   :  { %6207 = vmatprep.subr.bf16.mxu0 %v21648_v44 }
 0x9dd   :  { %6208 = vmatpush1.bf16.msra.mxu0 %v17951_v50 }
 0x9de   :  { %6209 = vmatprep.subr.bf16.mxu0 %v21648_v44 }
 0x9e1   :  { %6210 = vmatpush1.bf16.msra.mxu0 %v17952_v32 }
 0x9e2   :  { %6211 = vmatprep.subr.bf16.mxu0 %v21648_v44 }
 0x9e5   :  { %6212 = vmatpush1.bf16.msra.mxu0 %v17953_v14 }
 0x9e6   :  { %6213 = vmatprep.subr.bf16.mxu0 %v21648_v44 }
 0x9e9   :  { %6214 = vmatpush1.bf16.msra.mxu0 %v17954_v7 }
 0x9ea   :  { %6215 = vmatprep.subr.bf16.mxu0 %v21648_v44 }
 0x9ed   :  { %6216 = vmatpush1.bf16.msra.mxu0 %v17955_v42 }
 0x9ee   :  { %6217 = vmatprep.subr.bf16.mxu0 %v21648_v44 }
 0x9f1   :  { %6218 = vmatpush1.bf16.msra.mxu0 %v17956_v36 }
 0x9f2   :  { %6219 = vmatprep.subr.bf16.mxu0 %v21648_v44 }
 0x9f5   :  { %6220 = vmatpush1.bf16.msra.mxu0 %v6193_v40 }
 0x9f8   :  { %6228 = vmatmul.mubr.bf16.vlgmr.msra.gmra.mrb[136].mxu0 %v21771_v21 }
 0x9f9   :  { %15148 = vmatprep.mubr.msk.bf16.mxu0 %vm2595_vm1, %v6084_v23 }
 0xa00   :  { %6236 = vmatmul.mubr.bf16.gmra.mrb[140].mxu0 %v6083_v13 }
 0xacb   :  { %v20333_v18 = vpop.f32.mrb[136].mxu0 }
 0xacc   :  { %v6231_v2 = vpop.f32.mrb[137].mxu0  ;;  %v6249_v29 = vsel %vm6248_vm4, %v20333_v18, 0.0  ;;  %v6261_v4 = vmul.f32 %v20333_v18, %v20333_v18 }
 0xacd   :  { %6250 = vadd.xlane.f32.xlu1 %v6249_v29  ;;  %v20337_v39 = vpop.f32.mrb[138].mxu0 }
 0xace   :  { %v6234_v5 = vpop.f32.mrb[139].mxu0  ;;  %v6252_v60 = vsel %vm6248_vm4, %v20337_v39, 0.0  ;;  %v6262_v34 = vmul.f32 %v20337_v39, %v20337_v39  ;;  %v6265_v51 = vsel %vm6248_vm4, %v6261_v4, 0.0 }
 0xacf   :  { %6253 = vadd.xlane.f32.xlu0 %v6252_v60  ;;  %v6559_v60 = vld [vmem:[%s20372_s15 + $0x18] sm:$0xff] }
 0xad0   :  { %v6268_v24 = vsel %vm6248_vm4, %v6262_v34, 0.0 }
 0xad3   :  { %v20341_v23 = vpop.f32.mrb[140].mxu0 }
 0xad4   :  { %v6239_v62 = vpop.f32.mrb[141].mxu0  ;;  %v6255_v49 = vsel %vm6248_vm4, %v20341_v23, 0.0  ;;  %v6263_v20 = vmul.f32 %v20341_v23, %v20341_v23 }
 0xad5   :  { %6256 = vadd.xlane.f32.xlu0 %v6255_v49  ;;  %v20347_v13 = vpop.f32.mrb[142].mxu0  ;;  %v6558_v62 = vld [vmem:[%s20372_s15 + $0x10] sm:$0xff]  ;;  %v6620_v49 = vld [vmem:[%s20393_s19] sm:$0xff]  ;;  %s13861_s15 = sld [smem:[%s21603_s0 + %s18570_s12]]   ;;  %s18585_s12 = smov 41  }
 0xad6   :  { %v6242_v26 = vpop.f32.mrb[143].mxu0  ;;  %v6258_v22 = vsel %vm6248_vm4, %v20347_v13, 0.0  ;;  %v6264_v35 = vmul.f32 %v20347_v13, %v20347_v13  ;;  %v6271_v41 = vsel %vm6248_vm4, %v6263_v20, 0.0 }
 0xad7   :  { %6259 = vadd.xlane.f32.xlu1 %v6258_v22 }
 0xad8   :  { %v6274_v31 = vsel %vm6248_vm4, %v6264_v35, 0.0 }
 0xad9   :  { %6266 = vadd.xlane.f32.xlu0 %v6265_v51 }
 0xadb   :  { %6269 = vadd.xlane.f32.xlu1 %v6268_v24 }
 0xadd   :  { %6272 = vadd.xlane.f32.xlu0 %v6271_v41 }
 0xadf   :  { %6275 = vadd.xlane.f32.xlu1 %v6274_v31 }
 0xaf0   :  { %6534 = vperm.xlu1 %17317, %v6528_v57  }
 0xaf3   :  { %6539 = vperm.xlu0 %17316, %v6529_v58  }
 0xaf4   :  { %6562 = vperm.xlu1 %17317, %v6556_v11  }
 0xaf7   :  { %6567 = vperm.xlu0 %17316, %v6557_v10  }
 0xaf8   :  { %6544 = vperm.xlu1 %17317, %v6530_v56  }
 0xafb   :  { %6549 = vperm.xlu0 %17316, %v6531_v33  }
 0xb5a   :  { %v6251_v54 = vpop.xlane.xlu1 %6250 }
 0xb5c   :  { %v6254_v6 = vpop.xlane.xlu0 %6253 }
 0xb5d   :  { %v16812_v17 = vpack.c.bf16 %v6254_v6, %v6251_v54 }
 0xb5f   :  { %16813 = vmatprep.subr.bf16.mxu1 %v16812_v17 }
 0xb60   :  { %16815 = vmatpush3.bf16.msra.mxu1 %v16812_v17 }
 0xb62   :  { %v6257_v52 = vpop.xlane.xlu0 %6256 }
 0xb64   :  { %v6260_v16 = vpop.xlane.xlu1 %6259 }
 0xb65   :  { %v16816_v30 = vpack.c.bf16 %v6260_v16, %v6257_v52 }
 0xb66   :  { %v6267_v43 = vpop.xlane.xlu0 %6266 }
 0xb67   :  { %16817 = vmatprep.subr.bf16.mxu1 %v16816_v30 }
 0xb68   :  { %16819 = vmatpush3.bf16.msra.mxu1 %v16816_v30  ;;  %v6270_v48 = vpop.xlane.xlu1 %6269 }
 0xb69   :  { %v16820_v1 = vpack.c.bf16 %v6270_v48, %v6267_v43 }
 0xb6a   :  { %v6273_v12 = vpop.xlane.xlu0 %6272 }
 0xb6b   :  { %16385 = vmatmul.mubr.msk.f32.vlgmr.msra.gmra.mrb[34].mxu1 %vm6281_vm5, %v6278_v53  ;;  %16821 = vmatprep.subr.bf16.mxu1 %v16820_v1 }
 0xb6c   :  { %16823 = vmatpush3.bf16.msra.mxu1 %v16820_v1  ;;  %v6276_v8 = vpop.xlane.xlu1 %6275  ;;  %16387 = vmatprep.mubr.msk.f32.mxu1 %vm6281_vm5, %v6279_v47 }
 0xb6d   :  { %v16824_v45 = vpack.c.bf16 %v6276_v8, %v6273_v12 }
 0xb6f   :  { %16388 = vmatmul.mubr.msk.f32.gmra.mrb[40].mxu1 %vm6281_vm5, %v6280_v0  ;;  %16825 = vmatprep.subr.bf16.mxu1 %v16824_v45 }
 0xb70   :  { %16827 = vmatpush3.bf16.msra.mxu1 %v16824_v45  ;;  %16398 = vmatprep.mubr.msk.f32.mxu1 %vm6281_vm5, %v6277_v55  ;;  %v6535_v26 = vpop.permute.xlu1 %6534 }
 0xb72   :  { %v6540_v4 = vpop.permute.xlu0 %6539 }
 0xb73   :  { %16399 = vmatmul.mubr.msk.f32.vlgmr.msra.gmra.mrb[42].mxu1 %vm6281_vm5, %v6278_v53 }
 0xb74   :  { %16401 = vmatprep.mubr.msk.f32.mxu1 %vm6281_vm5, %v6279_v47  ;;  %v6563_v34 = vpop.permute.xlu1 %6562 }
 0xb76   :  { %v6568_v22 = vpop.permute.xlu0 %6567 }
 0xb77   :  { %16402 = vmatmul.mubr.msk.f32.gmra.mrb[44].mxu1 %vm6281_vm5, %v6280_v0 }
 0xb78   :  { %16412 = vmatprep.mubr.msk.f32.mxu1 %vm6281_vm5, %v6620_v49  ;;  %v6545_v20 = vpop.permute.xlu1 %6544 }
 0xb7a   :  { %v6550_v51 = vpop.permute.xlu0 %6549 }
 0xc3e   :  { %v16386_v3 = vpop.f32.mrb[34].mxu1 }
 0xc3f   :  { %6479 = vperm.xlu1 %17317, %v16386_v3   ;;  %v6360_v37 = vpop.f32.mrb[35].mxu1  ;;  %v6465_v9 = vmul.f32 %v16386_v3, %v16386_v3 }
 0xc40   :  { %6474 = vperm.xlu0 %17316, %v6360_v37   ;;  %v6464_v59 = vmul.f32 %v6360_v37, %v6360_v37 }
 0xc42   :  { %v16389_v27 = vpop.f32.mrb[40].mxu1 }
 0xc43   :  { %v6370_v61 = vpop.f32.mrb[41].mxu1  ;;  %v6467_v50 = vmul.f32 %v16389_v27, %v16389_v27 }
 0xc44   :  { %6489 = vperm.xlu0 %17316, %v16389_v27   ;;  %6484 = vperm.xlu1 %17317, %v6370_v61   ;;  %v6466_v14 = vmul.f32 %v6370_v61, %v6370_v61 }
 0xc46   :  { %v16400_v46 = vpop.f32.mrb[42].mxu1 }
 0xc47   :  { %v6469_v25 = vsub.f32 %v16400_v46, %v6465_v9  ;;  %v6445_v63 = vpop.f32.mrb[43].mxu1 }
 0xc48   :  { %v6468_v38 = vsub.f32 %v6445_v63, %v6464_v59 }
 0xc49   :  { %v6497_v32 = vadd.f32 1e-05, %v6469_v25 }
 0xc4a   :  { %v6496_v7 = vadd.f32 1e-05, %v6468_v38  ;;  %v16403_v42 = vpop.f32.mrb[44].mxu1 }
 0xc4b   :  { %18476 = vrsqrt.f32 %v6497_v32  ;;  %v6471_v36 = vsub.f32 %v16403_v42, %v6467_v50  ;;  %v6455_v28 = vpop.f32.mrb[45].mxu1 }
 0xc4c   :  { %18478 = vrsqrt.f32 %v6496_v7  ;;  %v6470_v40 = vsub.f32 %v6455_v28, %v6466_v14 }
 0xc4d   :  { %v6499_v19 = vadd.f32 1e-05, %v6471_v36 }
 0xc4e   :  { %v6498_v15 = vadd.f32 1e-05, %v6470_v40 }
 0xc4f   :  { %18480 = vrsqrt.f32 %v6499_v19 }
 0xc50   :  { %18482 = vrsqrt.f32 %v6498_v15 }
 0xc55   :  { %v18477_v21 = vpop.eup %18476 }
 0xc56   :  { %v18479_v2 = vpop.eup %18478  ;;  %6511 = vperm.xlu0 %17316, %v18477_v21  }
 0xc57   :  { %6506 = vperm.xlu1 %17317, %v18479_v2  }
 0xc59   :  { %v18481_v29 = vpop.eup %18480 }
 0xc5a   :  { %v18483_v5 = vpop.eup %18482  ;;  %6521 = vperm.xlu0 %17316, %v18481_v29  }
 0xc5b   :  { %6516 = vperm.xlu1 %17317, %v18483_v5  }
 0xc5e   :  { %6577 = vperm.xlu0 %17316, %v6559_v60  }
 0xc5f   :  { %6572 = vperm.xlu1 %17317, %v6558_v62  }
 0xcbe   :  { %v6480_v35 = vpop.permute.xlu1 %6479 }
 0xcbf   :  { %v6475_v24 = vpop.permute.xlu0 %6474  ;;  %v6493_v55 = vsub.f32 %v20337_v39, %v6480_v35  ;;  %v6621_v35 = vld [vmem:[%s20393_s19 + $0x8] sm:$0xff] }
 0xcc0   :  { %v6492_v57 = vsub.f32 %v20333_v18, %v6475_v24 }
 0xcc3   :  { %v6490_v41 = vpop.permute.xlu0 %6489  ;;  %v6485_v31 = vpop.permute.xlu1 %6484 }
 0xcc4   :  { %v6495_v33 = vsub.f32 %v20347_v13, %v6490_v41  ;;  %v6494_v6 = vsub.f32 %v20341_v23, %v6485_v31  ;;  %v17958_v41 = vld [vmem:[%s20400_s23 + $0x14] sm:$0xff]  }
 0xcc5   :  { %v6622_v31 = vld [vmem:[%s20393_s19 + $0x10] sm:$0xff] }
 0xcd5   :  { %v6512_v58 = vpop.permute.xlu0 %6511 }
 0xcd6   :  { %v6525_v11 = vmul.f32 %v6512_v58, %v6493_v55  ;;  %v6507_v10 = vpop.permute.xlu1 %6506  ;;  %v21772_v55 = vmov 0.0   ;;  %v17959_v58 = vld [vmem:[%s20400_s23 + $0x1c] sm:$0xff]  }
 0xcd7   :  { %v6524_v56 = vmul.f32 %v6507_v10, %v6492_v57  ;;  %v6623_v57 = vld [vmem:[%s20393_s19 + $0x18] sm:$0xff]  ;;  %v6625_v10 = vld [vmem:[%s20393_s19 + $0x28] sm:$0xff] }
 0xcd8   :  { %v6553_v54 = vmul.f32 %v6540_v4, %v6525_v11  ;;  %v6624_v11 = vld [vmem:[%s20393_s19 + $0x20] sm:$0xff] }
 0xcd9   :  { %v6552_v17 = vmul.f32 %v6535_v26, %v6524_v56  ;;  %v6522_v52 = vpop.permute.xlu0 %6521  ;;  %v6626_v56 = vld [vmem:[%s20393_s19 + $0x30] sm:$0xff] }
 0xcda   :  { %v6581_v16 = vadd.f32 %v6568_v22, %v6553_v54  ;;  %v6527_v30 = vmul.f32 %v6522_v52, %v6495_v33  ;;  %v6517_v43 = vpop.permute.xlu1 %6516  ;;  %v6627_v33 = vld [vmem:[%s20393_s19 + $0x38] sm:$0xff]  ;;  %v6628_v54 = vld [vmem:[%s20393_s19 + $0x40] sm:$0xff] }
 0xcdb   :  { %v6580_v48 = vadd.f32 %v6563_v34, %v6552_v17  ;;  %v6526_v53 = vmul.f32 %v6517_v43, %v6494_v6  ;;  %v6629_v6 = vld [vmem:[%s20393_s19 + $0x48] sm:$0xff]  ;;  %v6630_v17 = vld [vmem:[%s20393_s19 + $0x50] sm:$0xff]  ;;  %v6631_v52 = vld [vmem:[%s20393_s19 + $0x58] sm:$0xff] }
 0xcdc   :  { %v6589_v1 = vmul.f32 0.044715, %v6581_v16  ;;  %v6555_v39 = vmul.f32 %v6550_v51, %v6527_v30  ;;  %v6585_v19 = vmul.f32 0.5, %v6581_v16  ;;  %v6633_v30 = vld [vmem:[%s20393_s19 + $0x68] sm:$0xff]  ;;  %v6634_v43 = vld [vmem:[%s20393_s19 + $0x70] sm:$0xff] }
 0xcdd   :  { %v6588_v47 = vmul.f32 0.044715, %v6580_v48  ;;  %v6578_v18 = vpop.permute.xlu0 %6577  ;;  %v6554_v12 = vmul.f32 %v6545_v20, %v6526_v53  ;;  %v6584_v21 = vmul.f32 0.5, %v6580_v48  ;;  %v6636_v53 = vld [vmem:[%s20393_s19 + $0x80] sm:$0xff] }
 0xcde   :  { %v6583_v8 = vadd.f32 %v6578_v18, %v6555_v39  ;;  %v6573_v0 = vpop.permute.xlu1 %6572  ;;  %v6593_v45 = vmul.f32 %v6589_v1, %v6581_v16  ;;  %v6637_v1 = vld [vmem:[%s20393_s19 + $0x88] sm:$0xff]  ;;  %v17960_v39 = vld [vmem:[%s20400_s23 + $0x24] ss:$0 sps:$4 sm:$0x33]  }
 0xcdf   :  { %v6582_v3 = vadd.f32 %v6573_v0, %v6554_v12  ;;  %v6592_v13 = vmul.f32 %v6588_v47, %v6580_v48  ;;  %v6879_v47 = vsel %vm3724_vm3, %v17960_v39, 0 }
 0xce0   :  { %v6591_v37 = vmul.f32 0.044715, %v6583_v8  ;;  %v6597_v27 = vmul.f32 %v6593_v45, %v6581_v16  ;;  %v6587_v49 = vmul.f32 0.5, %v6583_v8 }
 0xce1   :  { %v6590_v23 = vmul.f32 0.044715, %v6582_v3  ;;  %v6596_v61 = vmul.f32 %v6592_v13, %v6580_v48  ;;  %v6586_v22 = vmul.f32 0.5, %v6582_v3 }
 0xce2   :  { %v6595_v9 = vmul.f32 %v6591_v37, %v6583_v8  ;;  %v6601_v59 = vadd.f32 %v6597_v27, %v6581_v16  ;;  %v6632_v16 = vld [vmem:[%s20393_s19 + $0x60] sm:$0xff]  ;;  %v17962_v27 = vld [vmem:[%s20400_s23 + $0x8] sm:$0xff]  }
 0xce3   :  { %v6594_v46 = vmul.f32 %v6590_v23, %v6582_v3  ;;  %v6600_v25 = vadd.f32 %v6596_v61, %v6580_v48  ;;  %v6635_v48 = vld [vmem:[%s20393_s19 + $0x78] sm:$0xff]  ;;  %v17963_v61 = vld [vmem:[%s20400_s23 + $0x10] ss:$0 sps:$4 sm:$0x33]   ;;  %s13885_s19 = sld [smem:[%s21603_s0 + %s18571_s16]]   ;;  %s18586_s16 = smov 39  }
 0xce4   :  { %v6599_v63 = vmul.f32 %v6595_v9, %v6583_v8  ;;  %v6605_v38 = vmul.f32 0.7978846, %v6601_v59 }
 0xce5   :  { %v6598_v50 = vmul.f32 %v6594_v46, %v6582_v3  ;;  %v6604_v32 = vmul.f32 0.7978846, %v6600_v25  ;;  %v6941_v25 = vsel %vm3724_vm3, %v17963_v61, 0 }
 0xce6   :  { %18484 = vtanh.f32 %v6605_v38  ;;  %v6603_v14 = vadd.f32 %v6599_v63, %v6583_v8 }
 0xce7   :  { %18486 = vtanh.f32 %v6604_v32  ;;  %v6602_v7 = vadd.f32 %v6598_v50, %v6582_v3  ;;  %v17961_v3 = vld [vmem:[%s20400_s23] sm:$0xff]   ;;  %v17964_v50 = vld [vmem:[%s20400_s23 + $0x28] sm:$0xff]  }
 0xce8   :  { %v6607_v42 = vmul.f32 0.7978846, %v6603_v14 }
 0xce9   :  { %v6606_v36 = vmul.f32 0.7978846, %v6602_v7 }
 0xcea   :  { %18488 = vtanh.f32 %v6607_v42  ;;  %v17965_v42 = vld [vmem:[%s20400_s23 + $0x30] sm:$0xff]  }
 0xceb   :  { %18490 = vtanh.f32 %v6606_v36 }
 0xcf0   :  { %v18485_v28 = vpop.eup %18484 }
 0xcf1   :  { %v18487_v40 = vpop.eup %18486  ;;  %v6613_v15 = vadd.f32 1.0, %v18485_v28  ;;  %v17966_v28 = vld [vmem:[%s20400_s23 + $0x38] ss:$0 sps:$4 sm:$0x33]  }
 0xcf2   :  { %v6612_v2 = vadd.f32 1.0, %v18487_v40 }
 0xcf3   :  { %v6617_v29 = vmul.f32 %v6613_v15, %v6585_v19 }
 0xcf4   :  { %v18489_v5 = vpop.eup %18488  ;;  %v6616_v60 = vmul.f32 %v6612_v2, %v6584_v21  ;;  %v7010_v21 = vsel %vm3724_vm3, %v17966_v28, 0 }
 0xcf5   :  { %v18491_v62 = vpop.eup %18490  ;;  %v6615_v4 = vadd.f32 1.0, %v18489_v5  ;;  %v17967_v5 = vld [vmem:[%s20400_s23 + $0x3c] sm:$0xff]  }
 0xcf6   :  { %v16828_v26 = vpack.c.bf16 %v6617_v29, %v6616_v60  ;;  %v6614_v34 = vadd.f32 1.0, %v18491_v62 }
 0xcf7   :  { %v6619_v51 = vmul.f32 %v6615_v4, %v6587_v49  ;;  %v17968_v4 = vld [vmem:[%s20400_s23 + $0x44] sm:$0xff]  }
 0xcf8   :  { %16829 = vmatprep.subr.bf16.mxu1 %v16828_v26  ;;  %v6618_v20 = vmul.f32 %v6614_v34, %v6586_v22  ;;  %v17969_v22 = vld [vmem:[%s20400_s23 + $0x4c] ss:$0 sps:$4 sm:$0x33]  }
 0xcf9   :  { %16831 = vmatpush3.bf16.msra.mxu1 %v16828_v26 }
 0xcfa   :  { %v16832_v24 = vpack.c.bf16 %v6619_v51, %v6618_v20  ;;  %v7081_v51 = vsel %vm3724_vm3, %v17969_v22, 0  ;;  %v17970_v20 = vld [vmem:[%s20400_s23 + $0x50] sm:$0xff]  }
 0xcfc   :  { %16833 = vmatprep.subr.bf16.mxu1 %v16832_v24 }
 0xcfd   :  { %16835 = vmatpush3.bf16.msra.mxu1 %v16832_v24  ;;  %v17971_v24 = vld [vmem:[%s20400_s23 + $0x58] sm:$0xff]  }
 0xcfe   :  { %16439 = vmatprep.subr.bf16.mxu1 %v21772_v55 }
 0xd00   :  { %16413 = vmatmul.mubr.msk.f32.vlgmr.msra.gmra.mrb[46].mxu1 %vm6281_vm5, %v6621_v35  ;;  %v17972_v35 = vld [vmem:[%s20400_s23 + $0x60] ss:$0 sps:$4 sm:$0x33]  }
 0xd01   :  { %16415 = vmatprep.mubr.msk.f32.mxu1 %vm6281_vm5, %v6622_v31  ;;  %16440 = vmatpush3.bf16.msra.mxu1 %v17958_v41  ;;  %v7152_v41 = vsel %vm3724_vm3, %v17972_v35, 0  ;;  %v17973_v31 = vld [vmem:[%s20400_s23 + $0x64] sm:$0xff]  }
 0xd02   :  { %16441 = vmatprep.subr.bf16.mxu1 %v21772_v55 }
 0xd04   :  { %16416 = vmatmul.mubr.msk.f32.gmra.mrb[48].mxu1 %vm6281_vm5, %v6623_v57  ;;  %v17974_v57 = vld [vmem:[%s20400_s23 + $0x6c] sm:$0xff]  }
 0xd05   :  { %16418 = vmatprep.mubr.msk.f32.mxu1 %vm6281_vm5, %v6624_v11  ;;  %16442 = vmatpush3.bf16.msra.mxu1 %v17959_v58  ;;  %v17975_v58 = vld [vmem:[%s20400_s23 + $0x74] ss:$0 sps:$4 sm:$0x33]  }
 0xd06   :  { %16443 = vmatprep.subr.bf16.mxu1 %v21772_v55  ;;  %v7223_v11 = vsel %vm3724_vm3, %v17975_v58, 0 }
 0xd08   :  { %16419 = vmatmul.mubr.msk.f32.gmra.mrb[50].mxu1 %vm6281_vm5, %v6625_v10  ;;  %v17976_v10 = vld [vmem:[%s20400_s23 + $0x78] sm:$0xff]  }
 0xd09   :  { %16421 = vmatprep.mubr.msk.f32.mxu1 %vm6281_vm5, %v6626_v56  ;;  %16444 = vmatpush3.bf16.msra.mxu1 %v6879_v47  ;;  %v17977_v56 = vld [vmem:[%s20400_s23 + $0x80] sm:$0xff]  }
 0xd0a   :  { %16449 = vmatprep.subr.bf16.mxu1 %v21772_v55 }
 0xd0c   :  { %16422 = vmatmul.mubr.msk.f32.gmra.mrb[52].mxu1 %vm6281_vm5, %v6627_v33  ;;  %v17978_v33 = vld [vmem:[%s20400_s23 + $0x88] ss:$0 sps:$4 sm:$0x33]  }
 0xd0d   :  { %16424 = vmatprep.mubr.msk.f32.mxu1 %vm6281_vm5, %v6628_v54  ;;  %v7294_v54 = vsel %vm3724_vm3, %v17978_v33, 0 }
 0xd10   :  { %16425 = vmatmul.mubr.msk.f32.gmra.mrb[54].mxu1 %vm6281_vm5, %v6629_v6  ;;  %v17979_v6 = vld [vmem:[%s20400_s23 + $0x8c] sm:$0xff]  }
 0xd11   :  { %16427 = vmatprep.mubr.msk.f32.mxu1 %vm6281_vm5, %v6630_v17  ;;  %v17980_v17 = vld [vmem:[%s20400_s23 + $0x94] sm:$0xff]  }
 0xd14   :  { %16428 = vmatmul.mubr.msk.f32.gmra.mrb[56].mxu1 %vm6281_vm5, %v6631_v52  ;;  %v17981_v52 = vld [vmem:[%s20400_s23 + $0x9c] ss:$0 sps:$4 sm:$0x33]  }
 0xd15   :  { %16430 = vmatprep.mubr.msk.f32.mxu1 %vm6281_vm5, %v6632_v16  ;;  %v7365_v16 = vsel %vm3724_vm3, %v17981_v52, 0 }
 0xd18   :  { %16431 = vmatmul.mubr.msk.f32.gmra.mrb[58].mxu1 %vm6281_vm5, %v6633_v30  ;;  %v17982_v30 = vld [vmem:[%s20400_s23 + $0xa0] sm:$0xff]  }
 0xd19   :  { %16433 = vmatprep.mubr.msk.f32.mxu1 %vm6281_vm5, %v6634_v43  ;;  %v17983_v43 = vld [vmem:[%s20400_s23 + $0xa8] sm:$0xff]  }
 0xd1c   :  { %16434 = vmatmul.mubr.msk.f32.gmra.mrb[60].mxu1 %vm6281_vm5, %v6635_v48  ;;  %v17984_v48 = vld [vmem:[%s20400_s23 + $0xb0] ss:$0 sps:$4 sm:$0x33]   ;;  %s20694_s23 = sld [smem:[%s21603_s0 + %s18572_s20]]   ;;  %s18587_s20 = smov 40  }
 0xd1d   :  { %16436 = vmatprep.mubr.msk.f32.mxu1 %vm6281_vm5, %v6636_v53  ;;  %v7436_v53 = vsel %vm3724_vm3, %v17984_v48, 0 }
 0xd20   :  { %16437 = vmatmul.mubr.msk.f32.gmra.mrb[62].mxu1 %vm6281_vm5, %v6637_v1 }
 0xd21   :  { %16445 = vmatprep.mubr.msk.bf16.mxu1 %vm18556_vm6, %v21772_v55 }
 0xdd3   :  { %v16414_v18 = vpop.f32.mrb[46].mxu1 }
 0xdd4   :  { %v6758_v12 = vpop.f32.mrb[47].mxu1 }
 0xdd5   :  { %v6847_v8 = vpack.c.bf16 %v16414_v18, %v6758_v12 }
 0xdd7   :  { %v16417_v0 = vpop.f32.mrb[48].mxu1 }
 0xdd8   :  { %v6768_v45 = vpop.f32.mrb[49].mxu1 }
 0xdd9   :  { %v6853_v13 = vpack.c.bf16 %v16417_v0, %v6768_v45 }
 0xddb   :  { %16446 = vmatmul.mubr.msk.bf16.vlgmr.msra.gmra.mrb[64].mxu1 %vm6248_vm4, %v6853_v13  ;;  %v16420_v37 = vpop.f32.mrb[50].mxu1 }
 0xddc   :  { %16450 = vmatpush3.bf16.msra.mxu1 %v17961_v3  ;;  %16455 = vmatprep.mubr.msk.bf16.mxu1 %vm18556_vm6, %v21772_v55  ;;  %v6778_v23 = vpop.f32.mrb[51].mxu1 }
 0xddd   :  { %16451 = vmatprep.subr.bf16.mxu1 %v21772_v55  ;;  %v6984_v9 = vpack.c.bf16 %v16420_v37, %v6778_v23  ;;  %v7495_v37 = vld [vmem:[%s13874_s27] sm:$0xff] }
 0xddf   :  { %v16423_v59 = vpop.f32.mrb[52].mxu1 }
 0xde0   :  { %16452 = vmatpush3.bf16.msra.mxu1 %v17962_v27  ;;  %v6788_v46 = vpop.f32.mrb[53].mxu1 }
 0xde1   :  { %16453 = vmatprep.subr.bf16.mxu1 %v21772_v55  ;;  %v7055_v63 = vpack.c.bf16 %v16423_v59, %v6788_v46  ;;  %v7496_v46 = vld [vmem:[%s13874_s27 + $0x8] sm:$0xff]  ;;  %s13886_s27 = sld [smem:[%s21603_s0 + %s18573_s24]]   ;;  %s18588_s24 = smov 42  }
 0xde3   :  { %v16426_v38 = vpop.f32.mrb[54].mxu1 }
 0xde4   :  { %16454 = vmatpush3.bf16.msra.mxu1 %v6941_v25  ;;  %v6798_v32 = vpop.f32.mrb[55].mxu1 }
 0xde5   :  { %16459 = vmatprep.subr.bf16.mxu1 %v21772_v55  ;;  %v7126_v14 = vpack.c.bf16 %v16426_v38, %v6798_v32  ;;  %v7685_v32 = vld [vmem:[%s13875_s1] sm:$0xff] }
 0xde7   :  { %16456 = vmatmul.mubr.msk.bf16.vlgmr.msra.gmra.mrb[64].mxu1 %vm6248_vm4, %v6847_v8  ;;  %v16429_v7 = vpop.f32.mrb[56].mxu1 }
 0xde8   :  { %16460 = vmatpush3.bf16.msra.mxu1 %v17964_v50  ;;  %16465 = vmatprep.mubr.msk.bf16.mxu1 %vm18556_vm6, %v21772_v55  ;;  %v6808_v36 = vpop.f32.mrb[57].mxu1 }
 0xde9   :  { %16461 = vmatprep.subr.bf16.mxu1 %v21772_v55  ;;  %v7197_v40 = vpack.c.bf16 %v16429_v7, %v6808_v36 }
 0xdeb   :  { %v20467_v19 = vpop.f32.mrb[58].mxu1 }
 0xdec   :  { %16462 = vmatpush3.bf16.msra.mxu1 %v17965_v42  ;;  %v6818_v15 = vpop.f32.mrb[59].mxu1 }
 0xded   :  { %16463 = vmatprep.subr.bf16.mxu1 %v21772_v55  ;;  %v7268_v2 = vpack.c.bf16 %v20467_v19, %v6818_v15 }
 0xdef   :  { %v20472_v29 = vpop.f32.mrb[60].mxu1 }
 0xdf0   :  { %16464 = vmatpush3.bf16.msra.mxu1 %v7010_v21  ;;  %v20475_v60 = vpop.f32.mrb[61].mxu1  ;;  %v7700_v21 = vld [vmem:[%s13876_s5 + $0x8] sm:$0xff] }
 0xdf1   :  { %16469 = vmatprep.subr.bf16.mxu1 %v21772_v55  ;;  %v7339_v62 = vpack.c.bf16 %v20472_v29, %v20475_v60  ;;  %v7732_v60 = vld [vmem:[%s13877_s9 + $0x8] sm:$0xff] }
 0xdf3   :  { %16466 = vmatmul.mubr.msk.bf16.vlgmr.msra.gmra.mrb[64].mxu1 %vm6248_vm4, %v6984_v9  ;;  %v20481_v49 = vpop.f32.mrb[62].mxu1 }
 0xdf4   :  { %16470 = vmatpush3.bf16.msra.mxu1 %v17967_v5  ;;  %16475 = vmatprep.mubr.msk.bf16.mxu1 %vm18556_vm6, %v21772_v55  ;;  %v20486_v26 = vpop.f32.mrb[63].mxu1  ;;  %v7686_v5 = vld [vmem:[%s13875_s1 + $0x8] sm:$0xff]  ;;  %s20721_s1 = sld [smem:[%s21603_s0 + %s18574_s28]]  }
 0xdf5   :  { %16471 = vmatprep.subr.bf16.mxu1 %v21772_v55  ;;  %v7410_v34 = vpack.c.bf16 %v20481_v49, %v20486_v26  ;;  %v7731_v49 = vld [vmem:[%s13877_s9] sm:$0xff]  ;;  %v7733_v26 = vld [vmem:[%s13877_s9 + $0x10] sm:$0xff] }
 0xdf6   :  { %v16846_v22 = vpack.c.bf16 %v7733_v26, %v7731_v49  ;;  %v7926_v49 = vld [vmem:[%s20591_s13 + $0xc8] sm:$0xff] }
 0xdf8   :  { %16472 = vmatpush3.bf16.msra.mxu1 %v17968_v4 }
 0xdf9   :  { %16473 = vmatprep.subr.bf16.mxu1 %v21772_v55 }
 0xdfc   :  { %16474 = vmatpush3.bf16.msra.mxu1 %v7081_v51 }
 0xdfd   :  { %16479 = vmatprep.subr.bf16.mxu1 %v21772_v55 }
 0xdff   :  { %16476 = vmatmul.mubr.msk.bf16.vlgmr.msra.gmra.mrb[64].mxu1 %vm6248_vm4, %v7055_v63 }
 0xe00   :  { %16480 = vmatpush3.bf16.msra.mxu1 %v17970_v20  ;;  %16485 = vmatprep.mubr.msk.bf16.mxu1 %vm18556_vm6, %v21772_v55 }
 0xe01   :  { %16481 = vmatprep.subr.bf16.mxu1 %v21772_v55 }
 0xe04   :  { %16482 = vmatpush3.bf16.msra.mxu1 %v17971_v24 }
 0xe05   :  { %16483 = vmatprep.subr.bf16.mxu1 %v21772_v55 }
 0xe08   :  { %16484 = vmatpush3.bf16.msra.mxu1 %v7152_v41 }
 0xe09   :  { %16489 = vmatprep.subr.bf16.mxu1 %v21772_v55 }
 0xe0b   :  { %16486 = vmatmul.mubr.msk.bf16.vlgmr.msra.gmra.mrb[64].mxu1 %vm6248_vm4, %v7126_v14 }
 0xe0c   :  { %16490 = vmatpush3.bf16.msra.mxu1 %v17973_v31  ;;  %16495 = vmatprep.mubr.msk.bf16.mxu1 %vm18556_vm6, %v21772_v55 }
 0xe0d   :  { %16491 = vmatprep.subr.bf16.mxu1 %v21772_v55 }
 0xe10   :  { %16492 = vmatpush3.bf16.msra.mxu1 %v17974_v57 }
 0xe11   :  { %16493 = vmatprep.subr.bf16.mxu1 %v21772_v55 }
 0xe14   :  { %16494 = vmatpush3.bf16.msra.mxu1 %v7223_v11 }
 0xe15   :  { %16499 = vmatprep.subr.bf16.mxu1 %v21772_v55 }
 0xe17   :  { %16496 = vmatmul.mubr.msk.bf16.vlgmr.msra.gmra.mrb[64].mxu1 %vm6248_vm4, %v7197_v40  ;;  %v7699_v40 = vld [vmem:[%s13876_s5] sm:$0xff]  ;;  %s20728_s5 = sld [smem:[%s21603_s0 + %s18575_s2]]  }
 0xe18   :  { %16500 = vmatpush3.bf16.msra.mxu1 %v17976_v10  ;;  %16505 = vmatprep.mubr.msk.bf16.mxu1 %vm18556_vm6, %v21772_v55 }
 0xe19   :  { %16501 = vmatprep.subr.bf16.mxu1 %v21772_v55 }
 0xe1c   :  { %16502 = vmatpush3.bf16.msra.mxu1 %v17977_v56 }
 0xe1d   :  { %16503 = vmatprep.subr.bf16.mxu1 %v21772_v55 }
 0xe20   :  { %16504 = vmatpush3.bf16.msra.mxu1 %v7294_v54 }
 0xe21   :  { %16509 = vmatprep.subr.bf16.mxu1 %v21772_v55 }
 0xe23   :  { %16506 = vmatmul.mubr.msk.bf16.vlgmr.msra.gmra.mrb[64].mxu1 %vm6248_vm4, %v7268_v2 }
 0xe24   :  { %16510 = vmatpush3.bf16.msra.mxu1 %v17979_v6  ;;  %16515 = vmatprep.mubr.msk.bf16.mxu1 %vm18556_vm6, %v21772_v55 }
 0xe25   :  { %16511 = vmatprep.subr.bf16.mxu1 %v21772_v55 }
 0xe28   :  { %16512 = vmatpush3.bf16.msra.mxu1 %v17980_v17 }
 0xe29   :  { %16513 = vmatprep.subr.bf16.mxu1 %v21772_v55 }
 0xe2c   :  { %16514 = vmatpush3.bf16.msra.mxu1 %v7365_v16 }
 0xe2d   :  { %16519 = vmatprep.subr.bf16.mxu1 %v21772_v55 }
 0xe2f   :  { %16516 = vmatmul.mubr.msk.bf16.vlgmr.msra.gmra.mrb[64].mxu1 %vm6248_vm4, %v7339_v62  ;;  %v7734_v62 = vld [vmem:[%s13877_s9 + $0x18] sm:$0xff]  ;;  %s13888_s9 = sld [smem:[%s21603_s0 + %s18576_s6]]  }
 0xe30   :  { %16520 = vmatpush3.bf16.msra.mxu1 %v17982_v30  ;;  %16525 = vmatprep.mubr.msk.bf16.mxu1 %vm18556_vm6, %v21772_v55  ;;  %v16844_v4 = vpack.c.bf16 %v7734_v62, %v7732_v60  ;;  %v7908_v60 = vld [vmem:[%s20591_s13 + $0x38] sm:$0xff]  ;;  %v7925_v62 = vld [vmem:[%s20591_s13 + $0xc0] sm:$0xff] }
 0xe31   :  { %16521 = vmatprep.subr.bf16.mxu1 %v21772_v55  ;;  %v16868_v26 = vpack.c.bf16 %v7926_v49, %v7925_v62 }
 0xe34   :  { %16522 = vmatpush3.bf16.msra.mxu1 %v17983_v43 }
 0xe35   :  { %16523 = vmatprep.subr.bf16.mxu1 %v21772_v55 }
 0xe38   :  { %16524 = vmatpush3.bf16.msra.mxu1 %v7436_v53 }
 0xe3b   :  { %16526 = vmatmul.mubr.msk.bf16.vlgmr.msra.gmra.mrb[64].mxu1 %vm6248_vm4, %v7410_v34 }
 0xe3c   :  { %16533 = vmatprep.mubr.msk.f32.mxu1 %vm2618_vm2, %v7495_v37 }
 0xf0e   :  { %v20551_v1 = vpop.f32.mrb[64].mxu1 }
 0xf0f   :  { %v16527_v39 = vpop.f32.mrb[65].mxu1  ;;  %v7481_v47 = vsel %vm2618_vm2, %v20551_v1, 0.0  ;;  %v7487_v45 = vmul.f32 %v20551_v1, %v20551_v1 }
 0xf10   :  { %7482 = vadd.xlane.f32.xlu1 %v7481_v47  ;;  %v20555_v18 = vpop.f32.mrb[66].mxu1 }
 0xf11   :  { %v16528_v12 = vpop.f32.mrb[67].mxu1  ;;  %v7484_v8 = vsel %vm2618_vm2, %v20555_v18, 0.0  ;;  %v7488_v0 = vmul.f32 %v20555_v18, %v20555_v18  ;;  %v7489_v13 = vsel %vm2618_vm2, %v7487_v45, 0.0 }
 0xf12   :  { %7485 = vadd.xlane.f32.xlu0 %v7484_v8 }
 0xf13   :  { %v7492_v3 = vsel %vm2618_vm2, %v7488_v0, 0.0 }
 0xf14   :  { %7493 = vadd.xlane.f32.xlu1 %v7492_v3 }
 0xf16   :  { %7490 = vadd.xlane.f32.xlu0 %v7489_v13 }
 0xf9d   :  { %v7483_v27 = vpop.xlane.xlu1 %7482 }
 0xf9f   :  { %v7486_v23 = vpop.xlane.xlu0 %7485 }
 0xfa0   :  { %v16836_v61 = vpack.c.bf16 %v7486_v23, %v7483_v27  ;;  %v7917_v23 = vld [vmem:[%s20591_s13 + $0x80] sm:$0xff] }
 0xfa1   :  { %v7494_v9 = vpop.xlane.xlu1 %7493 }
 0xfa2   :  { %16837 = vmatprep.subr.bf16.mxu1 %v16836_v61 }
 0xfa3   :  { %16839 = vmatpush3.bf16.msra.mxu1 %v16836_v61  ;;  %v7491_v59 = vpop.xlane.xlu0 %7490  ;;  %v7918_v61 = vld [vmem:[%s20591_s13 + $0x88] sm:$0xff] }
 0xfa4   :  { %v16840_v25 = vpack.c.bf16 %v7494_v9, %v7491_v59  ;;  %v16852_v9 = vpack.c.bf16 %v7918_v61, %v7917_v23  ;;  %v7901_v59 = vld [vmem:[%s20591_s13] sm:$0xff]  ;;  %v8020_v61 = vld [vmem:[%s20629_s21 + $0x8] sm:$0xff] }
 0xfa5   :  { %v8019_v23 = vld [vmem:[%s20629_s21] sm:$0xff] }
 0xfa6   :  { %16534 = vmatmul.mubr.msk.f32.vlgmr.msra.gmra.mrb[68].mxu1 %vm2618_vm2, %v7496_v46  ;;  %16841 = vmatprep.subr.bf16.mxu1 %v16840_v25 }
 0xfa7   :  { %16843 = vmatpush3.bf16.msra.mxu1 %v16840_v25  ;;  %16540 = vmatprep.mubr.msk.f32.mxu1 %vm2618_vm2, %v7495_v37 }
 0xfa8   :  { %16845 = vmatprep.subr.bf16.mxu1 %v16844_v4  ;;  %16853 = vmatprep.subr.bf16.mxu0 %v16852_v9  ;;  %v8037_v9 = vld [vmem:[%s20629_s21 + $0x90] sm:$0xff] }
 0xfaa   :  { %16541 = vmatmul.mubr.msk.f32.vlgmr.msra.gmra.mrb[70].mxu1 %vm2618_vm2, %v7496_v46  ;;  %v7902_v46 = vld [vmem:[%s20591_s13 + $0x8] sm:$0xff] }
 0xfab   :  { %7805 = vmatprep.mubr.f32.mxu1 %v21772_v55  ;;  %16847 = vmatpush1.bf16.msra.mxu1 %v16846_v22  ;;  %v16854_v25 = vpack.c.bf16 %v7902_v46, %v7901_v59  ;;  %v7909_v22 = vld [vmem:[%s20591_s13 + $0x40] sm:$0xff]  ;;  %v8038_v59 = vld [vmem:[%s20629_s21 + $0x98] sm:$0xff] }
 0xfac   :  { %v7818_v46 = vld [vmem:[%s13879_s25] sm:$0x3]  ;;  %s20890_s25 = sld [smem:[%s21603_s0 + %s18580_s22]]  }
 0xfad   :  { %16855 = vmatpush3.bf16.msra.mxu0 %v16854_v25  ;;  %v16886_v25 = vpack.c.bf16 %v8020_v61, %v8019_v23 }
0x1079   :  { %v16535_v63 = vpop.f32.mrb[68].mxu1 }
0x107a   :  { %7664 = vperm.xlu1 %17317, %v16535_v63   ;;  %v7569_v38 = vpop.f32.mrb[69].mxu1  ;;  %v7654_v50 = vmul.f32 %v16535_v63, %v16535_v63  ;;  %v7919_v63 = vld [vmem:[%s20591_s13 + $0x90] sm:$0xff] }
0x107b   :  { %7659 = vperm.xlu0 %17316, %v7569_v38   ;;  %v7653_v14 = vmul.f32 %v7569_v38, %v7569_v38  ;;  %v7920_v38 = vld [vmem:[%s20591_s13 + $0x98] sm:$0xff] }
0x107d   :  { %v16542_v7 = vpop.f32.mrb[70].mxu1 }
0x107e   :  { %v7656_v42 = vsub.f32 %v16542_v7, %v7654_v50  ;;  %v7644_v36 = vpop.f32.mrb[71].mxu1  ;;  %v16856_v50 = vpack.c.bf16 %v7920_v38, %v7919_v63  ;;  %v16888_v63 = vpack.c.bf16 %v8038_v59, %v8037_v9  ;;  %v8021_v38 = vld [vmem:[%s20629_s21 + $0x10] sm:$0xff] }
0x107f   :  { %v7655_v28 = vsub.f32 %v7644_v36, %v7653_v14  ;;  %7689 = vperm.xlu0 %17316, %v7685_v32   ;;  %v7903_v32 = vld [vmem:[%s20591_s13 + $0x10] sm:$0xff]  ;;  %v7904_v14 = vld [vmem:[%s20591_s13 + $0x18] sm:$0xff]  ;;  %v7922_v36 = vld [vmem:[%s20591_s13 + $0xa8] sm:$0xff] }
0x1080   :  { %v7670_v15 = vadd.f32 1e-05, %v7656_v42  ;;  %v16858_v7 = vpack.c.bf16 %v7904_v14, %v7903_v32  ;;  %v7921_v42 = vld [vmem:[%s20591_s13 + $0xa0] sm:$0xff]  ;;  %16857 = vmatprep.subr.bf16.mxu0 %v16856_v50  ;;  %v8022_v50 = vld [vmem:[%s20629_s21 + $0x18] sm:$0xff]  ;;  %v8040_v14 = vld [vmem:[%s20629_s21 + $0xa8] sm:$0xff] }
0x1081   :  { %v7669_v19 = vadd.f32 1e-05, %v7655_v28  ;;  %v16860_v28 = vpack.c.bf16 %v7922_v36, %v7921_v42  ;;  %v8039_v32 = vld [vmem:[%s20629_s21 + $0xa0] sm:$0xff] }
0x1082   :  { %16859 = vmatpush3.bf16.msra.mxu0 %v16858_v7  ;;  %v16890_v7 = vpack.c.bf16 %v8022_v50, %v8021_v38  ;;  %v16892_v42 = vpack.c.bf16 %v8040_v14, %v8039_v32  ;;  %v8023_v36 = vld [vmem:[%s20629_s21 + $0x20] sm:$0xff] }
0x1083   :  { %18492 = vrsqrt.f32 %v7669_v19  ;;  %7703 = vperm.xlu0 %17316, %v7699_v40   ;;  %v7905_v40 = vld [vmem:[%s20591_s13 + $0x20] sm:$0xff]  ;;  %v7906_v19 = vld [vmem:[%s20591_s13 + $0x28] sm:$0xff]  ;;  %16861 = vmatprep.subr.bf16.mxu0 %v16860_v28 }
0x1084   :  { %18494 = vrsqrt.f32 %v7670_v15  ;;  %v16862_v15 = vpack.c.bf16 %v7906_v19, %v7905_v40  ;;  %v8024_v28 = vld [vmem:[%s20629_s21 + $0x28] sm:$0xff]  ;;  %v8041_v40 = vld [vmem:[%s20629_s21 + $0xb0] sm:$0xff]  ;;  %v8042_v19 = vld [vmem:[%s20629_s21 + $0xb8] sm:$0xff] }
0x1086   :  { %16863 = vmatpush3.bf16.msra.mxu0 %v16862_v15  ;;  %v16894_v15 = vpack.c.bf16 %v8024_v28, %v8023_v36 }
0x1087   :  { %7708 = vperm.xlu0 %17316, %v7700_v21   ;;  %v7923_v21 = vld [vmem:[%s20591_s13 + $0xb0] sm:$0xff] }
0x108d   :  { %v18493_v2 = vpop.eup %18492 }
0x108e   :  { %7675 = vperm.xlu1 %17317, %v18493_v2   ;;  %v18495_v29 = vpop.eup %18494  ;;  %v7924_v2 = vld [vmem:[%s20591_s13 + $0xb8] sm:$0xff] }
0x1092   :  { %7680 = vperm.xlu1 %17317, %v18495_v29   ;;  %v16864_v29 = vpack.c.bf16 %v7924_v2, %v7923_v21  ;;  %v16896_v21 = vpack.c.bf16 %v8042_v19, %v8041_v40  ;;  %v8025_v2 = vld [vmem:[%s20629_s21 + $0x30] sm:$0xff] }
0x1094   :  { %16865 = vmatprep.subr.bf16.mxu0 %v16864_v29  ;;  %v8026_v29 = vld [vmem:[%s20629_s21 + $0x38] sm:$0xff] }
0x1095   :  { %v16898_v62 = vpack.c.bf16 %v8026_v29, %v8025_v2 }
0x1096   :  { %7694 = vperm.xlu1 %17317, %v7686_v5   ;;  %v7907_v5 = vld [vmem:[%s20591_s13 + $0x30] sm:$0xff] }
0x1097   :  { %v16866_v4 = vpack.c.bf16 %v7908_v60, %v7907_v5  ;;  %v8043_v5 = vld [vmem:[%s20629_s21 + $0xc0] sm:$0xff]  ;;  %v8044_v60 = vld [vmem:[%s20629_s21 + $0xc8] sm:$0xff] }
0x1098   :  { %v16900_v49 = vpack.c.bf16 %v8044_v60, %v8043_v5 }
0x1099   :  { %16867 = vmatpush3.bf16.msra.mxu0 %v16866_v4  ;;  %v8027_v4 = vld [vmem:[%s20629_s21 + $0x40] sm:$0xff] }
0x109a   :  { %16869 = vmatprep.subr.bf16.mxu0 %v16868_v26  ;;  %v8028_v26 = vld [vmem:[%s20629_s21 + $0x48] sm:$0xff] }
0x10f9   :  { %v7665_v51 = vpop.permute.xlu1 %7664 }
0x10fa   :  { %v7660_v34 = vpop.permute.xlu0 %7659  ;;  %v7668_v11 = vsub.f32 %v20555_v18, %v7665_v51  ;;  %v7927_v51 = vld [vmem:[%s20591_s13 + $0xd0] sm:$0xff] }
0x10fb   :  { %v7667_v24 = vsub.f32 %v20551_v1, %v7660_v34  ;;  %v7910_v34 = vld [vmem:[%s20591_s13 + $0x48] sm:$0xff] }
0x10fe   :  { %v7690_v20 = vpop.permute.xlu0 %7689 }
0x1102   :  { %v7704_v57 = vpop.permute.xlu0 %7703 }
0x1106   :  { %v7709_v52 = vpop.permute.xlu0 %7708 }
0x110d   :  { %v7676_v35 = vpop.permute.xlu1 %7675 }
0x110e   :  { %v7683_v41 = vmul.f32 %v7676_v35, %v7667_v24  ;;  %v16870_v24 = vpack.c.bf16 %v7910_v34, %v7909_v22  ;;  %v8045_v22 = vld [vmem:[%s20629_s21 + $0xd0] sm:$0xff]  ;;  %v8046_v34 = vld [vmem:[%s20629_s21 + $0xd8] sm:$0xff] }
0x1110   :  { %v7697_v31 = vmul.f32 %v7690_v20, %v7683_v41  ;;  %v7928_v20 = vld [vmem:[%s20591_s13 + $0xd8] sm:$0xff]  ;;  %v7911_v41 = vld [vmem:[%s20591_s13 + $0x50] sm:$0xff]  ;;  %16871 = vmatpush3.bf16.msra.mxu0 %v16870_v24 }
0x1111   :  { %v7681_v58 = vpop.permute.xlu1 %7680  ;;  %v16872_v35 = vpack.c.bf16 %v7928_v20, %v7927_v51  ;;  %v16902_v51 = vpack.c.bf16 %v8028_v26, %v8027_v4  ;;  %v16904_v20 = vpack.c.bf16 %v8046_v34, %v8045_v22  ;;  %v8029_v24 = vld [vmem:[%s20629_s21 + $0x50] sm:$0xff]  ;;  %v8224_v22 = vld [vmem:[%s13885_s19] sm:$0xff] }
0x1112   :  { %v7711_v10 = vadd.f32 %v7704_v57, %v7697_v31  ;;  %v7684_v33 = vmul.f32 %v7681_v58, %v7668_v11  ;;  %v7912_v31 = vld [vmem:[%s20591_s13 + $0x58] sm:$0xff]  ;;  %v7929_v57 = vld [vmem:[%s20591_s13 + $0xe0] sm:$0xff]  ;;  %v7930_v58 = vld [vmem:[%s20591_s13 + $0xe8] sm:$0xff] }
0x1113   :  { %v16874_v11 = vpack.c.bf16 %v7912_v31, %v7911_v41  ;;  %16873 = vmatprep.subr.bf16.mxu0 %v16872_v35  ;;  %v8030_v35 = vld [vmem:[%s20629_s21 + $0x58] sm:$0xff]  ;;  %v8047_v41 = vld [vmem:[%s20629_s21 + $0xe0] sm:$0xff]  ;;  %v8048_v31 = vld [vmem:[%s20629_s21 + $0xe8] sm:$0xff] }
0x1114   :  { %v7715_v56 = vmul.f32 0.044715, %v7711_v10  ;;  %v7713_v18 = vmul.f32 0.5, %v7711_v10  ;;  %v8315_v34 = vld [vmem:[%s20694_s23] sm:$0xff] }
0x1115   :  { %v7695_v54 = vpop.permute.xlu1 %7694  ;;  %16875 = vmatpush3.bf16.msra.mxu0 %v16874_v11  ;;  %v8031_v11 = vld [vmem:[%s20629_s21 + $0x60] sm:$0xff] }
0x1116   :  { %v7717_v6 = vmul.f32 %v7715_v56, %v7711_v10  ;;  %v7698_v17 = vmul.f32 %v7695_v54, %v7684_v33  ;;  %v7913_v56 = vld [vmem:[%s20591_s13 + $0x60] sm:$0xff]  ;;  %v7914_v33 = vld [vmem:[%s20591_s13 + $0x68] sm:$0xff]  ;;  %v7931_v54 = vld [vmem:[%s20591_s13 + $0xf0] sm:$0xff] }
0x1118   :  { %v7719_v16 = vmul.f32 %v7717_v6, %v7711_v10  ;;  %v7712_v30 = vadd.f32 %v7709_v52, %v7698_v17  ;;  %v7932_v6 = vld [vmem:[%s20591_s13 + $0xf8] sm:$0xff]  ;;  %v16878_v17 = vpack.c.bf16 %v7914_v33, %v7913_v56  ;;  %v8049_v56 = vld [vmem:[%s20629_s21 + $0xf0] sm:$0xff] }
0x1119   :  { %v16880_v52 = vpack.c.bf16 %v7932_v6, %v7931_v54  ;;  %v8050_v33 = vld [vmem:[%s20629_s21 + $0xf8] sm:$0xff] }
0x111a   :  { %v7721_v43 = vadd.f32 %v7719_v16, %v7711_v10  ;;  %v7716_v48 = vmul.f32 0.044715, %v7712_v30  ;;  %v7714_v13 = vmul.f32 0.5, %v7712_v30  ;;  %v16876_v10 = vpack.c.bf16 %v7930_v58, %v7929_v57 }
0x111b   :  { %v16906_v57 = vpack.c.bf16 %v8030_v35, %v8029_v24  ;;  %v16908_v58 = vpack.c.bf16 %v8048_v31, %v8047_v41  ;;  %v16912_v6 = vpack.c.bf16 %v8050_v33, %v8049_v56  ;;  %v8318_v24 = vld [vmem:[%s20694_s23 + $0x18] sm:$0xff]  ;;  %v8225_v31 = vld [vmem:[%s13885_s19 + $0x8] sm:$0xff]  ;;  %v8321_v33 = vld [vmem:[%s20694_s23 + $0x30] sm:$0xff]  ;;  %s21267_s19 = sld [smem:[%s21603_s0 + %s18586_s16]]  }
0x111c   :  { %v7718_v53 = vmul.f32 %v7716_v48, %v7712_v30  ;;  %v7723_v1 = vmul.f32 0.7978846, %v7721_v43  ;;  %16877 = vmatprep.subr.bf16.mxu0 %v16876_v10  ;;  %v7819_v43 = vld [vmem:[%s13878_s17] sm:$0xff]  ;;  %v7821_v48 = vld [vmem:[%s13878_s17 + $0x10] sm:$0xff]  ;;  %v8032_v10 = vld [vmem:[%s20629_s21 + $0x68] sm:$0xff] }
0x111d   :  { %16879 = vmatpush3.bf16.msra.mxu0 %v16878_v17  ;;  %v16910_v54 = vpack.c.bf16 %v8032_v10, %v8031_v11  ;;  %v7915_v17 = vld [vmem:[%s20591_s13 + $0x70] sm:$0xff]  ;;  %v8319_v11 = vld [vmem:[%s20694_s23 + $0x20] sm:$0xff]  ;;  %v8320_v10 = vld [vmem:[%s20694_s23 + $0x28] sm:$0xff] }
0x111e   :  { %v7720_v39 = vmul.f32 %v7718_v53, %v7712_v30  ;;  %18496 = vtanh.f32 %v7723_v1  ;;  %16881 = vmatprep.subr.bf16.mxu0 %v16880_v52  ;;  %v7820_v53 = vld [vmem:[%s13878_s17 + $0x8] sm:$0xff]  ;;  %v7822_v1 = vld [vmem:[%s13878_s17 + $0x18] sm:$0xff]  ;;  %v16927_v56 = vpack.c.bf16 %v8320_v10, %v8319_v11  ;;  %v8438_v11 = vld [vmem:[%s20721_s1 + $0x60] sm:$0xff]  ;;  %s20864_s17 = sld [smem:[%s21603_s0 + %s18578_s14]]  }
0x111f   :  { %v7916_v52 = vld [vmem:[%s20591_s13 + $0x78] sm:$0xff]  ;;  %v8439_v10 = vld [vmem:[%s20721_s1 + $0x68] sm:$0xff]  ;;  %s13892_s13 = sld [smem:[%s21603_s0 + %s18577_s10]]  }
0x1120   :  { %v7722_v47 = vadd.f32 %v7720_v39, %v7712_v30 }
0x1122   :  { %v7724_v12 = vmul.f32 0.7978846, %v7722_v47 }
0x1124   :  { %18498 = vtanh.f32 %v7724_v12 }
0x1128   :  { %v18497_v8 = vpop.eup %18496 }
0x1129   :  { %v7727_v0 = vadd.f32 1.0, %v18497_v8 }
0x112b   :  { %v7729_v45 = vmul.f32 %v7727_v0, %v7713_v18  ;;  %v8035_v18 = vld [vmem:[%s20629_s21 + $0x80] sm:$0xff]  ;;  %v8036_v0 = vld [vmem:[%s20629_s21 + $0x88] sm:$0xff] }
0x112d   :  { %15255 = vmatmul.mubr.msk.f32.vlgmr.msra.gmra.mrb[72].mxu1 %vm2618_vm2, %v7729_v45 }
0x112e   :  { %v18499_v3 = vpop.eup %18498  ;;  %7811 = vmatprep.mubr.f32.mxu1 %v21772_v55 }
0x112f   :  { %v7728_v37 = vadd.f32 1.0, %v18499_v3 }
0x1131   :  { %v7730_v27 = vmul.f32 %v7728_v37, %v7714_v13 }
0x1133   :  { %15256 = vmatmul.mubr.msk.f32.gmra.mrb[74].mxu1 %vm2618_vm2, %v7730_v27  ;;  %v16884_v27 = vpack.c.bf16 %v8036_v0, %v8035_v18 }
0x1134   :  { %7894 = vmatprep.mubr.f32.mxu1 %v21772_v55 }
0x1200   :  { %v7807_v16 = vpop.f32.mrb[72].mxu1 }
0x1201   :  { %v7809_v30 = vpop.f32.mrb[73].mxu1  ;;  %v7823_v47 = vmul.f32 %v7819_v43, %v7807_v16  ;;  %v8033_v16 = vld [vmem:[%s20629_s21 + $0x70] sm:$0xff]  ;;  %v8034_v43 = vld [vmem:[%s20629_s21 + $0x78] sm:$0xff]  ;;  %s20869_s21 = sld [smem:[%s21603_s0 + %s18579_s18]]  }
0x1202   :  { %v7824_v45 = vmul.f32 %v7820_v53, %v7809_v30  ;;  %v16882_v30 = vpack.c.bf16 %v7916_v52, %v7915_v17  ;;  %v8323_v17 = vld [vmem:[%s20694_s23 + $0x40] sm:$0xff]  ;;  %v8324_v52 = vld [vmem:[%s20694_s23 + $0x48] sm:$0xff] }
0x1204   :  { %16883 = vmatpush3.bf16.msra.mxu0 %v16882_v30  ;;  %v8325_v30 = vld [vmem:[%s20694_s23 + $0x50] sm:$0xff] }
0x1206   :  { %v7813_v39 = vpop.f32.mrb[74].mxu1 }
0x1207   :  { %v7825_v12 = vmul.f32 %v7821_v48, %v7813_v39  ;;  %v7815_v8 = vpop.f32.mrb[75].mxu1  ;;  %v16914_v48 = vpack.c.bf16 %v8034_v43, %v8033_v16  ;;  %v18565_v39 = vmov 0.0|0.0   ;;  %v16935_v16 = vpack.c.bf16 %v8324_v52, %v8323_v17  ;;  %v8326_v43 = vld [vmem:[%s20694_s23 + $0x58] sm:$0xff]  ;;  %v8444_v17 = vld [vmem:[%s20721_s1 + $0x90] sm:$0xff] }
0x1208   :  { %v7826_v3 = vmul.f32 %v7822_v1, %v7815_v8  ;;  %v8445_v52 = vld [vmem:[%s20721_s1 + $0x98] sm:$0xff] }
0x1209   :  { %v16850_v13 = vpack.c.bf16 %v7825_v12, %v7823_v47  ;;  %v8149_v47 = vld [vmem:[%s13884_s29] sm:$0xff]  ;;  %v8150_v12 = vld [vmem:[%s13884_s29 + $0x8] sm:$0xff]  ;;  %s20897_s29 = sld [smem:[%s21603_s0 + %s18581_s26]]  }
0x120a   :  { %v16848_v37 = vpack.c.bf16 %v7826_v3, %v7824_v45  ;;  %v16917_v8 = vpack.c.bf16 %v8150_v12, %v8149_v47  ;;  %v15258_v45 = vld [vmem:[%s13882_s3] ss:$0 sm:$0xff]  ;;  %v8329_v47 = vld [vmem:[%s20694_s23 + $0x70] sm:$0xff]  ;;  %v8330_v12 = vld [vmem:[%s20694_s23 + $0x78] sm:$0xff]  ;;  %s13897_s3 = sld [smem:[%s21603_s0 + %s18582_s30]]  }
0x120c   :  { %16849 = vmatprep.subr.bf16.mxu1 %v16848_v37 }
0x120d   :  { %16851 = vmatpush1.bf16.msra.mxu1 %v16850_v13  ;;  %v15259_v13 = vld [vmem:[%s13883_s7] ss:$0 sm:$0xff]  ;;  %s13896_s7 = sld [smem:[%s21603_s0 + %s18583_s4]]  }
0x120e   :  { %16885 = vmatprep.subr.bf16.mxu1 %v16884_v27 }
0x1210   :  { %15257 = vmatmul.mubr.msk.f32.vlgmr.msra.gmra.mrb[76].mxu1 %vm2618_vm2, %v7818_v46 }
0x1211   :  { %16887 = vmatpush3.bf16.msra.mxu1 %v16886_v25 }
0x1212   :  { %16889 = vmatprep.subr.bf16.mxu1 %v16888_v63 }
0x1215   :  { %16891 = vmatpush3.bf16.msra.mxu1 %v16890_v7 }
0x1216   :  { %16893 = vmatprep.subr.bf16.mxu1 %v16892_v42 }
0x1219   :  { %16895 = vmatpush3.bf16.msra.mxu1 %v16894_v15 }
0x121a   :  { %16897 = vmatprep.subr.bf16.mxu1 %v16896_v21 }
0x121d   :  { %16899 = vmatpush3.bf16.msra.mxu1 %v16898_v62  ;;  %v8137_v62 = vld [vmem:[%s13861_s15] sm:$0x3]  ;;  %s13901_s15 = sld [smem:[%s21603_s0 + %s18585_s12]]  }
0x121e   :  { %16901 = vmatprep.subr.bf16.mxu1 %v16900_v49 }
0x1221   :  { %16903 = vmatpush3.bf16.msra.mxu1 %v16902_v51  ;;  %v8316_v51 = vld [vmem:[%s20694_s23 + $0x8] sm:$0xff] }
0x1222   :  { %16905 = vmatprep.subr.bf16.mxu1 %v16904_v20  ;;  %v8317_v20 = vld [vmem:[%s20694_s23 + $0x10] sm:$0xff]  ;;  %v16919_v35 = vpack.c.bf16 %v8316_v51, %v8315_v34  ;;  %v8429_v34 = vld [vmem:[%s20721_s1 + $0x18] sm:$0xff]  ;;  %v8430_v51 = vld [vmem:[%s20721_s1 + $0x20] sm:$0xff] }
0x1225   :  { %16907 = vmatpush3.bf16.msra.mxu1 %v16906_v57 }
0x1226   :  { %16909 = vmatprep.subr.bf16.mxu1 %v16908_v58  ;;  %v16923_v58 = vpack.c.bf16 %v8318_v24, %v8317_v20  ;;  %v8431_v20 = vld [vmem:[%s20721_s1 + $0x28] sm:$0xff]  ;;  %v8432_v24 = vld [vmem:[%s20721_s1 + $0x30] sm:$0xff] }
0x1229   :  { %16911 = vmatpush3.bf16.msra.mxu1 %v16910_v54  ;;  %v8322_v54 = vld [vmem:[%s20694_s23 + $0x38] sm:$0xff] }
0x122a   :  { %16913 = vmatprep.subr.bf16.mxu1 %v16912_v6  ;;  %v16931_v6 = vpack.c.bf16 %v8322_v54, %v8321_v33  ;;  %v8441_v33 = vld [vmem:[%s20721_s1 + $0x78] sm:$0xff]  ;;  %v8442_v54 = vld [vmem:[%s20721_s1 + $0x80] sm:$0xff] }
0x122d   :  { %16915 = vmatpush3.bf16.msra.mxu1 %v16914_v48  ;;  %v16939_v48 = vpack.c.bf16 %v8326_v43, %v8325_v30  ;;  %v8447_v30 = vld [vmem:[%s20721_s1 + $0xa8] sm:$0xff]  ;;  %v8448_v43 = vld [vmem:[%s20721_s1 + $0xb0] sm:$0xff] }
0x122e   :  { %16916 = vmatprep.subr.bf16.mxu1 %v18565_v39 }
0x12e3   :  { %v7896_v53 = vpop.f32.mrb[76].mxu1 }
0x12e4   :  { %v7898_v1 = vpop.f32.mrb[77].mxu1 }
0x12e5   :  { %8004 = vmatprep.mubr.f32.mxu0 %v7898_v1  ;;  %8122 = vmatprep.mubr.f32.mxu1 %v7898_v1  ;;  %v8328_v1 = vld [vmem:[%s20694_s23 + $0x68] sm:$0xff] }
0x12e6   :  { %8005 = vmatmul.mubr.f32.vlgmr.msra.gmra.mrb[134].mxu0 %v7896_v53  ;;  %8123 = vmatmul.mubr.f32.vlgmr.msra.gmra.mrb[78].mxu1 %v7896_v53  ;;  %v8327_v53 = vld [vmem:[%s20694_s23 + $0x60] sm:$0xff]  ;;  %s21276_s23 = sld [smem:[%s21603_s0 + %s18587_s20]]  }
0x12e7   :  { %16547 = vmatprep.mubr.msk.f32.mxu1 %vm18556_vm6, %v21772_v55  ;;  %16918 = vmatpush3.bf16.msra.mxu1 %v16917_v8  ;;  %v16943_v39 = vpack.c.bf16 %v8328_v1, %v8327_v53  ;;  %v16947_v8 = vpack.c.bf16 %v8330_v12, %v8329_v47  ;;  %v8450_v53 = vld [vmem:[%s20721_s1 + $0xc0] sm:$0xff]  ;;  %v8451_v1 = vld [vmem:[%s20721_s1 + $0xc8] sm:$0xff]  ;;  %v8453_v47 = vld [vmem:[%s20721_s1 + $0xd8] sm:$0xff] }
0x12e8   :  { %v8454_v12 = vld [vmem:[%s20721_s1 + $0xe0] sm:$0xff] }
0x13b9   :  { %v16175_v18 = vpop.f32.mrb[134].mxu0  ;;  %v16210_v0 = vpop.f32.mrb[78].mxu1 }
0x13ba   :  { %v16176_v3 = vpop.f32.mrb[135].mxu0  ;;  %v16211_v37 = vpop.f32.mrb[79].mxu1 }
0x13bb   :  { %v16177_v27 = vadd.f32 %v16176_v3, %v16175_v18  ;;  %v16212_v23 = vadd.f32 %v16211_v37, %v16210_v0  ;;  %v8311_v18 = vld [vmem:[%s13886_s27] sm:$0xff] }
0x13bd   :  { %v8007_v61 = vadd.f32 %v16177_v27, %v15258_v45  ;;  %v8125_v9 = vadd.f32 %v16212_v23, %v15259_v13  ;;  %v8312_v45 = vld [vmem:[%s13886_s27 + $0x8] sm:$0xff]  ;;  %v8426_v27 = vld [vmem:[%s20721_s1] sm:$0xff]  ;;  %s13902_s27 = sld [smem:[%s21603_s0 + %s18588_s24]]  }
0x13be   :  { %v8332_v23 = vld [vmem:[%s13888_s9 + $0x8] sm:$0xff] }
0x13bf   :  { %v8011_v59 = vmul.f32 0.044715, %v8007_v61  ;;  %v8129_v46 = vmul.f32 0.044715, %v8125_v9  ;;  %v8010_v40 = vmul.f32 0.5, %v8007_v61  ;;  %v8128_v15 = vmul.f32 0.5, %v8125_v9 }
0x13c1   :  { %v8012_v25 = vmul.f32 %v8011_v59, %v8007_v61  ;;  %v8130_v63 = vmul.f32 %v8129_v46, %v8125_v9 }
0x13c3   :  { %v8013_v38 = vmul.f32 %v8012_v25, %v8007_v61  ;;  %v8131_v50 = vmul.f32 %v8130_v63, %v8125_v9 }
0x13c5   :  { %v8014_v32 = vadd.f32 %v8013_v38, %v8007_v61  ;;  %v8132_v14 = vadd.f32 %v8131_v50, %v8125_v9  ;;  %v8331_v61 = vld [vmem:[%s13888_s9] sm:$0xff] }
0x13c7   :  { %v8015_v7 = vmul.f32 0.7978846, %v8014_v32  ;;  %v8133_v42 = vmul.f32 0.7978846, %v8132_v14 }
0x13c9   :  { %18500 = vtanh.f32 %v8015_v7 }
0x13ca   :  { %18502 = vtanh.f32 %v8133_v42 }
0x13d3   :  { %v18501_v36 = vpop.eup %18500 }
0x13d4   :  { %v18503_v28 = vpop.eup %18502  ;;  %v8017_v19 = vadd.f32 1.0, %v18501_v36 }
0x13d5   :  { %v8135_v21 = vadd.f32 1.0, %v18503_v28 }
0x13d6   :  { %v8018_v2 = vmul.f32 %v8017_v19, %v8010_v40 }
0x13d7   :  { %v8136_v29 = vmul.f32 %v8135_v21, %v8128_v15 }
0x13d8   :  { %8144 = vst.msk [vmem:[%s13903_s11] sm:$0x3] %vm8143_vm7, %v8018_v2 }
0x13d9   :  { %v8138_v5 = vmul.f32 0.5, %v8136_v29  ;;  %15260 = vst.msk [vmem:[%s13903_s11 + $0x2] sm:$0x3] %vm8143_vm7, %v8136_v29 }
0x13db   :  { %v8139_v60 = vmul.f32 1.442695, %v8138_v5 }
0x13dd   :  { %18504 = vpow2.f32 %v8139_v60 }
0x13e7   :  { %v18505_v49 = vpop.eup %18504 }
0x13e8   :  { %v8141_v4 = vmul.f32 %v18505_v49, %v8137_v62 }
0x13ea   :  { %v8142_v26 = vadd.f32 %v8141_v4, %v8018_v2  ;;  %v17985_v4 = vld [vmem:[%s20728_s5 + $0x8] sm:$0xff]  }
0x13ec   :  { %15261 = vst.msk [vmem:[%s13903_s11 + $0x4] sm:$0x3] %vm8143_vm7, %v8142_v26  ;;  %16548 = vmatmul.mubr.msk.f32.vlgmr.msra.gmra.mrb[80].mxu1 %vm2618_vm2, %v8142_v26  ;;  %v8427_v26 = vld [vmem:[%s20721_s1 + $0x8] sm:$0xff]  ;;  %s13898_s11 = sld [smem:[%s21603_s0 + %s18584_s8]]  }
0x13ed   :  { %16552 = vmatprep.mubr.msk.f32.mxu1 %vm8226_vm8, %v8224_v22  ;;  %v8428_v22 = vld [vmem:[%s20721_s1 + $0x10] sm:$0xff] }
0x14bf   :  { %v8220_v41 = vpop.f32.mrb[80].mxu1 }
0x14c0   :  { %v16549_v57 = vpop.f32.mrb[81].mxu1  ;;  %16550 = vmatprep.subr.msk.mxu1 %vm3724_vm3, %v8220_v41 }
0x14c1   :  { %16551 = vmatpush3.msk.msra.mxu1 %vm3724_vm3, %v8220_v41  ;;  %v8434_v41 = vld [vmem:[%s20721_s1 + $0x40] sm:$0xff]  ;;  %v8436_v57 = vld [vmem:[%s20721_s1 + $0x50] sm:$0xff] }
0x14c2   :  { %16553 = vmatmul.mubr.msk.f32.vlgmr.msra.gmra.mrb[82].mxu1 %vm8226_vm8, %v8225_v31  ;;  %16920 = vmatprep.subr.bf16.mxu1 %v16919_v35  ;;  %v8435_v31 = vld [vmem:[%s20721_s1 + $0x48] sm:$0xff] }
0x14c3   :  { %16922 = vmatpush3.bf16.msra.mxu1 %v16919_v35  ;;  %v8433_v35 = vld [vmem:[%s20721_s1 + $0x38] sm:$0xff] }
0x14c4   :  { %16924 = vmatprep.subr.bf16.mxu1 %v16923_v58 }
0x14c7   :  { %16926 = vmatpush3.bf16.msra.mxu1 %v16923_v58  ;;  %v8437_v58 = vld [vmem:[%s20721_s1 + $0x58] sm:$0xff] }
0x14c8   :  { %16928 = vmatprep.subr.bf16.mxu1 %v16927_v56 }
0x14cb   :  { %16930 = vmatpush3.bf16.msra.mxu1 %v16927_v56  ;;  %v8440_v56 = vld [vmem:[%s20721_s1 + $0x70] sm:$0xff] }
0x14cc   :  { %16932 = vmatprep.subr.bf16.mxu1 %v16931_v6 }
0x14cf   :  { %16934 = vmatpush3.bf16.msra.mxu1 %v16931_v6  ;;  %v8443_v6 = vld [vmem:[%s20721_s1 + $0x88] sm:$0xff] }
0x14d0   :  { %16936 = vmatprep.subr.bf16.mxu1 %v16935_v16 }
0x14d3   :  { %16938 = vmatpush3.bf16.msra.mxu1 %v16935_v16  ;;  %v8446_v16 = vld [vmem:[%s20721_s1 + $0xa0] sm:$0xff] }
0x14d4   :  { %16940 = vmatprep.subr.bf16.mxu1 %v16939_v48 }
0x14d7   :  { %16942 = vmatpush3.bf16.msra.mxu1 %v16939_v48  ;;  %v8449_v48 = vld [vmem:[%s20721_s1 + $0xb8] sm:$0xff] }
0x14d8   :  { %16944 = vmatprep.subr.bf16.mxu1 %v16943_v39 }
0x14db   :  { %16946 = vmatpush3.bf16.msra.mxu1 %v16943_v39  ;;  %v8452_v39 = vld [vmem:[%s20721_s1 + $0xd0] sm:$0xff] }
0x14dc   :  { %16948 = vmatprep.subr.bf16.mxu1 %v16947_v8 }
0x14df   :  { %16950 = vmatpush3.bf16.msra.mxu1 %v16947_v8  ;;  %v8455_v8 = vld [vmem:[%s20721_s1 + $0xe8] sm:$0xff] }
0x1595   :  { %v16554_v0 = vpop.f32.mrb[82].mxu1 }
0x1596   :  { %v8302_v3 = vpop.f32.mrb[83].mxu1  ;;  %v8314_v37 = vmul.f32 %v16554_v0, %v8312_v45  ;;  %v8457_v0 = vld [vmem:[%s20721_s1 + $0xf8] sm:$0xff]  ;;  %v8458_v45 = vld [vmem:[%s20721_s1 + $0x100] sm:$0xff] }
0x1597   :  { %v8313_v13 = vmul.f32 %v8311_v18, %v8302_v3  ;;  %v8456_v18 = vld [vmem:[%s20721_s1 + $0xf0] sm:$0xff]  ;;  %v8459_v3 = vld [vmem:[%s20721_s1 + $0x108] sm:$0xff] }
0x1599   :  { %16587 = vmatprep.mubr.f32.mxu1 %v8313_v13  ;;  %v8460_v13 = vld [vmem:[%s20721_s1 + $0x110] sm:$0xff] }
0x159a   :  { %16588 = vmatmul.mubr.f32.vlgmr.msra.gmra.mrb[84].mxu1 %v8314_v37  ;;  %v8461_v37 = vld [vmem:[%s20721_s1 + $0x118] sm:$0xff] }
0x159b   :  { %16594 = vmatprep.mubr.msk.f32.mxu1 %vm2618_vm2, %v8426_v27  ;;  %v17986_v27 = vld [vmem:[%s20728_s5] sm:$0xff]  }
0x166d   :  { %v16589_v9 = vpop.f32.mrb[84].mxu1 }
0x166e   :  { %v8405_v59 = vadd.f32 %v16589_v9, %v8332_v23  ;;  %v8399_v46 = vpop.f32.mrb[85].mxu1 }
0x166f   :  { %v8400_v25 = vadd.f32 %v8399_v46, %v8331_v61 }
0x1670   :  { %v8411_v63 = vmul.f32 0.044715, %v8405_v59  ;;  %v8409_v21 = vmul.f32 0.5, %v8405_v59 }
0x1671   :  { %v8410_v38 = vmul.f32 0.044715, %v8400_v25  ;;  %v8408_v29 = vmul.f32 0.5, %v8400_v25 }
0x1672   :  { %v8413_v50 = vmul.f32 %v8411_v63, %v8405_v59 }
0x1673   :  { %v8412_v32 = vmul.f32 %v8410_v38, %v8400_v25 }
0x1674   :  { %v8415_v14 = vmul.f32 %v8413_v50, %v8405_v59 }
0x1675   :  { %v8414_v7 = vmul.f32 %v8412_v32, %v8400_v25 }
0x1676   :  { %v8417_v42 = vadd.f32 %v8415_v14, %v8405_v59 }
0x1677   :  { %v8416_v36 = vadd.f32 %v8414_v7, %v8400_v25 }
0x1678   :  { %v8419_v28 = vmul.f32 0.7978846, %v8417_v42  ;;  %v17987_v42 = vld [vmem:[%s20728_s5 + $0x10] sm:$0xff]  }
0x1679   :  { %v8418_v40 = vmul.f32 0.7978846, %v8416_v36 }
0x167a   :  { %18506 = vtanh.f32 %v8419_v28 }
0x167b   :  { %18508 = vtanh.f32 %v8418_v40 }
0x1684   :  { %v18507_v19 = vpop.eup %18506 }
0x1685   :  { %v18509_v15 = vpop.eup %18508  ;;  %v8423_v2 = vadd.f32 1.0, %v18507_v19 }
0x1686   :  { %v8422_v5 = vadd.f32 1.0, %v18509_v15 }
0x1687   :  { %v8425_v60 = vmul.f32 %v8423_v2, %v8409_v21 }
0x1688   :  { %v8424_v62 = vmul.f32 %v8422_v5, %v8408_v29  ;;  %v17988_v5 = vld [vmem:[%s20728_s5 + $0x18] sm:$0xff]  }
0x168a   :  { %v16951_v49 = vpack.c.bf16 %v8425_v60, %v8424_v62 }
0x168c   :  { %16952 = vmatprep.subr.bf16.mxu1 %v16951_v49 }
0x168d   :  { %16954 = vmatpush3.bf16.msra.mxu1 %v16951_v49 }
0x168e   :  { %16648 = vmatprep.subr.bf16.mxu1 %v17985_v4 }
0x1690   :  { %16595 = vmatmul.mubr.msk.f32.vlgmr.msra.gmra.mrb[86].mxu1 %vm2618_vm2, %v8427_v26 }
0x1691   :  { %16597 = vmatprep.mubr.msk.f32.mxu1 %vm2618_vm2, %v8428_v22  ;;  %16649 = vmatpush3.bf16.msra.mxu1 %v17985_v4 }
0x1692   :  { %16654 = vmatprep.subr.bf16.mxu1 %v17986_v27 }
0x1694   :  { %16598 = vmatmul.mubr.msk.f32.gmra.mrb[88].mxu1 %vm2618_vm2, %v8429_v34 }
0x1695   :  { %16600 = vmatprep.mubr.msk.f32.mxu1 %vm2618_vm2, %v8430_v51 }
0x1698   :  { %16601 = vmatmul.mubr.msk.f32.gmra.mrb[90].mxu1 %vm2618_vm2, %v8431_v20 }
0x1699   :  { %16603 = vmatprep.mubr.msk.f32.mxu1 %vm2618_vm2, %v8432_v24  ;;  %v17989_v24 = vld [vmem:[%s20728_s5 + $0x20] sm:$0xff]  }
0x169c   :  { %16604 = vmatmul.mubr.msk.f32.gmra.mrb[92].mxu1 %vm2618_vm2, %v8433_v35 }
0x169d   :  { %16606 = vmatprep.mubr.msk.f32.mxu1 %vm2618_vm2, %v8434_v41 }
0x16a0   :  { %16607 = vmatmul.mubr.msk.f32.gmra.mrb[94].mxu1 %vm2618_vm2, %v8435_v31 }
0x16a1   :  { %16609 = vmatprep.mubr.msk.f32.mxu1 %vm2618_vm2, %v8436_v57 }
0x16a4   :  { %16610 = vmatmul.mubr.msk.f32.gmra.mrb[96].mxu1 %vm2618_vm2, %v8437_v58 }
0x16a5   :  { %16612 = vmatprep.mubr.msk.f32.mxu1 %vm2618_vm2, %v8438_v11 }
0x16a8   :  { %16613 = vmatmul.mubr.msk.f32.gmra.mrb[98].mxu1 %vm2618_vm2, %v8439_v10 }
0x16a9   :  { %16615 = vmatprep.mubr.msk.f32.mxu1 %vm2618_vm2, %v8440_v56 }
0x16ac   :  { %16616 = vmatmul.mubr.msk.f32.gmra.mrb[100].mxu1 %vm2618_vm2, %v8441_v33 }
0x16ad   :  { %16618 = vmatprep.mubr.msk.f32.mxu1 %vm2618_vm2, %v8442_v54  ;;  %v17990_v54 = vld [vmem:[%s20728_s5 + $0x28] sm:$0xff]  }
0x16b0   :  { %16619 = vmatmul.mubr.msk.f32.gmra.mrb[102].mxu1 %vm2618_vm2, %v8443_v6 }
0x16b1   :  { %16621 = vmatprep.mubr.msk.f32.mxu1 %vm2618_vm2, %v8444_v17 }
0x16b4   :  { %16622 = vmatmul.mubr.msk.f32.gmra.mrb[104].mxu1 %vm2618_vm2, %v8445_v52 }
0x16b5   :  { %16624 = vmatprep.mubr.msk.f32.mxu1 %vm2618_vm2, %v8446_v16 }
0x16b8   :  { %16625 = vmatmul.mubr.msk.f32.gmra.mrb[106].mxu1 %vm2618_vm2, %v8447_v30 }
0x16b9   :  { %16627 = vmatprep.mubr.msk.f32.mxu1 %vm2618_vm2, %v8448_v43 }
0x16bc   :  { %16628 = vmatmul.mubr.msk.f32.gmra.mrb[108].mxu1 %vm2618_vm2, %v8449_v48 }
0x16bd   :  { %16630 = vmatprep.mubr.msk.f32.mxu1 %vm2618_vm2, %v8450_v53 }
0x16c0   :  { %16631 = vmatmul.mubr.msk.f32.gmra.mrb[110].mxu1 %vm2618_vm2, %v8451_v1 }
0x16c1   :  { %16633 = vmatprep.mubr.msk.f32.mxu1 %vm2618_vm2, %v8452_v39  ;;  %v17991_v39 = vld [vmem:[%s20728_s5 + $0x30] sm:$0xff]  }
0x16c4   :  { %16634 = vmatmul.mubr.msk.f32.gmra.mrb[112].mxu1 %vm2618_vm2, %v8453_v47 }
0x16c5   :  { %16636 = vmatprep.mubr.msk.f32.mxu1 %vm2618_vm2, %v8454_v12 }
0x16c8   :  { %16637 = vmatmul.mubr.msk.f32.gmra.mrb[114].mxu1 %vm2618_vm2, %v8455_v8 }
0x16c9   :  { %16639 = vmatprep.mubr.msk.f32.mxu1 %vm2618_vm2, %v8456_v18 }
0x16cc   :  { %16640 = vmatmul.mubr.msk.f32.gmra.mrb[116].mxu1 %vm2618_vm2, %v8457_v0 }
0x16cd   :  { %16642 = vmatprep.mubr.msk.f32.mxu1 %vm2618_vm2, %v8458_v45 }
0x16d0   :  { %16643 = vmatmul.mubr.msk.f32.gmra.mrb[118].mxu1 %vm2618_vm2, %v8459_v3 }
0x16d1   :  { %16645 = vmatprep.mubr.msk.f32.mxu1 %vm2618_vm2, %v8460_v13  ;;  %v17992_v13 = vld [vmem:[%s20728_s5 + $0x38] sm:$0xff]  }
0x16d4   :  { %16646 = vmatmul.mubr.msk.f32.gmra.mrb[120].mxu1 %vm2618_vm2, %v8461_v37  ;;  %v17993_v37 = vld [vmem:[%s20728_s5 + $0x40] sm:$0xff]  }
0x1763   :  { %v16596_v23 = vpop.f32.mrb[86].mxu1 }
0x1764   :  { %v8636_v61 = vpop.f32.mrb[87].mxu1 }
0x1765   :  { %v8815_v9 = vpack.c.bf16 %v16596_v23, %v8636_v61 }
0x1767   :  { %v16599_v59 = vpop.f32.mrb[88].mxu1 }
0x1768   :  { %v8646_v46 = vpop.f32.mrb[89].mxu1 }
0x1769   :  { %v8816_v25 = vpack.c.bf16 %v16599_v59, %v8646_v46 }
0x176b   :  { %v16602_v63 = vpop.f32.mrb[90].mxu1 }
0x176c   :  { %v8656_v38 = vpop.f32.mrb[91].mxu1 }
0x176d   :  { %v8819_v50 = vpack.c.bf16 %v16602_v63, %v8656_v38 }
0x176f   :  { %v16605_v32 = vpop.f32.mrb[92].mxu1  ;;  %16650 = vmatprep.mubr.msk.bf16.mxu1 %vm2618_vm2, %v8819_v50 }
0x1770   :  { %v8666_v14 = vpop.f32.mrb[93].mxu1 }
0x1771   :  { %v8820_v7 = vpack.c.bf16 %v16605_v32, %v8666_v14 }
0x1773   :  { %16651 = vmatmul.mubr.msk.bf16.vlgmr.msra.gmra.mrb[124].mxu1 %vm2618_vm2, %v8820_v7  ;;  %v16608_v36 = vpop.f32.mrb[94].mxu1 }
0x1774   :  { %16656 = vmatprep.mubr.msk.bf16.mxu1 %vm2618_vm2, %v8815_v9  ;;  %16655 = vmatpush3.bf16.msra.mxu1 %v17986_v27  ;;  %v8676_v28 = vpop.f32.mrb[95].mxu1 }
0x1775   :  { %16660 = vmatprep.subr.bf16.mxu1 %v17987_v42  ;;  %v8946_v40 = vpack.c.bf16 %v16608_v36, %v8676_v28 }
0x1777   :  { %v16611_v19 = vpop.f32.mrb[96].mxu1 }
0x1778   :  { %v8686_v15 = vpop.f32.mrb[97].mxu1 }
0x1779   :  { %v8947_v21 = vpack.c.bf16 %v16611_v19, %v8686_v15  ;;  %v9714_v19 = vld [vmem:[%s13892_s13] sm:$0xff] }
0x177a   :  { %v9742_v15 = vld [vmem:[%s20869_s21] sm:$0xff] }
0x177b   :  { %v16614_v2 = vpop.f32.mrb[98].mxu1 }
0x177c   :  { %v8696_v29 = vpop.f32.mrb[99].mxu1 }
0x177d   :  { %v9016_v60 = vpack.c.bf16 %v16614_v2, %v8696_v29  ;;  %v9716_v2 = vld [vmem:[%s13892_s13 + $0x10] sm:$0xff]  ;;  %v9743_v29 = vld [vmem:[%s20869_s21 + $0x8] sm:$0xff] }
0x177f   :  { %16657 = vmatmul.mubr.msk.bf16.vlgmr.msra.gmra.mrb[124].mxu1 %vm2618_vm2, %v8816_v25  ;;  %v16617_v62 = vpop.f32.mrb[100].mxu1 }
0x1780   :  { %16661 = vmatpush3.bf16.msra.mxu1 %v17987_v42  ;;  %16662 = vmatprep.mubr.msk.bf16.mxu1 %vm2618_vm2, %v8946_v40  ;;  %v8706_v49 = vpop.f32.mrb[101].mxu1  ;;  %v9464_v40 = vld [vmem:[%s20864_s17] sm:$0xff] }
0x1781   :  { %16666 = vmatprep.subr.bf16.mxu1 %v17988_v5  ;;  %v9017_v4 = vpack.c.bf16 %v16617_v62, %v8706_v49 }
0x1783   :  { %v16620_v26 = vpop.f32.mrb[102].mxu1 }
0x1784   :  { %v8716_v22 = vpop.f32.mrb[103].mxu1 }
0x1785   :  { %v9086_v34 = vpack.c.bf16 %v16620_v26, %v8716_v22 }
0x1787   :  { %v16623_v51 = vpop.f32.mrb[104].mxu1 }
0x1788   :  { %v8726_v20 = vpop.f32.mrb[105].mxu1 }
0x1789   :  { %v9087_v35 = vpack.c.bf16 %v16623_v51, %v8726_v20  ;;  %v9465_v20 = vld [vmem:[%s20864_s17 + $0x8] sm:$0xff] }
0x178b   :  { %16663 = vmatmul.mubr.msk.bf16.vlgmr.msra.gmra.mrb[124].mxu1 %vm2618_vm2, %v8947_v21  ;;  %v16626_v41 = vpop.f32.mrb[106].mxu1  ;;  %v9715_v21 = vld [vmem:[%s13892_s13 + $0x8] sm:$0xff] }
0x178c   :  { %16667 = vmatpush3.bf16.msra.mxu1 %v17988_v5  ;;  %16668 = vmatprep.mubr.msk.bf16.mxu1 %vm2618_vm2, %v9016_v60  ;;  %v8736_v31 = vpop.f32.mrb[107].mxu1  ;;  %v9717_v5 = vld [vmem:[%s13892_s13 + $0x18] sm:$0xff] }
0x178d   :  { %16672 = vmatprep.subr.bf16.mxu1 %v17989_v24  ;;  %v9156_v57 = vpack.c.bf16 %v16626_v41, %v8736_v31 }
0x178f   :  { %v16629_v58 = vpop.f32.mrb[108].mxu1 }
0x1790   :  { %v8746_v11 = vpop.f32.mrb[109].mxu1 }
0x1791   :  { %v9157_v10 = vpack.c.bf16 %v16629_v58, %v8746_v11 }
0x1793   :  { %v16632_v56 = vpop.f32.mrb[110].mxu1 }
0x1794   :  { %v8756_v33 = vpop.f32.mrb[111].mxu1 }
0x1795   :  { %v9226_v6 = vpack.c.bf16 %v16632_v56, %v8756_v33 }
0x1797   :  { %16669 = vmatmul.mubr.msk.bf16.vlgmr.msra.gmra.mrb[124].mxu1 %vm2618_vm2, %v9017_v4  ;;  %v16635_v17 = vpop.f32.mrb[112].mxu1 }
0x1798   :  { %16673 = vmatpush3.bf16.msra.mxu1 %v17989_v24  ;;  %16674 = vmatprep.mubr.msk.bf16.mxu1 %vm2618_vm2, %v9086_v34  ;;  %v8766_v52 = vpop.f32.mrb[113].mxu1 }
0x1799   :  { %16678 = vmatprep.subr.bf16.mxu1 %v17990_v54  ;;  %v9227_v16 = vpack.c.bf16 %v16635_v17, %v8766_v52 }
0x179b   :  { %v16638_v30 = vpop.f32.mrb[114].mxu1 }
0x179c   :  { %v8776_v43 = vpop.f32.mrb[115].mxu1 }
0x179d   :  { %v9296_v48 = vpack.c.bf16 %v16638_v30, %v8776_v43 }
0x179f   :  { %v16641_v53 = vpop.f32.mrb[116].mxu1 }
0x17a0   :  { %v8786_v1 = vpop.f32.mrb[117].mxu1 }
0x17a1   :  { %v9297_v47 = vpack.c.bf16 %v16641_v53, %v8786_v1 }
0x17a3   :  { %16675 = vmatmul.mubr.msk.bf16.vlgmr.msra.gmra.mrb[124].mxu1 %vm2618_vm2, %v9087_v35  ;;  %v16644_v12 = vpop.f32.mrb[118].mxu1  ;;  %v9466_v35 = vld [vmem:[%s20864_s17 + $0x10] sm:$0xff] }
0x17a4   :  { %16679 = vmatpush3.bf16.msra.mxu1 %v17990_v54  ;;  %16680 = vmatprep.mubr.msk.bf16.mxu1 %vm2618_vm2, %v9156_v57  ;;  %v8796_v8 = vpop.f32.mrb[119].mxu1  ;;  %v9467_v57 = vld [vmem:[%s20864_s17 + $0x18] sm:$0xff] }
0x17a5   :  { %16684 = vmatprep.subr.bf16.mxu1 %v17991_v39  ;;  %v9366_v18 = vpack.c.bf16 %v16644_v12, %v8796_v8 }
0x17a7   :  { %v16647_v0 = vpop.f32.mrb[120].mxu1 }
0x17a8   :  { %v8806_v45 = vpop.f32.mrb[121].mxu1 }
0x17a9   :  { %v9367_v3 = vpack.c.bf16 %v16647_v0, %v8806_v45 }
0x17af   :  { %16681 = vmatmul.mubr.msk.bf16.vlgmr.msra.gmra.mrb[124].mxu1 %vm2618_vm2, %v9157_v10 }
0x17b0   :  { %16685 = vmatpush3.bf16.msra.mxu1 %v17991_v39  ;;  %16686 = vmatprep.mubr.msk.bf16.mxu1 %vm2618_vm2, %v9226_v6 }
0x17b1   :  { %16690 = vmatprep.subr.bf16.mxu1 %v17992_v13 }
0x17bb   :  { %16687 = vmatmul.mubr.msk.bf16.vlgmr.msra.gmra.mrb[124].mxu1 %vm2618_vm2, %v9227_v16 }
0x17bc   :  { %16691 = vmatpush3.bf16.msra.mxu1 %v17992_v13  ;;  %16692 = vmatprep.mubr.msk.bf16.mxu1 %vm2618_vm2, %v9296_v48 }
0x17bd   :  { %16696 = vmatprep.subr.bf16.mxu1 %v17993_v37 }
0x17c7   :  { %16693 = vmatmul.mubr.msk.bf16.vlgmr.msra.gmra.mrb[124].mxu1 %vm2618_vm2, %v9297_v47 }
0x17c8   :  { %16697 = vmatpush3.bf16.msra.mxu1 %v17993_v37  ;;  %16698 = vmatprep.mubr.msk.bf16.mxu1 %vm2618_vm2, %v9366_v18 }
0x17d3   :  { %16699 = vmatmul.mubr.msk.bf16.vlgmr.msra.gmra.mrb[124].mxu1 %vm2618_vm2, %v9367_v3 }
0x17d4   :  { %16710 = vmatprep.mubr.msk.f32.mxu1 %vm6281_vm5, %v9464_v40 }
0x18a6   :  { %v20830_v27 = vpop.f32.mrb[124].mxu1 }
0x18a7   :  { %v20832_v23 = vpop.f32.mrb[125].mxu1  ;;  %v9442_v38 = vsel %vm6248_vm4, %v20830_v27, 0.0  ;;  %v9450_v42 = vmul.f32 %v20830_v27, %v20830_v27 }
0x18a8   :  { %v20834_v61 = vpop.f32.mrb[126].mxu1  ;;  %v9436_v9 = vsel %vm6248_vm4, %v20832_v23, 0.0  ;;  %v9448_v50 = vmul.f32 %v20832_v23, %v20832_v23 }
0x18a9   :  { %9437 = vadd.xlane.f32.xlu1 %v9436_v9  ;;  %v20838_v59 = vpop.f32.mrb[127].mxu1  ;;  %v9445_v25 = vsel %vm6248_vm4, %v20834_v61, 0.0  ;;  %v9451_v14 = vmul.f32 %v20834_v61, %v20834_v61  ;;  %v9458_v28 = vsel %vm6248_vm4, %v9450_v42, 0.0  ;;  %v9745_v9 = vld [vmem:[%s20869_s21 + $0x18] sm:$0xff] }
0x18aa   :  { %v9439_v46 = vsel %vm6248_vm4, %v20838_v59, 0.0  ;;  %v9449_v63 = vmul.f32 %v20838_v59, %v20838_v59  ;;  %v9452_v7 = vsel %vm6248_vm4, %v9448_v50, 0.0 }
0x18ab   :  { %9440 = vadd.xlane.f32.xlu0 %v9439_v46  ;;  %v9461_v36 = vsel %vm6248_vm4, %v9451_v14, 0.0  ;;  %v9744_v46 = vld [vmem:[%s20869_s21 + $0x10] sm:$0xff] }
0x18ac   :  { %v9455_v32 = vsel %vm6248_vm4, %v9449_v63, 0.0 }
0x18ad   :  { %9446 = vadd.xlane.f32.xlu1 %v9445_v25  ;;  %v9806_v25 = vld [vmem:[%s20890_s25] sm:$0xff] }
0x18af   :  { %9443 = vadd.xlane.f32.xlu0 %v9442_v38 }
0x18b1   :  { %9456 = vadd.xlane.f32.xlu1 %v9455_v32 }
0x18b3   :  { %9453 = vadd.xlane.f32.xlu0 %v9452_v7 }
0x18b5   :  { %9462 = vadd.xlane.f32.xlu1 %v9461_v36 }
0x18b7   :  { %9459 = vadd.xlane.f32.xlu0 %v9458_v28 }
0x18c6   :  { %9720 = vperm.xlu1 %17317, %v9714_v19  }
0x18ca   :  { %9748 = vperm.xlu1 %17317, %v9742_v15  }
0x18cd   :  { %9725 = vperm.xlu0 %17316, %v9715_v21  }
0x18ce   :  { %9730 = vperm.xlu1 %17317, %v9716_v2  }
0x18d1   :  { %9753 = vperm.xlu0 %17316, %v9743_v29  }
0x18d5   :  { %9735 = vperm.xlu0 %17316, %v9717_v5  }
0x1936   :  { %v9438_v60 = vpop.xlane.xlu1 %9437 }
0x1938   :  { %v9441_v62 = vpop.xlane.xlu0 %9440 }
0x1939   :  { %v16955_v49 = vpack.c.bf16 %v9441_v62, %v9438_v60 }
0x193a   :  { %v9447_v4 = vpop.xlane.xlu1 %9446 }
0x193b   :  { %16956 = vmatprep.subr.bf16.mxu1 %v16955_v49 }
0x193c   :  { %16958 = vmatpush3.bf16.msra.mxu1 %v16955_v49  ;;  %v9444_v26 = vpop.xlane.xlu0 %9443 }
0x193d   :  { %v16959_v22 = vpack.c.bf16 %v9447_v4, %v9444_v26 }
0x193e   :  { %v9457_v34 = vpop.xlane.xlu1 %9456 }
0x193f   :  { %16960 = vmatprep.subr.bf16.mxu1 %v16959_v22 }
0x1940   :  { %16962 = vmatpush3.bf16.msra.mxu1 %v16959_v22  ;;  %v9454_v51 = vpop.xlane.xlu0 %9453 }
0x1941   :  { %v16963_v24 = vpack.c.bf16 %v9457_v34, %v9454_v51 }
0x1942   :  { %v9463_v41 = vpop.xlane.xlu1 %9462 }
0x1943   :  { %16711 = vmatmul.mubr.msk.f32.vlgmr.msra.gmra.mrb[122].mxu1 %vm6281_vm5, %v9465_v20  ;;  %16964 = vmatprep.subr.bf16.mxu1 %v16963_v24 }
0x1944   :  { %16966 = vmatpush3.bf16.msra.mxu1 %v16963_v24  ;;  %v9460_v31 = vpop.xlane.xlu0 %9459  ;;  %16713 = vmatprep.mubr.msk.f32.mxu1 %vm6281_vm5, %v9466_v35 }
0x1945   :  { %v16967_v58 = vpack.c.bf16 %v9463_v41, %v9460_v31 }
0x1946   :  { %v9721_v38 = vpop.permute.xlu1 %9720 }
0x1947   :  { %16714 = vmatmul.mubr.msk.f32.gmra.mrb[128].mxu1 %vm6281_vm5, %v9467_v57  ;;  %16968 = vmatprep.subr.bf16.mxu1 %v16967_v58 }
0x1948   :  { %16970 = vmatpush3.bf16.msra.mxu1 %v16967_v58  ;;  %16724 = vmatprep.mubr.msk.f32.mxu1 %vm6281_vm5, %v9464_v40 }
0x194a   :  { %v9749_v32 = vpop.permute.xlu1 %9748 }
0x194b   :  { %16725 = vmatmul.mubr.msk.f32.vlgmr.msra.gmra.mrb[130].mxu1 %vm6281_vm5, %v9465_v20 }
0x194c   :  { %16727 = vmatprep.mubr.msk.f32.mxu1 %vm6281_vm5, %v9466_v35  ;;  %v9726_v63 = vpop.permute.xlu0 %9725 }
0x194e   :  { %v9731_v7 = vpop.permute.xlu1 %9730 }
0x194f   :  { %16728 = vmatmul.mubr.msk.f32.gmra.mrb[132].mxu1 %vm6281_vm5, %v9467_v57 }
0x1950   :  { %16738 = vmatprep.mubr.msk.f32.mxu1 %vm6281_vm5, %v9806_v25  ;;  %v9754_v50 = vpop.permute.xlu0 %9753 }
0x1954   :  { %v9736_v14 = vpop.permute.xlu0 %9735 }
0x1a16   :  { %v16712_v11 = vpop.f32.mrb[122].mxu1 }
0x1a17   :  { %9665 = vperm.xlu1 %17317, %v16712_v11   ;;  %v9546_v10 = vpop.f32.mrb[123].mxu1  ;;  %v9651_v54 = vmul.f32 %v16712_v11, %v16712_v11 }
0x1a18   :  { %9660 = vperm.xlu0 %17316, %v9546_v10   ;;  %v9650_v6 = vmul.f32 %v9546_v10, %v9546_v10 }
0x1a1a   :  { %v16715_v56 = vpop.f32.mrb[128].mxu1 }
0x1a1b   :  { %v9556_v33 = vpop.f32.mrb[129].mxu1  ;;  %v9653_v43 = vmul.f32 %v16715_v56, %v16715_v56 }
0x1a1c   :  { %9675 = vperm.xlu0 %17316, %v16715_v56   ;;  %9670 = vperm.xlu1 %17317, %v9556_v33   ;;  %v9652_v53 = vmul.f32 %v9556_v33, %v9556_v33 }
0x1a1e   :  { %v16726_v17 = vpop.f32.mrb[130].mxu1 }
0x1a1f   :  { %v9655_v52 = vsub.f32 %v16726_v17, %v9651_v54  ;;  %v9631_v16 = vpop.f32.mrb[131].mxu1 }
0x1a20   :  { %v9654_v30 = vsub.f32 %v9631_v16, %v9650_v6 }
0x1a21   :  { %v9683_v48 = vadd.f32 1e-05, %v9655_v52 }
0x1a22   :  { %v9682_v1 = vadd.f32 1e-05, %v9654_v30  ;;  %v16729_v39 = vpop.f32.mrb[132].mxu1 }
0x1a23   :  { %18510 = vrsqrt.f32 %v9683_v48  ;;  %v9657_v47 = vsub.f32 %v16729_v39, %v9653_v43  ;;  %v9641_v12 = vpop.f32.mrb[133].mxu1 }
0x1a24   :  { %18512 = vrsqrt.f32 %v9682_v1  ;;  %v9656_v8 = vsub.f32 %v9641_v12, %v9652_v53 }
0x1a25   :  { %v9685_v18 = vadd.f32 1e-05, %v9657_v47 }
0x1a26   :  { %v9684_v0 = vadd.f32 1e-05, %v9656_v8 }
0x1a27   :  { %18514 = vrsqrt.f32 %v9685_v18 }
0x1a28   :  { %18516 = vrsqrt.f32 %v9684_v0 }
0x1a2d   :  { %v18511_v45 = vpop.eup %18510 }
0x1a2e   :  { %v18513_v3 = vpop.eup %18512  ;;  %9697 = vperm.xlu0 %17316, %v18511_v45  }
0x1a2f   :  { %9692 = vperm.xlu1 %17317, %v18513_v3  }
0x1a31   :  { %v18515_v13 = vpop.eup %18514 }
0x1a32   :  { %v18517_v37 = vpop.eup %18516  ;;  %9707 = vperm.xlu0 %17316, %v18515_v13  }
0x1a33   :  { %9702 = vperm.xlu1 %17317, %v18517_v37  }
0x1a36   :  { %9763 = vperm.xlu0 %17316, %v9745_v9  }
0x1a37   :  { %9758 = vperm.xlu1 %17317, %v9744_v46  }
0x1a96   :  { %v9666_v36 = vpop.permute.xlu1 %9665 }
0x1a97   :  { %v9661_v42 = vpop.permute.xlu0 %9660  ;;  %v9679_v19 = vsub.f32 %v20838_v59, %v9666_v36 }
0x1a98   :  { %v9678_v15 = vsub.f32 %v20832_v23, %v9661_v42 }
0x1a9b   :  { %v9676_v28 = vpop.permute.xlu0 %9675  ;;  %v9671_v40 = vpop.permute.xlu1 %9670 }
0x1a9c   :  { %v9681_v60 = vsub.f32 %v20834_v61, %v9676_v28  ;;  %v9680_v49 = vsub.f32 %v20830_v27, %v9671_v40  ;;  %v17996_v28 = vld [vmem:[%s20897_s29 + $0x2c] ss:$8 sps:$4 sm:$0xff]  }
0x1a9d   :  { %v9807_v40 = vld [vmem:[%s20890_s25 + $0x8] sm:$0xff] }
0x1aad   :  { %v9698_v21 = vpop.permute.xlu0 %9697 }
0x1aae   :  { %v9711_v2 = vmul.f32 %v9698_v21, %v9679_v19  ;;  %v9693_v29 = vpop.permute.xlu1 %9692  ;;  %v17994_v19 = vld [vmem:[%s20897_s29 + $0x28] ss:$8 sps:$4 sm:$0xff]   ;;  %v17999_v21 = vld [vmem:[%s20897_s29 + $0x3c] ss:$8 sps:$4 sm:$0xff]  }
0x1aaf   :  { %v9710_v5 = vmul.f32 %v9693_v29, %v9678_v15  ;;  %v9808_v15 = vld [vmem:[%s20890_s25 + $0x10] sm:$0xff]  ;;  %v9809_v29 = vld [vmem:[%s20890_s25 + $0x18] sm:$0xff] }
0x1ab0   :  { %v9739_v62 = vmul.f32 %v9726_v63, %v9711_v2  ;;  %v15389_v2 = vld [vmem:[%s20897_s29 + $0x48] sm:$0x33] }
0x1ab1   :  { %v9738_v4 = vmul.f32 %v9721_v38, %v9710_v5  ;;  %v9708_v26 = vpop.permute.xlu0 %9707  ;;  %v17997_v5 = vld [vmem:[%s20897_s29 + $0x38] ss:$8 sps:$4 sm:$0xff]  }
0x1ab2   :  { %v9767_v22 = vadd.f32 %v9754_v50, %v9739_v62  ;;  %v9713_v34 = vmul.f32 %v9708_v26, %v9681_v60  ;;  %v9703_v51 = vpop.permute.xlu1 %9702  ;;  %v9810_v60 = vld [vmem:[%s20890_s25 + $0x20] sm:$0xff]  ;;  %v15395_v62 = vcombine.high %v15389_v2, %v15389_v2  ;;  %v9812_v26 = vld [vmem:[%s20890_s25 + $0x30] sm:$0xff] }
0x1ab3   :  { %v9766_v20 = vadd.f32 %v9749_v32, %v9738_v4  ;;  %v9712_v24 = vmul.f32 %v9703_v51, %v9680_v49  ;;  %v15394_v49 = vcombine.low %v15389_v2, %v15389_v2  ;;  %v9811_v4 = vld [vmem:[%s20890_s25 + $0x28] sm:$0xff]  ;;  %v9814_v51 = vld [vmem:[%s20890_s25 + $0x40] sm:$0xff] }
0x1ab4   :  { %v9775_v35 = vmul.f32 0.044715, %v9767_v22  ;;  %v9741_v59 = vmul.f32 %v9736_v14, %v9713_v34  ;;  %v9771_v0 = vmul.f32 0.5, %v9767_v22  ;;  %v9813_v34 = vld [vmem:[%s20890_s25 + $0x38] sm:$0xff]  ;;  %v18013_v2 = vld [vmem:[%s20897_s29 + $0x60] ss:$8 sps:$4 sm:$0xff]  }
0x1ab5   :  { %v9774_v41 = vmul.f32 0.044715, %v9766_v20  ;;  %v9764_v23 = vpop.permute.xlu0 %9763  ;;  %v9740_v31 = vmul.f32 %v9731_v7, %v9712_v24  ;;  %v9770_v3 = vmul.f32 0.5, %v9766_v20  ;;  %v9816_v24 = vld [vmem:[%s20890_s25 + $0x50] sm:$0xff] }
0x1ab6   :  { %v9769_v57 = vadd.f32 %v9764_v23, %v9741_v59  ;;  %v9759_v58 = vpop.permute.xlu1 %9758  ;;  %v9779_v11 = vmul.f32 %v9775_v35, %v9767_v22  ;;  %v9817_v35 = vld [vmem:[%s20890_s25 + $0x58] sm:$0xff]  ;;  %v9818_v59 = vld [vmem:[%s20890_s25 + $0x60] sm:$0xff]  ;;  %v9820_v23 = vld [vmem:[%s20890_s25 + $0x70] sm:$0xff] }
0x1ab7   :  { %v9768_v10 = vadd.f32 %v9759_v58, %v9740_v31  ;;  %v9778_v61 = vmul.f32 %v9774_v41, %v9766_v20  ;;  %v9819_v41 = vld [vmem:[%s20890_s25 + $0x68] sm:$0xff]  ;;  %v9821_v31 = vld [vmem:[%s20890_s25 + $0x78] sm:$0xff] }
0x1ab8   :  { %v9777_v56 = vmul.f32 0.044715, %v9769_v57  ;;  %v9783_v33 = vmul.f32 %v9779_v11, %v9767_v22  ;;  %v9773_v63 = vmul.f32 0.5, %v9769_v57  ;;  %v9823_v58 = vld [vmem:[%s20890_s25 + $0x88] sm:$0xff]  ;;  %v9824_v11 = vld [vmem:[%s20890_s25 + $0x90] sm:$0xff] }
0x1ab9   :  { %v9776_v27 = vmul.f32 0.044715, %v9768_v10  ;;  %v9782_v54 = vmul.f32 %v9778_v61, %v9766_v20  ;;  %v9772_v32 = vmul.f32 0.5, %v9768_v10  ;;  %v9826_v61 = vld [vmem:[%s20890_s25 + $0xa0] sm:$0xff] }
0x1aba   :  { %v9781_v6 = vmul.f32 %v9777_v56, %v9769_v57  ;;  %v9787_v17 = vadd.f32 %v9783_v33, %v9767_v22  ;;  %v10201_v22 = vsel %vm3724_vm3, %v15394_v49, 0  ;;  %v9827_v56 = vld [vmem:[%s20890_s25 + $0xa8] sm:$0xff]  ;;  %v9828_v33 = vld [vmem:[%s20890_s25 + $0xb0] sm:$0xff] }
0x1abb   :  { %v9780_v52 = vmul.f32 %v9776_v27, %v9768_v10  ;;  %v9786_v16 = vadd.f32 %v9782_v54, %v9766_v20  ;;  %v9815_v20 = vld [vmem:[%s20890_s25 + $0x48] sm:$0xff]  ;;  %v9829_v27 = vld [vmem:[%s20890_s25 + $0xb8] sm:$0xff]  ;;  %v9830_v54 = vld [vmem:[%s20890_s25 + $0xc0] sm:$0xff] }
0x1abc   :  { %v9785_v30 = vmul.f32 %v9781_v6, %v9769_v57  ;;  %v9791_v43 = vmul.f32 0.7978846, %v9787_v17  ;;  %v9831_v6 = vld [vmem:[%s20890_s25 + $0xc8] sm:$0xff]  ;;  %v9832_v17 = vld [vmem:[%s20890_s25 + $0xd0] sm:$0xff] }
0x1abd   :  { %v9784_v48 = vmul.f32 %v9780_v52, %v9768_v10  ;;  %v9790_v53 = vmul.f32 0.7978846, %v9786_v16  ;;  %v9833_v52 = vld [vmem:[%s20890_s25 + $0xd8] sm:$0xff]  ;;  %v9834_v16 = vld [vmem:[%s20890_s25 + $0xe0] sm:$0xff] }
0x1abe   :  { %18518 = vtanh.f32 %v9791_v43  ;;  %v9789_v1 = vadd.f32 %v9785_v30, %v9769_v57  ;;  %v9822_v57 = vld [vmem:[%s20890_s25 + $0x80] sm:$0xff]  ;;  %v9835_v30 = vld [vmem:[%s20890_s25 + $0xe8] sm:$0xff]  ;;  %v9836_v43 = vld [vmem:[%s20890_s25 + $0xf0] sm:$0xff] }
0x1abf   :  { %18520 = vtanh.f32 %v9790_v53  ;;  %v9788_v39 = vadd.f32 %v9784_v48, %v9768_v10  ;;  %v9825_v10 = vld [vmem:[%s20890_s25 + $0x98] sm:$0xff]  ;;  %v18004_v53 = vld [vmem:[%s20897_s29 + $0x4] ss:$8 sps:$4 sm:$0xff]  }
0x1ac0   :  { %v9793_v47 = vmul.f32 0.7978846, %v9789_v1  ;;  %v9837_v48 = vld [vmem:[%s20890_s25 + $0xf8] sm:$0xff] }
0x1ac1   :  { %v9792_v12 = vmul.f32 0.7978846, %v9788_v39 }
0x1ac2   :  { %18522 = vtanh.f32 %v9793_v47 }
0x1ac3   :  { %18524 = vtanh.f32 %v9792_v12 }
0x1ac8   :  { %v18519_v8 = vpop.eup %18518 }
0x1ac9   :  { %v18521_v18 = vpop.eup %18520  ;;  %v9799_v45 = vadd.f32 1.0, %v18519_v8 }
0x1aca   :  { %v9798_v13 = vadd.f32 1.0, %v18521_v18  ;;  %v18002_v18 = vld [vmem:[%s20897_s29] ss:$8 sps:$4 sm:$0xff]  }
0x1acb   :  { %v9803_v37 = vmul.f32 %v9799_v45, %v9771_v0  ;;  %v18007_v45 = vld [vmem:[%s20897_s29 + $0x14] ss:$8 sps:$4 sm:$0xff]  }
0x1acc   :  { %v18523_v9 = vpop.eup %18522  ;;  %v9802_v46 = vmul.f32 %v9798_v13, %v9770_v3  ;;  %v10164_v3 = vld [vmem:[%s20897_s29 + $0x20] sm:$0x33] }
0x1acd   :  { %v18525_v25 = vpop.eup %18524  ;;  %v9801_v38 = vadd.f32 1.0, %v18523_v9 }
0x1ace   :  { %v16971_v50 = vpack.c.bf16 %v9803_v37, %v9802_v46  ;;  %v9800_v14 = vadd.f32 1.0, %v18525_v25  ;;  %v18005_v37 = vld [vmem:[%s20897_s29 + $0x10] ss:$8 sps:$4 sm:$0xff]   ;;  %v15403_v46 = vcombine.high %v10164_v3, %v10164_v3  ;;  %v15402_v25 = vcombine.low %v10164_v3, %v10164_v3 }
0x1acf   :  { %v9805_v7 = vmul.f32 %v9801_v38, %v9773_v63 }
0x1ad0   :  { %16972 = vmatprep.subr.bf16.mxu1 %v16971_v50  ;;  %v9804_v42 = vmul.f32 %v9800_v14, %v9772_v32  ;;  %v10278_v32 = vsel %vm3724_vm3, %v15402_v25, 0  ;;  %v18012_v14 = vld [vmem:[%s20897_s29 + $0x54] ss:$8 sps:$4 sm:$0xff]  }
0x1ad1   :  { %16974 = vmatpush3.bf16.msra.mxu1 %v16971_v50 }
0x1ad2   :  { %v16975_v36 = vpack.c.bf16 %v9805_v7, %v9804_v42 }
0x1ad4   :  { %16976 = vmatprep.subr.bf16.mxu1 %v16975_v36 }
0x1ad5   :  { %16978 = vmatpush3.bf16.msra.mxu1 %v16975_v36  ;;  %v18010_v36 = vld [vmem:[%s20897_s29 + $0x50] ss:$8 sps:$4 sm:$0xff]  }
0x1ad6   :  { %10206 = vmatprep.subr.bf16.mxu1 %v17996_v28 }
0x1ad8   :  { %16739 = vmatmul.mubr.msk.f32.vlgmr.msra.gmra.mrb[134].mxu1 %vm6281_vm5, %v9807_v40  ;;  %v18015_v40 = vld [vmem:[%s20897_s29 + $0x64] ss:$8 sps:$4 sm:$0xff]  }
0x1ad9   :  { %16741 = vmatprep.mubr.msk.f32.mxu1 %vm6281_vm5, %v9808_v15  ;;  %10207 = vmatpush1.bf16.msra.mxu1 %v17994_v19  ;;  %v15410_v15 = vld [vmem:[%s20897_s29 + $0x70] sm:$0x33] }
0x1ada   :  { %10208 = vmatprep.subr.bf16.mxu1 %v17999_v21 }
0x1adc   :  { %16742 = vmatmul.mubr.msk.f32.gmra.mrb[136].mxu1 %vm6281_vm5, %v9809_v29 }
0x1add   :  { %16744 = vmatprep.mubr.msk.f32.mxu1 %vm6281_vm5, %v9810_v60  ;;  %10209 = vmatpush1.bf16.msra.mxu1 %v17997_v5  ;;  %v15416_v5 = vcombine.high %v15410_v15, %v15410_v15  ;;  %v15415_v60 = vcombine.low %v15410_v15, %v15410_v15 }
0x1ade   :  { %15396 = vmatprep.subr.msk.bf16.mxu1 %vm3724_vm3, %v15395_v62 }
0x1ae0   :  { %16745 = vmatmul.mubr.msk.f32.gmra.mrb[138].mxu1 %vm6281_vm5, %v9811_v4 }
0x1ae1   :  { %16747 = vmatprep.mubr.msk.f32.mxu1 %vm6281_vm5, %v9812_v26  ;;  %10211 = vmatpush1.bf16.msra.mxu1 %v10201_v22  ;;  %v10362_v26 = vsel %vm3724_vm3, %v15415_v60, 0  ;;  %v18020_v22 = vld [vmem:[%s20897_s29 + $0x7c] ss:$8 sps:$4 sm:$0xff]   ;;  %v15462_v60 = vld [vmem:[%s20897_s29 + $0x110] sm:$0x33] }
0x1ae2   :  { %10283 = vmatprep.subr.bf16.mxu1 %v18004_v53  ;;  %v18029_v53 = vld [vmem:[%s20897_s29 + $0xb0] ss:$8 sps:$4 sm:$0xff]  }
0x1ae4   :  { %16748 = vmatmul.mubr.msk.f32.gmra.mrb[140].mxu1 %vm6281_vm5, %v9813_v34 }
0x1ae5   :  { %16750 = vmatprep.mubr.msk.f32.mxu1 %vm6281_vm5, %v9814_v51 }
0x1ae8   :  { %16751 = vmatmul.mubr.msk.f32.gmra.mrb[142].mxu1 %vm6281_vm5, %v9815_v20  ;;  %v18018_v20 = vld [vmem:[%s20897_s29 + $0x78] ss:$8 sps:$4 sm:$0xff]  }
0x1ae9   :  { %16753 = vmatprep.mubr.msk.f32.mxu1 %vm6281_vm5, %v9816_v24 }
0x1aec   :  { %16754 = vmatmul.mubr.msk.f32.gmra.mrb[144].mxu1 %vm6281_vm5, %v9817_v35  ;;  %v18023_v35 = vld [vmem:[%s20897_s29 + $0x8c] ss:$8 sps:$4 sm:$0xff]  }
0x1aed   :  { %16756 = vmatprep.mubr.msk.f32.mxu1 %vm6281_vm5, %v9818_v59 }
0x1af0   :  { %16757 = vmatmul.mubr.msk.f32.gmra.mrb[146].mxu1 %vm6281_vm5, %v9819_v41  ;;  %v15423_v41 = vld [vmem:[%s20897_s29 + $0x98] sm:$0x33] }
0x1af1   :  { %16759 = vmatprep.mubr.msk.f32.mxu1 %vm6281_vm5, %v9820_v23 }
0x1af4   :  { %16760 = vmatmul.mubr.msk.f32.gmra.mrb[148].mxu1 %vm6281_vm5, %v9821_v31  ;;  %v18021_v31 = vld [vmem:[%s20897_s29 + $0x88] ss:$8 sps:$4 sm:$0xff]  }
0x1af5   :  { %16762 = vmatprep.mubr.msk.f32.mxu1 %vm6281_vm5, %v9822_v57 }
0x1af8   :  { %16763 = vmatmul.mubr.msk.f32.gmra.mrb[150].mxu1 %vm6281_vm5, %v9823_v58  ;;  %v15429_v58 = vcombine.high %v15423_v41, %v15423_v41 }
0x1af9   :  { %16765 = vmatprep.mubr.msk.f32.mxu1 %vm6281_vm5, %v9824_v11  ;;  %v15428_v11 = vcombine.low %v15423_v41, %v15423_v41  ;;  %v18052_v41 = vld [vmem:[%s20897_s29 + $0x11c] ss:$8 sps:$4 sm:$0xff]  }
0x1afc   :  { %16766 = vmatmul.mubr.msk.f32.gmra.mrb[152].mxu1 %vm6281_vm5, %v9825_v10 }
0x1afd   :  { %16768 = vmatprep.mubr.msk.f32.mxu1 %vm6281_vm5, %v9826_v61 }
0x1b00   :  { %16769 = vmatmul.mubr.msk.f32.gmra.mrb[154].mxu1 %vm6281_vm5, %v9827_v56 }
0x1b01   :  { %16771 = vmatprep.mubr.msk.f32.mxu1 %vm6281_vm5, %v9828_v33  ;;  %v10450_v33 = vsel %vm3724_vm3, %v15428_v11, 0 }
0x1b04   :  { %16772 = vmatmul.mubr.msk.f32.gmra.mrb[156].mxu1 %vm6281_vm5, %v9829_v27  ;;  %v18028_v27 = vld [vmem:[%s20897_s29 + $0xa4] ss:$8 sps:$4 sm:$0xff]  }
0x1b05   :  { %16774 = vmatprep.mubr.msk.f32.mxu1 %vm6281_vm5, %v9830_v54 }
0x1b08   :  { %16775 = vmatmul.mubr.msk.f32.gmra.mrb[158].mxu1 %vm6281_vm5, %v9831_v6 }
0x1b09   :  { %16777 = vmatprep.mubr.msk.f32.mxu1 %vm6281_vm5, %v9832_v17  ;;  %v18026_v17 = vld [vmem:[%s20897_s29 + $0xa0] ss:$8 sps:$4 sm:$0xff]  }
0x1b0c   :  { %16778 = vmatmul.mubr.msk.f32.gmra.mrb[160].mxu1 %vm6281_vm5, %v9833_v52 }
0x1b0d   :  { %16780 = vmatprep.mubr.msk.f32.mxu1 %vm6281_vm5, %v9834_v16  ;;  %v18031_v16 = vld [vmem:[%s20897_s29 + $0xb4] ss:$8 sps:$4 sm:$0xff]  }
0x1b10   :  { %16781 = vmatmul.mubr.msk.f32.gmra.mrb[162].mxu1 %vm6281_vm5, %v9835_v30 }
0x1b11   :  { %16783 = vmatprep.mubr.msk.f32.mxu1 %vm6281_vm5, %v9836_v43  ;;  %v15436_v43 = vld [vmem:[%s20897_s29 + $0xc0] sm:$0x33] }
0x1b14   :  { %16784 = vmatmul.mubr.msk.f32.gmra.mrb[164].mxu1 %vm6281_vm5, %v9837_v48 }
0x1b15   :  { %10238 = vmatprep.mubr.bf16.mxu1 %v21648_v44 }
0x1bab   :  { %v16740_v1 = vpop.f32.mrb[134].mxu1 }
0x1bac   :  { %v10000_v39 = vpop.f32.mrb[135].mxu1 }
0x1bad   :  { %v10159_v47 = vpack.c.bf16 %v16740_v1, %v10000_v39  ;;  %v15442_v39 = vcombine.high %v15436_v43, %v15436_v43 }
0x1baf   :  { %v16743_v12 = vpop.f32.mrb[136].mxu1 }
0x1bb0   :  { %v10010_v8 = vpop.f32.mrb[137].mxu1 }
0x1bb1   :  { %v10165_v0 = vpack.c.bf16 %v16743_v12, %v10010_v8 }
0x1bb3   :  { %15397 = vmatmul.mubr.msk.bf16.vlgmr.msra.gmra.mrb[168].mxu1 %vm6248_vm4, %v10165_v0  ;;  %v16746_v13 = vpop.f32.mrb[138].mxu1 }
0x1bb4   :  { %10284 = vmatpush1.bf16.msra.mxu1 %v18002_v18  ;;  %10315 = vmatprep.mubr.bf16.mxu1 %v21648_v44  ;;  %v10020_v9 = vpop.f32.mrb[139].mxu1 }
0x1bb5   :  { %10285 = vmatprep.subr.bf16.mxu1 %v18007_v45  ;;  %v10326_v63 = vpack.c.bf16 %v16746_v13, %v10020_v9  ;;  %v18036_v45 = vld [vmem:[%s20897_s29 + $0xcc] ss:$8 sps:$4 sm:$0xff]  }
0x1bb7   :  { %v20980_v38 = vpop.f32.mrb[140].mxu1 }
0x1bb8   :  { %10286 = vmatpush1.bf16.msra.mxu1 %v18005_v37  ;;  %v20982_v50 = vpop.f32.mrb[141].mxu1  ;;  %v18034_v37 = vld [vmem:[%s20897_s29 + $0xc8] ss:$8 sps:$4 sm:$0xff]  }
0x1bb9   :  { %15404 = vmatprep.subr.msk.bf16.mxu1 %vm3724_vm3, %v15403_v46  ;;  %v10414_v7 = vpack.c.bf16 %v20980_v38, %v20982_v50  ;;  %v18039_v46 = vld [vmem:[%s20897_s29 + $0xdc] ss:$8 sps:$4 sm:$0xff]   ;;  %v18037_v50 = vld [vmem:[%s20897_s29 + $0xd8] ss:$8 sps:$4 sm:$0xff]  }
0x1bbb   :  { %v20989_v42 = vpop.f32.mrb[142].mxu1 }
0x1bbc   :  { %10288 = vmatpush1.bf16.msra.mxu1 %v10278_v32  ;;  %v20992_v28 = vpop.f32.mrb[143].mxu1 }
0x1bbd   :  { %10367 = vmatprep.subr.bf16.mxu1 %v18012_v14  ;;  %v10502_v19 = vpack.c.bf16 %v20989_v42, %v20992_v28 }
0x1bbf   :  { %15405 = vmatmul.mubr.msk.bf16.vlgmr.msra.gmra.mrb[168].mxu1 %vm6248_vm4, %v10159_v47  ;;  %v20999_v21 = vpop.f32.mrb[144].mxu1  ;;  %v15441_v47 = vcombine.low %v15436_v43, %v15436_v43 }
0x1bc0   :  { %10368 = vmatpush1.bf16.msra.mxu1 %v18010_v36  ;;  %10399 = vmatprep.mubr.bf16.mxu1 %v21648_v44  ;;  %v21003_v29 = vpop.f32.mrb[145].mxu1 }
0x1bc1   :  { %10369 = vmatprep.subr.bf16.mxu1 %v18015_v40  ;;  %v10590_v62 = vpack.c.bf16 %v20999_v21, %v21003_v29  ;;  %v10538_v0 = vsel %vm3724_vm3, %v15441_v47, 0  ;;  %v18050_v21 = vld [vmem:[%s20897_s29 + $0x118] ss:$8 sps:$4 sm:$0xff]   ;;  %v18055_v29 = vld [vmem:[%s20897_s29 + $0x12c] ss:$8 sps:$4 sm:$0xff]  }
0x1bc2   :  { %v18069_v47 = vld [vmem:[%s20897_s29 + $0x178] ss:$8 sps:$4 sm:$0xff]  }
0x1bc3   :  { %v21007_v49 = vpop.f32.mrb[146].mxu1 }
0x1bc4   :  { %10370 = vmatpush1.bf16.msra.mxu1 %v18013_v2  ;;  %v21009_v4 = vpop.f32.mrb[147].mxu1  ;;  %v18042_v2 = vld [vmem:[%s20897_s29 + $0xf0] ss:$8 sps:$4 sm:$0xff]  }
0x1bc5   :  { %15417 = vmatprep.subr.msk.bf16.mxu1 %vm3724_vm3, %v15416_v5  ;;  %v10678_v34 = vpack.c.bf16 %v21007_v49, %v21009_v4  ;;  %v18047_v5 = vld [vmem:[%s20897_s29 + $0x104] ss:$8 sps:$4 sm:$0xff]   ;;  %v18058_v49 = vld [vmem:[%s20897_s29 + $0x140] ss:$8 sps:$4 sm:$0xff]   ;;  %v18063_v4 = vld [vmem:[%s20897_s29 + $0x154] ss:$8 sps:$4 sm:$0xff]  }
0x1bc7   :  { %v21016_v51 = vpop.f32.mrb[148].mxu1 }
0x1bc8   :  { %10372 = vmatpush1.bf16.msra.mxu1 %v10362_v26  ;;  %v21019_v24 = vpop.f32.mrb[149].mxu1  ;;  %v18045_v26 = vld [vmem:[%s20897_s29 + $0x100] ss:$8 sps:$4 sm:$0xff]  }
0x1bc9   :  { %10455 = vmatprep.subr.bf16.mxu1 %v18020_v22  ;;  %v10766_v59 = vpack.c.bf16 %v21016_v51, %v21019_v24  ;;  %v15468_v22 = vcombine.high %v15462_v60, %v15462_v60  ;;  %v18066_v51 = vld [vmem:[%s20897_s29 + $0x168] ss:$8 sps:$4 sm:$0xff]   ;;  %v18071_v24 = vld [vmem:[%s20897_s29 + $0x17c] ss:$8 sps:$4 sm:$0xff]  }
0x1bcb   :  { %15418 = vmatmul.mubr.msk.bf16.vlgmr.msra.gmra.mrb[168].mxu1 %vm6248_vm4, %v10326_v63  ;;  %v21026_v23 = vpop.f32.mrb[150].mxu1  ;;  %v15449_v63 = vld [vmem:[%s20897_s29 + $0xe8] sm:$0x33] }
0x1bcc   :  { %10456 = vmatpush1.bf16.msra.mxu1 %v18018_v20  ;;  %10487 = vmatprep.mubr.bf16.mxu1 %v21648_v44  ;;  %v21030_v57 = vpop.f32.mrb[151].mxu1  ;;  %v15455_v14 = vcombine.high %v15449_v63, %v15449_v63  ;;  %v15467_v20 = vcombine.low %v15462_v60, %v15462_v60 }
0x1bcd   :  { %10457 = vmatprep.subr.bf16.mxu1 %v18023_v35  ;;  %v10854_v10 = vpack.c.bf16 %v21026_v23, %v21030_v57  ;;  %v18074_v23 = vld [vmem:[%s20897_s29 + $0x190] ss:$8 sps:$4 sm:$0xff]   ;;  %v18079_v57 = vld [vmem:[%s20897_s29 + $0x1a4] ss:$8 sps:$4 sm:$0xff]  }
0x1bce   :  { %v10714_v35 = vsel %vm3724_vm3, %v15467_v20, 0 }
0x1bcf   :  { %v21034_v61 = vpop.f32.mrb[152].mxu1 }
0x1bd0   :  { %10458 = vmatpush1.bf16.msra.mxu1 %v18021_v31  ;;  %v21036_v56 = vpop.f32.mrb[153].mxu1  ;;  %v18053_v31 = vld [vmem:[%s20897_s29 + $0x128] ss:$8 sps:$4 sm:$0xff]  }
0x1bd1   :  { %15430 = vmatprep.subr.msk.bf16.mxu1 %vm3724_vm3, %v15429_v58  ;;  %v10942_v54 = vpack.c.bf16 %v21034_v61, %v21036_v56  ;;  %v18082_v61 = vld [vmem:[%s20897_s29 + $0x1b8] ss:$8 sps:$4 sm:$0xff]   ;;  %v18087_v56 = vld [vmem:[%s20897_s29 + $0x1cc] ss:$8 sps:$4 sm:$0xff]  }
0x1bd3   :  { %v21043_v6 = vpop.f32.mrb[154].mxu1 }
0x1bd4   :  { %10460 = vmatpush1.bf16.msra.mxu1 %v10450_v33  ;;  %v21046_v52 = vpop.f32.mrb[155].mxu1 }
0x1bd5   :  { %10543 = vmatprep.subr.bf16.mxu1 %v18028_v27  ;;  %v11030_v30 = vpack.c.bf16 %v21043_v6, %v21046_v52  ;;  %v18060_v27 = vld [vmem:[%s20897_s29 + $0x144] ss:$8 sps:$4 sm:$0xff]   ;;  %v18090_v6 = vld [vmem:[%s20897_s29 + $0x1e0] ss:$8 sps:$4 sm:$0xff]   ;;  %v18095_v52 = vld [vmem:[%s20897_s29 + $0x1f4] ss:$8 sps:$4 sm:$0xff]  }
0x1bd7   :  { %15431 = vmatmul.mubr.msk.bf16.vlgmr.msra.gmra.mrb[168].mxu1 %vm6248_vm4, %v10414_v7  ;;  %v21053_v48 = vpop.f32.mrb[156].mxu1  ;;  %v15454_v7 = vcombine.low %v15449_v63, %v15449_v63  ;;  %v18077_v63 = vld [vmem:[%s20897_s29 + $0x1a0] ss:$8 sps:$4 sm:$0xff]  }
0x1bd8   :  { %10544 = vmatpush1.bf16.msra.mxu1 %v18026_v17  ;;  %10575 = vmatprep.mubr.bf16.mxu1 %v21648_v44  ;;  %v21057_v1 = vpop.f32.mrb[157].mxu1  ;;  %v18061_v17 = vld [vmem:[%s20897_s29 + $0x150] ss:$8 sps:$4 sm:$0xff]  }
0x1bd9   :  { %10545 = vmatprep.subr.bf16.mxu1 %v18031_v16  ;;  %v11118_v12 = vpack.c.bf16 %v21053_v48, %v21057_v1  ;;  %v10626_v40 = vsel %vm3724_vm3, %v15454_v7, 0  ;;  %v18098_v48 = vld [vmem:[%s20897_s29 + $0x208] ss:$8 sps:$4 sm:$0xff]   ;;  %v18103_v1 = vld [vmem:[%s20897_s29 + $0x21c] ss:$8 sps:$4 sm:$0xff]  }
0x1bdb   :  { %v21061_v8 = vpop.f32.mrb[158].mxu1 }
0x1bdc   :  { %10546 = vmatpush1.bf16.msra.mxu1 %v18029_v53  ;;  %v21063_v18 = vpop.f32.mrb[159].mxu1 }
0x1bdd   :  { %15443 = vmatprep.subr.msk.bf16.mxu1 %vm3724_vm3, %v15442_v39  ;;  %v11206_v3 = vpack.c.bf16 %v21061_v8, %v21063_v18  ;;  %v18068_v39 = vld [vmem:[%s20897_s29 + $0x16c] ss:$8 sps:$4 sm:$0xff]   ;;  %v18106_v8 = vld [vmem:[%s20897_s29 + $0x230] ss:$8 sps:$4 sm:$0xff]  }
0x1bde   :  { %v18111_v18 = vld [vmem:[%s20897_s29 + $0x244] ss:$8 sps:$4 sm:$0xff]  }
0x1bdf   :  { %v21070_v13 = vpop.f32.mrb[160].mxu1 }
0x1be0   :  { %10548 = vmatpush1.bf16.msra.mxu1 %v10538_v0  ;;  %v21073_v9 = vpop.f32.mrb[161].mxu1 }
0x1be1   :  { %10631 = vmatprep.subr.bf16.mxu1 %v18036_v45  ;;  %v11294_v25 = vpack.c.bf16 %v21070_v13, %v21073_v9  ;;  %v18119_v13 = vld [vmem:[%s20897_s29 + $0x26c] ss:$8 sps:$4 sm:$0xff]   ;;  %v15579_v9 = vld [vmem:[%s20897_s29 + $0x278] sm:$0x33] }
0x1be3   :  { %15444 = vmatmul.mubr.msk.bf16.vlgmr.msra.gmra.mrb[168].mxu1 %vm6248_vm4, %v10502_v19  ;;  %v21083_v38 = vpop.f32.mrb[162].mxu1  ;;  %v18044_v19 = vld [vmem:[%s20897_s29 + $0xf4] ss:$8 sps:$4 sm:$0xff]  }
0x1be4   :  { %10632 = vmatpush1.bf16.msra.mxu1 %v18034_v37  ;;  %10663 = vmatprep.mubr.bf16.mxu1 %v21648_v44  ;;  %v21087_v32 = vpop.f32.mrb[163].mxu1 }
0x1be5   :  { %10633 = vmatprep.subr.bf16.mxu1 %v18039_v46  ;;  %v11382_v42 = vpack.c.bf16 %v21083_v38, %v21087_v32  ;;  %v18076_v46 = vld [vmem:[%s20897_s29 + $0x194] ss:$8 sps:$4 sm:$0xff]  }
0x1be7   :  { %v21091_v36 = vpop.f32.mrb[164].mxu1 }
0x1be8   :  { %10634 = vmatpush1.bf16.msra.mxu1 %v18037_v50  ;;  %v21093_v28 = vpop.f32.mrb[165].mxu1 }
0x1be9   :  { %15456 = vmatprep.subr.msk.bf16.mxu1 %vm3724_vm3, %v15455_v14  ;;  %v11470_v15 = vpack.c.bf16 %v21091_v36, %v21093_v28 }
0x1bec   :  { %10636 = vmatpush1.bf16.msra.mxu1 %v10626_v40  ;;  %v18084_v40 = vld [vmem:[%s20897_s29 + $0x1bc] ss:$8 sps:$4 sm:$0xff]  }
0x1bed   :  { %10719 = vmatprep.subr.bf16.mxu1 %v18044_v19  ;;  %v18085_v19 = vld [vmem:[%s20897_s29 + $0x1c8] ss:$8 sps:$4 sm:$0xff]  }
0x1bef   :  { %15457 = vmatmul.mubr.msk.bf16.vlgmr.msra.gmra.mrb[168].mxu1 %vm6248_vm4, %v10590_v62  ;;  %v15475_v62 = vld [vmem:[%s20897_s29 + $0x138] sm:$0x33] }
0x1bf0   :  { %10720 = vmatpush1.bf16.msra.mxu1 %v18042_v2  ;;  %10751 = vmatprep.mubr.bf16.mxu1 %v21648_v44  ;;  %v15481_v58 = vcombine.high %v15475_v62, %v15475_v62  ;;  %v15480_v11 = vcombine.low %v15475_v62, %v15475_v62 }
0x1bf1   :  { %10721 = vmatprep.subr.bf16.mxu1 %v18047_v5 }
0x1bf2   :  { %v10802_v33 = vsel %vm3724_vm3, %v15480_v11, 0  ;;  %v18108_v11 = vld [vmem:[%s20897_s29 + $0x234] ss:$8 sps:$4 sm:$0xff]  }
0x1bf4   :  { %10722 = vmatpush1.bf16.msra.mxu1 %v18045_v26  ;;  %v18092_v26 = vld [vmem:[%s20897_s29 + $0x1e4] ss:$8 sps:$4 sm:$0xff]  }
0x1bf5   :  { %15469 = vmatprep.subr.msk.bf16.mxu1 %vm3724_vm3, %v15468_v22  ;;  %v18093_v22 = vld [vmem:[%s20897_s29 + $0x1f0] ss:$8 sps:$4 sm:$0xff]  }
0x1bf8   :  { %10724 = vmatpush1.bf16.msra.mxu1 %v10714_v35 }
0x1bf9   :  { %10807 = vmatprep.subr.bf16.mxu1 %v18052_v41 }
0x1bfb   :  { %15470 = vmatmul.mubr.msk.bf16.vlgmr.msra.gmra.mrb[168].mxu1 %vm6248_vm4, %v10678_v34  ;;  %v15488_v34 = vld [vmem:[%s20897_s29 + $0x160] sm:$0x33] }
0x1bfc   :  { %10808 = vmatpush1.bf16.msra.mxu1 %v18050_v21  ;;  %10839 = vmatprep.mubr.bf16.mxu1 %v21648_v44  ;;  %v15494_v16 = vcombine.high %v15488_v34, %v15488_v34  ;;  %v15493_v43 = vcombine.low %v15488_v34, %v15488_v34  ;;  %v18100_v21 = vld [vmem:[%s20897_s29 + $0x20c] ss:$8 sps:$4 sm:$0xff]   ;;  %v18116_v34 = vld [vmem:[%s20897_s29 + $0x25c] ss:$8 sps:$4 sm:$0xff]  }
0x1bfd   :  { %10809 = vmatprep.subr.bf16.mxu1 %v18055_v29  ;;  %v18101_v29 = vld [vmem:[%s20897_s29 + $0x218] ss:$8 sps:$4 sm:$0xff]  }
0x1bfe   :  { %v10890_v53 = vsel %vm3724_vm3, %v15493_v43, 0  ;;  %v15584_v43 = vcombine.low %v15579_v9, %v15579_v9 }
0x1c00   :  { %10810 = vmatpush1.bf16.msra.mxu1 %v18053_v31 }
0x1c01   :  { %15482 = vmatprep.subr.msk.bf16.mxu1 %vm3724_vm3, %v15481_v58 }
0x1c04   :  { %10812 = vmatpush1.bf16.msra.mxu1 %v10802_v33  ;;  %v18109_v33 = vld [vmem:[%s20897_s29 + $0x240] ss:$8 sps:$4 sm:$0xff]  }
0x1c05   :  { %10895 = vmatprep.subr.bf16.mxu1 %v18060_v27 }
0x1c07   :  { %15483 = vmatmul.mubr.msk.bf16.vlgmr.msra.gmra.mrb[168].mxu1 %vm6248_vm4, %v10766_v59  ;;  %v15501_v59 = vld [vmem:[%s20897_s29 + $0x188] sm:$0x33] }
0x1c08   :  { %10896 = vmatpush1.bf16.msra.mxu1 %v18058_v49  ;;  %10927 = vmatprep.mubr.bf16.mxu1 %v21648_v44  ;;  %v15507_v0 = vcombine.high %v15501_v59, %v15501_v59  ;;  %v15506_v45 = vcombine.low %v15501_v59, %v15501_v59 }
0x1c09   :  { %10897 = vmatprep.subr.bf16.mxu1 %v18063_v4 }
0x1c0a   :  { %v10978_v37 = vsel %vm3724_vm3, %v15506_v45, 0 }
0x1c0c   :  { %10898 = vmatpush1.bf16.msra.mxu1 %v18061_v17  ;;  %v18114_v17 = vld [vmem:[%s20897_s29 + $0x258] ss:$8 sps:$4 sm:$0xff]  }
0x1c0d   :  { %15495 = vmatprep.subr.msk.bf16.mxu1 %vm3724_vm3, %v15494_v16  ;;  %v15585_v16 = vcombine.high %v15579_v9, %v15579_v9 }
0x1c10   :  { %10900 = vmatpush1.bf16.msra.mxu1 %v10890_v53  ;;  %v11506_v53 = vsel %vm3724_vm3, %v15584_v43, 0 }
0x1c11   :  { %10983 = vmatprep.subr.bf16.mxu1 %v18068_v39 }
0x1c13   :  { %15496 = vmatmul.mubr.msk.bf16.vlgmr.msra.gmra.mrb[168].mxu1 %vm6248_vm4, %v10854_v10  ;;  %v15514_v10 = vld [vmem:[%s20897_s29 + $0x1b0] sm:$0x33] }
0x1c14   :  { %10984 = vmatpush1.bf16.msra.mxu1 %v18066_v51  ;;  %11015 = vmatprep.mubr.bf16.mxu1 %v21648_v44  ;;  %v15520_v50 = vcombine.high %v15514_v10, %v15514_v10  ;;  %v15519_v14 = vcombine.low %v15514_v10, %v15514_v10  ;;  %v11773_v10 = vld [vmem:[%s13897_s3 + $0x8] sm:$0xff] }
0x1c15   :  { %10985 = vmatprep.subr.bf16.mxu1 %v18071_v24 }
0x1c16   :  { %v11066_v7 = vsel %vm3724_vm3, %v15519_v14, 0 }
0x1c18   :  { %10986 = vmatpush1.bf16.msra.mxu1 %v18069_v47 }
0x1c19   :  { %15508 = vmatprep.subr.msk.bf16.mxu1 %vm3724_vm3, %v15507_v0 }
0x1c1c   :  { %10988 = vmatpush1.bf16.msra.mxu1 %v10978_v37 }
0x1c1d   :  { %11071 = vmatprep.subr.bf16.mxu1 %v18076_v46 }
0x1c1f   :  { %15509 = vmatmul.mubr.msk.bf16.vlgmr.msra.gmra.mrb[168].mxu1 %vm6248_vm4, %v10942_v54  ;;  %v15527_v54 = vld [vmem:[%s20897_s29 + $0x1d8] sm:$0x33] }
0x1c20   :  { %11072 = vmatpush1.bf16.msra.mxu1 %v18074_v23  ;;  %11103 = vmatprep.mubr.bf16.mxu1 %v21648_v44  ;;  %v15533_v2 = vcombine.high %v15527_v54, %v15527_v54  ;;  %v15532_v5 = vcombine.low %v15527_v54, %v15527_v54  ;;  %v11772_v23 = vld [vmem:[%s13897_s3] sm:$0xff] }
0x1c21   :  { %11073 = vmatprep.subr.bf16.mxu1 %v18079_v57  ;;  %v11578_v57 = vld [vmem:[%s13896_s7] sm:$0xff] }
0x1c22   :  { %v11154_v60 = vsel %vm3724_vm3, %v15532_v5, 0  ;;  %16790 = vmatprep.mubr.msk.f32.mxu0 %vm2618_vm2, %v11578_v57 }
0x1c24   :  { %11074 = vmatpush1.bf16.msra.mxu1 %v18077_v63 }
0x1c25   :  { %15521 = vmatprep.subr.msk.bf16.mxu1 %vm3724_vm3, %v15520_v50 }
0x1c28   :  { %11076 = vmatpush1.bf16.msra.mxu1 %v11066_v7 }
0x1c29   :  { %11159 = vmatprep.subr.bf16.mxu1 %v18084_v40 }
0x1c2b   :  { %15522 = vmatmul.mubr.msk.bf16.vlgmr.msra.gmra.mrb[168].mxu1 %vm6248_vm4, %v11030_v30  ;;  %v15540_v30 = vld [vmem:[%s20897_s29 + $0x200] sm:$0x33] }
0x1c2c   :  { %11160 = vmatpush1.bf16.msra.mxu1 %v18082_v61  ;;  %11191 = vmatprep.mubr.bf16.mxu1 %v21648_v44  ;;  %v15546_v20 = vcombine.high %v15540_v30, %v15540_v30  ;;  %v15545_v35 = vcombine.low %v15540_v30, %v15540_v30  ;;  %v11579_v61 = vld [vmem:[%s13896_s7 + $0x8] sm:$0xff] }
0x1c2d   :  { %11161 = vmatprep.subr.bf16.mxu1 %v18087_v56 }
0x1c2e   :  { %v11242_v41 = vsel %vm3724_vm3, %v15545_v35, 0 }
0x1c30   :  { %11162 = vmatpush1.bf16.msra.mxu1 %v18085_v19 }
0x1c31   :  { %15534 = vmatprep.subr.msk.bf16.mxu1 %vm3724_vm3, %v15533_v2 }
0x1c34   :  { %11164 = vmatpush1.bf16.msra.mxu1 %v11154_v60 }
0x1c35   :  { %11247 = vmatprep.subr.bf16.mxu1 %v18092_v26 }
0x1c37   :  { %15535 = vmatmul.mubr.msk.bf16.vlgmr.msra.gmra.mrb[168].mxu1 %vm6248_vm4, %v11118_v12  ;;  %v15553_v12 = vld [vmem:[%s20897_s29 + $0x228] sm:$0x33] }
0x1c38   :  { %11248 = vmatpush1.bf16.msra.mxu1 %v18090_v6  ;;  %11279 = vmatprep.mubr.bf16.mxu1 %v21648_v44  ;;  %v15559_v62 = vcombine.high %v15553_v12, %v15553_v12  ;;  %v15558_v31 = vcombine.low %v15553_v12, %v15553_v12 }
0x1c39   :  { %11249 = vmatprep.subr.bf16.mxu1 %v18095_v52 }
0x1c3a   :  { %v11330_v58 = vsel %vm3724_vm3, %v15558_v31, 0 }
0x1c3c   :  { %11250 = vmatpush1.bf16.msra.mxu1 %v18093_v22 }
0x1c3d   :  { %15547 = vmatprep.subr.msk.bf16.mxu1 %vm3724_vm3, %v15546_v20 }
0x1c40   :  { %11252 = vmatpush1.bf16.msra.mxu1 %v11242_v41  ;;  %v11789_v41 = vld [vmem:[%s13898_s11 + $0x8] sm:$0xff] }
0x1c41   :  { %11335 = vmatprep.subr.bf16.mxu1 %v18100_v21  ;;  %v11788_v21 = vld [vmem:[%s13898_s11] sm:$0xff] }
0x1c43   :  { %15548 = vmatmul.mubr.msk.bf16.vlgmr.msra.gmra.mrb[168].mxu1 %vm6248_vm4, %v11206_v3  ;;  %v15566_v3 = vld [vmem:[%s20897_s29 + $0x250] sm:$0x33] }
0x1c44   :  { %11336 = vmatpush1.bf16.msra.mxu1 %v18098_v48  ;;  %11367 = vmatprep.mubr.bf16.mxu1 %v21648_v44  ;;  %v15572_v27 = vcombine.high %v15566_v3, %v15566_v3  ;;  %v15571_v49 = vcombine.low %v15566_v3, %v15566_v3  ;;  %v13835_v48 = vld [vmem:[%s13901_s15] sm:$0xff] }
0x1c45   :  { %11337 = vmatprep.subr.bf16.mxu1 %v18103_v1 }
0x1c46   :  { %v11418_v4 = vsel %vm3724_vm3, %v15571_v49, 0 }
0x1c48   :  { %11338 = vmatpush1.bf16.msra.mxu1 %v18101_v29 }
0x1c49   :  { %15560 = vmatprep.subr.msk.bf16.mxu1 %vm3724_vm3, %v15559_v62 }
0x1c4c   :  { %11340 = vmatpush1.bf16.msra.mxu1 %v11330_v58 }
0x1c4d   :  { %11423 = vmatprep.subr.bf16.mxu1 %v18108_v11 }
0x1c4f   :  { %15561 = vmatmul.mubr.msk.bf16.vlgmr.msra.gmra.mrb[168].mxu1 %vm6248_vm4, %v11294_v25  ;;  %v18117_v25 = vld [vmem:[%s20897_s29 + $0x268] ss:$8 sps:$4 sm:$0xff]  }
0x1c50   :  { %11424 = vmatpush1.bf16.msra.mxu1 %v18106_v8  ;;  %11455 = vmatprep.mubr.bf16.mxu1 %v21648_v44 }
0x1c51   :  { %11425 = vmatprep.subr.bf16.mxu1 %v18111_v18 }
0x1c54   :  { %11426 = vmatpush1.bf16.msra.mxu1 %v18109_v33 }
0x1c55   :  { %15573 = vmatprep.subr.msk.bf16.mxu1 %vm3724_vm3, %v15572_v27 }
0x1c58   :  { %11428 = vmatpush1.bf16.msra.mxu1 %v11418_v4 }
0x1c59   :  { %11511 = vmatprep.subr.bf16.mxu1 %v18116_v34 }
0x1c5b   :  { %15574 = vmatmul.mubr.msk.bf16.vlgmr.msra.gmra.mrb[168].mxu1 %vm6248_vm4, %v11382_v42 }
0x1c5c   :  { %11512 = vmatpush1.bf16.msra.mxu1 %v18114_v17  ;;  %11543 = vmatprep.mubr.bf16.mxu1 %v21648_v44 }
0x1c5d   :  { %11513 = vmatprep.subr.bf16.mxu1 %v18119_v13 }
0x1c60   :  { %11514 = vmatpush1.bf16.msra.mxu1 %v18117_v25 }
0x1c61   :  { %15586 = vmatprep.subr.msk.bf16.mxu1 %vm3724_vm3, %v15585_v16 }
0x1c64   :  { %11516 = vmatpush1.bf16.msra.mxu1 %v11506_v53 }
0x1c67   :  { %15587 = vmatmul.mubr.msk.bf16.vlgmr.msra.gmra.mrb[168].mxu1 %vm6248_vm4, %v11470_v15 }
0x1d3a   :  { %v21223_v38 = vpop.f32.mrb[168].mxu1 }
0x1d3b   :  { %v21225_v32 = vpop.f32.mrb[169].mxu1  ;;  %v11566_v36 = vmul.f32 %v21223_v38, %v21223_v38 }
0x1d3c   :  { %v11567_v44 = vmul.f32 %v21225_v32, %v21225_v32  ;;  %v21229_v42 = vpop.f32.mrb[170].mxu1  ;;  %v11558_v39 = vsel %vm2595_vm1, %v21225_v32, 0.0 }
0x1d3d   :  { %v21233_v51 = vpop.f32.mrb[171].mxu1  ;;  %v11559_v24 = vadd.f32 %v11558_v39, %v21223_v38  ;;  %v11568_v0 = vmul.f32 %v21229_v42, %v21229_v42 }
0x1d3e   :  { %v11569_v28 = vmul.f32 %v21233_v51, %v21233_v51  ;;  %v11562_v15 = vsel %vm2595_vm1, %v21233_v51, 0.0  ;;  %v11570_v59 = vsel %vm2595_vm1, %v11567_v44, 0.0 }
0x1d3f   :  { %11560 = vadd.xlane.f32.xlu1 %v11559_v24  ;;  %v11563_v47 = vadd.f32 %v11562_v15, %v21229_v42  ;;  %v11571_v45 = vadd.f32 %v11570_v59, %v11566_v36 }
0x1d40   :  { %v11574_v37 = vsel %vm2595_vm1, %v11569_v28, 0.0 }
0x1d41   :  { %11564 = vadd.xlane.f32.xlu0 %v11563_v47  ;;  %v11575_v46 = vadd.f32 %v11574_v37, %v11568_v0 }
0x1d43   :  { %11576 = vadd.xlane.f32.xlu1 %v11575_v46 }
0x1d45   :  { %11572 = vadd.xlane.f32.xlu0 %v11571_v45 }
0x1d54   :  { %11776 = vperm.xlu1 %17317, %v11772_v23  }
0x1d5b   :  { %11781 = vperm.xlu0 %17316, %v11773_v10  }
0x1dcc   :  { %v11561_v63 = vpop.xlane.xlu1 %11560 }
0x1dce   :  { %v11565_v50 = vpop.xlane.xlu0 %11564 }
0x1dcf   :  { %v16979_v14 = vpack.c.bf16 %v11565_v50, %v11561_v63 }
0x1dd0   :  { %v11577_v7 = vpop.xlane.xlu1 %11576 }
0x1dd1   :  { %16980 = vmatprep.subr.bf16.mxu0 %v16979_v14 }
0x1dd2   :  { %16982 = vmatpush3.bf16.msra.mxu0 %v16979_v14  ;;  %v11573_v40 = vpop.xlane.xlu0 %11572 }
0x1dd3   :  { %v16983_v56 = vpack.c.bf16 %v11577_v7, %v11573_v40 }
0x1dd4   :  { %v11777_v1 = vpop.permute.xlu1 %11776 }
0x1dd5   :  { %16791 = vmatmul.mubr.msk.f32.vlgmr.msra.gmra.mrb[144].mxu0 %vm2618_vm2, %v11579_v61  ;;  %16984 = vmatprep.subr.bf16.mxu0 %v16983_v56 }
0x1dd6   :  { %16986 = vmatpush3.bf16.msra.mxu0 %v16983_v56  ;;  %16797 = vmatprep.mubr.msk.f32.mxu0 %vm2618_vm2, %v11578_v57 }
0x1dd9   :  { %16798 = vmatmul.mubr.msk.f32.vlgmr.msra.gmra.mrb[146].mxu0 %vm2618_vm2, %v11579_v61 }
0x1dda   :  { %11940 = vmatprep.mubr.f32.mxu0 %v21772_v55  ;;  %v11782_v12 = vpop.permute.xlu0 %11781 }
0x1ea8   :  { %v16792_v54 = vpop.f32.mrb[144].mxu0 }
0x1ea9   :  { %11747 = vperm.xlu1 %17317, %v16792_v54   ;;  %v11652_v19 = vpop.f32.mrb[145].mxu0  ;;  %v11737_v2 = vmul.f32 %v16792_v54, %v16792_v54 }
0x1eaa   :  { %11742 = vperm.xlu0 %17316, %v11652_v19   ;;  %v11736_v5 = vmul.f32 %v11652_v19, %v11652_v19 }
0x1eac   :  { %v16799_v60 = vpop.f32.mrb[146].mxu0 }
0x1ead   :  { %v11739_v26 = vsub.f32 %v16799_v60, %v11737_v2  ;;  %v11727_v6 = vpop.f32.mrb[147].mxu0 }
0x1eae   :  { %v11738_v52 = vsub.f32 %v11727_v6, %v11736_v5 }
0x1eaf   :  { %v11755_v30 = vadd.f32 1e-05, %v11739_v26 }
0x1eb0   :  { %v11754_v22 = vadd.f32 1e-05, %v11738_v52 }
0x1eb1   :  { %18526 = vrsqrt.f32 %v11755_v30 }
0x1eb2   :  { %18528 = vrsqrt.f32 %v11754_v22 }
0x1ebb   :  { %v18527_v20 = vpop.eup %18526 }
0x1ebc   :  { %v18529_v35 = vpop.eup %18528  ;;  %11765 = vperm.xlu0 %17316, %v18527_v20  }
0x1ebd   :  { %11760 = vperm.xlu1 %17317, %v18529_v35  }
0x1ec0   :  { %11797 = vperm.xlu0 %17316, %v11789_v41  }
0x1ec1   :  { %11792 = vperm.xlu1 %17317, %v11788_v21   ;;  %v18124_v21 = vld [vmem:[%s21267_s19 + $0xcc] ss:$8 sps:$4 sm:$0xff]  }
0x1ec5   :  { %13838 = vperm.xlu1 %17317, %v13835_v48  }
0x1f28   :  { %v11748_v29 = vpop.permute.xlu1 %11747 }
0x1f29   :  { %v11743_v62 = vpop.permute.xlu0 %11742  ;;  %v11752_v31 = vsub.f32 %v21229_v42, %v11748_v29  ;;  %v11753_v58 = vsub.f32 %v21233_v51, %v11748_v29  ;;  %v18127_v29 = vld [vmem:[%s21267_s19 + $0xdc] ss:$8 sps:$4 sm:$0xff]  }
0x1f2a   :  { %v11750_v11 = vsub.f32 %v21223_v38, %v11743_v62  ;;  %v11751_v8 = vsub.f32 %v21225_v32, %v11743_v62  ;;  %v11841_v62 = vld [vmem:[%s21276_s23 + $0x8] sm:$0xff] }
0x1f3b   :  { %v11766_v18 = vpop.permute.xlu0 %11765 }
0x1f3c   :  { %v11770_v3 = vmul.f32 %v11766_v18, %v11752_v31  ;;  %v11771_v33 = vmul.f32 %v11766_v18, %v11753_v58  ;;  %v11761_v27 = vpop.permute.xlu1 %11760  ;;  %v18125_v31 = vld [vmem:[%s21267_s19 + $0xd8] ss:$8 sps:$4 sm:$0xff]   ;;  %v18130_v58 = vld [vmem:[%s21267_s19 + $0xec] ss:$8 sps:$4 sm:$0xff]   ;;  %v18133_v18 = vld [vmem:[%s21267_s19 + $0xfc] ss:$8 sps:$4 sm:$0xff]  }
0x1f3d   :  { %v11768_v49 = vmul.f32 %v11761_v27, %v11750_v11  ;;  %v11769_v4 = vmul.f32 %v11761_v27, %v11751_v8  ;;  %v11842_v11 = vld [vmem:[%s21276_s23 + $0x10] sm:$0xff] }
0x1f3e   :  { %v11786_v34 = vmul.f32 %v11782_v12, %v11770_v3  ;;  %v11787_v17 = vmul.f32 %v11782_v12, %v11771_v33  ;;  %v18122_v12 = vld [vmem:[%s21267_s19 + $0xc8] ss:$8 sps:$4 sm:$0xff]   ;;  %v11843_v3 = vld [vmem:[%s21276_s23 + $0x18] sm:$0xff]  ;;  %v18136_v27 = vld [vmem:[%s21267_s19 + $0x10c] ss:$8 sps:$4 sm:$0xff]  }
0x1f3f   :  { %v11798_v13 = vpop.permute.xlu0 %11797  ;;  %v11784_v9 = vmul.f32 %v11777_v1, %v11768_v49  ;;  %v11785_v25 = vmul.f32 %v11777_v1, %v11769_v4  ;;  %v11840_v1 = vld [vmem:[%s21276_s23] sm:$0xff]  ;;  %v18128_v8 = vld [vmem:[%s21267_s19 + $0xe8] ss:$8 sps:$4 sm:$0xff]  }
0x1f40   :  { %v11802_v16 = vadd.f32 %v11798_v13, %v11786_v34  ;;  %v11803_v43 = vadd.f32 %v11798_v13, %v11787_v17  ;;  %v11793_v53 = vpop.permute.xlu1 %11792  ;;  %v18131_v33 = vld [vmem:[%s21267_s19 + $0xf8] ss:$8 sps:$4 sm:$0xff]   ;;  %v18134_v4 = vld [vmem:[%s21267_s19 + $0x108] ss:$8 sps:$4 sm:$0xff]   ;;  %v18139_v34 = vld [vmem:[%s21267_s19 + $0x11c] ss:$8 sps:$4 sm:$0xff]  }
0x1f41   :  { %v11800_v44 = vadd.f32 %v11793_v53, %v11784_v9  ;;  %v11801_v42 = vadd.f32 %v11793_v53, %v11785_v25  ;;  %v11844_v49 = vld [vmem:[%s21276_s23 + $0x20] sm:$0xff]  ;;  %v11845_v17 = vld [vmem:[%s21276_s23 + $0x28] sm:$0xff] }
0x1f42   :  { %v11810_v39 = vmul.f32 0.044715, %v11802_v16  ;;  %v11811_v38 = vmul.f32 0.044715, %v11803_v43  ;;  %v11806_v2 = vmul.f32 0.5, %v11802_v16  ;;  %v11807_v60 = vmul.f32 0.5, %v11803_v43 }
0x1f43   :  { %v11808_v51 = vmul.f32 0.044715, %v11800_v44  ;;  %v11809_v32 = vmul.f32 0.044715, %v11801_v42  ;;  %v11805_v54 = vmul.f32 0.5, %v11801_v42  ;;  %v11804_v52 = vmul.f32 0.5, %v11800_v44 }
0x1f44   :  { %v11814_v24 = vmul.f32 %v11810_v39, %v11802_v16  ;;  %v11815_v36 = vmul.f32 %v11811_v38, %v11803_v43  ;;  %v18137_v13 = vld [vmem:[%s21267_s19 + $0x118] ss:$8 sps:$4 sm:$0xff]   ;;  %v18142_v9 = vld [vmem:[%s21267_s19 + $0x12c] ss:$8 sps:$4 sm:$0xff]   ;;  %v18140_v25 = vld [vmem:[%s21267_s19 + $0x128] ss:$8 sps:$4 sm:$0xff]  }
0x1f45   :  { %v11812_v28 = vmul.f32 %v11808_v51, %v11800_v44  ;;  %v11813_v15 = vmul.f32 %v11809_v32, %v11801_v42  ;;  %v18143_v53 = vld [vmem:[%s21267_s19 + $0x138] ss:$8 sps:$4 sm:$0xff]   ;;  %v18146_v39 = vld [vmem:[%s21267_s19 + $0x148] ss:$8 sps:$4 sm:$0xff]   ;;  %v18151_v38 = vld [vmem:[%s21267_s19 + $0x15c] ss:$8 sps:$4 sm:$0xff]  }
0x1f46   :  { %v11818_v59 = vmul.f32 %v11814_v24, %v11802_v16  ;;  %v11819_v47 = vmul.f32 %v11815_v36, %v11803_v43  ;;  %v18149_v51 = vld [vmem:[%s21267_s19 + $0x158] ss:$8 sps:$4 sm:$0xff]   ;;  %v18154_v32 = vld [vmem:[%s21267_s19 + $0x16c] ss:$8 sps:$4 sm:$0xff]   ;;  %v18152_v24 = vld [vmem:[%s21267_s19 + $0x168] ss:$8 sps:$4 sm:$0xff]  }
0x1f47   :  { %v11816_v0 = vmul.f32 %v11812_v28, %v11800_v44  ;;  %v11817_v45 = vmul.f32 %v11813_v15, %v11801_v42  ;;  %v18157_v36 = vld [vmem:[%s21267_s19 + $0x17c] ss:$8 sps:$4 sm:$0xff]   ;;  %v18155_v28 = vld [vmem:[%s21267_s19 + $0x178] ss:$8 sps:$4 sm:$0xff]  }
0x1f48   :  { %v11822_v37 = vadd.f32 %v11818_v59, %v11802_v16  ;;  %v11823_v46 = vadd.f32 %v11819_v47, %v11803_v43  ;;  %v11846_v16 = vld [vmem:[%s21276_s23 + $0x30] sm:$0xff]  ;;  %v18145_v43 = vld [vmem:[%s21267_s19 + $0x13c] ss:$8 sps:$4 sm:$0xff]  }
0x1f49   :  { %v11820_v23 = vadd.f32 %v11816_v0, %v11800_v44  ;;  %v11821_v57 = vadd.f32 %v11817_v45, %v11801_v42  ;;  %v11847_v44 = vld [vmem:[%s21276_s23 + $0x38] sm:$0xff]  ;;  %v18148_v42 = vld [vmem:[%s21267_s19 + $0x14c] ss:$8 sps:$4 sm:$0xff]   ;;  %v11848_v47 = vld [vmem:[%s21276_s23 + $0x40] sm:$0xff] }
0x1f4a   :  { %v11826_v10 = vmul.f32 0.7978846, %v11822_v37  ;;  %v11827_v63 = vmul.f32 0.7978846, %v11823_v46  ;;  %v18162_v45 = vld [vmem:[%s21267_s19 + $0x4] ss:$8 sps:$4 sm:$0xff]  }
0x1f4b   :  { %v11825_v50 = vmul.f32 0.7978846, %v11821_v57  ;;  %v11824_v14 = vmul.f32 0.7978846, %v11820_v23  ;;  %v18203_v37 = vld [vmem:[%s21267_s19 + $0x25c] ss:$8 sps:$4 sm:$0xff]  }
0x1f4c   :  { %18530 = vtanh.f32 %v11826_v10  ;;  %v18201_v46 = vld [vmem:[%s21267_s19 + $0x258] ss:$8 sps:$4 sm:$0xff]   ;;  %12767 = vmatprep.subr.bf16.mxu1 %v18203_v37  ;;  %v18209_v23 = vld [vmem:[%s21267_s19 + $0x26c] ss:$8 sps:$4 sm:$0xff]   ;;  %v18207_v57 = vld [vmem:[%s21267_s19 + $0x268] ss:$8 sps:$4 sm:$0xff]  }
0x1f4d   :  { %18532 = vtanh.f32 %v11825_v50  ;;  %12768 = vmatpush1.bf16.msra.mxu1 %v18201_v46  ;;  %v18215_v10 = vld [vmem:[%s21267_s19 + $0x27c] ss:$8 sps:$4 sm:$0xff]   ;;  %v18221_v50 = vld [vmem:[%s21267_s19 + $0x28c] ss:$8 sps:$4 sm:$0xff]   ;;  %v18178_v46 = vld [vmem:[%s21267_s19 + $0x60] ss:$8 sps:$4 sm:$0xff]  }
0x1f4e   :  { %18534 = vtanh.f32 %v11827_v63  ;;  %12769 = vmatprep.subr.bf16.mxu1 %v18209_v23  ;;  %v18213_v63 = vld [vmem:[%s21267_s19 + $0x278] ss:$8 sps:$4 sm:$0xff]   ;;  %v18301_v23 = vld [vmem:[%s21267_s19 + $0x428] ss:$8 sps:$4 sm:$0xff]  }
0x1f4f   :  { %18536 = vtanh.f32 %v11824_v14  ;;  %v18219_v14 = vld [vmem:[%s21267_s19 + $0x288] ss:$8 sps:$4 sm:$0xff]  }
0x1f51   :  { %12770 = vmatpush1.bf16.msra.mxu1 %v18207_v57 }
0x1f52   :  { %12771 = vmatprep.subr.bf16.mxu1 %v18215_v10  ;;  %v18183_v10 = vld [vmem:[%s21267_s19 + $0x74] ss:$8 sps:$4 sm:$0xff]  }
0x1f55   :  { %12772 = vmatpush1.bf16.msra.mxu1 %v18213_v63  ;;  %v18309_v63 = vld [vmem:[%s21267_s19 + $0x43c] ss:$8 sps:$4 sm:$0xff]  }
0x1f56   :  { %v18531_v7 = vpop.eup %18530  ;;  %12773 = vmatprep.subr.bf16.mxu1 %v18221_v50 }
0x1f57   :  { %v18533_v40 = vpop.eup %18532  ;;  %v11834_v61 = vadd.f32 1.0, %v18531_v7  ;;  %v18227_v7 = vld [vmem:[%s21267_s19 + $0x29c] ss:$8 sps:$4 sm:$0xff]  }
0x1f58   :  { %v18535_v56 = vpop.eup %18534  ;;  %v11833_v19 = vadd.f32 1.0, %v18533_v40  ;;  %v18225_v40 = vld [vmem:[%s21267_s19 + $0x298] ss:$8 sps:$4 sm:$0xff]  }
0x1f59   :  { %v18537_v5 = vpop.eup %18536  ;;  %v11835_v26 = vadd.f32 1.0, %v18535_v56  ;;  %v11838_v22 = vmul.f32 %v11834_v61, %v11806_v2  ;;  %12774 = vmatpush1.bf16.msra.mxu1 %v18219_v14  ;;  %v18233_v61 = vld [vmem:[%s21267_s19 + $0x2ac] ss:$8 sps:$4 sm:$0xff]   ;;  %v18231_v56 = vld [vmem:[%s21267_s19 + $0x2a8] ss:$8 sps:$4 sm:$0xff]  }
0x1f5a   :  { %v11837_v6 = vmul.f32 %v11833_v19, %v11805_v54  ;;  %v11832_v30 = vadd.f32 1.0, %v18537_v5  ;;  %12775 = vmatprep.subr.bf16.mxu1 %v18227_v7  ;;  %v18239_v54 = vld [vmem:[%s21267_s19 + $0x2bc] ss:$8 sps:$4 sm:$0xff]   ;;  %v18237_v19 = vld [vmem:[%s21267_s19 + $0x2b8] ss:$8 sps:$4 sm:$0xff]  }
0x1f5b   :  { %v11839_v20 = vmul.f32 %v11835_v26, %v11807_v60  ;;  %v18245_v2 = vld [vmem:[%s21267_s19 + $0x2cc] ss:$8 sps:$4 sm:$0xff]   ;;  %v18243_v5 = vld [vmem:[%s21267_s19 + $0x2c8] ss:$8 sps:$4 sm:$0xff]   ;;  %v18251_v60 = vld [vmem:[%s21267_s19 + $0x2dc] ss:$8 sps:$4 sm:$0xff]  }
0x1f5c   :  { %v11836_v35 = vmul.f32 %v11832_v30, %v11804_v52  ;;  %v18249_v26 = vld [vmem:[%s21267_s19 + $0x2d8] ss:$8 sps:$4 sm:$0xff]   ;;  %v18255_v52 = vld [vmem:[%s21267_s19 + $0x2e8] ss:$8 sps:$4 sm:$0xff]   ;;  %v18263_v30 = vld [vmem:[%s21267_s19 + $0x2fc] ss:$8 sps:$4 sm:$0xff]  }
0x1f5d   :  { %v16987_v41 = vpack.c.bf16 %v11839_v20, %v11837_v6  ;;  %12776 = vmatpush1.bf16.msra.mxu1 %v18225_v40  ;;  %v18257_v6 = vld [vmem:[%s21267_s19 + $0x2ec] ss:$8 sps:$4 sm:$0xff]   ;;  %v18181_v14 = vld [vmem:[%s21267_s19 + $0x70] ss:$8 sps:$4 sm:$0xff]  }
0x1f5e   :  { %v16989_v48 = vpack.c.bf16 %v11838_v22, %v11836_v35  ;;  %12777 = vmatprep.subr.bf16.mxu1 %v18233_v61  ;;  %v18261_v22 = vld [vmem:[%s21267_s19 + $0x2f8] ss:$8 sps:$4 sm:$0xff]   ;;  %v18269_v20 = vld [vmem:[%s21267_s19 + $0x30c] ss:$8 sps:$4 sm:$0xff]   ;;  %v18267_v35 = vld [vmem:[%s21267_s19 + $0x308] ss:$8 sps:$4 sm:$0xff]  }
0x1f5f   :  { %16988 = vmatprep.subr.bf16.mxu0 %v16987_v41  ;;  %v15759_v41 = vld [vmem:[%s21267_s19 + $0x318] sm:$0x33]  ;;  %v18186_v40 = vld [vmem:[%s21267_s19 + $0x84] ss:$8 sps:$4 sm:$0xff]  }
0x1f60   :  { %16990 = vmatpush1.bf16.msra.mxu0 %v16989_v48  ;;  %v15784_v48 = vcombine.low %v15759_v41, %v15759_v41  ;;  %v18307_v7 = vld [vmem:[%s21267_s19 + $0x438] ss:$8 sps:$4 sm:$0xff]   ;;  %v18315_v61 = vld [vmem:[%s21267_s19 + $0x44c] ss:$8 sps:$4 sm:$0xff]  }
0x1f61   :  { %12184 = vmatprep.subr.bf16.mxu0 %v18124_v21  ;;  %12778 = vmatpush1.bf16.msra.mxu1 %v18231_v56  ;;  %v15785_v21 = vcombine.high %v15759_v41, %v15759_v41  ;;  %v18184_v56 = vld [vmem:[%s21267_s19 + $0x80] ss:$8 sps:$4 sm:$0xff]   ;;  %v18193_v41 = vld [vmem:[%s21267_s19 + $0xb0] ss:$8 sps:$4 sm:$0xff]  }
0x1f62   :  { %12779 = vmatprep.subr.bf16.mxu1 %v18239_v54  ;;  %v18313_v54 = vld [vmem:[%s21267_s19 + $0x448] ss:$8 sps:$4 sm:$0xff]  }
0x1f63   :  { %15592 = vmatmul.mubr.msk.f32.vlgmr.msra.gmra.mrb[148].mxu0 %vm2618_vm2, %v11840_v1  ;;  %v12762_v1 = vsel %vm3724_vm3, %v15784_v48, 0 }
0x1f64   :  { %11946 = vmatprep.mubr.f32.mxu0 %v21772_v55  ;;  %12185 = vmatpush1.bf16.msra.mxu0 %v18122_v12  ;;  %v18279_v12 = vld [vmem:[%s21267_s19 + $0x3ec] ss:$8 sps:$4 sm:$0xff]  }
0x1f65   :  { %12186 = vmatprep.subr.bf16.mxu0 %v18127_v29  ;;  %12780 = vmatpush1.bf16.msra.mxu1 %v18237_v19  ;;  %v18189_v19 = vld [vmem:[%s21267_s19 + $0x94] ss:$8 sps:$4 sm:$0xff]  }
0x1f66   :  { %12781 = vmatprep.subr.bf16.mxu1 %v18245_v2  ;;  %v18321_v2 = vld [vmem:[%s21267_s19 + $0x45c] ss:$8 sps:$4 sm:$0xff]  }
0x1f67   :  { %15593 = vmatmul.mubr.msk.f32.gmra.mrb[150].mxu0 %vm2618_vm2, %v11841_v62 }
0x1f68   :  { %11952 = vmatprep.mubr.f32.mxu0 %v21772_v55  ;;  %12187 = vmatpush1.bf16.msra.mxu0 %v18125_v31 }
0x1f69   :  { %12188 = vmatprep.subr.bf16.mxu0 %v18130_v58  ;;  %12782 = vmatpush1.bf16.msra.mxu1 %v18243_v5  ;;  %v18187_v5 = vld [vmem:[%s21267_s19 + $0x90] ss:$8 sps:$4 sm:$0xff]  }
0x1f6a   :  { %12783 = vmatprep.subr.bf16.mxu1 %v18251_v60  ;;  %v18319_v60 = vld [vmem:[%s21267_s19 + $0x458] ss:$8 sps:$4 sm:$0xff]  }
0x1f6b   :  { %15594 = vmatmul.mubr.msk.f32.gmra.mrb[152].mxu0 %vm2618_vm2, %v11842_v11 }
0x1f6c   :  { %11958 = vmatprep.mubr.f32.mxu0 %v21772_v55  ;;  %12189 = vmatpush1.bf16.msra.mxu0 %v18128_v8  ;;  %v18160_v8 = vld [vmem:[%s21267_s19] ss:$8 sps:$4 sm:$0xff]  }
0x1f6d   :  { %12190 = vmatprep.subr.bf16.mxu0 %v18133_v18  ;;  %12784 = vmatpush1.bf16.msra.mxu1 %v18249_v26  ;;  %v18192_v26 = vld [vmem:[%s21267_s19 + $0xa4] ss:$8 sps:$4 sm:$0xff]  }
0x1f6e   :  { %12785 = vmatprep.subr.bf16.mxu1 %v18257_v6  ;;  %v18327_v6 = vld [vmem:[%s21267_s19 + $0x46c] ss:$8 sps:$4 sm:$0xff]  }
0x1f6f   :  { %15595 = vmatmul.mubr.msk.f32.gmra.mrb[154].mxu0 %vm2618_vm2, %v11843_v3  ;;  %v18165_v3 = vld [vmem:[%s21267_s19 + $0x14] ss:$8 sps:$4 sm:$0xff]  }
0x1f70   :  { %11964 = vmatprep.mubr.f32.mxu0 %v21772_v55  ;;  %12191 = vmatpush1.bf16.msra.mxu0 %v18131_v33 }
0x1f71   :  { %12192 = vmatprep.subr.bf16.mxu0 %v18136_v27  ;;  %12786 = vmatpush1.bf16.msra.mxu1 %v18255_v52  ;;  %v18190_v52 = vld [vmem:[%s21267_s19 + $0xa0] ss:$8 sps:$4 sm:$0xff]  }
0x1f72   :  { %12787 = vmatprep.subr.bf16.mxu1 %v18263_v30  ;;  %v18325_v30 = vld [vmem:[%s21267_s19 + $0x468] ss:$8 sps:$4 sm:$0xff]  }
0x1f73   :  { %15596 = vmatmul.mubr.msk.f32.gmra.mrb[156].mxu0 %vm2618_vm2, %v11844_v49 }
0x1f74   :  { %11970 = vmatprep.mubr.f32.mxu0 %v21772_v55  ;;  %12193 = vmatpush1.bf16.msra.mxu0 %v18134_v4  ;;  %v18163_v4 = vld [vmem:[%s21267_s19 + $0x10] ss:$8 sps:$4 sm:$0xff]  }
0x1f75   :  { %12194 = vmatprep.subr.bf16.mxu0 %v18139_v34  ;;  %12788 = vmatpush1.bf16.msra.mxu1 %v18261_v22  ;;  %v18168_v34 = vld [vmem:[%s21267_s19 + $0x24] ss:$8 sps:$4 sm:$0xff]   ;;  %v18195_v22 = vld [vmem:[%s21267_s19 + $0xb4] ss:$8 sps:$4 sm:$0xff]  }
0x1f76   :  { %12789 = vmatprep.subr.bf16.mxu1 %v18269_v20  ;;  %v18333_v20 = vld [vmem:[%s21267_s19 + $0x47c] ss:$8 sps:$4 sm:$0xff]  }
0x1f77   :  { %15597 = vmatmul.mubr.msk.f32.gmra.mrb[158].mxu0 %vm2618_vm2, %v11845_v17 }
0x1f78   :  { %12195 = vmatpush1.bf16.msra.mxu0 %v18137_v13  ;;  %11976 = vmatprep.mubr.f32.mxu0 %v21772_v55 }
0x1f79   :  { %12196 = vmatprep.subr.bf16.mxu0 %v18142_v9  ;;  %12790 = vmatpush1.bf16.msra.mxu1 %v18267_v35  ;;  %v12021_v35 = vld [vmem:[%s21267_s19 + $0xc0] sm:$0x33] }
0x1f7a   :  { %15786 = vmatprep.subr.msk.bf16.mxu1 %vm3724_vm3, %v15785_v21  ;;  %v18331_v21 = vld [vmem:[%s21267_s19 + $0x478] ss:$8 sps:$4 sm:$0xff]   ;;  %v15679_v48 = vcombine.high %v12021_v35, %v12021_v35 }
0x1f7b   :  { %15598 = vmatmul.mubr.msk.f32.gmra.mrb[160].mxu0 %vm2618_vm2, %v11846_v16 }
0x1f7c   :  { %12197 = vmatpush1.bf16.msra.mxu0 %v18140_v25  ;;  %11982 = vmatprep.mubr.f32.mxu0 %v21772_v55  ;;  %v18166_v25 = vld [vmem:[%s21267_s19 + $0x20] ss:$8 sps:$4 sm:$0xff]  }
0x1f7d   :  { %12198 = vmatprep.subr.bf16.mxu0 %v18145_v43  ;;  %12792 = vmatpush1.bf16.msra.mxu1 %v12762_v1  ;;  %v18277_v43 = vld [vmem:[%s21267_s19 + $0x3e8] ss:$8 sps:$4 sm:$0xff]   ;;  %v15678_v1 = vcombine.low %v12021_v35, %v12021_v35  ;;  %v18403_v35 = vld [vmem:[%s21267_s19 + $0x5fc] ss:$8 sps:$4 sm:$0xff]  }
0x1f7e   :  { %13177 = vmatprep.subr.bf16.mxu1 %v18279_v12  ;;  %v18339_v12 = vld [vmem:[%s21267_s19 + $0x48c] ss:$8 sps:$4 sm:$0xff]  }
0x1f7f   :  { %15599 = vmatmul.mubr.msk.f32.gmra.mrb[162].mxu0 %vm2618_vm2, %v11847_v44  ;;  %v18285_v44 = vld [vmem:[%s21267_s19 + $0x3fc] ss:$8 sps:$4 sm:$0xff]  }
0x1f80   :  { %12199 = vmatpush1.bf16.msra.mxu0 %v18143_v53  ;;  %11988 = vmatprep.mubr.f32.mxu0 %v21772_v55  ;;  %v15625_v55 = vld [vmem:[%s21267_s19 + $0x188] sm:$0x33]  ;;  %v18171_v53 = vld [vmem:[%s21267_s19 + $0x34] ss:$8 sps:$4 sm:$0xff]  }
0x1f81   :  { %12200 = vmatprep.subr.bf16.mxu0 %v18148_v42  ;;  %v15651_v15 = vcombine.high %v15625_v55, %v15625_v55  ;;  %v15650_v59 = vcombine.low %v15625_v55, %v15625_v55  ;;  %v18169_v42 = vld [vmem:[%s21267_s19 + $0x30] ss:$8 sps:$4 sm:$0xff]  }
0x1f82   :  { %v18175_v55 = vld [vmem:[%s21267_s19 + $0x50] ss:$8 sps:$4 sm:$0xff]  }
0x1f83   :  { %15600 = vmatmul.mubr.msk.f32.gmra.mrb[164].mxu0 %vm2618_vm2, %v11848_v47  ;;  %v12179_v0 = vsel %vm3724_vm3, %v15650_v59, 0  ;;  %v18180_v59 = vld [vmem:[%s21267_s19 + $0x64] ss:$8 sps:$4 sm:$0xff]  }
0x1f84   :  { %12201 = vmatpush1.bf16.msra.mxu0 %v18146_v39  ;;  %v18283_v39 = vld [vmem:[%s21267_s19 + $0x3f8] ss:$8 sps:$4 sm:$0xff]   ;;  %v18303_v47 = vld [vmem:[%s21267_s19 + $0x42c] ss:$8 sps:$4 sm:$0xff]  }
0x1f85   :  { %12202 = vmatprep.subr.bf16.mxu0 %v18151_v38  ;;  %v18174_v38 = vld [vmem:[%s21267_s19 + $0x44] ss:$8 sps:$4 sm:$0xff]  }
0x1f88   :  { %12203 = vmatpush1.bf16.msra.mxu0 %v18149_v51  ;;  %v18291_v51 = vld [vmem:[%s21267_s19 + $0x40c] ss:$8 sps:$4 sm:$0xff]  }
0x1f89   :  { %12204 = vmatprep.subr.bf16.mxu0 %v18154_v32  ;;  %v18172_v32 = vld [vmem:[%s21267_s19 + $0x40] ss:$8 sps:$4 sm:$0xff]  }
0x1f8c   :  { %12205 = vmatpush1.bf16.msra.mxu0 %v18152_v24  ;;  %v18289_v24 = vld [vmem:[%s21267_s19 + $0x408] ss:$8 sps:$4 sm:$0xff]  }
0x1f8d   :  { %12206 = vmatprep.subr.bf16.mxu0 %v18157_v36  ;;  %v18177_v36 = vld [vmem:[%s21267_s19 + $0x54] ss:$8 sps:$4 sm:$0xff]  }
0x1f90   :  { %12207 = vmatpush1.bf16.msra.mxu0 %v18155_v28  ;;  %v18297_v28 = vld [vmem:[%s21267_s19 + $0x41c] ss:$8 sps:$4 sm:$0xff]  }
0x1f91   :  { %15652 = vmatprep.subr.msk.bf16.mxu0 %vm3724_vm3, %v15651_v15  ;;  %v18295_v15 = vld [vmem:[%s21267_s19 + $0x418] ss:$8 sps:$4 sm:$0xff]  }
0x1f94   :  { %12209 = vmatpush1.bf16.msra.mxu0 %v12179_v0 }
0x1f95   :  { %12359 = vmatprep.subr.bf16.mxu0 %v18162_v45 }
0x2036   :  { %v21360_v29 = vpop.f32.mrb[148].mxu0 }
0x2037   :  { %v11944_v62 = vpop.f32.mrb[149].mxu0 }
0x2038   :  { %v11996_v33 = vpack.c.bf16 %v11944_v62, %v11944_v62  ;;  %v18337_v62 = vld [vmem:[%s21267_s19 + $0x488] ss:$8 sps:$4 sm:$0xff]  }
0x203a   :  { %v11948_v31 = vpop.f32.mrb[150].mxu0 }
0x203b   :  { %v11950_v58 = vpop.f32.mrb[151].mxu0  ;;  %v12022_v18 = vpack.c.bf16 %v11948_v31, %v11948_v31  ;;  %v12354_v31 = vsel %vm3724_vm3, %v15678_v1, 0  ;;  %v15706_v1 = vld [vmem:[%s21267_s19 + $0x250] sm:$0x33] }
0x203c   :  { %v12023_v11 = vpack.c.bf16 %v11950_v58, %v11950_v58  ;;  %v18200_v58 = vld [vmem:[%s21267_s19 + $0x194] ss:$8 sps:$4 sm:$0xff]  }
0x203e   :  { %15653 = vmatprep.mubr.msk.bf16.mxu0 %vm2595_vm1, %v12023_v11  ;;  %v21365_v27 = vpop.f32.mrb[152].mxu0  ;;  %v18345_v11 = vld [vmem:[%s21267_s19 + $0x49c] ss:$8 sps:$4 sm:$0xff]  }
0x203f   :  { %12217 = vmatmul.mubr.bf16.vlgmr.msra.gmra.mrb[168].mxu0 %v12022_v18  ;;  %v21367_v49 = vpop.f32.mrb[153].mxu0  ;;  %v18198_v18 = vld [vmem:[%s21267_s19 + $0x190] ss:$8 sps:$4 sm:$0xff]  }
0x2040   :  { %12360 = vmatpush1.bf16.msra.mxu0 %v18160_v8  ;;  %15681 = vmatprep.mubr.msk.bf16.mxu0 %vm2595_vm1, %v11996_v33  ;;  %v15865_v8 = vld [vmem:[%s21267_s19 + $0x4a8] sm:$0x33]  ;;  %v11995_v33 = vpack.c.bf16 %v21360_v29, %v21360_v29 }
0x2041   :  { %12361 = vmatprep.subr.bf16.mxu0 %v18165_v3  ;;  %v12401_v3 = vpack.c.bf16 %v21367_v49, %v21367_v49  ;;  %v18212_v49 = vld [vmem:[%s21267_s19 + $0x1b4] ss:$8 sps:$4 sm:$0xff]  }
0x2042   :  { %v11960_v17 = vpop.f32.mrb[154].mxu0 }
0x2043   :  { %v12605_v13 = vpack.c.bf16 %v11960_v17, %v11960_v17  ;;  %v11962_v9 = vpop.f32.mrb[155].mxu0  ;;  %v15891_v17 = vcombine.high %v15865_v8, %v15865_v8 }
0x2044   :  { %12362 = vmatpush1.bf16.msra.mxu0 %v18163_v4  ;;  %v12606_v16 = vpack.c.bf16 %v11962_v9, %v11962_v9  ;;  %v18206_v4 = vld [vmem:[%s21267_s19 + $0x1a4] ss:$8 sps:$4 sm:$0xff]   ;;  %v18204_v9 = vld [vmem:[%s21267_s19 + $0x1a0] ss:$8 sps:$4 sm:$0xff]  }
0x2045   :  { %12363 = vmatprep.subr.bf16.mxu0 %v18168_v34  ;;  %v18343_v34 = vld [vmem:[%s21267_s19 + $0x498] ss:$8 sps:$4 sm:$0xff]  }
0x2046   :  { %15787 = vmatprep.mubr.msk.bf16.mxu1 %vm2595_vm1, %v12606_v16  ;;  %v21389_v0 = vpop.f32.mrb[156].mxu0  ;;  %v18210_v16 = vld [vmem:[%s21267_s19 + $0x1b0] ss:$8 sps:$4 sm:$0xff]  }
0x2047   :  { %12800 = vmatmul.mubr.bf16.vlgmr.msra.gmra.mrb[172].mxu1 %v12605_v13  ;;  %v21391_v45 = vpop.f32.mrb[157].mxu0  ;;  %v15890_v13 = vcombine.low %v15865_v8, %v15865_v8  ;;  %v18415_v8 = vld [vmem:[%s21267_s19 + $0x61c] ss:$8 sps:$4 sm:$0xff]  }
0x2048   :  { %12364 = vmatpush1.bf16.msra.mxu0 %v18166_v25  ;;  %13178 = vmatpush1.bf16.msra.mxu1 %v18277_v43  ;;  %v18355_v25 = vld [vmem:[%s21267_s19 + $0x57c] ss:$8 sps:$4 sm:$0xff]  }
0x2049   :  { %12365 = vmatprep.subr.bf16.mxu0 %v18171_v53  ;;  %13179 = vmatprep.subr.bf16.mxu1 %v18285_v44  ;;  %v13172_v29 = vsel %vm3724_vm3, %v15890_v13, 0  ;;  %v18218_v53 = vld [vmem:[%s21267_s19 + $0x1c4] ss:$8 sps:$4 sm:$0xff]   ;;  %v18353_v44 = vld [vmem:[%s21267_s19 + $0x578] ss:$8 sps:$4 sm:$0xff]  }
0x204a   :  { %v21393_v37 = vpop.f32.mrb[158].mxu0  ;;  %v18274_v13 = vld [vmem:[%s21267_s19 + $0x320] ss:$8 sps:$4 sm:$0xff]  }
0x204b   :  { %v11974_v57 = vpop.f32.mrb[159].mxu0  ;;  %v13015_v43 = vpack.c.bf16 %v21393_v37, %v21393_v37  ;;  %v18371_v37 = vld [vmem:[%s21267_s19 + $0x5a8] ss:$8 sps:$4 sm:$0xff]  }
0x204c   :  { %12366 = vmatpush1.bf16.msra.mxu0 %v18169_v42  ;;  %13180 = vmatpush1.bf16.msra.mxu1 %v18283_v39  ;;  %v13016_v50 = vpack.c.bf16 %v11974_v57, %v11974_v57  ;;  %v18361_v42 = vld [vmem:[%s21267_s19 + $0x58c] ss:$8 sps:$4 sm:$0xff]   ;;  %v18216_v39 = vld [vmem:[%s21267_s19 + $0x1c0] ss:$8 sps:$4 sm:$0xff]  }
0x204d   :  { %12367 = vmatprep.subr.bf16.mxu0 %v18174_v38  ;;  %13181 = vmatprep.subr.bf16.mxu1 %v18291_v51  ;;  %v18224_v38 = vld [vmem:[%s21267_s19 + $0x1d4] ss:$8 sps:$4 sm:$0xff]   ;;  %v18359_v51 = vld [vmem:[%s21267_s19 + $0x588] ss:$8 sps:$4 sm:$0xff]  }
0x204e   :  { %15893 = vmatprep.mubr.msk.bf16.mxu1 %vm2595_vm1, %v13016_v50 }
0x2050   :  { %12368 = vmatpush1.bf16.msra.mxu0 %v18172_v32  ;;  %13182 = vmatpush1.bf16.msra.mxu1 %v18289_v24  ;;  %v18367_v32 = vld [vmem:[%s21267_s19 + $0x59c] ss:$8 sps:$4 sm:$0xff]   ;;  %v18222_v24 = vld [vmem:[%s21267_s19 + $0x1d0] ss:$8 sps:$4 sm:$0xff]  }
0x2051   :  { %12369 = vmatprep.subr.bf16.mxu0 %v18177_v36  ;;  %13183 = vmatprep.subr.bf16.mxu1 %v18297_v28  ;;  %v18230_v36 = vld [vmem:[%s21267_s19 + $0x1e4] ss:$8 sps:$4 sm:$0xff]   ;;  %v18365_v28 = vld [vmem:[%s21267_s19 + $0x598] ss:$8 sps:$4 sm:$0xff]  }
0x2054   :  { %12370 = vmatpush1.bf16.msra.mxu0 %v18175_v55  ;;  %13184 = vmatpush1.bf16.msra.mxu1 %v18295_v15  ;;  %v18373_v55 = vld [vmem:[%s21267_s19 + $0x5ac] ss:$8 sps:$4 sm:$0xff]   ;;  %v18228_v15 = vld [vmem:[%s21267_s19 + $0x1e0] ss:$8 sps:$4 sm:$0xff]  }
0x2055   :  { %12371 = vmatprep.subr.bf16.mxu0 %v18180_v59  ;;  %13185 = vmatprep.subr.bf16.mxu1 %v18303_v47  ;;  %v21454_v59 = vpop.f32.mrb[160].mxu0  ;;  %v18236_v47 = vld [vmem:[%s21267_s19 + $0x1f4] ss:$8 sps:$4 sm:$0xff]  }
0x2058   :  { %12372 = vmatpush1.bf16.msra.mxu0 %v18178_v46  ;;  %13186 = vmatpush1.bf16.msra.mxu1 %v18301_v23  ;;  %v21458_v46 = vpop.f32.mrb[161].mxu0  ;;  %v18379_v23 = vld [vmem:[%s21267_s19 + $0x5bc] ss:$8 sps:$4 sm:$0xff]  }
0x2059   :  { %12373 = vmatprep.subr.bf16.mxu0 %v18183_v10  ;;  %13187 = vmatprep.subr.bf16.mxu1 %v18309_v63  ;;  %v21461_v57 = vpop.f32.mrb[162].mxu0  ;;  %v18234_v63 = vld [vmem:[%s21267_s19 + $0x1f0] ss:$8 sps:$4 sm:$0xff]  }
0x205a   :  { %v11986_v10 = vpop.f32.mrb[163].mxu0 }
0x205b   :  { %v13426_v50 = vpack.c.bf16 %v11986_v10, %v11986_v10  ;;  %v18336_v10 = vld [vmem:[%s21267_s19 + $0x3c4] ss:$8 sps:$4 sm:$0xff]  }
0x205c   :  { %12374 = vmatpush1.bf16.msra.mxu0 %v18181_v14  ;;  %13188 = vmatpush1.bf16.msra.mxu1 %v18307_v7  ;;  %v18242_v14 = vld [vmem:[%s21267_s19 + $0x204] ss:$8 sps:$4 sm:$0xff]   ;;  %v18377_v7 = vld [vmem:[%s21267_s19 + $0x5b8] ss:$8 sps:$4 sm:$0xff]  }
0x205d   :  { %12375 = vmatprep.subr.bf16.mxu0 %v18186_v40  ;;  %13189 = vmatprep.subr.bf16.mxu1 %v18315_v61  ;;  %v18385_v40 = vld [vmem:[%s21267_s19 + $0x5cc] ss:$8 sps:$4 sm:$0xff]   ;;  %v18240_v61 = vld [vmem:[%s21267_s19 + $0x200] ss:$8 sps:$4 sm:$0xff]  }
0x2060   :  { %12376 = vmatpush1.bf16.msra.mxu0 %v18184_v56  ;;  %13190 = vmatpush1.bf16.msra.mxu1 %v18313_v54  ;;  %v18248_v56 = vld [vmem:[%s21267_s19 + $0x214] ss:$8 sps:$4 sm:$0xff]   ;;  %v18383_v54 = vld [vmem:[%s21267_s19 + $0x5c8] ss:$8 sps:$4 sm:$0xff]  }
0x2061   :  { %12377 = vmatprep.subr.bf16.mxu0 %v18189_v19  ;;  %13191 = vmatprep.subr.bf16.mxu1 %v18321_v2  ;;  %v18391_v19 = vld [vmem:[%s21267_s19 + $0x5dc] ss:$8 sps:$4 sm:$0xff]   ;;  %v21472_v2 = vpop.f32.mrb[164].mxu0 }
0x2064   :  { %12378 = vmatpush1.bf16.msra.mxu0 %v18187_v5  ;;  %13192 = vmatpush1.bf16.msra.mxu1 %v18319_v60  ;;  %v21474_v5 = vpop.f32.mrb[165].mxu0  ;;  %v18246_v60 = vld [vmem:[%s21267_s19 + $0x210] ss:$8 sps:$4 sm:$0xff]  }
0x2065   :  { %12379 = vmatprep.subr.bf16.mxu0 %v18192_v26  ;;  %13193 = vmatprep.subr.bf16.mxu1 %v18327_v6  ;;  %v18254_v26 = vld [vmem:[%s21267_s19 + $0x224] ss:$8 sps:$4 sm:$0xff]   ;;  %v18389_v6 = vld [vmem:[%s21267_s19 + $0x5d8] ss:$8 sps:$4 sm:$0xff]  }
0x2068   :  { %12380 = vmatpush1.bf16.msra.mxu0 %v18190_v52  ;;  %13194 = vmatpush1.bf16.msra.mxu1 %v18325_v30  ;;  %v18397_v52 = vld [vmem:[%s21267_s19 + $0x5ec] ss:$8 sps:$4 sm:$0xff]   ;;  %v18252_v30 = vld [vmem:[%s21267_s19 + $0x220] ss:$8 sps:$4 sm:$0xff]  }
0x2069   :  { %12381 = vmatprep.subr.bf16.mxu0 %v18195_v22  ;;  %13195 = vmatprep.subr.bf16.mxu1 %v18333_v20  ;;  %v18260_v22 = vld [vmem:[%s21267_s19 + $0x234] ss:$8 sps:$4 sm:$0xff]   ;;  %v18395_v20 = vld [vmem:[%s21267_s19 + $0x5e8] ss:$8 sps:$4 sm:$0xff]  }
0x206c   :  { %12382 = vmatpush1.bf16.msra.mxu0 %v18193_v41  ;;  %13196 = vmatpush1.bf16.msra.mxu1 %v18331_v21  ;;  %v18258_v41 = vld [vmem:[%s21267_s19 + $0x230] ss:$8 sps:$4 sm:$0xff]   ;;  %v18266_v21 = vld [vmem:[%s21267_s19 + $0x244] ss:$8 sps:$4 sm:$0xff]  }
0x206d   :  { %15680 = vmatprep.subr.msk.bf16.mxu0 %vm3724_vm3, %v15679_v48  ;;  %13197 = vmatprep.subr.bf16.mxu1 %v18339_v12  ;;  %v18401_v48 = vld [vmem:[%s21267_s19 + $0x5f8] ss:$8 sps:$4 sm:$0xff]   ;;  %v18409_v12 = vld [vmem:[%s21267_s19 + $0x60c] ss:$8 sps:$4 sm:$0xff]  }
0x2070   :  { %12384 = vmatpush1.bf16.msra.mxu0 %v12354_v31  ;;  %13198 = vmatpush1.bf16.msra.mxu1 %v18337_v62  ;;  %v18264_v62 = vld [vmem:[%s21267_s19 + $0x240] ss:$8 sps:$4 sm:$0xff]   ;;  %v15732_v31 = vcombine.high %v15706_v1, %v15706_v1 }
0x2071   :  { %12562 = vmatprep.subr.bf16.mxu0 %v18200_v58  ;;  %13199 = vmatprep.subr.bf16.mxu1 %v18345_v11  ;;  %v15731_v58 = vcombine.low %v15706_v1, %v15706_v1  ;;  %v18407_v11 = vld [vmem:[%s21267_s19 + $0x608] ss:$8 sps:$4 sm:$0xff]  }
0x2072   :  { %v18386_v1 = vld [vmem:[%s21267_s19 + $0x510] ss:$8 sps:$4 sm:$0xff]  }
0x2073   :  { %12392 = vmatmul.mubr.bf16.vlgmr.msra.gmra.mrb[172].mxu0 %v11995_v33  ;;  %v18413_v33 = vld [vmem:[%s21267_s19 + $0x618] ss:$8 sps:$4 sm:$0xff]  }
0x2074   :  { %12563 = vmatpush1.bf16.msra.mxu0 %v18198_v18  ;;  %15734 = vmatprep.mubr.msk.bf16.mxu0 %vm2595_vm1, %v12401_v3  ;;  %v12557_v18 = vsel %vm3724_vm3, %v15731_v58, 0  ;;  %v18276_v3 = vld [vmem:[%s21267_s19 + $0x324] ss:$8 sps:$4 sm:$0xff]   ;;  %v18398_v58 = vld [vmem:[%s21267_s19 + $0x530] ss:$8 sps:$4 sm:$0xff]  }
0x2075   :  { %12564 = vmatprep.subr.bf16.mxu0 %v18206_v4  ;;  %13200 = vmatpush1.bf16.msra.mxu1 %v18343_v34  ;;  %v18421_v4 = vld [vmem:[%s21267_s19 + $0x62c] ss:$8 sps:$4 sm:$0xff]   ;;  %v12400_v34 = vpack.c.bf16 %v21365_v27, %v21365_v27  ;;  %v18280_v27 = vld [vmem:[%s21267_s19 + $0x330] ss:$8 sps:$4 sm:$0xff]  }
0x2076   :  { %15892 = vmatprep.subr.msk.bf16.mxu1 %vm3724_vm3, %v15891_v17  ;;  %v15971_v17 = vld [vmem:[%s21267_s19 + $0x638] sm:$0x33] }
0x2078   :  { %12565 = vmatpush1.bf16.msra.mxu0 %v18204_v9  ;;  %v12811_v9 = vpack.c.bf16 %v21391_v45, %v21391_v45 }
0x2079   :  { %12566 = vmatprep.subr.bf16.mxu0 %v18212_v49  ;;  %13202 = vmatpush1.bf16.msra.mxu1 %v13172_v29  ;;  %v18282_v49 = vld [vmem:[%s21267_s19 + $0x334] ss:$8 sps:$4 sm:$0xff]   ;;  %v18419_v29 = vld [vmem:[%s21267_s19 + $0x628] ss:$8 sps:$4 sm:$0xff]  }
0x207a   :  { %13587 = vmatprep.subr.bf16.mxu1 %v18355_v25  ;;  %v15997_v25 = vcombine.high %v15971_v17, %v15971_v17 }
0x207c   :  { %12567 = vmatpush1.bf16.msra.mxu0 %v18210_v16  ;;  %13210 = vmatmul.mubr.bf16.vlgmr.msra.gmra.mrb[176].mxu1 %v13015_v43  ;;  %v15996_v16 = vcombine.low %v15971_v17, %v15971_v17  ;;  %v18288_v43 = vld [vmem:[%s21267_s19 + $0x344] ss:$8 sps:$4 sm:$0xff]  }
0x207d   :  { %12568 = vmatprep.subr.bf16.mxu0 %v18218_v53  ;;  %13588 = vmatpush1.bf16.msra.mxu1 %v18353_v44  ;;  %v18286_v53 = vld [vmem:[%s21267_s19 + $0x340] ss:$8 sps:$4 sm:$0xff]   ;;  %v13425_v44 = vpack.c.bf16 %v21461_v57, %v21461_v57  ;;  %v18328_v57 = vld [vmem:[%s21267_s19 + $0x3b0] ss:$8 sps:$4 sm:$0xff]  }
0x207e   :  { %13589 = vmatprep.subr.bf16.mxu1 %v18361_v42  ;;  %15999 = vmatprep.mubr.msk.bf16.mxu1 %vm2595_vm1, %v13426_v50  ;;  %v13582_v45 = vsel %vm3724_vm3, %v15996_v16, 0  ;;  %v18294_v42 = vld [vmem:[%s21267_s19 + $0x354] ss:$8 sps:$4 sm:$0xff]   ;;  %v13220_v16 = vpack.c.bf16 %v21454_v59, %v21454_v59 }
0x207f   :  { %v18342_v50 = vld [vmem:[%s21267_s19 + $0x3d4] ss:$8 sps:$4 sm:$0xff]  }
0x2080   :  { %12569 = vmatpush1.bf16.msra.mxu0 %v18216_v39  ;;  %v18292_v39 = vld [vmem:[%s21267_s19 + $0x350] ss:$8 sps:$4 sm:$0xff]  }
0x2081   :  { %12570 = vmatprep.subr.bf16.mxu0 %v18224_v38  ;;  %13590 = vmatpush1.bf16.msra.mxu1 %v18359_v51  ;;  %v18300_v38 = vld [vmem:[%s21267_s19 + $0x364] ss:$8 sps:$4 sm:$0xff]   ;;  %v18298_v51 = vld [vmem:[%s21267_s19 + $0x360] ss:$8 sps:$4 sm:$0xff]  }
0x2082   :  { %13591 = vmatprep.subr.bf16.mxu1 %v18367_v32  ;;  %v18306_v32 = vld [vmem:[%s21267_s19 + $0x374] ss:$8 sps:$4 sm:$0xff]  }
0x2084   :  { %12571 = vmatpush1.bf16.msra.mxu0 %v18222_v24  ;;  %v18304_v24 = vld [vmem:[%s21267_s19 + $0x370] ss:$8 sps:$4 sm:$0xff]  }
0x2085   :  { %12572 = vmatprep.subr.bf16.mxu0 %v18230_v36  ;;  %13592 = vmatpush1.bf16.msra.mxu1 %v18365_v28  ;;  %v18312_v36 = vld [vmem:[%s21267_s19 + $0x384] ss:$8 sps:$4 sm:$0xff]   ;;  %v18310_v28 = vld [vmem:[%s21267_s19 + $0x380] ss:$8 sps:$4 sm:$0xff]  }
0x2086   :  { %13593 = vmatprep.subr.bf16.mxu1 %v18373_v55  ;;  %v18318_v55 = vld [vmem:[%s21267_s19 + $0x394] ss:$8 sps:$4 sm:$0xff]  }
0x2088   :  { %12573 = vmatpush1.bf16.msra.mxu0 %v18228_v15  ;;  %v18316_v15 = vld [vmem:[%s21267_s19 + $0x390] ss:$8 sps:$4 sm:$0xff]  }
0x2089   :  { %12574 = vmatprep.subr.bf16.mxu0 %v18236_v47  ;;  %13594 = vmatpush1.bf16.msra.mxu1 %v18371_v37  ;;  %v18324_v47 = vld [vmem:[%s21267_s19 + $0x3a4] ss:$8 sps:$4 sm:$0xff]   ;;  %v18322_v37 = vld [vmem:[%s21267_s19 + $0x3a0] ss:$8 sps:$4 sm:$0xff]  }
0x208a   :  { %13595 = vmatprep.subr.bf16.mxu1 %v18379_v23  ;;  %v18330_v23 = vld [vmem:[%s21267_s19 + $0x3b4] ss:$8 sps:$4 sm:$0xff]  }
0x208c   :  { %12575 = vmatpush1.bf16.msra.mxu0 %v18234_v63  ;;  %v18334_v63 = vld [vmem:[%s21267_s19 + $0x3c0] ss:$8 sps:$4 sm:$0xff]  }
0x208d   :  { %12576 = vmatprep.subr.bf16.mxu0 %v18242_v14  ;;  %13596 = vmatpush1.bf16.msra.mxu1 %v18377_v7  ;;  %v15812_v14 = vld [vmem:[%s21267_s19 + $0x3e0] sm:$0x33]  ;;  %v18340_v7 = vld [vmem:[%s21267_s19 + $0x3d0] ss:$8 sps:$4 sm:$0xff]  }
0x208e   :  { %13597 = vmatprep.subr.bf16.mxu1 %v18385_v40  ;;  %v15838_v40 = vcombine.high %v15812_v14, %v15812_v14 }
0x2090   :  { %12577 = vmatpush1.bf16.msra.mxu0 %v18240_v61  ;;  %v15837_v61 = vcombine.low %v15812_v14, %v15812_v14  ;;  %v18455_v14 = vld [vmem:[%s21267_s19 + $0x6d4] ss:$8 sps:$4 sm:$0xff]  }
0x2091   :  { %12578 = vmatprep.subr.bf16.mxu0 %v18248_v56  ;;  %13598 = vmatpush1.bf16.msra.mxu1 %v18383_v54  ;;  %v18352_v54 = vld [vmem:[%s21267_s19 + $0x4b4] ss:$8 sps:$4 sm:$0xff]  }
0x2092   :  { %13599 = vmatprep.subr.bf16.mxu1 %v18391_v19  ;;  %v12967_v56 = vsel %vm3724_vm3, %v15837_v61, 0  ;;  %v12810_v19 = vpack.c.bf16 %v21389_v0, %v21389_v0  ;;  %v18362_v0 = vld [vmem:[%s21267_s19 + $0x4d0] ss:$8 sps:$4 sm:$0xff]   ;;  %v18456_v61 = vld [vmem:[%s21267_s19 + $0x6e0] ss:$8 sps:$4 sm:$0xff]  }
0x2094   :  { %12579 = vmatpush1.bf16.msra.mxu0 %v18246_v60  ;;  %v18350_v60 = vld [vmem:[%s21267_s19 + $0x4b0] ss:$8 sps:$4 sm:$0xff]  }
0x2095   :  { %12580 = vmatprep.subr.bf16.mxu0 %v18254_v26  ;;  %13600 = vmatpush1.bf16.msra.mxu1 %v18389_v6  ;;  %v13221_v26 = vpack.c.bf16 %v21458_v46, %v21458_v46  ;;  %v18358_v6 = vld [vmem:[%s21267_s19 + $0x4c4] ss:$8 sps:$4 sm:$0xff]   ;;  %v18368_v46 = vld [vmem:[%s21267_s19 + $0x4e0] ss:$8 sps:$4 sm:$0xff]  }
0x2096   :  { %13601 = vmatprep.subr.bf16.mxu1 %v18397_v52  ;;  %v18356_v52 = vld [vmem:[%s21267_s19 + $0x4c0] ss:$8 sps:$4 sm:$0xff]  }
0x2098   :  { %12581 = vmatpush1.bf16.msra.mxu0 %v18252_v30  ;;  %v18364_v30 = vld [vmem:[%s21267_s19 + $0x4d4] ss:$8 sps:$4 sm:$0xff]  }
0x2099   :  { %12582 = vmatprep.subr.bf16.mxu0 %v18260_v22  ;;  %13602 = vmatpush1.bf16.msra.mxu1 %v18395_v20  ;;  %v18370_v22 = vld [vmem:[%s21267_s19 + $0x4e4] ss:$8 sps:$4 sm:$0xff]   ;;  %v18376_v20 = vld [vmem:[%s21267_s19 + $0x4f4] ss:$8 sps:$4 sm:$0xff]  }
0x209a   :  { %13603 = vmatprep.subr.bf16.mxu1 %v18403_v35  ;;  %v18374_v35 = vld [vmem:[%s21267_s19 + $0x4f0] ss:$8 sps:$4 sm:$0xff]  }
0x209c   :  { %12583 = vmatpush1.bf16.msra.mxu0 %v18258_v41  ;;  %v18382_v41 = vld [vmem:[%s21267_s19 + $0x504] ss:$8 sps:$4 sm:$0xff]  }
0x209d   :  { %12584 = vmatprep.subr.bf16.mxu0 %v18266_v21  ;;  %13604 = vmatpush1.bf16.msra.mxu1 %v18401_v48  ;;  %v18380_v21 = vld [vmem:[%s21267_s19 + $0x500] ss:$8 sps:$4 sm:$0xff]   ;;  %v18388_v48 = vld [vmem:[%s21267_s19 + $0x514] ss:$8 sps:$4 sm:$0xff]  }
0x209e   :  { %13605 = vmatprep.subr.bf16.mxu1 %v18409_v12  ;;  %v18394_v12 = vld [vmem:[%s21267_s19 + $0x524] ss:$8 sps:$4 sm:$0xff]  }
0x20a0   :  { %12585 = vmatpush1.bf16.msra.mxu0 %v18264_v62  ;;  %v18392_v62 = vld [vmem:[%s21267_s19 + $0x520] ss:$8 sps:$4 sm:$0xff]  }
0x20a1   :  { %15733 = vmatprep.subr.msk.bf16.mxu0 %vm3724_vm3, %v15732_v31  ;;  %13606 = vmatpush1.bf16.msra.mxu1 %v18407_v11  ;;  %v18400_v31 = vld [vmem:[%s21267_s19 + $0x534] ss:$8 sps:$4 sm:$0xff]   ;;  %v18406_v11 = vld [vmem:[%s21267_s19 + $0x544] ss:$8 sps:$4 sm:$0xff]  }
0x20a2   :  { %13607 = vmatprep.subr.bf16.mxu1 %v18415_v8  ;;  %v18404_v8 = vld [vmem:[%s21267_s19 + $0x540] ss:$8 sps:$4 sm:$0xff]  }
0x20a4   :  { %12587 = vmatpush1.bf16.msra.mxu0 %v12557_v18  ;;  %v18412_v18 = vld [vmem:[%s21267_s19 + $0x554] ss:$8 sps:$4 sm:$0xff]  }
0x20a5   :  { %12972 = vmatprep.subr.bf16.mxu0 %v18276_v3  ;;  %13608 = vmatpush1.bf16.msra.mxu1 %v18413_v33  ;;  %v18410_v3 = vld [vmem:[%s21267_s19 + $0x550] ss:$8 sps:$4 sm:$0xff]   ;;  %v18418_v33 = vld [vmem:[%s21267_s19 + $0x564] ss:$8 sps:$4 sm:$0xff]  }
0x20a6   :  { %13609 = vmatprep.subr.bf16.mxu1 %v18421_v4  ;;  %v15918_v4 = vld [vmem:[%s21267_s19 + $0x570] sm:$0x33] }
0x20a7   :  { %12595 = vmatmul.mubr.bf16.vlgmr.msra.gmra.mrb[176].mxu0 %v12400_v34  ;;  %v18416_v34 = vld [vmem:[%s21267_s19 + $0x560] ss:$8 sps:$4 sm:$0xff]   ;;  %v15944_v17 = vcombine.high %v15918_v4, %v15918_v4 }
0x20a8   :  { %12973 = vmatpush1.bf16.msra.mxu0 %v18274_v13  ;;  %15840 = vmatprep.mubr.msk.bf16.mxu0 %vm2595_vm1, %v12811_v9  ;;  %v15943_v13 = vcombine.low %v15918_v4, %v15918_v4 }
0x20a9   :  { %12974 = vmatprep.subr.bf16.mxu0 %v18282_v49  ;;  %13610 = vmatpush1.bf16.msra.mxu1 %v18419_v29  ;;  %v18428_v49 = vld [vmem:[%s21267_s19 + $0x644] ss:$8 sps:$4 sm:$0xff]   ;;  %v18426_v29 = vld [vmem:[%s21267_s19 + $0x640] ss:$8 sps:$4 sm:$0xff]  }
0x20aa   :  { %15998 = vmatprep.subr.msk.bf16.mxu1 %vm3724_vm3, %v15997_v25  ;;  %v13377_v9 = vsel %vm3724_vm3, %v15943_v13, 0  ;;  %v13631_v25 = vpack.c.bf16 %v21474_v5, %v21474_v5 }
0x20ac   :  { %12975 = vmatpush1.bf16.msra.mxu0 %v18280_v27  ;;  %v18431_v27 = vld [vmem:[%s21267_s19 + $0x654] ss:$8 sps:$4 sm:$0xff]  }
0x20ad   :  { %12976 = vmatprep.subr.bf16.mxu0 %v18288_v43  ;;  %13612 = vmatpush1.bf16.msra.mxu1 %v13582_v45  ;;  %v18429_v43 = vld [vmem:[%s21267_s19 + $0x650] ss:$8 sps:$4 sm:$0xff]   ;;  %v18434_v45 = vld [vmem:[%s21267_s19 + $0x664] ss:$8 sps:$4 sm:$0xff]  }
0x20b0   :  { %12977 = vmatpush1.bf16.msra.mxu0 %v18286_v53  ;;  %13620 = vmatmul.mubr.bf16.vlgmr.msra.gmra.mrb[180].mxu1 %v13425_v44 }
0x20b1   :  { %12978 = vmatprep.subr.bf16.mxu0 %v18294_v42  ;;  %v18432_v42 = vld [vmem:[%s21267_s19 + $0x660] ss:$8 sps:$4 sm:$0xff]  }
0x20b4   :  { %12979 = vmatpush1.bf16.msra.mxu0 %v18292_v39  ;;  %v18437_v39 = vld [vmem:[%s21267_s19 + $0x674] ss:$8 sps:$4 sm:$0xff]  }
0x20b5   :  { %12980 = vmatprep.subr.bf16.mxu0 %v18300_v38  ;;  %v18435_v38 = vld [vmem:[%s21267_s19 + $0x670] ss:$8 sps:$4 sm:$0xff]  }
0x20b8   :  { %12981 = vmatpush1.bf16.msra.mxu0 %v18298_v51  ;;  %v18440_v51 = vld [vmem:[%s21267_s19 + $0x684] ss:$8 sps:$4 sm:$0xff]  }
0x20b9   :  { %12982 = vmatprep.subr.bf16.mxu0 %v18306_v32 }
0x20bc   :  { %12983 = vmatpush1.bf16.msra.mxu0 %v18304_v24 }
0x20bd   :  { %12984 = vmatprep.subr.bf16.mxu0 %v18312_v36  ;;  %v18438_v36 = vld [vmem:[%s21267_s19 + $0x680] ss:$8 sps:$4 sm:$0xff]  }
0x20c0   :  { %12985 = vmatpush1.bf16.msra.mxu0 %v18310_v28 }
0x20c1   :  { %12986 = vmatprep.subr.bf16.mxu0 %v18318_v55  ;;  %v18443_v55 = vld [vmem:[%s21267_s19 + $0x694] ss:$8 sps:$4 sm:$0xff]  }
0x20c4   :  { %12987 = vmatpush1.bf16.msra.mxu0 %v18316_v15 }
0x20c5   :  { %12988 = vmatprep.subr.bf16.mxu0 %v18324_v47  ;;  %v18441_v47 = vld [vmem:[%s21267_s19 + $0x690] ss:$8 sps:$4 sm:$0xff]  }
0x20c8   :  { %12989 = vmatpush1.bf16.msra.mxu0 %v18322_v37  ;;  %v18446_v37 = vld [vmem:[%s21267_s19 + $0x6a4] ss:$8 sps:$4 sm:$0xff]  }
0x20c9   :  { %12990 = vmatprep.subr.bf16.mxu0 %v18330_v23  ;;  %v18444_v23 = vld [vmem:[%s21267_s19 + $0x6a0] ss:$8 sps:$4 sm:$0xff]  }
0x20cc   :  { %12991 = vmatpush1.bf16.msra.mxu0 %v18328_v57  ;;  %v18449_v57 = vld [vmem:[%s21267_s19 + $0x6b4] ss:$8 sps:$4 sm:$0xff]  }
0x20cd   :  { %12992 = vmatprep.subr.bf16.mxu0 %v18336_v10  ;;  %v18447_v10 = vld [vmem:[%s21267_s19 + $0x6b0] ss:$8 sps:$4 sm:$0xff]  }
0x20d0   :  { %12993 = vmatpush1.bf16.msra.mxu0 %v18334_v63  ;;  %v18452_v63 = vld [vmem:[%s21267_s19 + $0x6c4] ss:$8 sps:$4 sm:$0xff]  }
0x20d1   :  { %12994 = vmatprep.subr.bf16.mxu0 %v18342_v50  ;;  %v18450_v50 = vld [vmem:[%s21267_s19 + $0x6c0] ss:$8 sps:$4 sm:$0xff]  }
0x20d4   :  { %12995 = vmatpush1.bf16.msra.mxu0 %v18340_v7  ;;  %v18453_v7 = vld [vmem:[%s21267_s19 + $0x6d0] ss:$8 sps:$4 sm:$0xff]  }
0x20d5   :  { %15839 = vmatprep.subr.msk.bf16.mxu0 %vm3724_vm3, %v15838_v40  ;;  %v18458_v40 = vld [vmem:[%s21267_s19 + $0x6e4] ss:$8 sps:$4 sm:$0xff]  }
0x20d8   :  { %12997 = vmatpush1.bf16.msra.mxu0 %v12967_v56  ;;  %v18461_v56 = vld [vmem:[%s21267_s19 + $0x6f4] ss:$8 sps:$4 sm:$0xff]  }
0x20d9   :  { %13382 = vmatprep.subr.bf16.mxu0 %v18352_v54  ;;  %v16024_v54 = vld [vmem:[%s21267_s19 + $0x700] sm:$0x33] }
0x20db   :  { %13005 = vmatmul.mubr.bf16.vlgmr.msra.gmra.mrb[180].mxu0 %v12810_v19  ;;  %v18459_v19 = vld [vmem:[%s21267_s19 + $0x6f0] ss:$8 sps:$4 sm:$0xff]  }
0x20dc   :  { %13383 = vmatpush1.bf16.msra.mxu0 %v18350_v60  ;;  %15946 = vmatprep.mubr.msk.bf16.mxu0 %vm2595_vm1, %v13221_v26  ;;  %v16050_v60 = vcombine.high %v16024_v54, %v16024_v54  ;;  %v16049_v26 = vcombine.low %v16024_v54, %v16024_v54 }
0x20dd   :  { %13384 = vmatprep.subr.bf16.mxu0 %v18358_v6 }
0x20de   :  { %v13787_v6 = vsel %vm3724_vm3, %v16049_v26, 0 }
0x20e0   :  { %13385 = vmatpush1.bf16.msra.mxu0 %v18356_v52  ;;  %v13630_v52 = vpack.c.bf16 %v21472_v2, %v21472_v2 }
0x20e1   :  { %13386 = vmatprep.subr.bf16.mxu0 %v18364_v30 }
0x20e4   :  { %13387 = vmatpush1.bf16.msra.mxu0 %v18362_v0 }
0x20e5   :  { %13388 = vmatprep.subr.bf16.mxu0 %v18370_v22 }
0x20e8   :  { %13389 = vmatpush1.bf16.msra.mxu0 %v18368_v46 }
0x20e9   :  { %13390 = vmatprep.subr.bf16.mxu0 %v18376_v20 }
0x20ec   :  { %13391 = vmatpush1.bf16.msra.mxu0 %v18374_v35 }
0x20ed   :  { %13392 = vmatprep.subr.bf16.mxu0 %v18382_v41 }
0x20f0   :  { %13393 = vmatpush1.bf16.msra.mxu0 %v18380_v21 }
0x20f1   :  { %13394 = vmatprep.subr.bf16.mxu0 %v18388_v48 }
0x20f4   :  { %13395 = vmatpush1.bf16.msra.mxu0 %v18386_v1 }
0x20f5   :  { %13396 = vmatprep.subr.bf16.mxu0 %v18394_v12 }
0x20f8   :  { %13397 = vmatpush1.bf16.msra.mxu0 %v18392_v62 }
0x20f9   :  { %13398 = vmatprep.subr.bf16.mxu0 %v18400_v31 }
0x20fc   :  { %13399 = vmatpush1.bf16.msra.mxu0 %v18398_v58 }
0x20fd   :  { %13400 = vmatprep.subr.bf16.mxu0 %v18406_v11 }
0x2100   :  { %13401 = vmatpush1.bf16.msra.mxu0 %v18404_v8 }
0x2101   :  { %13402 = vmatprep.subr.bf16.mxu0 %v18412_v18 }
0x2104   :  { %13403 = vmatpush1.bf16.msra.mxu0 %v18410_v3 }
0x2105   :  { %13404 = vmatprep.subr.bf16.mxu0 %v18418_v33 }
0x2108   :  { %13405 = vmatpush1.bf16.msra.mxu0 %v18416_v34 }
0x2109   :  { %15945 = vmatprep.subr.msk.bf16.mxu0 %vm3724_vm3, %v15944_v17 }
0x210c   :  { %13407 = vmatpush1.bf16.msra.mxu0 %v13377_v9 }
0x210d   :  { %13792 = vmatprep.subr.bf16.mxu0 %v18428_v49 }
0x210f   :  { %13415 = vmatmul.mubr.bf16.vlgmr.msra.gmra.mrb[184].mxu0 %v13220_v16 }
0x2110   :  { %13793 = vmatpush1.bf16.msra.mxu0 %v18426_v29  ;;  %16052 = vmatprep.mubr.msk.bf16.mxu0 %vm2595_vm1, %v13631_v25 }
0x2111   :  { %13794 = vmatprep.subr.bf16.mxu0 %v18431_v27 }
0x2112   :  { %v12218_v53 = vpop.f32.mrb[168].mxu0 }
0x2113   :  { %v12220_v44 = vpop.f32.mrb[169].mxu0 }
0x2114   :  { %13795 = vmatpush1.bf16.msra.mxu0 %v18429_v43  ;;  %v12222_v5 = vpop.f32.mrb[170].mxu0 }
0x2115   :  { %v12223_v59 = vpop.f32.mrb[171].mxu0  ;;  %13796 = vmatprep.subr.bf16.mxu0 %v18434_v45 }
0x2118   :  { %13797 = vmatpush1.bf16.msra.mxu0 %v18432_v42 }
0x2119   :  { %13798 = vmatprep.subr.bf16.mxu0 %v18437_v39 }
0x211a   :  { %v12801_v32 = vpop.f32.mrb[172].mxu1 }
0x211b   :  { %v12803_v24 = vpop.f32.mrb[173].mxu1 }
0x211c   :  { %13799 = vmatpush1.bf16.msra.mxu0 %v18435_v38  ;;  %v12805_v28 = vpop.f32.mrb[174].mxu1 }
0x211d   :  { %13800 = vmatprep.subr.bf16.mxu0 %v18440_v51  ;;  %v12806_v15 = vpop.f32.mrb[175].mxu1 }
0x2120   :  { %13801 = vmatpush1.bf16.msra.mxu0 %v18438_v36 }
0x2121   :  { %13802 = vmatprep.subr.bf16.mxu0 %v18443_v55 }
0x2124   :  { %13803 = vmatpush1.bf16.msra.mxu0 %v18441_v47 }
0x2125   :  { %13804 = vmatprep.subr.bf16.mxu0 %v18446_v37 }
0x2128   :  { %13805 = vmatpush1.bf16.msra.mxu0 %v18444_v23 }
0x2129   :  { %13806 = vmatprep.subr.bf16.mxu0 %v18449_v57 }
0x212c   :  { %13807 = vmatpush1.bf16.msra.mxu0 %v18447_v10 }
0x212d   :  { %13808 = vmatprep.subr.bf16.mxu0 %v18452_v63 }
0x2130   :  { %13809 = vmatpush1.bf16.msra.mxu0 %v18450_v50 }
0x2131   :  { %13810 = vmatprep.subr.bf16.mxu0 %v18455_v14 }
0x2134   :  { %13811 = vmatpush1.bf16.msra.mxu0 %v18453_v7 }
0x2135   :  { %13812 = vmatprep.subr.bf16.mxu0 %v18458_v40 }
0x2138   :  { %13813 = vmatpush1.bf16.msra.mxu0 %v18456_v61 }
0x2139   :  { %13814 = vmatprep.subr.bf16.mxu0 %v18461_v56 }
0x213c   :  { %13815 = vmatpush1.bf16.msra.mxu0 %v18459_v19 }
0x213d   :  { %16051 = vmatprep.subr.msk.bf16.mxu0 %vm3724_vm3, %v16050_v60 }
0x2140   :  { %13817 = vmatpush1.bf16.msra.mxu0 %v13787_v6 }
0x2143   :  { %13825 = vmatmul.mubr.bf16.vlgmr.msra.gmra.mrb[188].mxu0 %v13630_v52 }
0x2146   :  { %v12393_v30 = vpop.f32.mrb[172].mxu0 }
0x2147   :  { %v12394_v0 = vadd.f32 %v12393_v30, %v12218_v53  ;;  %v12395_v22 = vpop.f32.mrb[173].mxu0 }
0x2148   :  { %v12396_v46 = vadd.f32 %v12395_v22, %v12220_v44  ;;  %v12397_v20 = vpop.f32.mrb[174].mxu0 }
0x2149   :  { %v12398_v35 = vpop.f32.mrb[175].mxu0 }
0x214f   :  { %v13211_v41 = vpop.f32.mrb[176].mxu1 }
0x2150   :  { %v13213_v21 = vpop.f32.mrb[177].mxu1 }
0x2151   :  { %v13215_v48 = vpop.f32.mrb[178].mxu1 }
0x2152   :  { %v13216_v1 = vpop.f32.mrb[179].mxu1 }
0x217a   :  { %v12596_v12 = vpop.f32.mrb[176].mxu0 }
0x217b   :  { %v12603_v62 = vadd.f32 %v12596_v12, %v12394_v0  ;;  %v12598_v31 = vpop.f32.mrb[177].mxu0 }
0x217c   :  { %v12604_v58 = vadd.f32 %v12598_v31, %v12396_v46  ;;  %v12600_v11 = vpop.f32.mrb[178].mxu0 }
0x217d   :  { %v12808_v8 = vadd.f32 %v12801_v32, %v12603_v62  ;;  %v12601_v18 = vpop.f32.mrb[179].mxu0 }
0x217e   :  { %v12809_v3 = vadd.f32 %v12803_v24, %v12604_v58  ;;  %v13839_v24 = vpop.permute.xlu1 %13838 }
0x2183   :  { %v13621_v2 = vpop.f32.mrb[180].mxu1 }
0x2184   :  { %v13623_v33 = vpop.f32.mrb[181].mxu1 }
0x2185   :  { %v13625_v4 = vpop.f32.mrb[182].mxu1 }
0x2186   :  { %v13626_v34 = vpop.f32.mrb[183].mxu1 }
0x21ae   :  { %v13006_v17 = vpop.f32.mrb[180].mxu0 }
0x21af   :  { %v13013_v13 = vadd.f32 %v13006_v17, %v12808_v8  ;;  %v13008_v9 = vpop.f32.mrb[181].mxu0 }
0x21b0   :  { %v13014_v49 = vadd.f32 %v13008_v9, %v12809_v3  ;;  %v13010_v29 = vpop.f32.mrb[182].mxu0 }
0x21b1   :  { %v13218_v25 = vadd.f32 %v13211_v41, %v13013_v13  ;;  %v13011_v16 = vpop.f32.mrb[183].mxu0 }
0x21b2   :  { %v13219_v27 = vadd.f32 %v13213_v21, %v13014_v49 }
0x21e2   :  { %v13416_v43 = vpop.f32.mrb[184].mxu0 }
0x21e3   :  { %v13423_v45 = vadd.f32 %v13416_v43, %v13218_v25  ;;  %v13418_v53 = vpop.f32.mrb[185].mxu0 }
0x21e4   :  { %v13424_v44 = vadd.f32 %v13418_v53, %v13219_v27  ;;  %v13420_v5 = vpop.f32.mrb[186].mxu0 }
0x21e5   :  { %v13628_v42 = vadd.f32 %v13621_v2, %v13423_v45  ;;  %v13421_v59 = vpop.f32.mrb[187].mxu0 }
0x21e6   :  { %v13629_v39 = vadd.f32 %v13623_v33, %v13424_v44 }
0x2216   :  { %v13826_v38 = vpop.f32.mrb[188].mxu0 }
0x2217   :  { %v13833_v51 = vadd.f32 %v13826_v38, %v13628_v42  ;;  %v13828_v32 = vpop.f32.mrb[189].mxu0 }
0x2218   :  { %v13834_v36 = vadd.f32 %v13828_v32, %v13629_v39  ;;  %v13830_v28 = vpop.f32.mrb[190].mxu0 }
0x2219   :  { %v13841_v55 = vadd.f32 %v13839_v24, %v13833_v51  ;;  %v13831_v15 = vpop.f32.mrb[191].mxu0 }
0x221a   :  { %v13842_v47 = vadd.f32 %v13839_v24, %v13834_v36 }
0x221b   :  { %v13843_v37 = vmul.f32 0.5, %v13841_v55 }
0x221c   :  { %v13844_v23 = vmul.f32 0.5, %v13842_v47 }
0x221d   :  { %18538 = vtanh.f32 %v13843_v37 }
0x221e   :  { %18540 = vtanh.f32 %v13844_v23 }
0x2227   :  { %v18539_v57 = vpop.eup %18538 }
0x2228   :  { %v18541_v10 = vpop.eup %18540  ;;  %v13847_v63 = vadd.f32 1.0, %v18539_v57 }
0x2229   :  { %v13848_v50 = vadd.f32 1.0, %v18541_v10 }
0x222a   :  { %v13849_v14 = vmul.f32 0.5, %v13847_v63 }
0x222b   :  { %v13850_v7 = vmul.f32 0.5, %v13848_v50 }
0x222c   :  { %13851 = vst [vmem:[%s13902_s27] sm:$0xff] %v13849_v14 }
0x222d   :  { %13852 = vst [vmem:[%s13902_s27 + $0x8] sm:$0xff] %v13850_v7 }

</bundles_post_ra>
